<compile_context>
chip_gen: v7x
topology: tpu7x:2x2x1
jax: 0.10.0
libtpu: 0.0.40
codegen_flags: <defaults>
</compile_context>

<pallas_src>
import numpy as np
import jax
import jax.numpy as jnp
from jax.experimental import pallas as pl
from jax.experimental.pallas import tpu as pltpu


# Fixed geometry implied by the module: input (N, 1, 128, 8) so that after three 2x2 pools the
# feature map is (C=128, H=16, W=1) -> 128*16*1 = 2048 = fc1 in_features.
H_IN, W_IN = 128, 8
HID_PAD = 1024          # fc1 out_features 1000 padded to 1024 (zero columns)
HID_TILE = 256          # fc1 hidden chunk streamed per manual-DMA wait
N_TILES = HID_PAD // HID_TILE


def _net_kernel(x_ref, m1_ref, b1_ref, m2_ref, b2_ref, m3_ref, b3_ref,
                pe_ref, po_ref, w1_hbm, fb1_ref, w2_ref, fb2_ref,
                out_ref, feat_ref, w1_buf, w1_sem):
    n = out_ref.shape[0]

    # ---- kick off the fc1 weight stream immediately; it overlaps the whole conv stack ----
    for k in range(N_TILES):
        pltpu.make_async_copy(w1_hbm.at[k], w1_buf.at[k], w1_sem.at[k]).start()

    def conv_relu_pool(a, m_ref, b_ref, H, Wo_groups, Co):
        # a: (n*H, W*Cin) f32 activation, batch stacked along rows (sample-major).
        # m_ref[dy]: (W*Cin, W*Cout) folded conv matrix for kernel row dy (width shifts and
        # width zero-padding baked in).  Returns pooled (n*H//2, (W//2)*Cout) f32.
        nH = a.shape[0]
        rows = jax.lax.broadcasted_iota(jnp.int32, a.shape, 0)
        rm = rows % H                                   # row index inside its own sample
        zero = jnp.zeros_like(a)
        # row r <- a[r-1] (zero at each sample's first row); row r <- a[r+1] (zero at last row)
        a_dn = jnp.where(rm == 0, zero, pltpu.roll(a, shift=1, axis=0))
        a_up = jnp.where(rm == H - 1, zero, pltpu.roll(a, shift=nH - 1, axis=0))
        acc = jnp.dot(a_dn.astype(jnp.bfloat16), m_ref[0], preferred_element_type=jnp.float32)
        acc = acc + jnp.dot(a.astype(jnp.bfloat16), m_ref[1], preferred_element_type=jnp.float32)
        acc = acc + jnp.dot(a_up.astype(jnp.bfloat16), m_ref[2], preferred_element_type=jnp.float32)
        y = jnp.maximum(acc + b_ref[...], 0.0)          # (nH, W*Co), bias + ReLU in f32
        yb = y.astype(jnp.bfloat16)                     # bf16 operands for the pool matmuls
        # 2x2 max-pool: H direction via exact even/odd row-selection matmuls (valid across the
        # stacked batch because sample heights are even), W direction via lane-block maxes.
        ev = jnp.dot(pe_ref[0:nH // 2, 0:nH], yb, preferred_element_type=jnp.float32)
        od = jnp.dot(po_ref[0:nH // 2, 0:nH], yb, preferred_element_type=jnp.float32)
        ph = jnp.maximum(ev, od)                        # (nH//2, W*Co) f32
        cols = [jnp.maximum(ph[:, (2 * w) * Co:(2 * w + 1) * Co],
                            ph[:, (2 * w + 1) * Co:(2 * w + 2) * Co])
                for w in range(Wo_groups)]
        return cols[0] if Wo_groups == 1 else jnp.concatenate(cols, axis=1)

    # ---- conv stack (batch folded along rows), all activations VMEM/vreg resident ----
    a0 = x_ref[...]                                                   # (n*128, 8) f32
    p1 = conv_relu_pool(a0, m1_ref, b1_ref, 128, 4, 32)               # (n*64, 128)
    p2 = conv_relu_pool(p1, m2_ref, b2_ref, 64, 2, 64)                # (n*32, 128)
    p3 = conv_relu_pool(p2, m3_ref, b3_ref, 32, 1, 128)               # (n*16, 128)

    # Flatten (h, c) -> 2048 lanes per sample (torch's c*16+h order is absorbed into the
    # pre-permuted fc1 weight).  This small relayout is hidden under the fc1 weight DMA.
    for smp in range(n):
        for h in range(16):
            r = smp * 16 + h
            feat_ref[smp:smp + 1, h * 128:(h + 1) * 128] = p3[r:r + 1, :].astype(jnp.bfloat16)

    # ---- FC head: per-chunk wait on the streamed fc1 weight, fc2 accumulated lane-dense ----
    feat = feat_ref[...]                                              # (n, 2048) bf16
    acc2 = jnp.zeros((n, 128), jnp.float32)
    for k in range(N_TILES):
        pltpu.make_async_copy(w1_hbm.at[k], w1_buf.at[k], w1_sem.at[k]).wait()
        h1 = jnp.dot(feat, w1_buf[k], preferred_element_type=jnp.float32)     # (n, 256) f32
        h1 = jnp.maximum(h1 + fb1_ref[:, k * HID_TILE:(k + 1) * HID_TILE], 0.0)
        acc2 = acc2 + jnp.dot(h1.astype(jnp.bfloat16),
                              w2_ref[k * HID_TILE:(k + 1) * HID_TILE, :],
                              preferred_element_type=jnp.float32)             # (n, 128) f32
    out_ref[...] = acc2[:, 0:9] + fb2_ref[...]


def net_forward_impl(prep, x_nchw):
    n, c, h, w = x_nchw.shape
    assert (c, h, w) == (1, H_IN, W_IN), "geometry implied by fc1 in_features = 128*16*1"
    x2 = x_nchw.astype(jnp.float32).reshape(n * H_IN, W_IN)   # batch stacked along rows

    def full(shape):
        return pl.BlockSpec(shape, lambda i, _s=shape: (0,) * len(_s))

    return pl.pallas_call(
        _net_kernel,
        out_shape=jax.ShapeDtypeStruct((n, 9), jnp.float32),
        grid_spec=pltpu.PrefetchScalarGridSpec(
            num_scalar_prefetch=0,
            grid=(1,),
            in_specs=[
                full((n * H_IN, W_IN)),                        # stacked input image (f32)
                full((3, 8, 256)), full((1, 256)),             # conv1 folded matrices / bias
                full((3, 128, 256)), full((1, 256)),           # conv2
                full((3, 128, 256)), full((1, 256)),           # conv3
                full((n * 64, n * 128)),                       # even-row pool selector (bf16)
                full((n * 64, n * 128)),                       # odd-row pool selector (bf16)
                pl.BlockSpec(memory_space=pl.ANY),             # fc1 weight tiles stay in HBM
                full((1, HID_PAD)),                            # fc1 bias (f32)
                full((HID_PAD, 128)),                          # fc2 weight, lane-padded (bf16)
                full((1, 9)),                                  # fc2 bias (f32)
            ],
            out_specs=pl.BlockSpec((n, 9), lambda i: (0, 0)),
            scratch_shapes=[
                pltpu.VMEM((n, 2048), jnp.bfloat16),                     # flattened conv features
                pltpu.VMEM((N_TILES, 2048, HID_TILE), jnp.bfloat16),     # streamed fc1 weight
                pltpu.SemaphoreType.DMA((N_TILES,)),
            ],
        ),
        compiler_params=pltpu.CompilerParams(
            dimension_semantics=("arbitrary",),
            vmem_limit_bytes=24 * 1024 * 1024,
        ),
    )(x2, prep["m1"], prep["b1"], prep["m2"], prep["b2"], prep["m3"], prep["b3"],
      prep["pe"], prep["po"], prep["fw1"], prep["fb1"], prep["fw2"], prep["fb2"])


net_forward = jax.jit(net_forward_impl)


# ----------------------------------------------------------------------------------------------
# One-time (outside jit) weight preprocessing.
# ----------------------------------------------------------------------------------------------
def prepare_params(params, batch):
    def f32(a):
        return np.asarray(a, dtype=np.float32)

    def bf16(a):
        return jnp.asarray(np.ascontiguousarray(a), dtype=jnp.bfloat16)

    def folded_conv_matrices(w, W):
        # w: (Cout, Cin, 3, 3) torch layout. Build M[dy] of shape (W*Cin, W*Cout) such that
        # conv_out[h, (w_out, co)] = sum_dy in_row(h + dy - 1) @ M[dy]  (width pad baked in).
        w = f32(w)
        Co, Ci = w.shape[0], w.shape[1]
        M = np.zeros((3, W * Ci, W * Co), np.float32)
        for dy in range(3):
            for wo in range(W):
                for dx in range(3):
                    wi = wo + dx - 1
                    if 0 <= wi < W:
                        M[dy, wi * Ci:(wi + 1) * Ci, wo * Co:(wo + 1) * Co] = w[:, :, dy, dx].T
        return M

    m1 = folded_conv_matrices(params["conv1_w"], 8)      # (3, 8, 256)
    m2 = folded_conv_matrices(params["conv2_w"], 4)      # (3, 128, 256)
    m3 = folded_conv_matrices(params["conv3_w"], 2)      # (3, 128, 256)
    b1 = np.tile(f32(params["conv1_b"]), 8)[None, :]     # folded bias, lane order (w, c)
    b2 = np.tile(f32(params["conv2_b"]), 4)[None, :]
    b3 = np.tile(f32(params["conv3_b"]), 2)[None, :]

    # Even / odd row selectors for the 2x2 H-pool on the batch-stacked activation (largest
    # stacked layer is batch*128 rows -> batch*64; smaller layers use top-left sub-blocks).
    rows = batch * 64
    pe = np.zeros((rows, 2 * rows), np.float32)
    po = np.zeros((rows, 2 * rows), np.float32)
    pe[np.arange(rows), 2 * np.arange(rows)] = 1.0
    po[np.arange(rows), 2 * np.arange(rows) + 1] = 1.0

    # fc1: torch flatten index f = c*16 + h ; kernel feature index g = h*128 + c.
    # Pre-permute + transpose to (in=2048, out), pad 1000 -> 1024, split into contiguous
    # hidden-column tiles (N_TILES, 2048, HID_TILE), cast to bf16 (halved HBM stream).
    fw1 = f32(params["fc1_w"]).reshape(1000, 128, 16).transpose(2, 1, 0).reshape(2048, 1000)
    fw1 = np.pad(fw1, ((0, 0), (0, HID_PAD - 1000)))
    fw1 = fw1.reshape(2048, N_TILES, HID_TILE).transpose(1, 0, 2)             # (4, 2048, 256)
    fb1 = np.pad(f32(params["fc1_b"]), (0, HID_PAD - 1000))[None, :]          # (1, 1024) f32

    fw2 = np.pad(f32(params["fc2_w"]).T, ((0, HID_PAD - 1000), (0, 128 - 9)))  # (1024, 128)
    fb2 = f32(params["fc2_b"])[None, :]                                        # (1, 9)

    return {
        "m1": bf16(m1), "b1": jnp.asarray(b1),
        "m2": bf16(m2), "b2": jnp.asarray(b2),
        "m3": bf16(m3), "b3": jnp.asarray(b3),
        "pe": bf16(pe), "po": bf16(po),
        "fw1": bf16(fw1), "fb1": jnp.asarray(fb1),
        "fw2": bf16(fw2), "fb2": jnp.asarray(fb2),
    }


def init_params(key):
    ks = jax.random.split(key, 10)

    def w(k, shape, fan_in):
        return jax.random.normal(k, shape, jnp.float32) * (2.0 / fan_in) ** 0.5

    return {
        "conv1_w": w(ks[0], (32, 1, 3, 3), 9),
        "conv1_b": jax.random.normal(ks[1], (32,), jnp.float32) * 0.01,
        "conv2_w": w(ks[2], (64, 32, 3, 3), 9 * 32),
        "conv2_b": jax.random.normal(ks[3], (64,), jnp.float32) * 0.01,
        "conv3_w": w(ks[4], (128, 64, 3, 3), 9 * 64),
        "conv3_b": jax.random.normal(ks[5], (128,), jnp.float32) * 0.01,
        "fc1_w": w(ks[6], (1000, 2048), 2048),
        "fc1_b": jax.random.normal(ks[7], (1000,), jnp.float32) * 0.01,
        "fc2_w": w(ks[8], (9, 1000), 1000),
        "fc2_b": jax.random.normal(ks[9], (9,), jnp.float32) * 0.01,
    }


def net_reference(params, x_nchw):
    """Pure-JAX f32 reference reproducing the PyTorch forward (eval mode)."""
    def conv(x, w, b):
        y = jax.lax.conv_general_dilated(
            x, w, window_strides=(1, 1), padding=((1, 1), (1, 1)),
            dimension_numbers=("NCHW", "OIHW", "NCHW"))
        return y + b[None, :, None, None]

    def pool(x):
        return jax.lax.reduce_window(
            x, jnp.array(-jnp.inf, dtype=x.dtype), jax.lax.max,
            (1, 1, 2, 2), (1, 1, 2, 2), "VALID")

    x = pool(jax.nn.relu(conv(x_nchw, params["conv1_w"], params["conv1_b"])))
    x = pool(jax.nn.relu(conv(x, params["conv2_w"], params["conv2_b"])))
    x = pool(jax.nn.relu(conv(x, params["conv3_w"], params["conv3_b"])))
    x = x.reshape(x.shape[0], -1)
    x = jax.nn.relu(x @ params["fc1_w"].T + params["fc1_b"])
    return x @ params["fc2_w"].T + params["fc2_b"]


if __name__ == "__main__":
    key = jax.random.PRNGKey(0)
    pkey, xkey = jax.random.split(key)
    params = init_params(pkey)

    # Input spatial size 128x8 so the final feature map is (128, 16, 1) -> 2048 features,
    # matching torch's x.view(-1, 128*16*1).
    batch = 2
    prep = prepare_params(params, batch)   # heavy weight reshuffling done once, outside jit
    x = jax.random.normal(xkey, (batch, 1, H_IN, W_IN), jnp.float32)

    out = net_forward(prep, x)
    out = jax.block_until_ready(out)
    assert out.shape == (batch, 9), out.shape
    assert bool(jnp.all(jnp.isfinite(out)))

    ref = net_reference(params, x)
    max_abs = float(jnp.max(jnp.abs(ref)))
    err = float(jnp.max(jnp.abs(out - ref)))
    # Tolerance absorbs the deliberate bf16 quantization of conv/fc weights and activations.
    assert err <= 4e-2 + 4e-2 * max_abs, (err, max_abs)

    print("KERNEL_OK")
</pallas_src>

<mosaic_0001>
module attributes {stable_mosaic.version = 11 : i64} {
  func.func @_net_kernel(%arg0: i32, %arg1: memref<256x8xf32, #tpu.memory_space<vmem>>, %arg2: memref<3x8x256xbf16, #tpu.memory_space<vmem>>, %arg3: memref<1x256xf32, #tpu.memory_space<vmem>>, %arg4: memref<3x128x256xbf16, #tpu.memory_space<vmem>>, %arg5: memref<1x256xf32, #tpu.memory_space<vmem>>, %arg6: memref<3x128x256xbf16, #tpu.memory_space<vmem>>, %arg7: memref<1x256xf32, #tpu.memory_space<vmem>>, %arg8: memref<128x256xbf16, #tpu.memory_space<vmem>>, %arg9: memref<128x256xbf16, #tpu.memory_space<vmem>>, %arg10: memref<4x2048x256xbf16, #tpu.memory_space<any>>, %arg11: memref<1x1024xf32, #tpu.memory_space<vmem>>, %arg12: memref<1024x128xbf16, #tpu.memory_space<vmem>>, %arg13: memref<1x9xf32, #tpu.memory_space<vmem>>, %arg14: memref<2x9xf32, #tpu.memory_space<vmem>>, %arg15: memref<2x2048xbf16, #tpu.memory_space<vmem>>, %arg16: memref<4x2048x256xbf16, #tpu.memory_space<vmem>>, %arg17: memref<4x!tpu.dma_semaphore, #tpu.memory_space<semaphore_mem>>) attributes {dimension_semantics = [#tpu.dimension_semantics<arbitrary>], iteration_bounds = array<i64: 1>, scalar_prefetch = 0 : i64, scratch_operands = 3 : i64, tpu.core_type = #tpu.core_type<tc>, window_params = [{pipeline_mode = #tpu.pipeline_mode<synchronous>, transform_indices = @transform_0, window_bounds = array<i64: 256, 8>}, {pipeline_mode = #tpu.pipeline_mode<synchronous>, transform_indices = @transform_1, window_bounds = array<i64: 3, 8, 256>}, {pipeline_mode = #tpu.pipeline_mode<synchronous>, transform_indices = @transform_2, window_bounds = array<i64: 1, 256>}, {pipeline_mode = #tpu.pipeline_mode<synchronous>, transform_indices = @transform_3, window_bounds = array<i64: 3, 128, 256>}, {pipeline_mode = #tpu.pipeline_mode<synchronous>, transform_indices = @transform_4, window_bounds = array<i64: 1, 256>}, {pipeline_mode = #tpu.pipeline_mode<synchronous>, transform_indices = @transform_5, window_bounds = array<i64: 3, 128, 256>}, {pipeline_mode = #tpu.pipeline_mode<synchronous>, transform_indices = @transform_6, window_bounds = array<i64: 1, 256>}, {pipeline_mode = #tpu.pipeline_mode<synchronous>, transform_indices = @transform_7, window_bounds = array<i64: 128, 256>}, {pipeline_mode = #tpu.pipeline_mode<synchronous>, transform_indices = @transform_8, window_bounds = array<i64: 128, 256>}, {}, {pipeline_mode = #tpu.pipeline_mode<synchronous>, transform_indices = @transform_10, window_bounds = array<i64: 1, 1024>}, {pipeline_mode = #tpu.pipeline_mode<synchronous>, transform_indices = @transform_11, window_bounds = array<i64: 1024, 128>}, {pipeline_mode = #tpu.pipeline_mode<synchronous>, transform_indices = @transform_12, window_bounds = array<i64: 1, 9>}, {pipeline_mode = #tpu.pipeline_mode<synchronous>, transform_indices = @transform_13, window_bounds = array<i64: 2, 9>}]} {
    %c0_i32 = arith.constant 0 : i32
    %c0_i32_0 = arith.constant 0 : i32
    %c0_i32_1 = arith.constant 0 : i32
    %c0_i32_2 = arith.constant 0 : i32
    %c0_i32_3 = arith.constant 0 : i32
    %0 = tpu.memref_slice %arg10[%c0_i32, %c0_i32_2, %c0_i32_3] : memref<4x2048x256xbf16, #tpu.memory_space<any>> -> memref<1x2048x256xbf16, #tpu.memory_space<any>>
    %1 = tpu.memref_squeeze %0 : memref<1x2048x256xbf16, #tpu.memory_space<any>> -> memref<2048x256xbf16, #tpu.memory_space<any>>
    %c0_i32_4 = arith.constant 0 : i32
    %c0_i32_5 = arith.constant 0 : i32
    %2 = tpu.memref_slice %arg16[%c0_i32_0, %c0_i32_4, %c0_i32_5] : memref<4x2048x256xbf16, #tpu.memory_space<vmem>> -> memref<1x2048x256xbf16, #tpu.memory_space<vmem>>
    %3 = tpu.memref_squeeze %2 : memref<1x2048x256xbf16, #tpu.memory_space<vmem>> -> memref<2048x256xbf16, #tpu.memory_space<vmem>>
    %4 = tpu.memref_slice %arg17[%c0_i32_1] : memref<4x!tpu.dma_semaphore, #tpu.memory_space<semaphore_mem>> -> memref<1x!tpu.dma_semaphore, #tpu.memory_space<semaphore_mem>>
    %5 = tpu.memref_squeeze %4 : memref<1x!tpu.dma_semaphore, #tpu.memory_space<semaphore_mem>> -> memref<!tpu.dma_semaphore, #tpu.memory_space<semaphore_mem>>
    tpu.enqueue_dma source(%1 : memref<2048x256xbf16, #tpu.memory_space<any>>) target(%3 : memref<2048x256xbf16, #tpu.memory_space<vmem>>) target_semaphore(%5 : memref<!tpu.dma_semaphore, #tpu.memory_space<semaphore_mem>>)
    %c1_i32 = arith.constant 1 : i32
    %c1_i32_6 = arith.constant 1 : i32
    %c1_i32_7 = arith.constant 1 : i32
    %c0_i32_8 = arith.constant 0 : i32
    %c0_i32_9 = arith.constant 0 : i32
    %6 = tpu.memref_slice %arg10[%c1_i32, %c0_i32_8, %c0_i32_9] : memref<4x2048x256xbf16, #tpu.memory_space<any>> -> memref<1x2048x256xbf16, #tpu.memory_space<any>>
    %7 = tpu.memref_squeeze %6 : memref<1x2048x256xbf16, #tpu.memory_space<any>> -> memref<2048x256xbf16, #tpu.memory_space<any>>
    %c0_i32_10 = arith.constant 0 : i32
    %c0_i32_11 = arith.constant 0 : i32
    %8 = tpu.memref_slice %arg16[%c1_i32_6, %c0_i32_10, %c0_i32_11] : memref<4x2048x256xbf16, #tpu.memory_space<vmem>> -> memref<1x2048x256xbf16, #tpu.memory_space<vmem>>
    %9 = tpu.memref_squeeze %8 : memref<1x2048x256xbf16, #tpu.memory_space<vmem>> -> memref<2048x256xbf16, #tpu.memory_space<vmem>>
    %10 = tpu.memref_slice %arg17[%c1_i32_7] : memref<4x!tpu.dma_semaphore, #tpu.memory_space<semaphore_mem>> -> memref<1x!tpu.dma_semaphore, #tpu.memory_space<semaphore_mem>>
    %11 = tpu.memref_squeeze %10 : memref<1x!tpu.dma_semaphore, #tpu.memory_space<semaphore_mem>> -> memref<!tpu.dma_semaphore, #tpu.memory_space<semaphore_mem>>
    tpu.enqueue_dma source(%7 : memref<2048x256xbf16, #tpu.memory_space<any>>) target(%9 : memref<2048x256xbf16, #tpu.memory_space<vmem>>) target_semaphore(%11 : memref<!tpu.dma_semaphore, #tpu.memory_space<semaphore_mem>>)
    %c2_i32 = arith.constant 2 : i32
    %c2_i32_12 = arith.constant 2 : i32
    %c2_i32_13 = arith.constant 2 : i32
    %c0_i32_14 = arith.constant 0 : i32
    %c0_i32_15 = arith.constant 0 : i32
    %12 = tpu.memref_slice %arg10[%c2_i32, %c0_i32_14, %c0_i32_15] : memref<4x2048x256xbf16, #tpu.memory_space<any>> -> memref<1x2048x256xbf16, #tpu.memory_space<any>>
    %13 = tpu.memref_squeeze %12 : memref<1x2048x256xbf16, #tpu.memory_space<any>> -> memref<2048x256xbf16, #tpu.memory_space<any>>
    %c0_i32_16 = arith.constant 0 : i32
    %c0_i32_17 = arith.constant 0 : i32
    %14 = tpu.memref_slice %arg16[%c2_i32_12, %c0_i32_16, %c0_i32_17] : memref<4x2048x256xbf16, #tpu.memory_space<vmem>> -> memref<1x2048x256xbf16, #tpu.memory_space<vmem>>
    %15 = tpu.memref_squeeze %14 : memref<1x2048x256xbf16, #tpu.memory_space<vmem>> -> memref<2048x256xbf16, #tpu.memory_space<vmem>>
    %16 = tpu.memref_slice %arg17[%c2_i32_13] : memref<4x!tpu.dma_semaphore, #tpu.memory_space<semaphore_mem>> -> memref<1x!tpu.dma_semaphore, #tpu.memory_space<semaphore_mem>>
    %17 = tpu.memref_squeeze %16 : memref<1x!tpu.dma_semaphore, #tpu.memory_space<semaphore_mem>> -> memref<!tpu.dma_semaphore, #tpu.memory_space<semaphore_mem>>
    tpu.enqueue_dma source(%13 : memref<2048x256xbf16, #tpu.memory_space<any>>) target(%15 : memref<2048x256xbf16, #tpu.memory_space<vmem>>) target_semaphore(%17 : memref<!tpu.dma_semaphore, #tpu.memory_space<semaphore_mem>>)
    %c3_i32 = arith.constant 3 : i32
    %c3_i32_18 = arith.constant 3 : i32
    %c3_i32_19 = arith.constant 3 : i32
    %c0_i32_20 = arith.constant 0 : i32
    %c0_i32_21 = arith.constant 0 : i32
    %18 = tpu.memref_slice %arg10[%c3_i32, %c0_i32_20, %c0_i32_21] : memref<4x2048x256xbf16, #tpu.memory_space<any>> -> memref<1x2048x256xbf16, #tpu.memory_space<any>>
    %19 = tpu.memref_squeeze %18 : memref<1x2048x256xbf16, #tpu.memory_space<any>> -> memref<2048x256xbf16, #tpu.memory_space<any>>
    %c0_i32_22 = arith.constant 0 : i32
    %c0_i32_23 = arith.constant 0 : i32
    %20 = tpu.memref_slice %arg16[%c3_i32_18, %c0_i32_22, %c0_i32_23] : memref<4x2048x256xbf16, #tpu.memory_space<vmem>> -> memref<1x2048x256xbf16, #tpu.memory_space<vmem>>
    %21 = tpu.memref_squeeze %20 : memref<1x2048x256xbf16, #tpu.memory_space<vmem>> -> memref<2048x256xbf16, #tpu.memory_space<vmem>>
    %22 = tpu.memref_slice %arg17[%c3_i32_19] : memref<4x!tpu.dma_semaphore, #tpu.memory_space<semaphore_mem>> -> memref<1x!tpu.dma_semaphore, #tpu.memory_space<semaphore_mem>>
    %23 = tpu.memref_squeeze %22 : memref<1x!tpu.dma_semaphore, #tpu.memory_space<semaphore_mem>> -> memref<!tpu.dma_semaphore, #tpu.memory_space<semaphore_mem>>
    tpu.enqueue_dma source(%19 : memref<2048x256xbf16, #tpu.memory_space<any>>) target(%21 : memref<2048x256xbf16, #tpu.memory_space<vmem>>) target_semaphore(%23 : memref<!tpu.dma_semaphore, #tpu.memory_space<semaphore_mem>>)
    %c0 = arith.constant 0 : index
    %c0_24 = arith.constant 0 : index
    %24 = vector.load %arg1[%c0, %c0_24] : memref<256x8xf32, #tpu.memory_space<vmem>>, vector<256x8xf32>
    %25 = tpu.iota {dimensions = array<i32: 0>} : vector<256x8xi32>
    %c128_i32 = arith.constant 128 : i32
    %c0_i32_25 = arith.constant 0 : i32
    %26 = arith.cmpi eq, %c128_i32, %c0_i32_25 : i32
    %c1_i32_26 = arith.constant 1 : i32
    %27 = arith.select %26, %c1_i32_26, %c128_i32 : i32
    %28 = vector.broadcast %27 : i32 to vector<256x8xi32>
    %29 = arith.remsi %25, %28 : vector<256x8xi32>
    %c0_i32_27 = arith.constant 0 : i32
    %30 = vector.broadcast %c0_i32_27 : i32 to vector<256x8xi32>
    %31 = arith.cmpi ne, %29, %30 : vector<256x8xi32>
    %c0_i32_28 = arith.constant 0 : i32
    %32 = vector.broadcast %c0_i32_28 : i32 to vector<256x8xi32>
    %33 = arith.cmpi slt, %29, %32 : vector<256x8xi32>
    %c0_i32_29 = arith.constant 0 : i32
    %34 = arith.cmpi slt, %27, %c0_i32_29 : i32
    %35 = vector.broadcast %34 : i1 to vector<256x8xi1>
    %36 = vector.broadcast %35 : vector<256x8xi1> to vector<256x8xi1>
    %37 = arith.xori %33, %36 : vector<256x8xi1>
    %38 = arith.andi %37, %31 : vector<256x8xi1>
    %39 = vector.broadcast %27 : i32 to vector<256x8xi32>
    %40 = arith.addi %29, %39 : vector<256x8xi32>
    %41 = arith.select %38, %40, %29 : vector<256x8xi1>, vector<256x8xi32>
    %cst = arith.constant 0.000000e+00 : f32
    %42 = vector.broadcast %cst : f32 to vector<256x8xf32>
    %c0_i32_30 = arith.constant 0 : i32
    %43 = vector.broadcast %c0_i32_30 : i32 to vector<256x8xi32>
    %44 = arith.cmpi eq, %41, %43 : vector<256x8xi32>
    %c1_i32_31 = arith.constant 1 : i32
    %45 = tpu.dynamic_rotate %24 by %c1_i32_31 dim 0 : vector<256x8xf32>, i32 -> vector<256x8xf32>
    %46 = arith.select %44, %42, %45 : vector<256x8xi1>, vector<256x8xf32>
    %c127_i32 = arith.constant 127 : i32
    %47 = vector.broadcast %c127_i32 : i32 to vector<256x8xi32>
    %48 = arith.cmpi eq, %41, %47 : vector<256x8xi32>
    %c255_i32 = arith.constant 255 : i32
    %49 = tpu.dynamic_rotate %24 by %c255_i32 dim 0 : vector<256x8xf32>, i32 -> vector<256x8xf32>
    %50 = arith.select %48, %42, %49 : vector<256x8xi1>, vector<256x8xf32>
    %51 = arith.truncf %46 : vector<256x8xf32> to vector<256x8xbf16>
    %c0_32 = arith.constant 0 : index
    %c0_33 = arith.constant 0 : index
    %c0_34 = arith.constant 0 : index
    %52 = vector.load %arg2[%c0_32, %c0_33, %c0_34] : memref<3x8x256xbf16, #tpu.memory_space<vmem>>, vector<1x8x256xbf16>
    %53 = vector.shape_cast %52 : vector<1x8x256xbf16> to vector<8x256xbf16>
    %cst_35 = arith.constant dense<0.000000e+00> : vector<256x256xf32>
    %54 = tpu.matmul %51, %53, %cst_35 {dimension_numbers = #tpu.dot_dimension_numbers<[1], [0], [0], [1], [0, 0, 1, 1], [], []>} : vector<256x8xbf16>, vector<8x256xbf16>, vector<256x256xf32> -> vector<256x256xf32>
    %55 = arith.truncf %24 : vector<256x8xf32> to vector<256x8xbf16>
    %c1 = arith.constant 1 : index
    %c0_36 = arith.constant 0 : index
    %c0_37 = arith.constant 0 : index
    %56 = vector.load %arg2[%c1, %c0_36, %c0_37] : memref<3x8x256xbf16, #tpu.memory_space<vmem>>, vector<1x8x256xbf16>
    %57 = vector.shape_cast %56 : vector<1x8x256xbf16> to vector<8x256xbf16>
    %cst_38 = arith.constant dense<0.000000e+00> : vector<256x256xf32>
    %58 = tpu.matmul %55, %57, %cst_38 {dimension_numbers = #tpu.dot_dimension_numbers<[1], [0], [0], [1], [0, 0, 1, 1], [], []>} : vector<256x8xbf16>, vector<8x256xbf16>, vector<256x256xf32> -> vector<256x256xf32>
    %59 = arith.addf %54, %58 : vector<256x256xf32>
    %60 = arith.truncf %50 : vector<256x8xf32> to vector<256x8xbf16>
    %c2 = arith.constant 2 : index
    %c0_39 = arith.constant 0 : index
    %c0_40 = arith.constant 0 : index
    %61 = vector.load %arg2[%c2, %c0_39, %c0_40] : memref<3x8x256xbf16, #tpu.memory_space<vmem>>, vector<1x8x256xbf16>
    %62 = vector.shape_cast %61 : vector<1x8x256xbf16> to vector<8x256xbf16>
    %cst_41 = arith.constant dense<0.000000e+00> : vector<256x256xf32>
    %63 = tpu.matmul %60, %62, %cst_41 {dimension_numbers = #tpu.dot_dimension_numbers<[1], [0], [0], [1], [0, 0, 1, 1], [], []>} : vector<256x8xbf16>, vector<8x256xbf16>, vector<256x256xf32> -> vector<256x256xf32>
    %64 = arith.addf %59, %63 : vector<256x256xf32>
    %c0_42 = arith.constant 0 : index
    %c0_43 = arith.constant 0 : index
    %65 = vector.load %arg3[%c0_42, %c0_43] : memref<1x256xf32, #tpu.memory_space<vmem>>, vector<1x256xf32>
    %66 = vector.broadcast %65 : vector<1x256xf32> to vector<256x256xf32>
    %67 = arith.addf %64, %66 : vector<256x256xf32>
    %cst_44 = arith.constant 0.000000e+00 : f32
    %68 = vector.broadcast %cst_44 : f32 to vector<256x256xf32>
    %69 = arith.maximumf %67, %68 : vector<256x256xf32>
    %70 = arith.truncf %69 : vector<256x256xf32> to vector<256x256xbf16>
    %c0_45 = arith.constant 0 : index
    %c0_46 = arith.constant 0 : index
    %71 = vector.load %arg8[%c0_45, %c0_46] : memref<128x256xbf16, #tpu.memory_space<vmem>>, vector<128x256xbf16>
    %cst_47 = arith.constant dense<0.000000e+00> : vector<128x256xf32>
    %72 = tpu.matmul %71, %70, %cst_47 {dimension_numbers = #tpu.dot_dimension_numbers<[1], [0], [0], [1], [0, 0, 1, 1], [], []>} : vector<128x256xbf16>, vector<256x256xbf16>, vector<128x256xf32> -> vector<128x256xf32>
    %c0_48 = arith.constant 0 : index
    %c0_49 = arith.constant 0 : index
    %73 = vector.load %arg9[%c0_48, %c0_49] : memref<128x256xbf16, #tpu.memory_space<vmem>>, vector<128x256xbf16>
    %cst_50 = arith.constant dense<0.000000e+00> : vector<128x256xf32>
    %74 = tpu.matmul %73, %70, %cst_50 {dimension_numbers = #tpu.dot_dimension_numbers<[1], [0], [0], [1], [0, 0, 1, 1], [], []>} : vector<128x256xbf16>, vector<256x256xbf16>, vector<128x256xf32> -> vector<128x256xf32>
    %75 = arith.maximumf %72, %74 : vector<128x256xf32>
    %76 = vector.extract_strided_slice %75 {offsets = [0, 0], sizes = [128, 32], strides = [1, 1]} : vector<128x256xf32> to vector<128x32xf32>
    %77 = vector.extract_strided_slice %75 {offsets = [0, 32], sizes = [128, 32], strides = [1, 1]} : vector<128x256xf32> to vector<128x32xf32>
    %78 = arith.maximumf %76, %77 : vector<128x32xf32>
    %79 = vector.extract_strided_slice %75 {offsets = [0, 64], sizes = [128, 32], strides = [1, 1]} : vector<128x256xf32> to vector<128x32xf32>
    %80 = vector.extract_strided_slice %75 {offsets = [0, 96], sizes = [128, 32], strides = [1, 1]} : vector<128x256xf32> to vector<128x32xf32>
    %81 = arith.maximumf %79, %80 : vector<128x32xf32>
    %82 = vector.extract_strided_slice %75 {offsets = [0, 128], sizes = [128, 32], strides = [1, 1]} : vector<128x256xf32> to vector<128x32xf32>
    %83 = vector.extract_strided_slice %75 {offsets = [0, 160], sizes = [128, 32], strides = [1, 1]} : vector<128x256xf32> to vector<128x32xf32>
    %84 = arith.maximumf %82, %83 : vector<128x32xf32>
    %85 = vector.extract_strided_slice %75 {offsets = [0, 192], sizes = [128, 32], strides = [1, 1]} : vector<128x256xf32> to vector<128x32xf32>
    %86 = vector.extract_strided_slice %75 {offsets = [0, 224], sizes = [128, 32], strides = [1, 1]} : vector<128x256xf32> to vector<128x32xf32>
    %87 = arith.maximumf %85, %86 : vector<128x32xf32>
    %88 = tpu.concatenate %78, %81, %84, %87 in 1 : vector<128x32xf32>, vector<128x32xf32>, vector<128x32xf32>, vector<128x32xf32> -> vector<128x128xf32>
    %89 = tpu.iota {dimensions = array<i32: 0>} : vector<128x128xi32>
    %c64_i32 = arith.constant 64 : i32
    %c0_i32_51 = arith.constant 0 : i32
    %90 = arith.cmpi eq, %c64_i32, %c0_i32_51 : i32
    %c1_i32_52 = arith.constant 1 : i32
    %91 = arith.select %90, %c1_i32_52, %c64_i32 : i32
    %92 = vector.broadcast %91 : i32 to vector<128x128xi32>
    %93 = arith.remsi %89, %92 : vector<128x128xi32>
    %c0_i32_53 = arith.constant 0 : i32
    %94 = vector.broadcast %c0_i32_53 : i32 to vector<128x128xi32>
    %95 = arith.cmpi ne, %93, %94 : vector<128x128xi32>
    %c0_i32_54 = arith.constant 0 : i32
    %96 = vector.broadcast %c0_i32_54 : i32 to vector<128x128xi32>
    %97 = arith.cmpi slt, %93, %96 : vector<128x128xi32>
    %c0_i32_55 = arith.constant 0 : i32
    %98 = arith.cmpi slt, %91, %c0_i32_55 : i32
    %99 = vector.broadcast %98 : i1 to vector<128x128xi1>
    %100 = vector.broadcast %99 : vector<128x128xi1> to vector<128x128xi1>
    %101 = arith.xori %97, %100 : vector<128x128xi1>
    %102 = arith.andi %101, %95 : vector<128x128xi1>
    %103 = vector.broadcast %91 : i32 to vector<128x128xi32>
    %104 = arith.addi %93, %103 : vector<128x128xi32>
    %105 = arith.select %102, %104, %93 : vector<128x128xi1>, vector<128x128xi32>
    %cst_56 = arith.constant 0.000000e+00 : f32
    %106 = vector.broadcast %cst_56 : f32 to vector<128x128xf32>
    %c0_i32_57 = arith.constant 0 : i32
    %107 = vector.broadcast %c0_i32_57 : i32 to vector<128x128xi32>
    %108 = arith.cmpi eq, %105, %107 : vector<128x128xi32>
    %c1_i32_58 = arith.constant 1 : i32
    %109 = tpu.dynamic_rotate %88 by %c1_i32_58 dim 0 : vector<128x128xf32>, i32 -> vector<128x128xf32>
    %110 = arith.select %108, %106, %109 : vector<128x128xi1>, vector<128x128xf32>
    %c63_i32 = arith.constant 63 : i32
    %111 = vector.broadcast %c63_i32 : i32 to vector<128x128xi32>
    %112 = arith.cmpi eq, %105, %111 : vector<128x128xi32>
    %c127_i32_59 = arith.constant 127 : i32
    %113 = tpu.dynamic_rotate %88 by %c127_i32_59 dim 0 : vector<128x128xf32>, i32 -> vector<128x128xf32>
    %114 = arith.select %112, %106, %113 : vector<128x128xi1>, vector<128x128xf32>
    %115 = arith.truncf %110 : vector<128x128xf32> to vector<128x128xbf16>
    %c0_60 = arith.constant 0 : index
    %c0_61 = arith.constant 0 : index
    %c0_62 = arith.constant 0 : index
    %116 = vector.load %arg4[%c0_60, %c0_61, %c0_62] : memref<3x128x256xbf16, #tpu.memory_space<vmem>>, vector<1x128x256xbf16>
    %117 = vector.shape_cast %116 : vector<1x128x256xbf16> to vector<128x256xbf16>
    %cst_63 = arith.constant dense<0.000000e+00> : vector<128x256xf32>
    %118 = tpu.matmul %115, %117, %cst_63 {dimension_numbers = #tpu.dot_dimension_numbers<[1], [0], [0], [1], [0, 0, 1, 1], [], []>} : vector<128x128xbf16>, vector<128x256xbf16>, vector<128x256xf32> -> vector<128x256xf32>
    %119 = arith.truncf %88 : vector<128x128xf32> to vector<128x128xbf16>
    %c1_64 = arith.constant 1 : index
    %c0_65 = arith.constant 0 : index
    %c0_66 = arith.constant 0 : index
    %120 = vector.load %arg4[%c1_64, %c0_65, %c0_66] : memref<3x128x256xbf16, #tpu.memory_space<vmem>>, vector<1x128x256xbf16>
    %121 = vector.shape_cast %120 : vector<1x128x256xbf16> to vector<128x256xbf16>
    %cst_67 = arith.constant dense<0.000000e+00> : vector<128x256xf32>
    %122 = tpu.matmul %119, %121, %cst_67 {dimension_numbers = #tpu.dot_dimension_numbers<[1], [0], [0], [1], [0, 0, 1, 1], [], []>} : vector<128x128xbf16>, vector<128x256xbf16>, vector<128x256xf32> -> vector<128x256xf32>
    %123 = arith.addf %118, %122 : vector<128x256xf32>
    %124 = arith.truncf %114 : vector<128x128xf32> to vector<128x128xbf16>
    %c2_68 = arith.constant 2 : index
    %c0_69 = arith.constant 0 : index
    %c0_70 = arith.constant 0 : index
    %125 = vector.load %arg4[%c2_68, %c0_69, %c0_70] : memref<3x128x256xbf16, #tpu.memory_space<vmem>>, vector<1x128x256xbf16>
    %126 = vector.shape_cast %125 : vector<1x128x256xbf16> to vector<128x256xbf16>
    %cst_71 = arith.constant dense<0.000000e+00> : vector<128x256xf32>
    %127 = tpu.matmul %124, %126, %cst_71 {dimension_numbers = #tpu.dot_dimension_numbers<[1], [0], [0], [1], [0, 0, 1, 1], [], []>} : vector<128x128xbf16>, vector<128x256xbf16>, vector<128x256xf32> -> vector<128x256xf32>
    %128 = arith.addf %123, %127 : vector<128x256xf32>
    %c0_72 = arith.constant 0 : index
    %c0_73 = arith.constant 0 : index
    %129 = vector.load %arg5[%c0_72, %c0_73] : memref<1x256xf32, #tpu.memory_space<vmem>>, vector<1x256xf32>
    %130 = vector.broadcast %129 : vector<1x256xf32> to vector<128x256xf32>
    %131 = arith.addf %128, %130 : vector<128x256xf32>
    %cst_74 = arith.constant 0.000000e+00 : f32
    %132 = vector.broadcast %cst_74 : f32 to vector<128x256xf32>
    %133 = arith.maximumf %131, %132 : vector<128x256xf32>
    %134 = arith.truncf %133 : vector<128x256xf32> to vector<128x256xbf16>
    %c0_75 = arith.constant 0 : index
    %c0_76 = arith.constant 0 : index
    %135 = vector.load %arg8[%c0_75, %c0_76] : memref<128x256xbf16, #tpu.memory_space<vmem>>, vector<64x128xbf16>
    %cst_77 = arith.constant dense<0.000000e+00> : vector<64x256xf32>
    %136 = tpu.matmul %135, %134, %cst_77 {dimension_numbers = #tpu.dot_dimension_numbers<[1], [0], [0], [1], [0, 0, 1, 1], [], []>} : vector<64x128xbf16>, vector<128x256xbf16>, vector<64x256xf32> -> vector<64x256xf32>
    %c0_78 = arith.constant 0 : index
    %c0_79 = arith.constant 0 : index
    %137 = vector.load %arg9[%c0_78, %c0_79] : memref<128x256xbf16, #tpu.memory_space<vmem>>, vector<64x128xbf16>
    %cst_80 = arith.constant dense<0.000000e+00> : vector<64x256xf32>
    %138 = tpu.matmul %137, %134, %cst_80 {dimension_numbers = #tpu.dot_dimension_numbers<[1], [0], [0], [1], [0, 0, 1, 1], [], []>} : vector<64x128xbf16>, vector<128x256xbf16>, vector<64x256xf32> -> vector<64x256xf32>
    %139 = arith.maximumf %136, %138 : vector<64x256xf32>
    %140 = vector.extract_strided_slice %139 {offsets = [0, 0], sizes = [64, 64], strides = [1, 1]} : vector<64x256xf32> to vector<64x64xf32>
    %141 = vector.extract_strided_slice %139 {offsets = [0, 64], sizes = [64, 64], strides = [1, 1]} : vector<64x256xf32> to vector<64x64xf32>
    %142 = arith.maximumf %140, %141 : vector<64x64xf32>
    %143 = vector.extract_strided_slice %139 {offsets = [0, 128], sizes = [64, 64], strides = [1, 1]} : vector<64x256xf32> to vector<64x64xf32>
    %144 = vector.extract_strided_slice %139 {offsets = [0, 192], sizes = [64, 64], strides = [1, 1]} : vector<64x256xf32> to vector<64x64xf32>
    %145 = arith.maximumf %143, %144 : vector<64x64xf32>
    %146 = tpu.concatenate %142, %145 in 1 : vector<64x64xf32>, vector<64x64xf32> -> vector<64x128xf32>
    %147 = tpu.iota {dimensions = array<i32: 0>} : vector<64x128xi32>
    %c32_i32 = arith.constant 32 : i32
    %c0_i32_81 = arith.constant 0 : i32
    %148 = arith.cmpi eq, %c32_i32, %c0_i32_81 : i32
    %c1_i32_82 = arith.constant 1 : i32
    %149 = arith.select %148, %c1_i32_82, %c32_i32 : i32
    %150 = vector.broadcast %149 : i32 to vector<64x128xi32>
    %151 = arith.remsi %147, %150 : vector<64x128xi32>
    %c0_i32_83 = arith.constant 0 : i32
    %152 = vector.broadcast %c0_i32_83 : i32 to vector<64x128xi32>
    %153 = arith.cmpi ne, %151, %152 : vector<64x128xi32>
    %c0_i32_84 = arith.constant 0 : i32
    %154 = vector.broadcast %c0_i32_84 : i32 to vector<64x128xi32>
    %155 = arith.cmpi slt, %151, %154 : vector<64x128xi32>
    %c0_i32_85 = arith.constant 0 : i32
    %156 = arith.cmpi slt, %149, %c0_i32_85 : i32
    %157 = vector.broadcast %156 : i1 to vector<64x128xi1>
    %158 = vector.broadcast %157 : vector<64x128xi1> to vector<64x128xi1>
    %159 = arith.xori %155, %158 : vector<64x128xi1>
    %160 = arith.andi %159, %153 : vector<64x128xi1>
    %161 = vector.broadcast %149 : i32 to vector<64x128xi32>
    %162 = arith.addi %151, %161 : vector<64x128xi32>
    %163 = arith.select %160, %162, %151 : vector<64x128xi1>, vector<64x128xi32>
    %cst_86 = arith.constant 0.000000e+00 : f32
    %164 = vector.broadcast %cst_86 : f32 to vector<64x128xf32>
    %c0_i32_87 = arith.constant 0 : i32
    %165 = vector.broadcast %c0_i32_87 : i32 to vector<64x128xi32>
    %166 = arith.cmpi eq, %163, %165 : vector<64x128xi32>
    %c1_i32_88 = arith.constant 1 : i32
    %167 = tpu.dynamic_rotate %146 by %c1_i32_88 dim 0 : vector<64x128xf32>, i32 -> vector<64x128xf32>
    %168 = arith.select %166, %164, %167 : vector<64x128xi1>, vector<64x128xf32>
    %c31_i32 = arith.constant 31 : i32
    %169 = vector.broadcast %c31_i32 : i32 to vector<64x128xi32>
    %170 = arith.cmpi eq, %163, %169 : vector<64x128xi32>
    %c63_i32_89 = arith.constant 63 : i32
    %171 = tpu.dynamic_rotate %146 by %c63_i32_89 dim 0 : vector<64x128xf32>, i32 -> vector<64x128xf32>
    %172 = arith.select %170, %164, %171 : vector<64x128xi1>, vector<64x128xf32>
    %173 = arith.truncf %168 : vector<64x128xf32> to vector<64x128xbf16>
    %c0_90 = arith.constant 0 : index
    %c0_91 = arith.constant 0 : index
    %c0_92 = arith.constant 0 : index
    %174 = vector.load %arg6[%c0_90, %c0_91, %c0_92] : memref<3x128x256xbf16, #tpu.memory_space<vmem>>, vector<1x128x256xbf16>
    %175 = vector.shape_cast %174 : vector<1x128x256xbf16> to vector<128x256xbf16>
    %cst_93 = arith.constant dense<0.000000e+00> : vector<64x256xf32>
    %176 = tpu.matmul %173, %175, %cst_93 {dimension_numbers = #tpu.dot_dimension_numbers<[1], [0], [0], [1], [0, 0, 1, 1], [], []>} : vector<64x128xbf16>, vector<128x256xbf16>, vector<64x256xf32> -> vector<64x256xf32>
    %177 = arith.truncf %146 : vector<64x128xf32> to vector<64x128xbf16>
    %c1_94 = arith.constant 1 : index
    %c0_95 = arith.constant 0 : index
    %c0_96 = arith.constant 0 : index
    %178 = vector.load %arg6[%c1_94, %c0_95, %c0_96] : memref<3x128x256xbf16, #tpu.memory_space<vmem>>, vector<1x128x256xbf16>
    %179 = vector.shape_cast %178 : vector<1x128x256xbf16> to vector<128x256xbf16>
    %cst_97 = arith.constant dense<0.000000e+00> : vector<64x256xf32>
    %180 = tpu.matmul %177, %179, %cst_97 {dimension_numbers = #tpu.dot_dimension_numbers<[1], [0], [0], [1], [0, 0, 1, 1], [], []>} : vector<64x128xbf16>, vector<128x256xbf16>, vector<64x256xf32> -> vector<64x256xf32>
    %181 = arith.addf %176, %180 : vector<64x256xf32>
    %182 = arith.truncf %172 : vector<64x128xf32> to vector<64x128xbf16>
    %c2_98 = arith.constant 2 : index
    %c0_99 = arith.constant 0 : index
    %c0_100 = arith.constant 0 : index
    %183 = vector.load %arg6[%c2_98, %c0_99, %c0_100] : memref<3x128x256xbf16, #tpu.memory_space<vmem>>, vector<1x128x256xbf16>
    %184 = vector.shape_cast %183 : vector<1x128x256xbf16> to vector<128x256xbf16>
    %cst_101 = arith.constant dense<0.000000e+00> : vector<64x256xf32>
    %185 = tpu.matmul %182, %184, %cst_101 {dimension_numbers = #tpu.dot_dimension_numbers<[1], [0], [0], [1], [0, 0, 1, 1], [], []>} : vector<64x128xbf16>, vector<128x256xbf16>, vector<64x256xf32> -> vector<64x256xf32>
    %186 = arith.addf %181, %185 : vector<64x256xf32>
    %c0_102 = arith.constant 0 : index
    %c0_103 = arith.constant 0 : index
    %187 = vector.load %arg7[%c0_102, %c0_103] : memref<1x256xf32, #tpu.memory_space<vmem>>, vector<1x256xf32>
    %188 = vector.broadcast %187 : vector<1x256xf32> to vector<64x256xf32>
    %189 = arith.addf %186, %188 : vector<64x256xf32>
    %cst_104 = arith.constant 0.000000e+00 : f32
    %190 = vector.broadcast %cst_104 : f32 to vector<64x256xf32>
    %191 = arith.maximumf %189, %190 : vector<64x256xf32>
    %192 = arith.truncf %191 : vector<64x256xf32> to vector<64x256xbf16>
    %c0_105 = arith.constant 0 : index
    %c0_106 = arith.constant 0 : index
    %193 = vector.load %arg8[%c0_105, %c0_106] : memref<128x256xbf16, #tpu.memory_space<vmem>>, vector<32x64xbf16>
    %cst_107 = arith.constant dense<0.000000e+00> : vector<32x256xf32>
    %194 = tpu.matmul %193, %192, %cst_107 {dimension_numbers = #tpu.dot_dimension_numbers<[1], [0], [0], [1], [0, 0, 1, 1], [], []>} : vector<32x64xbf16>, vector<64x256xbf16>, vector<32x256xf32> -> vector<32x256xf32>
    %c0_108 = arith.constant 0 : index
    %c0_109 = arith.constant 0 : index
    %195 = vector.load %arg9[%c0_108, %c0_109] : memref<128x256xbf16, #tpu.memory_space<vmem>>, vector<32x64xbf16>
    %cst_110 = arith.constant dense<0.000000e+00> : vector<32x256xf32>
    %196 = tpu.matmul %195, %192, %cst_110 {dimension_numbers = #tpu.dot_dimension_numbers<[1], [0], [0], [1], [0, 0, 1, 1], [], []>} : vector<32x64xbf16>, vector<64x256xbf16>, vector<32x256xf32> -> vector<32x256xf32>
    %197 = arith.maximumf %194, %196 : vector<32x256xf32>
    %198 = vector.extract_strided_slice %197 {offsets = [0, 0], sizes = [32, 128], strides = [1, 1]} : vector<32x256xf32> to vector<32x128xf32>
    %199 = vector.extract_strided_slice %197 {offsets = [0, 128], sizes = [32, 128], strides = [1, 1]} : vector<32x256xf32> to vector<32x128xf32>
    %200 = arith.maximumf %198, %199 : vector<32x128xf32>
    %201 = vector.extract_strided_slice %200 {offsets = [0, 0], sizes = [1, 128], strides = [1, 1]} : vector<32x128xf32> to vector<1x128xf32>
    %202 = arith.truncf %201 : vector<1x128xf32> to vector<1x128xbf16>
    %c0_111 = arith.constant 0 : index
    %c0_112 = arith.constant 0 : index
    %203 = vector.load %arg15[%c0_111, %c0_112] : memref<2x2048xbf16, #tpu.memory_space<vmem>>, vector<1x128xbf16>
    tpu.vector_store %arg15[%c0_111, %c0_112], %202 {strides = array<i32>} : memref<2x2048xbf16, #tpu.memory_space<vmem>>, vector<1x128xbf16>,
    %204 = vector.extract_strided_slice %200 {offsets = [1, 0], sizes = [1, 128], strides = [1, 1]} : vector<32x128xf32> to vector<1x128xf32>
    %205 = arith.truncf %204 : vector<1x128xf32> to vector<1x128xbf16>
    %c0_113 = arith.constant 0 : index
    %c128 = arith.constant 128 : index
    %206 = vector.load %arg15[%c0_113, %c128] : memref<2x2048xbf16, #tpu.memory_space<vmem>>, vector<1x128xbf16>
    tpu.vector_store %arg15[%c0_113, %c128], %205 {strides = array<i32>} : memref<2x2048xbf16, #tpu.memory_space<vmem>>, vector<1x128xbf16>,
    %207 = vector.extract_strided_slice %200 {offsets = [2, 0], sizes = [1, 128], strides = [1, 1]} : vector<32x128xf32> to vector<1x128xf32>
    %208 = arith.truncf %207 : vector<1x128xf32> to vector<1x128xbf16>
    %c0_114 = arith.constant 0 : index
    %c256 = arith.constant 256 : index
    %209 = vector.load %arg15[%c0_114, %c256] : memref<2x2048xbf16, #tpu.memory_space<vmem>>, vector<1x128xbf16>
    tpu.vector_store %arg15[%c0_114, %c256], %208 {strides = array<i32>} : memref<2x2048xbf16, #tpu.memory_space<vmem>>, vector<1x128xbf16>,
    %210 = vector.extract_strided_slice %200 {offsets = [3, 0], sizes = [1, 128], strides = [1, 1]} : vector<32x128xf32> to vector<1x128xf32>
    %211 = arith.truncf %210 : vector<1x128xf32> to vector<1x128xbf16>
    %c0_115 = arith.constant 0 : index
    %c384 = arith.constant 384 : index
    %212 = vector.load %arg15[%c0_115, %c384] : memref<2x2048xbf16, #tpu.memory_space<vmem>>, vector<1x128xbf16>
    tpu.vector_store %arg15[%c0_115, %c384], %211 {strides = array<i32>} : memref<2x2048xbf16, #tpu.memory_space<vmem>>, vector<1x128xbf16>,
    %213 = vector.extract_strided_slice %200 {offsets = [4, 0], sizes = [1, 128], strides = [1, 1]} : vector<32x128xf32> to vector<1x128xf32>
    %214 = arith.truncf %213 : vector<1x128xf32> to vector<1x128xbf16>
    %c0_116 = arith.constant 0 : index
    %c512 = arith.constant 512 : index
    %215 = vector.load %arg15[%c0_116, %c512] : memref<2x2048xbf16, #tpu.memory_space<vmem>>, vector<1x128xbf16>
    tpu.vector_store %arg15[%c0_116, %c512], %214 {strides = array<i32>} : memref<2x2048xbf16, #tpu.memory_space<vmem>>, vector<1x128xbf16>,
    %216 = vector.extract_strided_slice %200 {offsets = [5, 0], sizes = [1, 128], strides = [1, 1]} : vector<32x128xf32> to vector<1x128xf32>
    %217 = arith.truncf %216 : vector<1x128xf32> to vector<1x128xbf16>
    %c0_117 = arith.constant 0 : index
    %c640 = arith.constant 640 : index
    %218 = vector.load %arg15[%c0_117, %c640] : memref<2x2048xbf16, #tpu.memory_space<vmem>>, vector<1x128xbf16>
    tpu.vector_store %arg15[%c0_117, %c640], %217 {strides = array<i32>} : memref<2x2048xbf16, #tpu.memory_space<vmem>>, vector<1x128xbf16>,
    %219 = vector.extract_strided_slice %200 {offsets = [6, 0], sizes = [1, 128], strides = [1, 1]} : vector<32x128xf32> to vector<1x128xf32>
    %220 = arith.truncf %219 : vector<1x128xf32> to vector<1x128xbf16>
    %c0_118 = arith.constant 0 : index
    %c768 = arith.constant 768 : index
    %221 = vector.load %arg15[%c0_118, %c768] : memref<2x2048xbf16, #tpu.memory_space<vmem>>, vector<1x128xbf16>
    tpu.vector_store %arg15[%c0_118, %c768], %220 {strides = array<i32>} : memref<2x2048xbf16, #tpu.memory_space<vmem>>, vector<1x128xbf16>,
    %222 = vector.extract_strided_slice %200 {offsets = [7, 0], sizes = [1, 128], strides = [1, 1]} : vector<32x128xf32> to vector<1x128xf32>
    %223 = arith.truncf %222 : vector<1x128xf32> to vector<1x128xbf16>
    %c0_119 = arith.constant 0 : index
    %c896 = arith.constant 896 : index
    %224 = vector.load %arg15[%c0_119, %c896] : memref<2x2048xbf16, #tpu.memory_space<vmem>>, vector<1x128xbf16>
    tpu.vector_store %arg15[%c0_119, %c896], %223 {strides = array<i32>} : memref<2x2048xbf16, #tpu.memory_space<vmem>>, vector<1x128xbf16>,
    %225 = vector.extract_strided_slice %200 {offsets = [8, 0], sizes = [1, 128], strides = [1, 1]} : vector<32x128xf32> to vector<1x128xf32>
    %226 = arith.truncf %225 : vector<1x128xf32> to vector<1x128xbf16>
    %c0_120 = arith.constant 0 : index
    %c1024 = arith.constant 1024 : index
    %227 = vector.load %arg15[%c0_120, %c1024] : memref<2x2048xbf16, #tpu.memory_space<vmem>>, vector<1x128xbf16>
    tpu.vector_store %arg15[%c0_120, %c1024], %226 {strides = array<i32>} : memref<2x2048xbf16, #tpu.memory_space<vmem>>, vector<1x128xbf16>,
    %228 = vector.extract_strided_slice %200 {offsets = [9, 0], sizes = [1, 128], strides = [1, 1]} : vector<32x128xf32> to vector<1x128xf32>
    %229 = arith.truncf %228 : vector<1x128xf32> to vector<1x128xbf16>
    %c0_121 = arith.constant 0 : index
    %c1152 = arith.constant 1152 : index
    %230 = vector.load %arg15[%c0_121, %c1152] : memref<2x2048xbf16, #tpu.memory_space<vmem>>, vector<1x128xbf16>
    tpu.vector_store %arg15[%c0_121, %c1152], %229 {strides = array<i32>} : memref<2x2048xbf16, #tpu.memory_space<vmem>>, vector<1x128xbf16>,
    %231 = vector.extract_strided_slice %200 {offsets = [10, 0], sizes = [1, 128], strides = [1, 1]} : vector<32x128xf32> to vector<1x128xf32>
    %232 = arith.truncf %231 : vector<1x128xf32> to vector<1x128xbf16>
    %c0_122 = arith.constant 0 : index
    %c1280 = arith.constant 1280 : index
    %233 = vector.load %arg15[%c0_122, %c1280] : memref<2x2048xbf16, #tpu.memory_space<vmem>>, vector<1x128xbf16>
    tpu.vector_store %arg15[%c0_122, %c1280], %232 {strides = array<i32>} : memref<2x2048xbf16, #tpu.memory_space<vmem>>, vector<1x128xbf16>,
    %234 = vector.extract_strided_slice %200 {offsets = [11, 0], sizes = [1, 128], strides = [1, 1]} : vector<32x128xf32> to vector<1x128xf32>
    %235 = arith.truncf %234 : vector<1x128xf32> to vector<1x128xbf16>
    %c0_123 = arith.constant 0 : index
    %c1408 = arith.constant 1408 : index
    %236 = vector.load %arg15[%c0_123, %c1408] : memref<2x2048xbf16, #tpu.memory_space<vmem>>, vector<1x128xbf16>
    tpu.vector_store %arg15[%c0_123, %c1408], %235 {strides = array<i32>} : memref<2x2048xbf16, #tpu.memory_space<vmem>>, vector<1x128xbf16>,
    %237 = vector.extract_strided_slice %200 {offsets = [12, 0], sizes = [1, 128], strides = [1, 1]} : vector<32x128xf32> to vector<1x128xf32>
    %238 = arith.truncf %237 : vector<1x128xf32> to vector<1x128xbf16>
    %c0_124 = arith.constant 0 : index
    %c1536 = arith.constant 1536 : index
    %239 = vector.load %arg15[%c0_124, %c1536] : memref<2x2048xbf16, #tpu.memory_space<vmem>>, vector<1x128xbf16>
    tpu.vector_store %arg15[%c0_124, %c1536], %238 {strides = array<i32>} : memref<2x2048xbf16, #tpu.memory_space<vmem>>, vector<1x128xbf16>,
    %240 = vector.extract_strided_slice %200 {offsets = [13, 0], sizes = [1, 128], strides = [1, 1]} : vector<32x128xf32> to vector<1x128xf32>
    %241 = arith.truncf %240 : vector<1x128xf32> to vector<1x128xbf16>
    %c0_125 = arith.constant 0 : index
    %c1664 = arith.constant 1664 : index
    %242 = vector.load %arg15[%c0_125, %c1664] : memref<2x2048xbf16, #tpu.memory_space<vmem>>, vector<1x128xbf16>
    tpu.vector_store %arg15[%c0_125, %c1664], %241 {strides = array<i32>} : memref<2x2048xbf16, #tpu.memory_space<vmem>>, vector<1x128xbf16>,
    %243 = vector.extract_strided_slice %200 {offsets = [14, 0], sizes = [1, 128], strides = [1, 1]} : vector<32x128xf32> to vector<1x128xf32>
    %244 = arith.truncf %243 : vector<1x128xf32> to vector<1x128xbf16>
    %c0_126 = arith.constant 0 : index
    %c1792 = arith.constant 1792 : index
    %245 = vector.load %arg15[%c0_126, %c1792] : memref<2x2048xbf16, #tpu.memory_space<vmem>>, vector<1x128xbf16>
    tpu.vector_store %arg15[%c0_126, %c1792], %244 {strides = array<i32>} : memref<2x2048xbf16, #tpu.memory_space<vmem>>, vector<1x128xbf16>,
    %246 = vector.extract_strided_slice %200 {offsets = [15, 0], sizes = [1, 128], strides = [1, 1]} : vector<32x128xf32> to vector<1x128xf32>
    %247 = arith.truncf %246 : vector<1x128xf32> to vector<1x128xbf16>
    %c0_127 = arith.constant 0 : index
    %c1920 = arith.constant 1920 : index
    %248 = vector.load %arg15[%c0_127, %c1920] : memref<2x2048xbf16, #tpu.memory_space<vmem>>, vector<1x128xbf16>
    tpu.vector_store %arg15[%c0_127, %c1920], %247 {strides = array<i32>} : memref<2x2048xbf16, #tpu.memory_space<vmem>>, vector<1x128xbf16>,
    %249 = vector.extract_strided_slice %200 {offsets = [16, 0], sizes = [1, 128], strides = [1, 1]} : vector<32x128xf32> to vector<1x128xf32>
    %250 = arith.truncf %249 : vector<1x128xf32> to vector<1x128xbf16>
    %c1_128 = arith.constant 1 : index
    %c0_129 = arith.constant 0 : index
    %251 = vector.load %arg15[%c1_128, %c0_129] : memref<2x2048xbf16, #tpu.memory_space<vmem>>, vector<1x128xbf16>
    tpu.vector_store %arg15[%c1_128, %c0_129], %250 {strides = array<i32>} : memref<2x2048xbf16, #tpu.memory_space<vmem>>, vector<1x128xbf16>,
    %252 = vector.extract_strided_slice %200 {offsets = [17, 0], sizes = [1, 128], strides = [1, 1]} : vector<32x128xf32> to vector<1x128xf32>
    %253 = arith.truncf %252 : vector<1x128xf32> to vector<1x128xbf16>
    %c1_130 = arith.constant 1 : index
    %c128_131 = arith.constant 128 : index
    %254 = vector.load %arg15[%c1_130, %c128_131] : memref<2x2048xbf16, #tpu.memory_space<vmem>>, vector<1x128xbf16>
    tpu.vector_store %arg15[%c1_130, %c128_131], %253 {strides = array<i32>} : memref<2x2048xbf16, #tpu.memory_space<vmem>>, vector<1x128xbf16>,
    %255 = vector.extract_strided_slice %200 {offsets = [18, 0], sizes = [1, 128], strides = [1, 1]} : vector<32x128xf32> to vector<1x128xf32>
    %256 = arith.truncf %255 : vector<1x128xf32> to vector<1x128xbf16>
    %c1_132 = arith.constant 1 : index
    %c256_133 = arith.constant 256 : index
    %257 = vector.load %arg15[%c1_132, %c256_133] : memref<2x2048xbf16, #tpu.memory_space<vmem>>, vector<1x128xbf16>
    tpu.vector_store %arg15[%c1_132, %c256_133], %256 {strides = array<i32>} : memref<2x2048xbf16, #tpu.memory_space<vmem>>, vector<1x128xbf16>,
    %258 = vector.extract_strided_slice %200 {offsets = [19, 0], sizes = [1, 128], strides = [1, 1]} : vector<32x128xf32> to vector<1x128xf32>
    %259 = arith.truncf %258 : vector<1x128xf32> to vector<1x128xbf16>
    %c1_134 = arith.constant 1 : index
    %c384_135 = arith.constant 384 : index
    %260 = vector.load %arg15[%c1_134, %c384_135] : memref<2x2048xbf16, #tpu.memory_space<vmem>>, vector<1x128xbf16>
    tpu.vector_store %arg15[%c1_134, %c384_135], %259 {strides = array<i32>} : memref<2x2048xbf16, #tpu.memory_space<vmem>>, vector<1x128xbf16>,
    %261 = vector.extract_strided_slice %200 {offsets = [20, 0], sizes = [1, 128], strides = [1, 1]} : vector<32x128xf32> to vector<1x128xf32>
    %262 = arith.truncf %261 : vector<1x128xf32> to vector<1x128xbf16>
    %c1_136 = arith.constant 1 : index
    %c512_137 = arith.constant 512 : index
    %263 = vector.load %arg15[%c1_136, %c512_137] : memref<2x2048xbf16, #tpu.memory_space<vmem>>, vector<1x128xbf16>
    tpu.vector_store %arg15[%c1_136, %c512_137], %262 {strides = array<i32>} : memref<2x2048xbf16, #tpu.memory_space<vmem>>, vector<1x128xbf16>,
    %264 = vector.extract_strided_slice %200 {offsets = [21, 0], sizes = [1, 128], strides = [1, 1]} : vector<32x128xf32> to vector<1x128xf32>
    %265 = arith.truncf %264 : vector<1x128xf32> to vector<1x128xbf16>
    %c1_138 = arith.constant 1 : index
    %c640_139 = arith.constant 640 : index
    %266 = vector.load %arg15[%c1_138, %c640_139] : memref<2x2048xbf16, #tpu.memory_space<vmem>>, vector<1x128xbf16>
    tpu.vector_store %arg15[%c1_138, %c640_139], %265 {strides = array<i32>} : memref<2x2048xbf16, #tpu.memory_space<vmem>>, vector<1x128xbf16>,
    %267 = vector.extract_strided_slice %200 {offsets = [22, 0], sizes = [1, 128], strides = [1, 1]} : vector<32x128xf32> to vector<1x128xf32>
    %268 = arith.truncf %267 : vector<1x128xf32> to vector<1x128xbf16>
    %c1_140 = arith.constant 1 : index
    %c768_141 = arith.constant 768 : index
    %269 = vector.load %arg15[%c1_140, %c768_141] : memref<2x2048xbf16, #tpu.memory_space<vmem>>, vector<1x128xbf16>
    tpu.vector_store %arg15[%c1_140, %c768_141], %268 {strides = array<i32>} : memref<2x2048xbf16, #tpu.memory_space<vmem>>, vector<1x128xbf16>,
    %270 = vector.extract_strided_slice %200 {offsets = [23, 0], sizes = [1, 128], strides = [1, 1]} : vector<32x128xf32> to vector<1x128xf32>
    %271 = arith.truncf %270 : vector<1x128xf32> to vector<1x128xbf16>
    %c1_142 = arith.constant 1 : index
    %c896_143 = arith.constant 896 : index
    %272 = vector.load %arg15[%c1_142, %c896_143] : memref<2x2048xbf16, #tpu.memory_space<vmem>>, vector<1x128xbf16>
    tpu.vector_store %arg15[%c1_142, %c896_143], %271 {strides = array<i32>} : memref<2x2048xbf16, #tpu.memory_space<vmem>>, vector<1x128xbf16>,
    %273 = vector.extract_strided_slice %200 {offsets = [24, 0], sizes = [1, 128], strides = [1, 1]} : vector<32x128xf32> to vector<1x128xf32>
    %274 = arith.truncf %273 : vector<1x128xf32> to vector<1x128xbf16>
    %c1_144 = arith.constant 1 : index
    %c1024_145 = arith.constant 1024 : index
    %275 = vector.load %arg15[%c1_144, %c1024_145] : memref<2x2048xbf16, #tpu.memory_space<vmem>>, vector<1x128xbf16>
    tpu.vector_store %arg15[%c1_144, %c1024_145], %274 {strides = array<i32>} : memref<2x2048xbf16, #tpu.memory_space<vmem>>, vector<1x128xbf16>,
    %276 = vector.extract_strided_slice %200 {offsets = [25, 0], sizes = [1, 128], strides = [1, 1]} : vector<32x128xf32> to vector<1x128xf32>
    %277 = arith.truncf %276 : vector<1x128xf32> to vector<1x128xbf16>
    %c1_146 = arith.constant 1 : index
    %c1152_147 = arith.constant 1152 : index
    %278 = vector.load %arg15[%c1_146, %c1152_147] : memref<2x2048xbf16, #tpu.memory_space<vmem>>, vector<1x128xbf16>
    tpu.vector_store %arg15[%c1_146, %c1152_147], %277 {strides = array<i32>} : memref<2x2048xbf16, #tpu.memory_space<vmem>>, vector<1x128xbf16>,
    %279 = vector.extract_strided_slice %200 {offsets = [26, 0], sizes = [1, 128], strides = [1, 1]} : vector<32x128xf32> to vector<1x128xf32>
    %280 = arith.truncf %279 : vector<1x128xf32> to vector<1x128xbf16>
    %c1_148 = arith.constant 1 : index
    %c1280_149 = arith.constant 1280 : index
    %281 = vector.load %arg15[%c1_148, %c1280_149] : memref<2x2048xbf16, #tpu.memory_space<vmem>>, vector<1x128xbf16>
    tpu.vector_store %arg15[%c1_148, %c1280_149], %280 {strides = array<i32>} : memref<2x2048xbf16, #tpu.memory_space<vmem>>, vector<1x128xbf16>,
    %282 = vector.extract_strided_slice %200 {offsets = [27, 0], sizes = [1, 128], strides = [1, 1]} : vector<32x128xf32> to vector<1x128xf32>
    %283 = arith.truncf %282 : vector<1x128xf32> to vector<1x128xbf16>
    %c1_150 = arith.constant 1 : index
    %c1408_151 = arith.constant 1408 : index
    %284 = vector.load %arg15[%c1_150, %c1408_151] : memref<2x2048xbf16, #tpu.memory_space<vmem>>, vector<1x128xbf16>
    tpu.vector_store %arg15[%c1_150, %c1408_151], %283 {strides = array<i32>} : memref<2x2048xbf16, #tpu.memory_space<vmem>>, vector<1x128xbf16>,
    %285 = vector.extract_strided_slice %200 {offsets = [28, 0], sizes = [1, 128], strides = [1, 1]} : vector<32x128xf32> to vector<1x128xf32>
    %286 = arith.truncf %285 : vector<1x128xf32> to vector<1x128xbf16>
    %c1_152 = arith.constant 1 : index
    %c1536_153 = arith.constant 1536 : index
    %287 = vector.load %arg15[%c1_152, %c1536_153] : memref<2x2048xbf16, #tpu.memory_space<vmem>>, vector<1x128xbf16>
    tpu.vector_store %arg15[%c1_152, %c1536_153], %286 {strides = array<i32>} : memref<2x2048xbf16, #tpu.memory_space<vmem>>, vector<1x128xbf16>,
    %288 = vector.extract_strided_slice %200 {offsets = [29, 0], sizes = [1, 128], strides = [1, 1]} : vector<32x128xf32> to vector<1x128xf32>
    %289 = arith.truncf %288 : vector<1x128xf32> to vector<1x128xbf16>
    %c1_154 = arith.constant 1 : index
    %c1664_155 = arith.constant 1664 : index
    %290 = vector.load %arg15[%c1_154, %c1664_155] : memref<2x2048xbf16, #tpu.memory_space<vmem>>, vector<1x128xbf16>
    tpu.vector_store %arg15[%c1_154, %c1664_155], %289 {strides = array<i32>} : memref<2x2048xbf16, #tpu.memory_space<vmem>>, vector<1x128xbf16>,
    %291 = vector.extract_strided_slice %200 {offsets = [30, 0], sizes = [1, 128], strides = [1, 1]} : vector<32x128xf32> to vector<1x128xf32>
    %292 = arith.truncf %291 : vector<1x128xf32> to vector<1x128xbf16>
    %c1_156 = arith.constant 1 : index
    %c1792_157 = arith.constant 1792 : index
    %293 = vector.load %arg15[%c1_156, %c1792_157] : memref<2x2048xbf16, #tpu.memory_space<vmem>>, vector<1x128xbf16>
    tpu.vector_store %arg15[%c1_156, %c1792_157], %292 {strides = array<i32>} : memref<2x2048xbf16, #tpu.memory_space<vmem>>, vector<1x128xbf16>,
    %294 = vector.extract_strided_slice %200 {offsets = [31, 0], sizes = [1, 128], strides = [1, 1]} : vector<32x128xf32> to vector<1x128xf32>
    %295 = arith.truncf %294 : vector<1x128xf32> to vector<1x128xbf16>
    %c1_158 = arith.constant 1 : index
    %c1920_159 = arith.constant 1920 : index
    %296 = vector.load %arg15[%c1_158, %c1920_159] : memref<2x2048xbf16, #tpu.memory_space<vmem>>, vector<1x128xbf16>
    tpu.vector_store %arg15[%c1_158, %c1920_159], %295 {strides = array<i32>} : memref<2x2048xbf16, #tpu.memory_space<vmem>>, vector<1x128xbf16>,
    %c0_160 = arith.constant 0 : index
    %c0_161 = arith.constant 0 : index
    %297 = vector.load %arg15[%c0_160, %c0_161] : memref<2x2048xbf16, #tpu.memory_space<vmem>>, vector<2x2048xbf16>
    %cst_162 = arith.constant 0.000000e+00 : f32
    %298 = vector.broadcast %cst_162 : f32 to vector<2x128xf32>
    %c0_i32_163 = arith.constant 0 : i32
    %c0_i32_164 = arith.constant 0 : i32
    %c0_i32_165 = arith.constant 0 : i32
    %c0_i32_166 = arith.constant 0 : i32
    %c0_i32_167 = arith.constant 0 : i32
    %299 = tpu.memref_slice %arg10[%c0_i32_163, %c0_i32_166, %c0_i32_167] : memref<4x2048x256xbf16, #tpu.memory_space<any>> -> memref<1x2048x256xbf16, #tpu.memory_space<any>>
    %300 = tpu.memref_squeeze %299 : memref<1x2048x256xbf16, #tpu.memory_space<any>> -> memref<2048x256xbf16, #tpu.memory_space<any>>
    %c0_i32_168 = arith.constant 0 : i32
    %c0_i32_169 = arith.constant 0 : i32
    %301 = tpu.memref_slice %arg16[%c0_i32_164, %c0_i32_168, %c0_i32_169] : memref<4x2048x256xbf16, #tpu.memory_space<vmem>> -> memref<1x2048x256xbf16, #tpu.memory_space<vmem>>
    %302 = tpu.memref_squeeze %301 : memref<1x2048x256xbf16, #tpu.memory_space<vmem>> -> memref<2048x256xbf16, #tpu.memory_space<vmem>>
    %303 = tpu.memref_slice %arg17[%c0_i32_165] : memref<4x!tpu.dma_semaphore, #tpu.memory_space<semaphore_mem>> -> memref<1x!tpu.dma_semaphore, #tpu.memory_space<semaphore_mem>>
    %304 = tpu.memref_squeeze %303 : memref<1x!tpu.dma_semaphore, #tpu.memory_space<semaphore_mem>> -> memref<!tpu.dma_semaphore, #tpu.memory_space<semaphore_mem>>
    tpu.wait_dma2 semaphore(%304 : memref<!tpu.dma_semaphore, #tpu.memory_space<semaphore_mem>>) src(%300 : memref<2048x256xbf16, #tpu.memory_space<any>>) dst(%302 : memref<2048x256xbf16, #tpu.memory_space<vmem>>)
    %c0_170 = arith.constant 0 : index
    %c0_171 = arith.constant 0 : index
    %c0_172 = arith.constant 0 : index
    %305 = vector.load %arg16[%c0_170, %c0_171, %c0_172] : memref<4x2048x256xbf16, #tpu.memory_space<vmem>>, vector<1x2048x256xbf16>
    %306 = vector.shape_cast %305 : vector<1x2048x256xbf16> to vector<2048x256xbf16>
    %cst_173 = arith.constant dense<0.000000e+00> : vector<2x256xf32>
    %307 = tpu.matmul %297, %306, %cst_173 {dimension_numbers = #tpu.dot_dimension_numbers<[1], [0], [0], [1], [0, 0, 1, 1], [], []>} : vector<2x2048xbf16>, vector<2048x256xbf16>, vector<2x256xf32> -> vector<2x256xf32>
    %c0_174 = arith.constant 0 : index
    %c0_175 = arith.constant 0 : index
    %308 = vector.load %arg11[%c0_174, %c0_175] : memref<1x1024xf32, #tpu.memory_space<vmem>>, vector<1x256xf32>
    %309 = vector.broadcast %308 : vector<1x256xf32> to vector<2x256xf32>
    %310 = arith.addf %307, %309 : vector<2x256xf32>
    %cst_176 = arith.constant 0.000000e+00 : f32
    %311 = vector.broadcast %cst_176 : f32 to vector<2x256xf32>
    %312 = arith.maximumf %310, %311 : vector<2x256xf32>
    %313 = arith.truncf %312 : vector<2x256xf32> to vector<2x256xbf16>
    %c0_177 = arith.constant 0 : index
    %c0_178 = arith.constant 0 : index
    %314 = vector.load %arg12[%c0_177, %c0_178] : memref<1024x128xbf16, #tpu.memory_space<vmem>>, vector<256x128xbf16>
    %cst_179 = arith.constant dense<0.000000e+00> : vector<2x128xf32>
    %315 = tpu.matmul %313, %314, %cst_179 {dimension_numbers = #tpu.dot_dimension_numbers<[1], [0], [0], [1], [0, 0, 1, 1], [], []>} : vector<2x256xbf16>, vector<256x128xbf16>, vector<2x128xf32> -> vector<2x128xf32>
    %316 = arith.addf %298, %315 : vector<2x128xf32>
    %c1_i32_180 = arith.constant 1 : i32
    %c1_i32_181 = arith.constant 1 : i32
    %c1_i32_182 = arith.constant 1 : i32
    %c0_i32_183 = arith.constant 0 : i32
    %c0_i32_184 = arith.constant 0 : i32
    %317 = tpu.memref_slice %arg10[%c1_i32_180, %c0_i32_183, %c0_i32_184] : memref<4x2048x256xbf16, #tpu.memory_space<any>> -> memref<1x2048x256xbf16, #tpu.memory_space<any>>
    %318 = tpu.memref_squeeze %317 : memref<1x2048x256xbf16, #tpu.memory_space<any>> -> memref<2048x256xbf16, #tpu.memory_space<any>>
    %c0_i32_185 = arith.constant 0 : i32
    %c0_i32_186 = arith.constant 0 : i32
    %319 = tpu.memref_slice %arg16[%c1_i32_181, %c0_i32_185, %c0_i32_186] : memref<4x2048x256xbf16, #tpu.memory_space<vmem>> -> memref<1x2048x256xbf16, #tpu.memory_space<vmem>>
    %320 = tpu.memref_squeeze %319 : memref<1x2048x256xbf16, #tpu.memory_space<vmem>> -> memref<2048x256xbf16, #tpu.memory_space<vmem>>
    %321 = tpu.memref_slice %arg17[%c1_i32_182] : memref<4x!tpu.dma_semaphore, #tpu.memory_space<semaphore_mem>> -> memref<1x!tpu.dma_semaphore, #tpu.memory_space<semaphore_mem>>
    %322 = tpu.memref_squeeze %321 : memref<1x!tpu.dma_semaphore, #tpu.memory_space<semaphore_mem>> -> memref<!tpu.dma_semaphore, #tpu.memory_space<semaphore_mem>>
    tpu.wait_dma2 semaphore(%322 : memref<!tpu.dma_semaphore, #tpu.memory_space<semaphore_mem>>) src(%318 : memref<2048x256xbf16, #tpu.memory_space<any>>) dst(%320 : memref<2048x256xbf16, #tpu.memory_space<vmem>>)
    %c1_187 = arith.constant 1 : index
    %c0_188 = arith.constant 0 : index
    %c0_189 = arith.constant 0 : index
    %323 = vector.load %arg16[%c1_187, %c0_188, %c0_189] : memref<4x2048x256xbf16, #tpu.memory_space<vmem>>, vector<1x2048x256xbf16>
    %324 = vector.shape_cast %323 : vector<1x2048x256xbf16> to vector<2048x256xbf16>
    %cst_190 = arith.constant dense<0.000000e+00> : vector<2x256xf32>
    %325 = tpu.matmul %297, %324, %cst_190 {dimension_numbers = #tpu.dot_dimension_numbers<[1], [0], [0], [1], [0, 0, 1, 1], [], []>} : vector<2x2048xbf16>, vector<2048x256xbf16>, vector<2x256xf32> -> vector<2x256xf32>
    %c0_191 = arith.constant 0 : index
    %c256_192 = arith.constant 256 : index
    %326 = vector.load %arg11[%c0_191, %c256_192] : memref<1x1024xf32, #tpu.memory_space<vmem>>, vector<1x256xf32>
    %327 = vector.broadcast %326 : vector<1x256xf32> to vector<2x256xf32>
    %328 = arith.addf %325, %327 : vector<2x256xf32>
    %cst_193 = arith.constant 0.000000e+00 : f32
    %329 = vector.broadcast %cst_193 : f32 to vector<2x256xf32>
    %330 = arith.maximumf %328, %329 : vector<2x256xf32>
    %331 = arith.truncf %330 : vector<2x256xf32> to vector<2x256xbf16>
    %c256_194 = arith.constant 256 : index
    %c0_195 = arith.constant 0 : index
    %332 = vector.load %arg12[%c256_194, %c0_195] : memref<1024x128xbf16, #tpu.memory_space<vmem>>, vector<256x128xbf16>
    %cst_196 = arith.constant dense<0.000000e+00> : vector<2x128xf32>
    %333 = tpu.matmul %331, %332, %cst_196 {dimension_numbers = #tpu.dot_dimension_numbers<[1], [0], [0], [1], [0, 0, 1, 1], [], []>} : vector<2x256xbf16>, vector<256x128xbf16>, vector<2x128xf32> -> vector<2x128xf32>
    %334 = arith.addf %316, %333 : vector<2x128xf32>
    %c2_i32_197 = arith.constant 2 : i32
    %c2_i32_198 = arith.constant 2 : i32
    %c2_i32_199 = arith.constant 2 : i32
    %c0_i32_200 = arith.constant 0 : i32
    %c0_i32_201 = arith.constant 0 : i32
    %335 = tpu.memref_slice %arg10[%c2_i32_197, %c0_i32_200, %c0_i32_201] : memref<4x2048x256xbf16, #tpu.memory_space<any>> -> memref<1x2048x256xbf16, #tpu.memory_space<any>>
    %336 = tpu.memref_squeeze %335 : memref<1x2048x256xbf16, #tpu.memory_space<any>> -> memref<2048x256xbf16, #tpu.memory_space<any>>
    %c0_i32_202 = arith.constant 0 : i32
    %c0_i32_203 = arith.constant 0 : i32
    %337 = tpu.memref_slice %arg16[%c2_i32_198, %c0_i32_202, %c0_i32_203] : memref<4x2048x256xbf16, #tpu.memory_space<vmem>> -> memref<1x2048x256xbf16, #tpu.memory_space<vmem>>
    %338 = tpu.memref_squeeze %337 : memref<1x2048x256xbf16, #tpu.memory_space<vmem>> -> memref<2048x256xbf16, #tpu.memory_space<vmem>>
    %339 = tpu.memref_slice %arg17[%c2_i32_199] : memref<4x!tpu.dma_semaphore, #tpu.memory_space<semaphore_mem>> -> memref<1x!tpu.dma_semaphore, #tpu.memory_space<semaphore_mem>>
    %340 = tpu.memref_squeeze %339 : memref<1x!tpu.dma_semaphore, #tpu.memory_space<semaphore_mem>> -> memref<!tpu.dma_semaphore, #tpu.memory_space<semaphore_mem>>
    tpu.wait_dma2 semaphore(%340 : memref<!tpu.dma_semaphore, #tpu.memory_space<semaphore_mem>>) src(%336 : memref<2048x256xbf16, #tpu.memory_space<any>>) dst(%338 : memref<2048x256xbf16, #tpu.memory_space<vmem>>)
    %c2_204 = arith.constant 2 : index
    %c0_205 = arith.constant 0 : index
    %c0_206 = arith.constant 0 : index
    %341 = vector.load %arg16[%c2_204, %c0_205, %c0_206] : memref<4x2048x256xbf16, #tpu.memory_space<vmem>>, vector<1x2048x256xbf16>
    %342 = vector.shape_cast %341 : vector<1x2048x256xbf16> to vector<2048x256xbf16>
    %cst_207 = arith.constant dense<0.000000e+00> : vector<2x256xf32>
    %343 = tpu.matmul %297, %342, %cst_207 {dimension_numbers = #tpu.dot_dimension_numbers<[1], [0], [0], [1], [0, 0, 1, 1], [], []>} : vector<2x2048xbf16>, vector<2048x256xbf16>, vector<2x256xf32> -> vector<2x256xf32>
    %c0_208 = arith.constant 0 : index
    %c512_209 = arith.constant 512 : index
    %344 = vector.load %arg11[%c0_208, %c512_209] : memref<1x1024xf32, #tpu.memory_space<vmem>>, vector<1x256xf32>
    %345 = vector.broadcast %344 : vector<1x256xf32> to vector<2x256xf32>
    %346 = arith.addf %343, %345 : vector<2x256xf32>
    %cst_210 = arith.constant 0.000000e+00 : f32
    %347 = vector.broadcast %cst_210 : f32 to vector<2x256xf32>
    %348 = arith.maximumf %346, %347 : vector<2x256xf32>
    %349 = arith.truncf %348 : vector<2x256xf32> to vector<2x256xbf16>
    %c512_211 = arith.constant 512 : index
    %c0_212 = arith.constant 0 : index
    %350 = vector.load %arg12[%c512_211, %c0_212] : memref<1024x128xbf16, #tpu.memory_space<vmem>>, vector<256x128xbf16>
    %cst_213 = arith.constant dense<0.000000e+00> : vector<2x128xf32>
    %351 = tpu.matmul %349, %350, %cst_213 {dimension_numbers = #tpu.dot_dimension_numbers<[1], [0], [0], [1], [0, 0, 1, 1], [], []>} : vector<2x256xbf16>, vector<256x128xbf16>, vector<2x128xf32> -> vector<2x128xf32>
    %352 = arith.addf %334, %351 : vector<2x128xf32>
    %c3_i32_214 = arith.constant 3 : i32
    %c3_i32_215 = arith.constant 3 : i32
    %c3_i32_216 = arith.constant 3 : i32
    %c0_i32_217 = arith.constant 0 : i32
    %c0_i32_218 = arith.constant 0 : i32
    %353 = tpu.memref_slice %arg10[%c3_i32_214, %c0_i32_217, %c0_i32_218] : memref<4x2048x256xbf16, #tpu.memory_space<any>> -> memref<1x2048x256xbf16, #tpu.memory_space<any>>
    %354 = tpu.memref_squeeze %353 : memref<1x2048x256xbf16, #tpu.memory_space<any>> -> memref<2048x256xbf16, #tpu.memory_space<any>>
    %c0_i32_219 = arith.constant 0 : i32
    %c0_i32_220 = arith.constant 0 : i32
    %355 = tpu.memref_slice %arg16[%c3_i32_215, %c0_i32_219, %c0_i32_220] : memref<4x2048x256xbf16, #tpu.memory_space<vmem>> -> memref<1x2048x256xbf16, #tpu.memory_space<vmem>>
    %356 = tpu.memref_squeeze %355 : memref<1x2048x256xbf16, #tpu.memory_space<vmem>> -> memref<2048x256xbf16, #tpu.memory_space<vmem>>
    %357 = tpu.memref_slice %arg17[%c3_i32_216] : memref<4x!tpu.dma_semaphore, #tpu.memory_space<semaphore_mem>> -> memref<1x!tpu.dma_semaphore, #tpu.memory_space<semaphore_mem>>
    %358 = tpu.memref_squeeze %357 : memref<1x!tpu.dma_semaphore, #tpu.memory_space<semaphore_mem>> -> memref<!tpu.dma_semaphore, #tpu.memory_space<semaphore_mem>>
    tpu.wait_dma2 semaphore(%358 : memref<!tpu.dma_semaphore, #tpu.memory_space<semaphore_mem>>) src(%354 : memref<2048x256xbf16, #tpu.memory_space<any>>) dst(%356 : memref<2048x256xbf16, #tpu.memory_space<vmem>>)
    %c3 = arith.constant 3 : index
    %c0_221 = arith.constant 0 : index
    %c0_222 = arith.constant 0 : index
    %359 = vector.load %arg16[%c3, %c0_221, %c0_222] : memref<4x2048x256xbf16, #tpu.memory_space<vmem>>, vector<1x2048x256xbf16>
    %360 = vector.shape_cast %359 : vector<1x2048x256xbf16> to vector<2048x256xbf16>
    %cst_223 = arith.constant dense<0.000000e+00> : vector<2x256xf32>
    %361 = tpu.matmul %297, %360, %cst_223 {dimension_numbers = #tpu.dot_dimension_numbers<[1], [0], [0], [1], [0, 0, 1, 1], [], []>} : vector<2x2048xbf16>, vector<2048x256xbf16>, vector<2x256xf32> -> vector<2x256xf32>
    %c0_224 = arith.constant 0 : index
    %c768_225 = arith.constant 768 : index
    %362 = vector.load %arg11[%c0_224, %c768_225] : memref<1x1024xf32, #tpu.memory_space<vmem>>, vector<1x256xf32>
    %363 = vector.broadcast %362 : vector<1x256xf32> to vector<2x256xf32>
    %364 = arith.addf %361, %363 : vector<2x256xf32>
    %cst_226 = arith.constant 0.000000e+00 : f32
    %365 = vector.broadcast %cst_226 : f32 to vector<2x256xf32>
    %366 = arith.maximumf %364, %365 : vector<2x256xf32>
    %367 = arith.truncf %366 : vector<2x256xf32> to vector<2x256xbf16>
    %c768_227 = arith.constant 768 : index
    %c0_228 = arith.constant 0 : index
    %368 = vector.load %arg12[%c768_227, %c0_228] : memref<1024x128xbf16, #tpu.memory_space<vmem>>, vector<256x128xbf16>
    %cst_229 = arith.constant dense<0.000000e+00> : vector<2x128xf32>
    %369 = tpu.matmul %367, %368, %cst_229 {dimension_numbers = #tpu.dot_dimension_numbers<[1], [0], [0], [1], [0, 0, 1, 1], [], []>} : vector<2x256xbf16>, vector<256x128xbf16>, vector<2x128xf32> -> vector<2x128xf32>
    %370 = arith.addf %352, %369 : vector<2x128xf32>
    %371 = vector.extract_strided_slice %370 {offsets = [0, 0], sizes = [2, 9], strides = [1, 1]} : vector<2x128xf32> to vector<2x9xf32>
    %c0_230 = arith.constant 0 : index
    %c0_231 = arith.constant 0 : index
    %372 = vector.load %arg13[%c0_230, %c0_231] : memref<1x9xf32, #tpu.memory_space<vmem>>, vector<1x9xf32>
    %373 = vector.broadcast %372 : vector<1x9xf32> to vector<2x9xf32>
    %374 = arith.addf %371, %373 : vector<2x9xf32>
    %c0_232 = arith.constant 0 : index
    %c0_233 = arith.constant 0 : index
    %375 = vector.load %arg14[%c0_232, %c0_233] : memref<2x9xf32, #tpu.memory_space<vmem>>, vector<2x9xf32>
    tpu.vector_store %arg14[%c0_232, %c0_233], %374 {strides = array<i32>} : memref<2x9xf32, #tpu.memory_space<vmem>>, vector<2x9xf32>,
    return
  }
  func.func @transform_0(%arg0: i32) -> (i32, i32) {
    %c0_i32 = arith.constant 0 : i32
    %c0_i32_0 = arith.constant 0 : i32
    %c0_i32_1 = arith.constant 0 : i32
    return %c0_i32, %c0_i32_0 : i32, i32
  }
  func.func @transform_1(%arg0: i32) -> (i32, i32, i32) {
    %c0_i32 = arith.constant 0 : i32
    %c0_i32_0 = arith.constant 0 : i32
    %c0_i32_1 = arith.constant 0 : i32
    %c0_i32_2 = arith.constant 0 : i32
    return %c0_i32, %c0_i32_0, %c0_i32_1 : i32, i32, i32
  }
  func.func @transform_2(%arg0: i32) -> (i32, i32) {
    %c0_i32 = arith.constant 0 : i32
    %c0_i32_0 = arith.constant 0 : i32
    %c0_i32_1 = arith.constant 0 : i32
    return %c0_i32, %c0_i32_0 : i32, i32
  }
  func.func @transform_3(%arg0: i32) -> (i32, i32, i32) {
    %c0_i32 = arith.constant 0 : i32
    %c0_i32_0 = arith.constant 0 : i32
    %c0_i32_1 = arith.constant 0 : i32
    %c0_i32_2 = arith.constant 0 : i32
    return %c0_i32, %c0_i32_0, %c0_i32_1 : i32, i32, i32
  }
  func.func @transform_4(%arg0: i32) -> (i32, i32) {
    %c0_i32 = arith.constant 0 : i32
    %c0_i32_0 = arith.constant 0 : i32
    %c0_i32_1 = arith.constant 0 : i32
    return %c0_i32, %c0_i32_0 : i32, i32
  }
  func.func @transform_5(%arg0: i32) -> (i32, i32, i32) {
    %c0_i32 = arith.constant 0 : i32
    %c0_i32_0 = arith.constant 0 : i32
    %c0_i32_1 = arith.constant 0 : i32
    %c0_i32_2 = arith.constant 0 : i32
    return %c0_i32, %c0_i32_0, %c0_i32_1 : i32, i32, i32
  }
  func.func @transform_6(%arg0: i32) -> (i32, i32) {
    %c0_i32 = arith.constant 0 : i32
    %c0_i32_0 = arith.constant 0 : i32
    %c0_i32_1 = arith.constant 0 : i32
    return %c0_i32, %c0_i32_0 : i32, i32
  }
  func.func @transform_7(%arg0: i32) -> (i32, i32) {
    %c0_i32 = arith.constant 0 : i32
    %c0_i32_0 = arith.constant 0 : i32
    %c0_i32_1 = arith.constant 0 : i32
    return %c0_i32, %c0_i32_0 : i32, i32
  }
  func.func @transform_8(%arg0: i32) -> (i32, i32) {
    %c0_i32 = arith.constant 0 : i32
    %c0_i32_0 = arith.constant 0 : i32
    %c0_i32_1 = arith.constant 0 : i32
    return %c0_i32, %c0_i32_0 : i32, i32
  }
  func.func @transform_10(%arg0: i32) -> (i32, i32) {
    %c0_i32 = arith.constant 0 : i32
    %c0_i32_0 = arith.constant 0 : i32
    %c0_i32_1 = arith.constant 0 : i32
    return %c0_i32, %c0_i32_0 : i32, i32
  }
  func.func @transform_11(%arg0: i32) -> (i32, i32) {
    %c0_i32 = arith.constant 0 : i32
    %c0_i32_0 = arith.constant 0 : i32
    %c0_i32_1 = arith.constant 0 : i32
    return %c0_i32, %c0_i32_0 : i32, i32
  }
  func.func @transform_12(%arg0: i32) -> (i32, i32) {
    %c0_i32 = arith.constant 0 : i32
    %c0_i32_0 = arith.constant 0 : i32
    %c0_i32_1 = arith.constant 0 : i32
    return %c0_i32, %c0_i32_0 : i32, i32
  }
  func.func @transform_13(%arg0: i32) -> (i32, i32) {
    %c0_i32 = arith.constant 0 : i32
    %c0_i32_0 = arith.constant 0 : i32
    %c0_i32_1 = arith.constant 0 : i32
    return %c0_i32, %c0_i32_0 : i32, i32
  }
}

</mosaic_0001>

<bundles_post_ra>
// kernel: net_forward_impl.1
= control target key start
LH: loop header
LB: loop body
LE: loop exit
PB: predicated region body
PF: predicated region fallthrough
CT: control target
= control target key end

     0   :  { %18 = vsyncpa [#allocation6], 0  ;;  %s12874_s0 = inlined_call_operand.vmem [shape: f32[256,8], index: 0, kind: input, shape index: {}]   ;;  %s12875_s1 = inlined_call_operand.hbm [shape: bf16[3,8,256], index: 1, kind: input, shape index: {}]   ;;  %s12876_s2 = inlined_call_operand.hbm [shape: f32[1,256], index: 2, kind: input, shape index: {}]   ;;  %s12877_s3 = inlined_call_operand.hbm [shape: bf16[3,128,256], index: 3, kind: input, shape index: {}]   ;;  %s12878_s4 = inlined_call_operand.hbm [shape: f32[1,256], index: 4, kind: input, shape index: {}]   ;;  %s12879_s5 = inlined_call_operand.hbm [shape: bf16[3,128,256], index: 5, kind: input, shape index: {}]   ;;  %s12880_s6 = inlined_call_operand.hbm [shape: f32[1,256], index: 6, kind: input, shape index: {}]   ;;  %s12881_s7 = inlined_call_operand.hbm [shape: bf16[128,256], index: 7, kind: input, shape index: {}]   ;;  %s12882_s8 = inlined_call_operand.hbm [shape: bf16[128,256], index: 8, kind: input, shape index: {}]   ;;  %s12883_s9 = inlined_call_operand.hbm [shape: bf16[4,2048,256], index: 9, kind: input, shape index: {}]   ;;  %s12884_s10 = inlined_call_operand.hbm [shape: f32[1,1024], index: 10, kind: input, shape index: {}]   ;;  %s12885_s11 = inlined_call_operand.hbm [shape: bf16[1024,128], index: 11, kind: input, shape index: {}]   ;;  %s12886_s12 = inlined_call_operand.hbm [shape: f32[1,9], index: 12, kind: input, shape index: {}]   ;;  %s12887_s13 = inlined_call_operand.hbm [shape: f32[2,9], index: 13, kind: output, shape index: {}]  }
   0x1   :  { %19 = vsyncpa [#allocation9], 0 }
   0x2   :  { %20 = vsyncpa [#allocation12], 0 }
   0x3   :  { %21 = vsyncpa [#allocation15], 0 }
   0x4   :  { %22 = vsyncpa [#allocation18], 0 }
   0x5   :  { %23 = vsyncpa [#allocation21], 0 }
   0x6   :  { %24 = vsyncpa [#allocation7], 0  ;;  %s10423_s25 = smov [#allocation8]   ;;  %s10424_s27 = smov [#allocation11]  }
   0x7   :  { %s45_s26 = sshll.u32 %s10423_s25, 4  ;;  %s67_s28 = sshll.u32 %s10424_s27, 4  ;;  %s46_s26 = int_to_ptr.vmem [resolvable:$true] %s45_s26  ;;  %s68_s28 = int_to_ptr.vmem [resolvable:$true] %s67_s28 }
   0x8   :  { %s10137_s14 = scalar_lea.hbm %s12876_s2, 32 }
   0x9   :  { %p10138_p0 = scmp.ne.s32.totalorder %s12876_s2, %s10137_s14  ;;  %p10141_p1 = scmp.lt.u32.totalorder %s10137_s14, %s12876_s2 }
   0xb   :  { %p10143_p2 = pnand %p10141_p1, %p10138_p0 }
   0xd   :  { %10146 = shalt.err (!%p10143_p2)
}
   0xe   :  { %s10147_s19 = scalar_lea.vmem %s46_s26, 32  ;;  %p10152_p4 = scmp.lt.s32.totalorder %s46_s26, %s46_s26 }
   0xf   :  { %p10148_p3 = scmp.ne.s32.totalorder %s46_s26, %s10147_s19  ;;  %p10153_p5 = scmp.lt.s32.totalorder %s10147_s19, %s10147_s19 }
  0x11   :  { %p10154_p6 = por %p10153_p5, %p10152_p4 }
  0x13   :  { %p10155_p7 = pnand %p10154_p6, %p10148_p3 }
  0x15   :  { %10158 = shalt.err (!%p10155_p7)
}
  0x16   :  { %48 = dma.hbm_to_vmem [thread:$0]  %s12876_s2, 32, %s46_s26, [#allocation9]  }
  0x17   :  { %s10159_s24 = scalar_lea.hbm %s12878_s4, 32 }
  0x18   :  { %p10160_p8 = scmp.ne.s32.totalorder %s12878_s4, %s10159_s24  ;;  %p10163_p9 = scmp.lt.u32.totalorder %s10159_s24, %s12878_s4 }
  0x1a   :  { %p10165_p10 = pnand %p10163_p9, %p10160_p8 }
  0x1c   :  { %10168 = shalt.err (!%p10165_p10)
}
  0x1d   :  { %s10169_s14 = scalar_lea.vmem %s68_s28, 32  ;;  %p10174_p12 = scmp.lt.s32.totalorder %s68_s28, %s68_s28 }
  0x1e   :  { %p10170_p11 = scmp.ne.s32.totalorder %s68_s28, %s10169_s14  ;;  %p10175_p13 = scmp.lt.s32.totalorder %s10169_s14, %s10169_s14 }
  0x20   :  { %p10176_p0 = por %p10175_p13, %p10174_p12 }
  0x22   :  { %p10177_p1 = pnand %p10176_p0, %p10170_p11 }
  0x24   :  { %10180 = shalt.err (!%p10177_p1)
}
  0x25   :  { %70 = dma.hbm_to_vmem [thread:$0]  %s12878_s4, 32, %s68_s28, [#allocation12]  }
  0x26   :  { %s10425_s15 = smov [#allocation14]   ;;  %s10181_s19 = scalar_lea.hbm %s12880_s6, 32 }
  0x27   :  { %s89_s16 = sshll.u32 %s10425_s15, 4  ;;  %p10182_p2 = scmp.ne.s32.totalorder %s12880_s6, %s10181_s19  ;;  %s90_s16 = int_to_ptr.vmem [resolvable:$true] %s89_s16 }
  0x28   :  { %p10185_p3 = scmp.lt.u32.totalorder %s10181_s19, %s12880_s6 }
  0x2a   :  { %p10187_p4 = pnand %p10185_p3, %p10182_p2 }
  0x2c   :  { %10190 = shalt.err (!%p10187_p4)
}
  0x2d   :  { %s10191_s24 = scalar_lea.vmem %s90_s16, 32  ;;  %p10196_p6 = scmp.lt.s32.totalorder %s90_s16, %s90_s16 }
  0x2e   :  { %p10192_p5 = scmp.ne.s32.totalorder %s90_s16, %s10191_s24  ;;  %p10197_p7 = scmp.lt.s32.totalorder %s10191_s24, %s10191_s24 }
  0x30   :  { %p10198_p8 = por %p10197_p7, %p10196_p6 }
  0x32   :  { %p10199_p9 = pnand %p10198_p8, %p10192_p5 }
  0x34   :  { %10202 = shalt.err (!%p10199_p9)
}
  0x35   :  { %92 = dma.hbm_to_vmem [thread:$0]  %s12880_s6, 32, %s90_s16, [#allocation15]  }
  0x36   :  { %s10426_s25 = smov [#allocation17]   ;;  %s10427_s29 = smov [#allocation20]  }
  0x37   :  { %s110_s27 = sshll.u32 %s10426_s25, 4  ;;  %s132_s30 = sshll.u32 %s10427_s29, 4  ;;  %s111_s27 = int_to_ptr.vmem [resolvable:$true] %s110_s27  ;;  %s133_s30 = int_to_ptr.vmem [resolvable:$true] %s132_s30 }
  0x38   :  { %s10203_s26 = scalar_lea.hbm %s12882_s8, 2048 }
  0x39   :  { %p10204_p10 = scmp.ne.s32.totalorder %s12882_s8, %s10203_s26  ;;  %p10207_p11 = scmp.lt.u32.totalorder %s10203_s26, %s12882_s8 }
  0x3b   :  { %p10209_p12 = pnand %p10207_p11, %p10204_p10 }
  0x3d   :  { %10212 = shalt.err (!%p10209_p12)
}
  0x3e   :  { %s10213_s6 = scalar_lea.vmem %s111_s27, 2048  ;;  %p10218_p0 = scmp.lt.s32.totalorder %s111_s27, %s111_s27 }
  0x3f   :  { %p10214_p13 = scmp.ne.s32.totalorder %s111_s27, %s10213_s6  ;;  %p10219_p1 = scmp.lt.s32.totalorder %s10213_s6, %s10213_s6 }
  0x41   :  { %p10220_p2 = por %p10219_p1, %p10218_p0 }
  0x43   :  { %p10221_p3 = pnand %p10220_p2, %p10214_p13 }
  0x45   :  { %10224 = shalt.err (!%p10221_p3)
}
  0x46   :  { %s10428_s16 = smov 128   ;;  %s10429_s20 = smov 8  }
  0x47   :  { %116 = dma.hbm_to_vmem [thread:$0]  %s12882_s8, 2048, %s111_s27, [#allocation18], %s10428_s16, %s10428_s16, %s10429_s20  }
  0x48   :  { %s10225_s4 = scalar_lea.hbm %s12885_s11, 8192 }
  0x49   :  { %p10226_p4 = scmp.ne.s32.totalorder %s12885_s11, %s10225_s4  ;;  %p10229_p5 = scmp.lt.u32.totalorder %s10225_s4, %s12885_s11 }
  0x4b   :  { %p10231_p6 = pnand %p10229_p5, %p10226_p4 }
  0x4d   :  { %10234 = shalt.err (!%p10231_p6)
}
  0x4e   :  { %s10235_s2 = scalar_lea.vmem %s133_s30, 8192  ;;  %p10240_p8 = scmp.lt.s32.totalorder %s133_s30, %s133_s30 }
  0x4f   :  { %p10236_p7 = scmp.ne.s32.totalorder %s133_s30, %s10235_s2  ;;  %p10241_p9 = scmp.lt.s32.totalorder %s10235_s2, %s10235_s2 }
  0x51   :  { %p10242_p10 = por %p10241_p9, %p10240_p8 }
  0x53   :  { %p10243_p11 = pnand %p10242_p10, %p10236_p7 }
  0x55   :  { %10246 = shalt.err (!%p10243_p11)
}
  0x56   :  { %s10430_s8 = smov 64   ;;  %s10431_s27 = smov 4  }
  0x57   :  { %138 = dma.hbm_to_vmem [thread:$0]  %s12885_s11, 8192, %s133_s30, [#allocation21], %s10430_s8, %s10430_s8, %s10431_s27  }
  0x58   :  { %s10432_s17 = smov [#allocation5]   ;;  %s10433_s19 = smov [#allocation10]  }
  0x59   :  { %s32_s18 = sshll.u32 %s10432_s17, 4  ;;  %s54_s6 = sshll.u32 %s10433_s19, 4  ;;  %s33_s18 = int_to_ptr.vmem [resolvable:$true] %s32_s18  ;;  %s55_s6 = int_to_ptr.vmem [resolvable:$true] %s54_s6 }
  0x5a   :  { %s10247_s23 = scalar_lea.hbm %s12875_s1, 384 }
  0x5b   :  { %p10248_p12 = scmp.ne.s32.totalorder %s12875_s1, %s10247_s23  ;;  %p10251_p13 = scmp.lt.u32.totalorder %s10247_s23, %s12875_s1 }
  0x5d   :  { %p10253_p0 = pnand %p10251_p13, %p10248_p12 }
  0x5f   :  { %10256 = shalt.err (!%p10253_p0)
}
  0x60   :  { %s10257_s11 = scalar_lea.vmem %s33_s18, 384  ;;  %p10262_p2 = scmp.lt.s32.totalorder %s33_s18, %s33_s18 }
  0x61   :  { %p10258_p1 = scmp.ne.s32.totalorder %s33_s18, %s10257_s11  ;;  %p10263_p3 = scmp.lt.s32.totalorder %s10257_s11, %s10257_s11 }
  0x63   :  { %p10264_p4 = por %p10263_p3, %p10262_p2 }
  0x65   :  { %p10265_p5 = pnand %p10264_p4, %p10258_p1 }
  0x67   :  { %10268 = shalt.err (!%p10265_p5)
}
  0x68   :  { %38 = dma.hbm_to_vmem [thread:$0]  %s12875_s1, 384, %s33_s18, [#allocation6], %s10428_s16, %s10428_s16, %s10429_s20  }
  0x69   :  { %s10269_s26 = scalar_lea.hbm %s12877_s3, 6144 }
  0x6a   :  { %p10270_p6 = scmp.ne.s32.totalorder %s12877_s3, %s10269_s26  ;;  %p10273_p7 = scmp.lt.u32.totalorder %s10269_s26, %s12877_s3 }
  0x6c   :  { %p10275_p8 = pnand %p10273_p7, %p10270_p6 }
  0x6e   :  { %10278 = shalt.err (!%p10275_p8)
}
  0x6f   :  { %s10279_s22 = scalar_lea.vmem %s55_s6, 6144  ;;  %p10284_p10 = scmp.lt.s32.totalorder %s55_s6, %s55_s6 }
  0x70   :  { %p10280_p9 = scmp.ne.s32.totalorder %s55_s6, %s10279_s22  ;;  %p10285_p11 = scmp.lt.s32.totalorder %s10279_s22, %s10279_s22 }
  0x72   :  { %p10286_p12 = por %p10285_p11, %p10284_p10 }
  0x74   :  { %p10287_p13 = pnand %p10286_p12, %p10280_p9 }
  0x76   :  { %10290 = shalt.err (!%p10287_p13)
}
  0x77   :  { %60 = dma.hbm_to_vmem [thread:$0]  %s12877_s3, 6144, %s55_s6, [#allocation9], %s10428_s16, %s10428_s16, %s10429_s20  }
  0x78   :  { %s10434_s23 = smov [#allocation13]   ;;  %s10435_s4 = smov [#allocation16]  }
  0x79   :  { %s76_s24 = sshll.u32 %s10434_s23, 4  ;;  %s98_s28 = sshll.u32 %s10435_s4, 4  ;;  %s77_s24 = int_to_ptr.vmem [resolvable:$true] %s76_s24  ;;  %s99_s28 = int_to_ptr.vmem [resolvable:$true] %s98_s28 }
  0x7a   :  { %s10291_s30 = scalar_lea.hbm %s12879_s5, 6144 }
  0x7b   :  { %p10292_p0 = scmp.ne.s32.totalorder %s12879_s5, %s10291_s30  ;;  %p10295_p1 = scmp.lt.u32.totalorder %s10291_s30, %s12879_s5 }
  0x7d   :  { %p10297_p2 = pnand %p10295_p1, %p10292_p0 }
  0x7f   :  { %10300 = shalt.err (!%p10297_p2)
}
  0x80   :  { %s10301_s3 = scalar_lea.vmem %s77_s24, 6144  ;;  %p10306_p4 = scmp.lt.s32.totalorder %s77_s24, %s77_s24 }
  0x81   :  { %p10302_p3 = scmp.ne.s32.totalorder %s77_s24, %s10301_s3  ;;  %p10307_p5 = scmp.lt.s32.totalorder %s10301_s3, %s10301_s3 }
  0x83   :  { %p10308_p6 = por %p10307_p5, %p10306_p4 }
  0x85   :  { %p10309_p7 = pnand %p10308_p6, %p10302_p3 }
  0x87   :  { %10312 = shalt.err (!%p10309_p7)
}
  0x88   :  { %82 = dma.hbm_to_vmem [thread:$0]  %s12879_s5, 6144, %s77_s24, [#allocation12], %s10428_s16, %s10428_s16, %s10429_s20  }
  0x89   :  { %s10313_s21 = scalar_lea.hbm %s12881_s7, 2048 }
  0x8a   :  { %p10314_p8 = scmp.ne.s32.totalorder %s12881_s7, %s10313_s21  ;;  %p10317_p9 = scmp.lt.u32.totalorder %s10313_s21, %s12881_s7 }
  0x8c   :  { %p10319_p10 = pnand %p10317_p9, %p10314_p8 }
  0x8e   :  { %10322 = shalt.err (!%p10319_p10)
}
  0x8f   :  { %s10323_s4 = scalar_lea.vmem %s99_s28, 2048  ;;  %p10328_p12 = scmp.lt.s32.totalorder %s99_s28, %s99_s28 }
  0x90   :  { %p10324_p11 = scmp.ne.s32.totalorder %s99_s28, %s10323_s4  ;;  %p10329_p13 = scmp.lt.s32.totalorder %s10323_s4, %s10323_s4 }
  0x92   :  { %p10330_p0 = por %p10329_p13, %p10328_p12 }
  0x94   :  { %p10331_p1 = pnand %p10330_p0, %p10324_p11 }
  0x96   :  { %10334 = shalt.err (!%p10331_p1)
}
  0x97   :  { %104 = dma.hbm_to_vmem [thread:$0]  %s12881_s7, 2048, %s99_s28, [#allocation15], %s10428_s16, %s10428_s16, %s10429_s20  }
  0x98   :  { %s10436_s25 = smov [#allocation19]   ;;  %s10437_s30 = smov [#allocation22]  }
  0x99   :  { %s123_s11 = sshll.u32 %s10436_s25, 4  ;;  %s145_s29 = sshll.u32 %s10437_s30, 4  ;;  %s124_s11 = int_to_ptr.vmem [resolvable:$true] %s123_s11  ;;  %s146_s29 = int_to_ptr.vmem [resolvable:$true] %s145_s29 }
  0x9a   :  { %s10335_s26 = scalar_lea.hbm %s12884_s10, 128 }
  0x9b   :  { %p10336_p2 = scmp.ne.s32.totalorder %s12884_s10, %s10335_s26  ;;  %p10339_p3 = scmp.lt.u32.totalorder %s10335_s26, %s12884_s10 }
  0x9d   :  { %p10341_p4 = pnand %p10339_p3, %p10336_p2 }
  0x9f   :  { %10344 = shalt.err (!%p10341_p4)
}
  0xa0   :  { %s10345_s7 = scalar_lea.vmem %s124_s11, 128  ;;  %p10350_p6 = scmp.lt.s32.totalorder %s124_s11, %s124_s11 }
  0xa1   :  { %p10346_p5 = scmp.ne.s32.totalorder %s124_s11, %s10345_s7  ;;  %p10351_p7 = scmp.lt.s32.totalorder %s10345_s7, %s10345_s7 }
  0xa3   :  { %p10352_p8 = por %p10351_p7, %p10350_p6 }
  0xa5   :  { %p10353_p9 = pnand %p10352_p8, %p10346_p5 }
  0xa7   :  { %10356 = shalt.err (!%p10353_p9)
}
  0xa8   :  { %126 = dma.hbm_to_vmem [thread:$0]  %s12884_s10, 128, %s124_s11, [#allocation18]  }
  0xa9   :  { %s10357_s22 = scalar_lea.hbm %s12886_s12, 16 }
  0xaa   :  { %p10358_p10 = scmp.ne.s32.totalorder %s12886_s12, %s10357_s22  ;;  %p10361_p11 = scmp.lt.u32.totalorder %s10357_s22, %s12886_s12 }
  0xac   :  { %p10363_p12 = pnand %p10361_p11, %p10358_p10 }
  0xae   :  { %10366 = shalt.err (!%p10363_p12)
}
  0xaf   :  { %s10367_s5 = scalar_lea.vmem %s146_s29, 16  ;;  %s10371_s24 = scalar_lea.vmem %s146_s29, 32 }
  0xb0   :  { %p10368_p13 = scmp.ne.s32.totalorder %s146_s29, %s10367_s5  ;;  %p10372_p0 = scmp.lt.s32.totalorder %s146_s29, %s146_s29 }
  0xb1   :  { %p10373_p1 = scmp.lt.s32.totalorder %s10371_s24, %s10367_s5 }
  0xb3   :  { %p10374_p2 = por %p10373_p1, %p10372_p0 }
  0xb5   :  { %p10375_p3 = pnand %p10374_p2, %p10368_p13 }
  0xb7   :  { %10378 = shalt.err (!%p10375_p3)
}
  0xb8   :  { %148 = dma.hbm_to_vmem [thread:$0]  %s12886_s12, 16, %s146_s29, [#allocation21]  }
  0xb9   :  { %10401 = dma.done.wait [#allocation6], 384  }
  0xba   :  { %10402 = vsyncadd [#allocation6], 4294966912 }
  0xbb   :  { %10403 = dma.done.wait [#allocation9], 6176  }
  0xbc   :  { %10404 = vsyncadd [#allocation9], 4294961120 }
  0xbd   :  { %10405 = dma.done.wait [#allocation12], 6176  }
  0xbe   :  { %10406 = vsyncadd [#allocation12], 4294961120 }
  0xbf   :  { %10407 = dma.done.wait [#allocation15], 2080  }
  0xc0   :  { %10408 = vsyncadd [#allocation15], 4294965216 }
  0xc1   :  { %10409 = dma.done.wait [#allocation18], 2176  }
  0xc2   :  { %10410 = vsyncadd [#allocation18], 4294965120 }
  0xc3   :  { %10411 = dma.done.wait [#allocation21], 8208  }
  0xc4   :  { %10412 = vsyncadd [#allocation21], 4294959088  ;;  %s187_s11 = sld [smem:[#allocation0]]   ;;  %s10438_s30 = smov 256   ;;  %v12892_v0 = vmov 0   ;;  %v361_v1 = vlaneseq  ;;  %vm1125_vm0 = vcmask 1043456  }
  0xc5   :  { %199 = sst [smem:[#allocation25]] %s10438_s30  ;;  %1164 = vmatprep.mubr.bf16.mxu0 %v12892_v0  ;;  %s10440_s12 = smov 2   ;;  %vm1076_vm3 = vcmask 64512   ;;  %vm2869_vm8 = vcmask 261120   ;;  %vm2886_vm9 = vcmask 523264   ;;  %vm2903_vm10 = vcmask 785408  }
  0xc6   :  { %201 = sst [smem:[#allocation25 + $0x1]] %s10438_s30  ;;  %s10441_s29 = smov [#allocation3]   ;;  %v10733_v2 = vshrl.u32 %v361_v1, 7  ;;  %vm10455_vm12 = vmmov 1  }
  0xc7   :  { %203 = sst [smem:[#allocation25 + $0x2]] %s10440_s12  ;;  %s195_s14 = sshll.u32 %s10441_s29, 4  ;;  %s196_s14 = int_to_ptr.vmem [resolvable:$true] %s195_s14 }
  0xc8   :  { %205 = sst [smem:[#allocation25 + $0x3]] %s10430_s8  ;;  %s10442_s3 = smov [#allocation4]   ;;  %vm842_vm1 = vcmp.lt.s32.totalorder %v10733_v2, 1  ;;  %vm971_vm2 = vcmp.lt.s32.totalorder %v10733_v2, 7  ;;  %v398_v27 = vand.u32 127, %v10733_v2 }
  0xc9   :  { %207 = sst [smem:[#allocation25 + $0x4]] %s10428_s16  ;;  %s10443_s6 = smov [#allocation24]  }
  0xca   :  { %209 = sst [smem:[#allocation25 + $0x5]] %s10440_s12  ;;  %s8826_s2 = sshll.u32 %s187_s11, 26  ;;  %vm778_vm4 = vcmp.eq.s32.totalorder %v398_v27, 0 }
  0xcb   :  { %211 = sst [smem:[#allocation25 + $0x6]] %s10428_s16  ;;  %s10686_s26 = sadd.s32 134217728, %s8826_s2 }
  0xcc   :  { %213 = sst [smem:[#allocation25 + $0x7]] %s10430_s8  ;;  %s10444_s7 = smov [#allocation3 + $0x800]  }
  0xcd   :  { %215 = sst [smem:[#allocation25 + $0x8]] %s10431_s27  ;;  %s232_s20 = sshll.u32 %s10444_s7, 4  ;;  %s233_s20 = int_to_ptr.vmem [resolvable:$true] %s232_s20 }
  0xce   :  { %217 = dma.general %s12883_s9, 32768, %s196_s14, %s10442_s3, %s10443_s6, [#allocation25], %s10686_s26, 0  }
  0xcf   :  { %236 = sst [smem:[#allocation27]] %s10438_s30  ;;  %s218_s21 = scalar_lea.hbm %s12883_s9, 32768 }
  0xd0   :  { %238 = sst [smem:[#allocation27 + $0x1]] %s10438_s30  ;;  %s10445_s22 = smov [#allocation4 + $0x1]  }
  0xd1   :  { %240 = sst [smem:[#allocation27 + $0x2]] %s10440_s12  ;;  %s10446_s1 = smov [#allocation26]  }
  0xd2   :  { %242 = sst [smem:[#allocation27 + $0x3]] %s10430_s8  ;;  %s10447_s18 = smov [#allocation3 + $0x1000]  }
  0xd3   :  { %244 = sst [smem:[#allocation27 + $0x4]] %s10428_s16  ;;  %s269_s23 = sshll.u32 %s10447_s18, 4  ;;  %s270_s23 = int_to_ptr.vmem [resolvable:$true] %s269_s23 }
  0xd4   :  { %246 = sst [smem:[#allocation27 + $0x5]] %s10440_s12  ;;  %s255_s24 = scalar_lea.hbm %s12883_s9, 65536 }
  0xd5   :  { %248 = sst [smem:[#allocation27 + $0x6]] %s10428_s16  ;;  %s10448_s10 = smov [#allocation4 + $0x2]  }
  0xd6   :  { %250 = sst [smem:[#allocation27 + $0x7]] %s10430_s8  ;;  %s10449_s25 = smov [#allocation28]  }
  0xd7   :  { %252 = sst [smem:[#allocation27 + $0x8]] %s10431_s27  ;;  %s10450_s11 = smov [#allocation3 + $0x1800]  }
  0xd8   :  { %254 = dma.general %s218_s21, 32768, %s233_s20, %s10445_s22, %s10446_s1, [#allocation27], %s10686_s26, 0  }
  0xd9   :  { %273 = sst [smem:[#allocation29]] %s10438_s30  ;;  %s306_s29 = sshll.u32 %s10450_s11, 4  ;;  %s307_s29 = int_to_ptr.vmem [resolvable:$true] %s306_s29 }
  0xda   :  { %275 = sst [smem:[#allocation29 + $0x1]] %s10438_s30  ;;  %s292_s3 = scalar_lea.hbm %s12883_s9, 98304 }
  0xdb   :  { %277 = sst [smem:[#allocation29 + $0x2]] %s10440_s12  ;;  %s10452_s6 = smov [#allocation30]  }
  0xdc   :  { %279 = sst [smem:[#allocation29 + $0x3]] %s10430_s8  ;;  %s10454_s20 = smov 32  }
  0xdd   :  { %281 = sst [smem:[#allocation29 + $0x4]] %s10428_s16 }
  0xde   :  { %283 = sst [smem:[#allocation29 + $0x5]] %s10440_s12 }
  0xdf   :  { %285 = sst [smem:[#allocation29 + $0x6]] %s10428_s16 }
  0xe0   :  { %287 = sst [smem:[#allocation29 + $0x7]] %s10430_s8 }
  0xe1   :  { %289 = sst [smem:[#allocation29 + $0x8]] %s10431_s27 }
  0xe2   :  { %291 = dma.general %s255_s24, 32768, %s270_s23, %s10448_s10, %s10449_s25, [#allocation29], %s10686_s26, 0  }
  0xe3   :  { %310 = sst [smem:[#allocation31]] %s10438_s30 }
  0xe4   :  { %312 = sst [smem:[#allocation31 + $0x1]] %s10438_s30  ;;  %s10451_s30 = smov [#allocation4 + $0x3]  }
  0xe5   :  { %314 = sst [smem:[#allocation31 + $0x2]] %s10440_s12 }
  0xe6   :  { %316 = sst [smem:[#allocation31 + $0x3]] %s10430_s8 }
  0xe7   :  { %318 = sst [smem:[#allocation31 + $0x4]] %s10428_s16 }
  0xe8   :  { %320 = sst [smem:[#allocation31 + $0x5]] %s10440_s12 }
  0xe9   :  { %322 = sst [smem:[#allocation31 + $0x6]] %s10428_s16 }
  0xea   :  { %324 = sst [smem:[#allocation31 + $0x7]] %s10430_s8 }
  0xeb   :  { %326 = sst [smem:[#allocation31 + $0x8]] %s10431_s27 }
  0xec   :  { %328 = dma.general %s292_s3, 32768, %s307_s29, %s10451_s30, %s10452_s6, [#allocation31], %s10686_s26, 0  }
  0xed   :  { %v1070_v3 = vld [vmem:[#allocation5 + $0x8] sm:$0xff]  ;;  %v10738_v4 = vld [vmem:[%s12874_s0] sm:$0xff]  ;;  %v10743_v5 = vld [vmem:[%s12874_s0 + $0x8] sm:$0xff] }
  0xee   :  { %v8835_v6 = vcombine.high %v1070_v3, %v1070_v3  ;;  %v8834_v7 = vcombine.low %v1070_v3, %v1070_v3  ;;  %v810_v8 = vrot.slane %v10738_v4, 7  ;;  %v811_v9 = vrot.slane %v10743_v5, 7  ;;  %v10753_v11 = vld [vmem:[%s12874_s0 + $0x10] sm:$0xff]  ;;  %v10775_v17 = vld [vmem:[%s12874_s0 + $0x18] sm:$0xff]  ;;  %v10782_v21 = vld [vmem:[%s12874_s0 + $0x20] sm:$0xff] }
  0xef   :  { %v12889_v10 = vrot.slane %v10743_v5, 1  ;;  %v1053_v14 = vpack.c.bf16 %v10743_v5, %v10738_v4  ;;  %v12888_v15 = vrot.slane %v10753_v11, 1  ;;  %v1052_v18 = vld [vmem:[#allocation5] sm:$0xff]  ;;  %v1054_v19 = vpack.c.bf16 %v10775_v17, %v10753_v11  ;;  %v10787_v22 = vld [vmem:[%s12874_s0 + $0x28] sm:$0xff]  ;;  %v10801_v26 = vld [vmem:[%s12874_s0 + $0x38] sm:$0xff] }
  0xf0   :  { %8836 = vmatprep.subr.msk.bf16.mxu0 %vm1125_vm0, %v8835_v6  ;;  %v1127_v12 = vsel %vm1125_vm0, %v8834_v7, 0  ;;  %v873_v13 = vsel %vm842_vm1, %v810_v8, %v811_v9  ;;  %v8854_v20 = vcombine.high %v1052_v18, %v1052_v18  ;;  %v8853_v23 = vcombine.low %v1052_v18, %v1052_v18  ;;  %v10796_v25 = vld [vmem:[%s12874_s0 + $0x30] sm:$0xff]  ;;  %v10811_v31 = vld [vmem:[%s12874_s0 + $0xf8] sm:$0xff]  ;;  %v10843_v42 = vld [vmem:[%s12874_s0 + $0x40] sm:$0xff] }
  0xf1   :  { %1133 = vmatpush1.bf16.msra.mxu0 %v1127_v12  ;;  %v10768_v16 = vsel %vm971_vm2, %v12889_v10, %v12888_v15  ;;  %v812_v28 = vrot.slane %v10753_v11, 7  ;;  %v813_v29 = vrot.slane %v10775_v17, 7  ;;  %v1055_v30 = vpack.c.bf16 %v10787_v22, %v10782_v21  ;;  %v10848_v43 = vld [vmem:[%s12874_s0 + $0x48] sm:$0xff]  ;;  %v10883_v56 = vld [vmem:[%s12874_s0 + $0x50] sm:$0xff]  ;;  %v10888_v57 = vld [vmem:[%s12874_s0 + $0x58] sm:$0xff] }
  0xf2   :  { %8855 = vmatprep.subr.msk.bf16.mxu0 %vm1125_vm0, %v8854_v20  ;;  %v1379_v24 = vsel %vm1125_vm0, %v8853_v23, 0  ;;  %v814_v32 = vrot.slane %v10782_v21, 7  ;;  %v815_v33 = vrot.slane %v10787_v22, 7  ;;  %v816_v34 = vrot.slane %v10796_v25, 7  ;;  %v10899_v62 = vld [vmem:[%s12874_s0 + $0x60] sm:$0xff]  ;;  %v10904_v63 = vld [vmem:[%s12874_s0 + $0x68] sm:$0xff] }
  0xf3   :  { %v817_v35 = vrot.slane %v10801_v26, 7  ;;  %v12890_v36 = vrot.slane %v10811_v31, 7  ;;  %v10821_v37 = vsel %vm842_vm1, %v812_v28, %v813_v29  ;;  %v10830_v39 = vsel %vm842_vm1, %v811_v9, %v812_v28  ;;  %v10940_v18 = vld [vmem:[%s12874_s0 + $0x78] sm:$0xff]  ;;  %v11076_v58 = vld [vmem:[%s12874_s0 + $0xc8] sm:$0xff] }
  0xf4   :  { %8837 = vmatmul.mubr.msk.bf16.vlgmr.msra.gmra.mrb[0].mxu0 %vm1076_vm3, %v1053_v14  ;;  %v10834_v40 = vsel %vm842_vm1, %v814_v32, %v815_v33  ;;  %v10838_v41 = vsel %vm842_vm1, %v813_v29, %v814_v32  ;;  %v10862_v49 = vsel %vm842_vm1, %v815_v33, %v816_v34  ;;  %v1056_v50 = vpack.c.bf16 %v10801_v26, %v10796_v25  ;;  %v10935_v14 = vld [vmem:[%s12874_s0 + $0x70] sm:$0xff]  ;;  %v10961_v29 = vld [vmem:[%s12874_s0 + $0x80] sm:$0xff]  ;;  %v11102_v15 = vld [vmem:[%s12874_s0 + $0xd8] sm:$0xff] }
  0xf5   :  { %1174 = vmatprep.mubr.bf16.mxu0 %v12892_v0  ;;  %1385 = vmatpush1.bf16.msra.mxu0 %v1379_v24  ;;  %v874_v38 = vsel %vm842_vm1, %v12890_v36, %v810_v8  ;;  %v10856_v47 = vsel %vm842_vm1, %v816_v34, %v817_v35  ;;  %v818_v52 = vrot.slane %v10843_v42, 7  ;;  %v819_v53 = vrot.slane %v10848_v43, 7  ;;  %12908 = vst [vmem:[#allocation46_spill] sm:$0xff] %v11102_v15 }
  0xf6   :  { %v875_v44 = vsel %vm778_vm4, 0.0, %v874_v38  ;;  %v1057_v59 = vpack.c.bf16 %v10848_v43, %v10843_v42  ;;  %v820_v60 = vrot.slane %v10883_v56, 7  ;;  %v821_v61 = vrot.slane %v10888_v57, 7 }
  0xf7   :  { %v10858_v48 = vpack.c.bf16 %v873_v13, %v875_v44  ;;  %v10874_v54 = vsel %vm842_vm1, %v818_v52, %v819_v53  ;;  %v10878_v55 = vsel %vm842_vm1, %v817_v35, %v818_v52  ;;  %v822_v1 = vrot.slane %v10899_v62, 7 }
  0xf8   :  { %v823_v3 = vrot.slane %v10904_v63, 7  ;;  %v10912_v6 = vsel %vm842_vm1, %v820_v60, %v821_v61  ;;  %v10916_v7 = vsel %vm842_vm1, %v819_v53, %v820_v60  ;;  %v1058_v9 = vpack.c.bf16 %v10888_v57, %v10883_v56  ;;  %v10991_v60 = vld [vmem:[%s12874_s0 + $0x98] sm:$0xff] }
  0xf9   :  { %v10930_v13 = vsel %vm842_vm1, %v821_v61, %v822_v1  ;;  %v1059_v20 = vpack.c.bf16 %v10904_v63, %v10899_v62  ;;  %v824_v23 = vrot.slane %v10935_v14, 7  ;;  %v825_v24 = vrot.slane %v10940_v18, 7 }
  0xfa   :  { %v10926_v12 = vsel %vm842_vm1, %v822_v1, %v823_v3  ;;  %v1060_v33 = vpack.c.bf16 %v10940_v18, %v10935_v14  ;;  %v826_v34 = vrot.slane %v10961_v29, 7  ;;  %v378_v38 = vadd.s32 128, %v10733_v2 }
  0xfb   :  { %v10952_v27 = vsel %vm842_vm1, %v824_v23, %v825_v24  ;;  %v10956_v28 = vsel %vm842_vm1, %v823_v3, %v824_v23  ;;  %v829_v1 = vrot.slane %v10991_v60, 7 }
  0xfc   :  { %8838 = vmatmul.mubr.msk.bf16.gmra.mrb[4].mxu0 %vm1076_vm3, %v1054_v19  ;;  %v510_v52 = vand.u32 127, %v378_v38 }
  0xfd   :  { %1184 = vmatprep.mubr.bf16.mxu0 %v12892_v0 }
  0xfe   :  { %vm794_vm5 = vcmp.eq.s32.totalorder %v510_v52, 0 }
 0x104   :  { %8839 = vmatmul.mubr.msk.bf16.gmra.mrb[8].mxu0 %vm1076_vm3, %v1055_v30  ;;  %v10966_v30 = vld [vmem:[%s12874_s0 + $0x88] sm:$0xff] }
 0x105   :  { %1194 = vmatprep.mubr.bf16.mxu0 %v12892_v0  ;;  %v827_v35 = vrot.slane %v10966_v30, 7  ;;  %v1061_v53 = vpack.c.bf16 %v10966_v30, %v10961_v29 }
 0x107   :  { %v857_v44 = vsel %vm842_vm1, %v826_v34, %v827_v35 }
 0x10c   :  { %8840 = vmatmul.mubr.msk.bf16.gmra.mrb[12].mxu0 %vm1076_vm3, %v1056_v50  ;;  %v858_v50 = vsel %vm842_vm1, %v825_v24, %v826_v34  ;;  %v11050_v34 = vld [vmem:[%s12874_s0 + $0xb8] sm:$0xff] }
 0x10d   :  { %1204 = vmatprep.mubr.bf16.mxu0 %v12892_v0  ;;  %v891_v3 = vsel %vm794_vm5, 0.0, %v858_v50  ;;  %v11024_v50 = vld [vmem:[%s12874_s0 + $0xa8] sm:$0xff] }
 0x10e   :  { %v831_v52 = vrot.slane %v11024_v50, 7 }
 0x114   :  { %8841 = vmatmul.mubr.msk.bf16.gmra.mrb[16].mxu0 %vm1076_vm3, %v1057_v59  ;;  %v10986_v59 = vld [vmem:[%s12874_s0 + $0x90] sm:$0xff] }
 0x115   :  { %1214 = vmatprep.mubr.bf16.mxu0 %v12892_v0  ;;  %v828_v61 = vrot.slane %v10986_v59, 7  ;;  %v1062_v38 = vpack.c.bf16 %v10991_v60, %v10986_v59 }
 0x117   :  { %v11005_v24 = vsel %vm842_vm1, %v828_v61, %v829_v1 }
 0x11c   :  { %8842 = vmatmul.mubr.msk.bf16.gmra.mrb[20].mxu0 %vm1076_vm3, %v1058_v9  ;;  %v10995_v9 = vpack.c.bf16 %v857_v44, %v891_v3  ;;  %v11019_v44 = vld [vmem:[%s12874_s0 + $0xa0] sm:$0xff] }
 0x11d   :  { %1224 = vmatprep.mubr.bf16.mxu0 %v12892_v0 }
 0x124   :  { %8843 = vmatmul.mubr.msk.bf16.gmra.mrb[24].mxu0 %vm1076_vm3, %v1059_v20  ;;  %v10998_v20 = vld [vmem:[#allocation5 + $0x10] sm:$0xff] }
 0x125   :  { %1234 = vmatprep.mubr.bf16.mxu0 %v12892_v0  ;;  %v8873_v23 = vcombine.high %v10998_v20, %v10998_v20 }
 0x127   :  { %8874 = vmatprep.subr.msk.bf16.mxu0 %vm1125_vm0, %v8873_v23  ;;  %v1063_v23 = vpack.c.bf16 %v11024_v50, %v11019_v44 }
 0x12c   :  { %8844 = vmatmul.mubr.msk.bf16.gmra.mrb[28].mxu0 %vm1076_vm3, %v1060_v33  ;;  %v11009_v33 = vsel %vm842_vm1, %v827_v35, %v828_v61  ;;  %v830_v35 = vrot.slane %v11019_v44, 7 }
 0x12d   :  { %1244 = vmatprep.mubr.bf16.mxu0 %v12892_v0 }
 0x12e   :  { %v11036_v61 = vsel %vm842_vm1, %v829_v1, %v830_v35  ;;  %v833_v1 = vrot.slane %v11050_v34, 7 }
 0x134   :  { %8845 = vmatmul.mubr.msk.bf16.gmra.mrb[32].mxu0 %vm1076_vm3, %v1061_v53  ;;  %v11032_v53 = vsel %vm842_vm1, %v830_v35, %v831_v52 }
 0x135   :  { %1254 = vmatprep.mubr.bf16.mxu0 %v12892_v0 }
 0x13c   :  { %8846 = vmatmul.mubr.msk.bf16.gmra.mrb[36].mxu0 %vm1076_vm3, %v1062_v38  ;;  %v11045_v38 = vld [vmem:[%s12874_s0 + $0xb0] sm:$0xff] }
 0x13d   :  { %1264 = vmatprep.mubr.bf16.mxu0 %v12892_v0  ;;  %v832_v32 = vrot.slane %v11045_v38, 7  ;;  %v1064_v8 = vpack.c.bf16 %v11050_v34, %v11045_v38 }
 0x13f   :  { %v11058_v35 = vsel %vm842_vm1, %v832_v32, %v833_v1  ;;  %v11062_v3 = vsel %vm842_vm1, %v831_v52, %v832_v32  ;;  %v835_v32 = vrot.slane %v11076_v58, 7 }
 0x140   :  { %12905 = vst [vmem:[#allocation43_spill] sm:$0xff] %v11062_v3 }
 0x144   :  { %8847 = vmatmul.mubr.msk.bf16.gmra.mrb[40].mxu0 %vm1076_vm3, %v1063_v23  ;;  %v11071_v23 = vld [vmem:[%s12874_s0 + $0xc0] sm:$0xff] }
 0x145   :  { %1274 = vmatprep.mubr.bf16.mxu0 %v12892_v0  ;;  %v834_v51 = vrot.slane %v11071_v23, 7  ;;  %v1065_v45 = vpack.c.bf16 %v11076_v58, %v11071_v23 }
 0x147   :  { %v11084_v52 = vsel %vm842_vm1, %v834_v51, %v835_v32  ;;  %v11088_v19 = vsel %vm842_vm1, %v833_v1, %v834_v51  ;;  %v837_v51 = vrot.slane %v11102_v15, 7 }
 0x148   :  { %12906 = vst [vmem:[#allocation44_spill] sm:$0xff] %v11084_v52  ;;  %12907 = vst [vmem:[#allocation45_spill] sm:$0xff] %v11088_v19 }
 0x14c   :  { %8848 = vmatmul.mubr.msk.bf16.gmra.mrb[44].mxu0 %vm1076_vm3, %v1064_v8  ;;  %v11097_v8 = vld [vmem:[%s12874_s0 + $0xd0] sm:$0xff] }
 0x14d   :  { %1284 = vmatprep.mubr.bf16.mxu0 %v12892_v0  ;;  %v836_v10 = vrot.slane %v11097_v8, 7  ;;  %v1066_v19 = vpack.c.bf16 %v11102_v15, %v11097_v8 }
 0x14f   :  { %v11110_v1 = vsel %vm842_vm1, %v836_v10, %v837_v51  ;;  %v11114_v46 = vsel %vm842_vm1, %v835_v32, %v836_v10  ;;  %v12912_v32 = vmov 0  }
 0x150   :  { %12909 = vst [vmem:[#allocation47_spill] sm:$0xff] %v11110_v1  ;;  %12910 = vst [vmem:[#allocation48_spill] sm:$0xff] %v11114_v46 }
 0x154   :  { %8849 = vmatmul.mubr.msk.bf16.gmra.mrb[48].mxu0 %vm1076_vm3, %v1065_v45  ;;  %v11123_v45 = vld [vmem:[%s12874_s0 + $0xe0] sm:$0xff] }
 0x155   :  { %1294 = vmatprep.mubr.bf16.mxu0 %v12892_v0  ;;  %v11128_v0 = vld [vmem:[%s12874_s0 + $0xe8] sm:$0xff]  ;;  %v838_v52 = vrot.slane %v11123_v45, 7 }
 0x156   :  { %12911 = vst [vmem:[#allocation49_spill] sm:$0xff] %v11128_v0  ;;  %v839_v10 = vrot.slane %v11128_v0, 7  ;;  %v1067_v15 = vpack.c.bf16 %v11128_v0, %v11123_v45  ;;  %v12917_v0 = vrot.slane %v10743_v5, 1  ;;  %v943_v5 = vrot.slane %v10782_v21, 1 }
 0x157   :  { %v11140_v46 = vsel %vm842_vm1, %v837_v51, %v838_v52  ;;  %v944_v21 = vrot.slane %v10787_v22, 1 }
 0x158   :  { %v11136_v36 = vsel %vm842_vm1, %v838_v52, %v839_v10  ;;  %12914 = vst [vmem:[#allocation51_spill] sm:$0xff] %v11140_v46  ;;  %v12915_v52 = vrot.slane %v10811_v31, 7  ;;  %v939_v46 = vrot.slane %v10738_v4, 1  ;;  %v11475_v4 = vsub.s32 0, %v10733_v2 }
 0x159   :  { %12913 = vst [vmem:[#allocation50_spill] sm:$0xff] %v11136_v36  ;;  %v942_v36 = vrot.slane %v10775_v17, 1 }
 0x15c   :  { %8850 = vmatmul.mubr.msk.bf16.gmra.mrb[52].mxu0 %vm1076_vm3, %v1066_v19  ;;  %v11149_v19 = vld [vmem:[%s12874_s0 + $0xf0] sm:$0xff]  ;;  %s10453_s0 = smov 96  }
 0x15d   :  { %1304 = vmatprep.mubr.bf16.mxu0 %v12912_v32  ;;  %v840_v3 = vrot.slane %v11149_v19, 7 }
 0x15f   :  { %v11158_v51 = vsel %vm842_vm1, %v840_v3, %v12915_v52  ;;  %v11162_v1 = vsel %vm842_vm1, %v839_v10, %v840_v3  ;;  %v11175_v52 = vsel %vm971_vm2, %v939_v46, %v12917_v0  ;;  %v8872_v10 = vcombine.low %v10998_v20, %v10998_v20 }
 0x160   :  { %12916 = vst [vmem:[#allocation52_spill] sm:$0xff] %v11162_v1  ;;  %v1577_v3 = vpack.c.bf16 %v10768_v16, %v11175_v52  ;;  %v11191_v0 = vsel %vm971_vm2, %v942_v36, %v943_v5  ;;  %v1911_v16 = vld [vmem:[#allocation8] sm:$0x3] }
 0x161   :  { %v1649_v1 = vsel %vm1125_vm0, %v8872_v10, 0  ;;  %v947_v10 = vrot.slane %v10843_v42, 1  ;;  %v948_v42 = vrot.slane %v10848_v43, 1 }
 0x164   :  { %8851 = vmatmul.mubr.msk.bf16.gmra.mrb[56].mxu0 %vm1076_vm3, %v1067_v15  ;;  %v1068_v15 = vpack.c.bf16 %v10811_v31, %v11149_v19 }
 0x165   :  { %1314 = vmatprep.mubr.bf16.mxu0 %v12912_v32 }
 0x16c   :  { %8852 = vmatmul.mubr.msk.bf16.gmra.mrb[60].mxu0 %vm1076_vm3, %v1068_v15  ;;  %v12918_v15 = vrot.slane %v10753_v11, 1 }
 0x16d   :  { %1416 = vmatprep.mubr.bf16.mxu0 %v12912_v32 }
 0x16e   :  { %v11197_v20 = vsel %vm971_vm2, %v12918_v15, %v942_v36  ;;  %v11214_v36 = vsel %vm971_vm2, %v943_v5, %v944_v21  ;;  %v949_v15 = vrot.slane %v10883_v56, 1  ;;  %v950_v56 = vrot.slane %v10888_v57, 1 }
 0x16f   :  { %v1578_v17 = vpack.c.bf16 %v11191_v0, %v11197_v20 }
 0x174   :  { %8856 = vmatmul.mubr.msk.bf16.vlgmr.msra.gmra.mrb[0].mxu0 %vm1076_vm3, %v10858_v48  ;;  %v945_v48 = vrot.slane %v10796_v25, 1  ;;  %v946_v25 = vrot.slane %v10801_v26, 1 }
 0x175   :  { %1426 = vmatprep.mubr.bf16.mxu0 %v12912_v32  ;;  %1655 = vmatpush1.bf16.msra.mxu0 %v1649_v1  ;;  %v12919_v1 = vpack.c.bf16 %v10821_v37, %v10830_v39  ;;  %v12920_v37 = vpack.c.bf16 %v10834_v40, %v10838_v41  ;;  %v12921_v40 = vpack.c.bf16 %v10856_v47, %v10862_v49 }
 0x176   :  { %v11210_v11 = vsel %vm971_vm2, %v944_v21, %v945_v48  ;;  %v11227_v39 = vsel %vm971_vm2, %v946_v25, %v947_v10  ;;  %v11231_v5 = vsel %vm971_vm2, %v945_v48, %v946_v25  ;;  %v11244_v41 = vsel %vm971_vm2, %v948_v42, %v949_v15 }
 0x177   :  { %v1579_v22 = vpack.c.bf16 %v11210_v11, %v11214_v36  ;;  %v1580_v26 = vpack.c.bf16 %v11227_v39, %v11231_v5  ;;  %v11248_v21 = vsel %vm971_vm2, %v947_v10, %v948_v42  ;;  %v951_v48 = vrot.slane %v10899_v62, 1  ;;  %v9887_v39 = vld [vmem:[#allocation16 + $0x4] ss:$8 sps:$4 sm:$0xff]  }
 0x178   :  { %v1581_v43 = vpack.c.bf16 %v11244_v41, %v11248_v21  ;;  %v12922_v47 = vpack.c.bf16 %v10874_v54, %v10878_v55  ;;  %v952_v62 = vrot.slane %v10904_v63, 1  ;;  %v953_v25 = vrot.slane %v10935_v14, 1  ;;  %2211 = vmatprep.mubr.bf16.mxu1 %v9887_v39 }
 0x179   :  { %v11261_v49 = vsel %vm971_vm2, %v950_v56, %v951_v48  ;;  %v12923_v54 = vpack.c.bf16 %v10912_v6, %v10916_v7  ;;  %v954_v14 = vrot.slane %v10940_v18, 1  ;;  %v12924_v6 = vpack.c.bf16 %v10926_v12, %v10930_v13 }
 0x17a   :  { %v11278_v55 = vsel %vm971_vm2, %v952_v62, %v953_v25  ;;  %v11282_v10 = vsel %vm971_vm2, %v951_v48, %v952_v62  ;;  %v11293_v7 = vadd.s32 120, %v10733_v2  ;;  %v957_v12 = vrot.slane %v10986_v59, 1 }
 0x17b   :  { %v1583_v63 = vpack.c.bf16 %v11278_v55, %v11282_v10  ;;  %v958_v59 = vrot.slane %v10991_v60, 1  ;;  %v959_v62 = vrot.slane %v11019_v44, 1  ;;  %v960_v60 = vrot.slane %v11024_v50, 1 }
 0x17c   :  { %8857 = vmatmul.mubr.msk.bf16.gmra.mrb[4].mxu0 %vm1076_vm3, %v12919_v1  ;;  %v11265_v1 = vsel %vm971_vm2, %v949_v15, %v950_v56  ;;  %v988_v15 = vsel %vm971_vm2, %v953_v25, %v954_v14  ;;  %v503_v18 = vand.u32 127, %v11293_v7  ;;  %v12925_v56 = vpack.c.bf16 %v10952_v27, %v10956_v28 }
 0x17d   :  { %1436 = vmatprep.mubr.bf16.mxu0 %v12912_v32  ;;  %v1582_v57 = vpack.c.bf16 %v11261_v49, %v11265_v1  ;;  %v11327_v27 = vsel %vm971_vm2, %v958_v59, %v959_v62  ;;  %v11331_v28 = vsel %vm971_vm2, %v957_v12, %v958_v59  ;;  %v961_v44 = vrot.slane %v11045_v38, 1 }
 0x17e   :  { %vm922_vm6 = vcmp.eq.s32.totalorder %v503_v18, 127  ;;  %v1586_v25 = vpack.c.bf16 %v11327_v27, %v11331_v28  ;;  %v962_v38 = vrot.slane %v11050_v34, 1  ;;  %v965_v34 = vrot.slane %v11097_v8, 1  ;;  %v12932_v8 = vld [vmem:[#allocation45_spill] sm:$0xff] }
 0x184   :  { %8858 = vmatmul.mubr.msk.bf16.gmra.mrb[8].mxu0 %vm1076_vm3, %v12920_v37  ;;  %v955_v37 = vrot.slane %v10961_v29, 1  ;;  %v956_v29 = vrot.slane %v10966_v30, 1 }
 0x185   :  { %1446 = vmatprep.mubr.bf16.mxu0 %v12912_v32 }
 0x186   :  { %v987_v42 = vsel %vm971_vm2, %v954_v14, %v955_v37  ;;  %v11312_v48 = vsel %vm971_vm2, %v956_v29, %v957_v12  ;;  %v11348_v14 = vsel %vm971_vm2, %v959_v62, %v960_v60  ;;  %v12930_v12 = vld [vmem:[#allocation46_spill] sm:$0xff] }
 0x187   :  { %v1019_v13 = vsel %vm922_vm6, 0.0, %v987_v42 }
 0x18c   :  { %8859 = vmatmul.mubr.msk.bf16.gmra.mrb[12].mxu0 %vm1076_vm3, %v12921_v40  ;;  %v11303_v40 = vpack.c.bf16 %v1019_v13, %v988_v15  ;;  %v964_v15 = vrot.slane %v11076_v58, 1  ;;  %v966_v13 = vrot.slane %v12930_v12, 1  ;;  %v967_v58 = vrot.slane %v11123_v45, 1  ;;  %v12936_v45 = vld [vmem:[#allocation48_spill] sm:$0xff] }
 0x18d   :  { %1456 = vmatprep.mubr.bf16.mxu0 %v12912_v32 }
 0x18e   :  { %v976_v62 = vsel %vm971_vm2, %v965_v34, %v966_v13 }
 0x194   :  { %8860 = vmatmul.mubr.msk.bf16.gmra.mrb[16].mxu0 %vm1076_vm3, %v12922_v47  ;;  %v11316_v47 = vsel %vm971_vm2, %v955_v37, %v956_v29  ;;  %v963_v37 = vrot.slane %v11071_v23, 1  ;;  %v12928_v23 = vld [vmem:[#allocation43_spill] sm:$0xff] }
 0x195   :  { %1466 = vmatprep.mubr.bf16.mxu0 %v12912_v32  ;;  %v1585_v30 = vpack.c.bf16 %v11312_v48, %v11316_v47  ;;  %v12929_v18 = vpack.c.bf16 %v11058_v35, %v12928_v23  ;;  %v975_v35 = vsel %vm971_vm2, %v966_v13, %v967_v58  ;;  %v12941_v13 = vld [vmem:[#allocation52_spill] sm:$0xff] }
 0x19c   :  { %8861 = vmatmul.mubr.msk.bf16.gmra.mrb[20].mxu0 %vm1076_vm3, %v12923_v54  ;;  %v11344_v54 = vsel %vm971_vm2, %v960_v60, %v961_v44  ;;  %v1590_v60 = vpack.c.bf16 %v975_v35, %v976_v62 }
 0x19d   :  { %1476 = vmatprep.mubr.bf16.mxu0 %v12912_v32  ;;  %v1587_v50 = vpack.c.bf16 %v11344_v54, %v11348_v14  ;;  %v969_v54 = vrot.slane %v11149_v19, 1  ;;  %v12935_v14 = vld [vmem:[#allocation47_spill] sm:$0xff]  ;;  %v393_v19 = vadd.s32 248, %v10733_v2 }
 0x1a4   :  { %8862 = vmatmul.mubr.msk.bf16.gmra.mrb[24].mxu0 %vm1076_vm3, %v12924_v6  ;;  %v980_v6 = vsel %vm971_vm2, %v961_v44, %v962_v38  ;;  %v12934_v44 = vld [vmem:[#allocation49_spill] sm:$0xff] }
 0x1a5   :  { %1486 = vmatprep.mubr.bf16.mxu0 %v12912_v32 }
 0x1ac   :  { %8863 = vmatmul.mubr.msk.bf16.gmra.mrb[28].mxu0 %vm1076_vm3, %v12925_v56  ;;  %v12931_v56 = vld [vmem:[#allocation44_spill] sm:$0xff] }
 0x1ad   :  { %1496 = vmatprep.mubr.bf16.mxu0 %v12912_v32  ;;  %v12933_v59 = vpack.c.bf16 %v12931_v56, %v12932_v8 }
 0x1b4   :  { %8864 = vmatmul.mubr.msk.bf16.gmra.mrb[32].mxu0 %vm1076_vm3, %v10995_v9  ;;  %v12926_v9 = vpack.c.bf16 %v11005_v24, %v11009_v33  ;;  %v12927_v24 = vpack.c.bf16 %v11032_v53, %v11036_v61  ;;  %v979_v33 = vsel %vm971_vm2, %v962_v38, %v963_v37  ;;  %v977_v53 = vsel %vm971_vm2, %v964_v15, %v965_v34  ;;  %v12939_v34 = vld [vmem:[#allocation51_spill] sm:$0xff] }
 0x1b5   :  { %1506 = vmatprep.mubr.bf16.mxu0 %v12912_v32  ;;  %v1588_v42 = vpack.c.bf16 %v979_v33, %v980_v6  ;;  %v978_v61 = vsel %vm971_vm2, %v963_v37, %v964_v15  ;;  %v12937_v38 = vpack.c.bf16 %v12935_v14, %v12936_v45  ;;  %v970_v6 = vrot.slane %v10811_v31, 1  ;;  %v12938_v15 = vld [vmem:[#allocation50_spill] sm:$0xff] }
 0x1b6   :  { %v1589_v29 = vpack.c.bf16 %v977_v53, %v978_v61  ;;  %v12940_v23 = vpack.c.bf16 %v12938_v15, %v12939_v34  ;;  %v615_v53 = vand.u32 127, %v393_v19 }
 0x1b7   :  { %v1003_v61 = vsel %vm971_vm2, %v970_v6, %v939_v46  ;;  %v11478_v46 = vsub.s32 1, %v10733_v2 }
 0x1b8   :  { %vm938_vm7 = vcmp.eq.s32.totalorder %v615_v53, 127 }
 0x1b9   :  { %v1035_v31 = vsel %vm938_vm7, 0.0, %v1003_v61  ;;  %v11484_v52 = vrot.slane %v1911_v16, %v11478_v46 }
 0x1bc   :  { %8865 = vmatmul.mubr.msk.bf16.gmra.mrb[36].mxu0 %vm1076_vm3, %v12926_v9  ;;  %v968_v9 = vrot.slane %v12934_v44, 1 }
 0x1bd   :  { %1516 = vmatprep.mubr.bf16.mxu0 %v12912_v32 }
 0x1be   :  { %v973_v37 = vsel %vm971_vm2, %v968_v9, %v969_v54 }
 0x1c4   :  { %8866 = vmatmul.mubr.msk.bf16.gmra.mrb[40].mxu0 %vm1076_vm3, %v12927_v24  ;;  %v974_v24 = vsel %vm971_vm2, %v967_v58, %v968_v9  ;;  %v12942_v58 = vpack.c.bf16 %v11158_v51, %v12941_v13  ;;  %v11481_v51 = vrot.slane %v1911_v16, %v11475_v4 }
 0x1c5   :  { %1526 = vmatprep.mubr.bf16.mxu0 %v12912_v32  ;;  %v1591_v33 = vpack.c.bf16 %v973_v37, %v974_v24 }
 0x1cc   :  { %8867 = vmatmul.mubr.msk.bf16.gmra.mrb[44].mxu0 %vm1076_vm3, %v12929_v18  ;;  %v972_v18 = vsel %vm971_vm2, %v969_v54, %v970_v6 }
 0x1cd   :  { %1536 = vmatprep.mubr.bf16.mxu0 %v12912_v32  ;;  %v1592_v12 = vpack.c.bf16 %v1035_v31, %v972_v18 }
 0x1d4   :  { %8868 = vmatmul.mubr.msk.bf16.gmra.mrb[48].mxu0 %vm1076_vm3, %v12933_v59 }
 0x1d5   :  { %1546 = vmatprep.mubr.bf16.mxu0 %v12912_v32 }
 0x1dc   :  { %8869 = vmatmul.mubr.msk.bf16.gmra.mrb[52].mxu0 %vm1076_vm3, %v12937_v38 }
 0x1dd   :  { %1556 = vmatprep.mubr.bf16.mxu0 %v12912_v32 }
 0x1e4   :  { %8870 = vmatmul.mubr.msk.bf16.gmra.mrb[56].mxu0 %vm1076_vm3, %v12940_v23 }
 0x1e5   :  { %1566 = vmatprep.mubr.bf16.mxu0 %v12912_v32 }
 0x1ec   :  { %8871 = vmatmul.mubr.msk.bf16.gmra.mrb[60].mxu0 %vm1076_vm3, %v12942_v58 }
 0x1ed   :  { %1686 = vmatprep.mubr.bf16.mxu0 %v12912_v32 }
 0x1f4   :  { %8875 = vmatmul.mubr.msk.bf16.vlgmr.msra.gmra.mrb[0].mxu0 %vm1076_vm3, %v1577_v3 }
 0x1f5   :  { %1696 = vmatprep.mubr.bf16.mxu0 %v12912_v32 }
 0x1fc   :  { %8876 = vmatmul.mubr.msk.bf16.gmra.mrb[4].mxu0 %vm1076_vm3, %v1578_v17 }
 0x1fd   :  { %1706 = vmatprep.mubr.bf16.mxu0 %v12912_v32 }
 0x204   :  { %8877 = vmatmul.mubr.msk.bf16.gmra.mrb[8].mxu0 %vm1076_vm3, %v1579_v22 }
 0x205   :  { %1716 = vmatprep.mubr.bf16.mxu0 %v12912_v32 }
 0x20c   :  { %8878 = vmatmul.mubr.msk.bf16.gmra.mrb[12].mxu0 %vm1076_vm3, %v1580_v26 }
 0x20d   :  { %1726 = vmatprep.mubr.bf16.mxu0 %v12912_v32 }
 0x214   :  { %8879 = vmatmul.mubr.msk.bf16.gmra.mrb[16].mxu0 %vm1076_vm3, %v1581_v43 }
 0x215   :  { %1736 = vmatprep.mubr.bf16.mxu0 %v12912_v32 }
 0x21c   :  { %8880 = vmatmul.mubr.msk.bf16.gmra.mrb[20].mxu0 %vm1076_vm3, %v1582_v57 }
 0x21d   :  { %1746 = vmatprep.mubr.bf16.mxu0 %v12912_v32 }
 0x224   :  { %8881 = vmatmul.mubr.msk.bf16.gmra.mrb[24].mxu0 %vm1076_vm3, %v1583_v63 }
 0x225   :  { %1756 = vmatprep.mubr.bf16.mxu0 %v12912_v32 }
 0x22c   :  { %8882 = vmatmul.mubr.msk.bf16.gmra.mrb[28].mxu0 %vm1076_vm3, %v11303_v40 }
 0x22d   :  { %1766 = vmatprep.mubr.bf16.mxu0 %v12912_v32 }
 0x234   :  { %8883 = vmatmul.mubr.msk.bf16.gmra.mrb[32].mxu0 %vm1076_vm3, %v1585_v30 }
 0x235   :  { %1776 = vmatprep.mubr.bf16.mxu0 %v12912_v32 }
 0x23c   :  { %8884 = vmatmul.mubr.msk.bf16.gmra.mrb[36].mxu0 %vm1076_vm3, %v1586_v25 }
 0x23d   :  { %1786 = vmatprep.mubr.bf16.mxu0 %v12912_v32 }
 0x244   :  { %8885 = vmatmul.mubr.msk.bf16.gmra.mrb[40].mxu0 %vm1076_vm3, %v1587_v50 }
 0x245   :  { %1796 = vmatprep.mubr.bf16.mxu0 %v12912_v32 }
 0x24c   :  { %8886 = vmatmul.mubr.msk.bf16.gmra.mrb[44].mxu0 %vm1076_vm3, %v1588_v42 }
 0x24d   :  { %1806 = vmatprep.mubr.bf16.mxu0 %v12912_v32 }
 0x254   :  { %8887 = vmatmul.mubr.msk.bf16.gmra.mrb[48].mxu0 %vm1076_vm3, %v1589_v29 }
 0x255   :  { %1816 = vmatprep.mubr.bf16.mxu0 %v12912_v32 }
 0x25c   :  { %8888 = vmatmul.mubr.msk.bf16.gmra.mrb[52].mxu0 %vm1076_vm3, %v1590_v60 }
 0x25d   :  { %1826 = vmatprep.mubr.bf16.mxu0 %v12912_v32 }
 0x264   :  { %8889 = vmatmul.mubr.msk.bf16.gmra.mrb[56].mxu0 %vm1076_vm3, %v1591_v33 }
 0x265   :  { %1836 = vmatprep.mubr.bf16.mxu0 %v12912_v32 }
 0x26c   :  { %8890 = vmatmul.mubr.msk.bf16.gmra.mrb[60].mxu0 %vm1076_vm3, %v1592_v12 }
 0x26d   :  { %4186 = vmatprep.mubr.bf16.mxu0 %v12912_v32 }
 0x2c7   :  { %v1688_v3 = vpop.f32.mrb[0].mxu0 }
 0x2c8   :  { %v1923_v0 = vadd.f32 %v11481_v51, %v1688_v3  ;;  %v1690_v20 = vpop.f32.mrb[1].mxu0 }
 0x2c9   :  { %v1924_v17 = vadd.f32 %v11484_v52, %v1690_v20  ;;  %v1692_v11 = vpop.f32.mrb[2].mxu0 }
 0x2ca   :  { %v1925_v36 = vadd.f32 %v11481_v51, %v1692_v11  ;;  %v1694_v22 = vpop.f32.mrb[3].mxu0  ;;  %v1987_v26 = vmax.f32 %v1923_v0, 0.0 }
 0x2cb   :  { %v1926_v5 = vadd.f32 %v11484_v52, %v1694_v22  ;;  %v1988_v21 = vmax.f32 %v1924_v17, 0.0 }
 0x2cc   :  { %v1989_v41 = vmax.f32 %v1925_v36, 0.0 }
 0x2cd   :  { %v1990_v43 = vmax.f32 %v1926_v5, 0.0 }
 0x2ce   :  { %v11490_v49 = vpack.c.bf16 %v1989_v41, %v1987_v26 }
 0x2cf   :  { %v1698_v1 = vpop.f32.mrb[4].mxu0  ;;  %v11492_v57 = vpack.c.bf16 %v1990_v43, %v1988_v21 }
 0x2d0   :  { %v1927_v55 = vadd.f32 %v11481_v51, %v1698_v1  ;;  %v1700_v10 = vpop.f32.mrb[5].mxu0 }
 0x2d1   :  { %v1928_v63 = vadd.f32 %v11484_v52, %v1700_v10  ;;  %v1702_v40 = vpop.f32.mrb[6].mxu0  ;;  %2179 = vmatprep.subr.bf16.mxu1 %v11492_v57 }
 0x2d2   :  { %v1929_v48 = vadd.f32 %v11481_v51, %v1702_v40  ;;  %v1704_v47 = vpop.f32.mrb[7].mxu0  ;;  %2180 = vmatpush1.bf16.msra.mxu1 %v11490_v49  ;;  %v1991_v27 = vmax.f32 %v1927_v55, 0.0 }
 0x2d3   :  { %v1930_v30 = vadd.f32 %v11484_v52, %v1704_v47  ;;  %v1992_v25 = vmax.f32 %v1928_v63, 0.0 }
 0x2d4   :  { %v1993_v28 = vmax.f32 %v1929_v48, 0.0 }
 0x2d5   :  { %v1994_v50 = vmax.f32 %v1930_v30, 0.0 }
 0x2d6   :  { %v11500_v42 = vpack.c.bf16 %v1993_v28, %v1991_v27 }
 0x2d7   :  { %v11502_v29 = vpack.c.bf16 %v1994_v50, %v1992_v25  ;;  %v1708_v56 = vpop.f32.mrb[8].mxu0 }
 0x2d8   :  { %v1931_v8 = vadd.f32 %v11481_v51, %v1708_v56  ;;  %v1710_v59 = vpop.f32.mrb[9].mxu0 }
 0x2d9   :  { %v1932_v35 = vadd.f32 %v11484_v52, %v1710_v59  ;;  %v1712_v62 = vpop.f32.mrb[10].mxu0  ;;  %2181 = vmatprep.subr.bf16.mxu1 %v11502_v29 }
 0x2da   :  { %v1933_v60 = vadd.f32 %v11481_v51, %v1712_v62  ;;  %v1714_v44 = vpop.f32.mrb[11].mxu0  ;;  %2182 = vmatpush1.bf16.msra.mxu1 %v11500_v42  ;;  %v1995_v54 = vmax.f32 %v1931_v8, 0.0 }
 0x2db   :  { %v1934_v9 = vadd.f32 %v11484_v52, %v1714_v44  ;;  %v1996_v45 = vmax.f32 %v1932_v35, 0.0 }
 0x2dc   :  { %v1997_v14 = vmax.f32 %v1933_v60, 0.0 }
 0x2dd   :  { %v1998_v38 = vmax.f32 %v1934_v9, 0.0 }
 0x2de   :  { %v11510_v37 = vpack.c.bf16 %v1997_v14, %v1995_v54 }
 0x2df   :  { %v11512_v24 = vpack.c.bf16 %v1998_v38, %v1996_v45  ;;  %v1718_v33 = vpop.f32.mrb[12].mxu0 }
 0x2e0   :  { %v1935_v6 = vadd.f32 %v11481_v51, %v1718_v33  ;;  %v1720_v15 = vpop.f32.mrb[13].mxu0 }
 0x2e1   :  { %v1936_v34 = vadd.f32 %v11484_v52, %v1720_v15  ;;  %v1722_v23 = vpop.f32.mrb[14].mxu0  ;;  %2183 = vmatprep.subr.bf16.mxu1 %v11512_v24 }
 0x2e2   :  { %v1937_v19 = vadd.f32 %v11481_v51, %v1722_v23  ;;  %v1724_v18 = vpop.f32.mrb[15].mxu0  ;;  %2184 = vmatpush1.bf16.msra.mxu1 %v11510_v37  ;;  %v1999_v61 = vmax.f32 %v1935_v6, 0.0 }
 0x2e3   :  { %v1938_v53 = vadd.f32 %v11484_v52, %v1724_v18  ;;  %v2000_v12 = vmax.f32 %v1936_v34, 0.0 }
 0x2e4   :  { %v2001_v31 = vmax.f32 %v1937_v19, 0.0 }
 0x2e5   :  { %v2002_v13 = vmax.f32 %v1938_v53, 0.0 }
 0x2e6   :  { %v11520_v58 = vpack.c.bf16 %v2001_v31, %v1999_v61 }
 0x2e7   :  { %v11522_v16 = vpack.c.bf16 %v2002_v13, %v2000_v12  ;;  %v1728_v3 = vpop.f32.mrb[16].mxu0 }
 0x2e8   :  { %v1939_v0 = vadd.f32 %v11481_v51, %v1728_v3  ;;  %v1730_v20 = vpop.f32.mrb[17].mxu0 }
 0x2e9   :  { %v1940_v17 = vadd.f32 %v11484_v52, %v1730_v20  ;;  %v1732_v11 = vpop.f32.mrb[18].mxu0  ;;  %2185 = vmatprep.subr.bf16.mxu1 %v11522_v16 }
 0x2ea   :  { %v1941_v36 = vadd.f32 %v11481_v51, %v1732_v11  ;;  %v1734_v22 = vpop.f32.mrb[19].mxu0  ;;  %2186 = vmatpush1.bf16.msra.mxu1 %v11520_v58  ;;  %v2003_v5 = vmax.f32 %v1939_v0, 0.0 }
 0x2eb   :  { %v1942_v39 = vadd.f32 %v11484_v52, %v1734_v22  ;;  %v2004_v41 = vmax.f32 %v1940_v17, 0.0 }
 0x2ec   :  { %v2005_v26 = vmax.f32 %v1941_v36, 0.0 }
 0x2ed   :  { %v2006_v21 = vmax.f32 %v1942_v39, 0.0 }
 0x2ee   :  { %v11530_v43 = vpack.c.bf16 %v2005_v26, %v2003_v5 }
 0x2ef   :  { %v11532_v1 = vpack.c.bf16 %v2006_v21, %v2004_v41  ;;  %v1738_v55 = vpop.f32.mrb[20].mxu0 }
 0x2f0   :  { %v1943_v10 = vadd.f32 %v11481_v51, %v1738_v55  ;;  %v1740_v63 = vpop.f32.mrb[21].mxu0 }
 0x2f1   :  { %v1944_v40 = vadd.f32 %v11484_v52, %v1740_v63  ;;  %v1742_v48 = vpop.f32.mrb[22].mxu0  ;;  %2187 = vmatprep.subr.bf16.mxu1 %v11532_v1 }
 0x2f2   :  { %v1945_v47 = vadd.f32 %v11481_v51, %v1742_v48  ;;  %v1744_v30 = vpop.f32.mrb[23].mxu0  ;;  %2188 = vmatpush1.bf16.msra.mxu1 %v11530_v43  ;;  %v2007_v28 = vmax.f32 %v1943_v10, 0.0 }
 0x2f3   :  { %v1946_v27 = vadd.f32 %v11484_v52, %v1744_v30  ;;  %v2008_v50 = vmax.f32 %v1944_v40, 0.0 }
 0x2f4   :  { %v2009_v25 = vmax.f32 %v1945_v47, 0.0 }
 0x2f5   :  { %v2010_v56 = vmax.f32 %v1946_v27, 0.0 }
 0x2f6   :  { %v11540_v8 = vpack.c.bf16 %v2009_v25, %v2007_v28 }
 0x2f7   :  { %v11542_v59 = vpack.c.bf16 %v2010_v56, %v2008_v50  ;;  %v1748_v35 = vpop.f32.mrb[24].mxu0 }
 0x2f8   :  { %v1947_v62 = vadd.f32 %v11481_v51, %v1748_v35  ;;  %v1750_v60 = vpop.f32.mrb[25].mxu0 }
 0x2f9   :  { %v1948_v44 = vadd.f32 %v11484_v52, %v1750_v60  ;;  %v1752_v9 = vpop.f32.mrb[26].mxu0  ;;  %2189 = vmatprep.subr.bf16.mxu1 %v11542_v59 }
 0x2fa   :  { %v1949_v54 = vadd.f32 %v11481_v51, %v1752_v9  ;;  %v1754_v14 = vpop.f32.mrb[27].mxu0  ;;  %2190 = vmatpush1.bf16.msra.mxu1 %v11540_v8  ;;  %v2011_v38 = vmax.f32 %v1947_v62, 0.0 }
 0x2fb   :  { %v1950_v45 = vadd.f32 %v11484_v52, %v1754_v14  ;;  %v2012_v6 = vmax.f32 %v1948_v44, 0.0 }
 0x2fc   :  { %v2013_v33 = vmax.f32 %v1949_v54, 0.0 }
 0x2fd   :  { %v2014_v15 = vmax.f32 %v1950_v45, 0.0 }
 0x2fe   :  { %v11550_v34 = vpack.c.bf16 %v2013_v33, %v2011_v38 }
 0x2ff   :  { %v11552_v23 = vpack.c.bf16 %v2014_v15, %v2012_v6  ;;  %v1758_v19 = vpop.f32.mrb[28].mxu0 }
 0x300   :  { %v1951_v18 = vadd.f32 %v11481_v51, %v1758_v19  ;;  %v1760_v53 = vpop.f32.mrb[29].mxu0 }
 0x301   :  { %v1952_v61 = vadd.f32 %v11484_v52, %v1760_v53  ;;  %v1762_v31 = vpop.f32.mrb[30].mxu0  ;;  %2191 = vmatprep.subr.bf16.mxu1 %v11552_v23 }
 0x302   :  { %v1953_v12 = vadd.f32 %v11481_v51, %v1762_v31  ;;  %v1764_v13 = vpop.f32.mrb[31].mxu0  ;;  %2192 = vmatpush1.bf16.msra.mxu1 %v11550_v34  ;;  %v2015_v0 = vmax.f32 %v1951_v18, 0.0 }
 0x303   :  { %v1954_v3 = vadd.f32 %v11484_v52, %v1764_v13  ;;  %v2016_v17 = vmax.f32 %v1952_v61, 0.0 }
 0x304   :  { %v2017_v20 = vmax.f32 %v1953_v12, 0.0 }
 0x305   :  { %v2018_v11 = vmax.f32 %v1954_v3, 0.0 }
 0x306   :  { %v11560_v36 = vpack.c.bf16 %v2017_v20, %v2015_v0 }
 0x307   :  { %v11562_v22 = vpack.c.bf16 %v2018_v11, %v2016_v17  ;;  %v1768_v39 = vpop.f32.mrb[32].mxu0 }
 0x308   :  { %v1955_v5 = vadd.f32 %v11481_v51, %v1768_v39  ;;  %v1770_v26 = vpop.f32.mrb[33].mxu0 }
 0x309   :  { %v1956_v41 = vadd.f32 %v11484_v52, %v1770_v26  ;;  %v1772_v21 = vpop.f32.mrb[34].mxu0  ;;  %2193 = vmatprep.subr.bf16.mxu1 %v11562_v22 }
 0x30a   :  { %v1957_v55 = vadd.f32 %v11481_v51, %v1772_v21  ;;  %v1774_v10 = vpop.f32.mrb[35].mxu0  ;;  %2194 = vmatpush1.bf16.msra.mxu1 %v11560_v36  ;;  %v2019_v40 = vmax.f32 %v1955_v5, 0.0 }
 0x30b   :  { %v1958_v63 = vadd.f32 %v11484_v52, %v1774_v10  ;;  %v2020_v47 = vmax.f32 %v1956_v41, 0.0 }
 0x30c   :  { %v2021_v48 = vmax.f32 %v1957_v55, 0.0 }
 0x30d   :  { %v2022_v30 = vmax.f32 %v1958_v63, 0.0 }
 0x30e   :  { %v11570_v27 = vpack.c.bf16 %v2021_v48, %v2019_v40 }
 0x30f   :  { %v11572_v28 = vpack.c.bf16 %v2022_v30, %v2020_v47  ;;  %v1778_v25 = vpop.f32.mrb[36].mxu0 }
 0x310   :  { %v1959_v50 = vadd.f32 %v11481_v51, %v1778_v25  ;;  %v1780_v56 = vpop.f32.mrb[37].mxu0 }
 0x311   :  { %v1960_v35 = vadd.f32 %v11484_v52, %v1780_v56  ;;  %v1782_v62 = vpop.f32.mrb[38].mxu0  ;;  %2195 = vmatprep.subr.bf16.mxu1 %v11572_v28 }
 0x312   :  { %v1961_v60 = vadd.f32 %v11481_v51, %v1782_v62  ;;  %v1784_v44 = vpop.f32.mrb[39].mxu0  ;;  %2196 = vmatpush1.bf16.msra.mxu1 %v11570_v27  ;;  %v2023_v54 = vmax.f32 %v1959_v50, 0.0 }
 0x313   :  { %v1962_v9 = vadd.f32 %v11484_v52, %v1784_v44  ;;  %v2024_v45 = vmax.f32 %v1960_v35, 0.0 }
 0x314   :  { %v2025_v14 = vmax.f32 %v1961_v60, 0.0 }
 0x315   :  { %v2026_v38 = vmax.f32 %v1962_v9, 0.0 }
 0x316   :  { %v11580_v33 = vpack.c.bf16 %v2025_v14, %v2023_v54 }
 0x317   :  { %v11582_v6 = vpack.c.bf16 %v2026_v38, %v2024_v45  ;;  %v1788_v15 = vpop.f32.mrb[40].mxu0 }
 0x318   :  { %v1963_v19 = vadd.f32 %v11481_v51, %v1788_v15  ;;  %v1790_v18 = vpop.f32.mrb[41].mxu0 }
 0x319   :  { %v1964_v53 = vadd.f32 %v11484_v52, %v1790_v18  ;;  %v1792_v61 = vpop.f32.mrb[42].mxu0  ;;  %2197 = vmatprep.subr.bf16.mxu1 %v11582_v6 }
 0x31a   :  { %v1965_v31 = vadd.f32 %v11481_v51, %v1792_v61  ;;  %v1794_v12 = vpop.f32.mrb[43].mxu0  ;;  %2198 = vmatpush1.bf16.msra.mxu1 %v11580_v33  ;;  %v2027_v3 = vmax.f32 %v1963_v19, 0.0 }
 0x31b   :  { %v1966_v13 = vadd.f32 %v11484_v52, %v1794_v12  ;;  %v2028_v20 = vmax.f32 %v1964_v53, 0.0 }
 0x31c   :  { %v2029_v0 = vmax.f32 %v1965_v31, 0.0 }
 0x31d   :  { %v2030_v17 = vmax.f32 %v1966_v13, 0.0 }
 0x31e   :  { %v11590_v11 = vpack.c.bf16 %v2029_v0, %v2027_v3 }
 0x31f   :  { %v11592_v39 = vpack.c.bf16 %v2030_v17, %v2028_v20  ;;  %v1798_v5 = vpop.f32.mrb[44].mxu0 }
 0x320   :  { %v1967_v26 = vadd.f32 %v11481_v51, %v1798_v5  ;;  %v1800_v41 = vpop.f32.mrb[45].mxu0 }
 0x321   :  { %v1968_v21 = vadd.f32 %v11484_v52, %v1800_v41  ;;  %v1802_v55 = vpop.f32.mrb[46].mxu0  ;;  %2199 = vmatprep.subr.bf16.mxu1 %v11592_v39 }
 0x322   :  { %v1969_v10 = vadd.f32 %v11481_v51, %v1802_v55  ;;  %v1804_v63 = vpop.f32.mrb[47].mxu0  ;;  %2200 = vmatpush1.bf16.msra.mxu1 %v11590_v11  ;;  %v2031_v48 = vmax.f32 %v1967_v26, 0.0 }
 0x323   :  { %v1970_v40 = vadd.f32 %v11484_v52, %v1804_v63  ;;  %v2032_v30 = vmax.f32 %v1968_v21, 0.0 }
 0x324   :  { %v2033_v47 = vmax.f32 %v1969_v10, 0.0 }
 0x325   :  { %v2034_v25 = vmax.f32 %v1970_v40, 0.0 }
 0x326   :  { %v11600_v50 = vpack.c.bf16 %v2033_v47, %v2031_v48 }
 0x327   :  { %v11602_v56 = vpack.c.bf16 %v2034_v25, %v2032_v30  ;;  %v1808_v35 = vpop.f32.mrb[48].mxu0 }
 0x328   :  { %v1971_v62 = vadd.f32 %v11481_v51, %v1808_v35  ;;  %v1810_v60 = vpop.f32.mrb[49].mxu0 }
 0x329   :  { %v1972_v44 = vadd.f32 %v11484_v52, %v1810_v60  ;;  %v1812_v9 = vpop.f32.mrb[50].mxu0  ;;  %2201 = vmatprep.subr.bf16.mxu1 %v11602_v56 }
 0x32a   :  { %v1973_v54 = vadd.f32 %v11481_v51, %v1812_v9  ;;  %v1814_v14 = vpop.f32.mrb[51].mxu0  ;;  %2202 = vmatpush1.bf16.msra.mxu1 %v11600_v50  ;;  %v2035_v38 = vmax.f32 %v1971_v62, 0.0 }
 0x32b   :  { %v1974_v45 = vadd.f32 %v11484_v52, %v1814_v14  ;;  %v2036_v19 = vmax.f32 %v1972_v44, 0.0 }
 0x32c   :  { %v2037_v15 = vmax.f32 %v1973_v54, 0.0 }
 0x32d   :  { %v2038_v18 = vmax.f32 %v1974_v45, 0.0 }
 0x32e   :  { %v11610_v53 = vpack.c.bf16 %v2037_v15, %v2035_v38 }
 0x32f   :  { %v11612_v61 = vpack.c.bf16 %v2038_v18, %v2036_v19  ;;  %v1818_v31 = vpop.f32.mrb[52].mxu0 }
 0x330   :  { %v1975_v12 = vadd.f32 %v11481_v51, %v1818_v31  ;;  %v1820_v13 = vpop.f32.mrb[53].mxu0 }
 0x331   :  { %v1976_v3 = vadd.f32 %v11484_v52, %v1820_v13  ;;  %v1822_v0 = vpop.f32.mrb[54].mxu0  ;;  %2203 = vmatprep.subr.bf16.mxu1 %v11612_v61 }
 0x332   :  { %v1977_v20 = vadd.f32 %v11481_v51, %v1822_v0  ;;  %v1824_v17 = vpop.f32.mrb[55].mxu0  ;;  %2204 = vmatpush1.bf16.msra.mxu1 %v11610_v53  ;;  %v2039_v26 = vmax.f32 %v1975_v12, 0.0 }
 0x333   :  { %v1978_v5 = vadd.f32 %v11484_v52, %v1824_v17  ;;  %v2040_v21 = vmax.f32 %v1976_v3, 0.0 }
 0x334   :  { %v2041_v41 = vmax.f32 %v1977_v20, 0.0 }
 0x335   :  { %v2042_v55 = vmax.f32 %v1978_v5, 0.0 }
 0x336   :  { %v11620_v10 = vpack.c.bf16 %v2041_v41, %v2039_v26 }
 0x337   :  { %v11622_v63 = vpack.c.bf16 %v2042_v55, %v2040_v21  ;;  %v1828_v40 = vpop.f32.mrb[56].mxu0  ;;  %v9885_v55 = vld [vmem:[#allocation16] ss:$8 sps:$4 sm:$0xff]  }
 0x338   :  { %v1979_v48 = vadd.f32 %v11481_v51, %v1828_v40  ;;  %v1830_v47 = vpop.f32.mrb[57].mxu0  ;;  %v9888_v40 = vld [vmem:[#allocation16 + $0x14] ss:$8 sps:$4 sm:$0xff]  }
 0x339   :  { %v1980_v30 = vadd.f32 %v11484_v52, %v1830_v47  ;;  %v1832_v25 = vpop.f32.mrb[58].mxu0  ;;  %2205 = vmatprep.subr.bf16.mxu1 %v11622_v63 }
 0x33a   :  { %v1981_v35 = vadd.f32 %v11481_v51, %v1832_v25  ;;  %v1834_v62 = vpop.f32.mrb[59].mxu0  ;;  %2206 = vmatpush1.bf16.msra.mxu1 %v11620_v10  ;;  %v2043_v44 = vmax.f32 %v1979_v48, 0.0  ;;  %v9893_v48 = vld [vmem:[#allocation16 + $0x20] ss:$8 sps:$4 sm:$0xff]  }
 0x33b   :  { %v1982_v60 = vadd.f32 %v11484_v52, %v1834_v62  ;;  %v2044_v54 = vmax.f32 %v1980_v30, 0.0 }
 0x33c   :  { %v2045_v9 = vmax.f32 %v1981_v35, 0.0 }
 0x33d   :  { %v2046_v14 = vmax.f32 %v1982_v60, 0.0 }
 0x33e   :  { %v11630_v45 = vpack.c.bf16 %v2045_v9, %v2043_v44 }
 0x33f   :  { %v11632_v38 = vpack.c.bf16 %v2046_v14, %v2044_v54  ;;  %v1838_v15 = vpop.f32.mrb[60].mxu0 }
 0x340   :  { %v1983_v19 = vadd.f32 %v11481_v51, %v1838_v15  ;;  %v1840_v18 = vpop.f32.mrb[61].mxu0 }
 0x341   :  { %v1984_v31 = vadd.f32 %v11484_v52, %v1840_v18  ;;  %v1842_v12 = vpop.f32.mrb[62].mxu0  ;;  %2207 = vmatprep.subr.bf16.mxu1 %v11632_v38 }
 0x342   :  { %v1985_v13 = vadd.f32 %v11481_v51, %v1842_v12  ;;  %v1844_v3 = vpop.f32.mrb[63].mxu0  ;;  %2208 = vmatpush1.bf16.msra.mxu1 %v11630_v45  ;;  %v2047_v20 = vmax.f32 %v1983_v19, 0.0  ;;  %v9890_v51 = vld [vmem:[#allocation16 + $0x10] ss:$8 sps:$4 sm:$0xff]  }
 0x343   :  { %v1986_v0 = vadd.f32 %v11484_v52, %v1844_v3  ;;  %v2048_v5 = vmax.f32 %v1984_v31, 0.0  ;;  %v9891_v52 = vld [vmem:[#allocation16 + $0x24] ss:$8 sps:$4 sm:$0xff]  }
 0x344   :  { %v2049_v17 = vmax.f32 %v1985_v13, 0.0 }
 0x345   :  { %v2050_v26 = vmax.f32 %v1986_v0, 0.0 }
 0x346   :  { %v11640_v41 = vpack.c.bf16 %v2049_v17, %v2047_v20 }
 0x347   :  { %v11642_v21 = vpack.c.bf16 %v2050_v26, %v2048_v5 }
 0x349   :  { %2209 = vmatprep.subr.bf16.mxu1 %v11642_v21 }
 0x34a   :  { %2210 = vmatpush1.bf16.msra.mxu1 %v11640_v41 }
 0x34b   :  { %2388 = vmatprep.subr.bf16.mxu1 %v11492_v57  ;;  %v9894_v57 = vld [vmem:[#allocation16 + $0x34] ss:$8 sps:$4 sm:$0xff]  }
 0x34d   :  { %2212 = vmatmul.mubr.bf16.vlgmr.msra.gmra.mrb[0].mxu1 %v9885_v55 }
 0x34e   :  { %2389 = vmatpush1.bf16.msra.mxu1 %v11490_v49  ;;  %2221 = vmatprep.mubr.bf16.mxu1 %v9888_v40  ;;  %v9896_v49 = vld [vmem:[#allocation16 + $0x30] ss:$8 sps:$4 sm:$0xff]  }
 0x34f   :  { %2390 = vmatprep.subr.bf16.mxu1 %v11502_v29  ;;  %v9899_v29 = vld [vmem:[#allocation16 + $0x40] ss:$8 sps:$4 sm:$0xff]  }
 0x352   :  { %2391 = vmatpush1.bf16.msra.mxu1 %v11500_v42  ;;  %v9897_v42 = vld [vmem:[#allocation16 + $0x44] ss:$8 sps:$4 sm:$0xff]  }
 0x353   :  { %2392 = vmatprep.subr.bf16.mxu1 %v11512_v24  ;;  %v9902_v24 = vld [vmem:[#allocation16 + $0x50] ss:$8 sps:$4 sm:$0xff]  }
 0x355   :  { %2222 = vmatmul.mubr.bf16.gmra.mrb[4].mxu1 %v9890_v51 }
 0x356   :  { %2393 = vmatpush1.bf16.msra.mxu1 %v11510_v37  ;;  %2231 = vmatprep.mubr.bf16.mxu1 %v9891_v52  ;;  %v9900_v37 = vld [vmem:[#allocation16 + $0x54] ss:$8 sps:$4 sm:$0xff]  }
 0x357   :  { %2394 = vmatprep.subr.bf16.mxu1 %v11522_v16  ;;  %v9905_v16 = vld [vmem:[#allocation16 + $0x60] ss:$8 sps:$4 sm:$0xff]  }
 0x35a   :  { %2395 = vmatpush1.bf16.msra.mxu1 %v11520_v58  ;;  %v9903_v58 = vld [vmem:[#allocation16 + $0x64] ss:$8 sps:$4 sm:$0xff]  }
 0x35b   :  { %2396 = vmatprep.subr.bf16.mxu1 %v11532_v1  ;;  %v9908_v1 = vld [vmem:[#allocation16 + $0x70] ss:$8 sps:$4 sm:$0xff]  }
 0x35d   :  { %2232 = vmatmul.mubr.bf16.gmra.mrb[8].mxu1 %v9893_v48 }
 0x35e   :  { %2397 = vmatpush1.bf16.msra.mxu1 %v11530_v43  ;;  %2241 = vmatprep.mubr.bf16.mxu1 %v9894_v57  ;;  %v9906_v43 = vld [vmem:[#allocation16 + $0x74] ss:$8 sps:$4 sm:$0xff]  }
 0x35f   :  { %2398 = vmatprep.subr.bf16.mxu1 %v11542_v59  ;;  %v9909_v59 = vld [vmem:[#allocation17] ss:$8 sps:$4 sm:$0xff]  }
 0x362   :  { %2399 = vmatpush1.bf16.msra.mxu1 %v11540_v8  ;;  %v9911_v8 = vld [vmem:[#allocation17 + $0x4] ss:$8 sps:$4 sm:$0xff]  }
 0x363   :  { %2400 = vmatprep.subr.bf16.mxu1 %v11552_v23  ;;  %v9914_v23 = vld [vmem:[#allocation17 + $0x10] ss:$8 sps:$4 sm:$0xff]  }
 0x365   :  { %2242 = vmatmul.mubr.bf16.gmra.mrb[12].mxu1 %v9896_v49 }
 0x366   :  { %2401 = vmatpush1.bf16.msra.mxu1 %v11550_v34  ;;  %2251 = vmatprep.mubr.bf16.mxu1 %v9897_v42  ;;  %v9912_v34 = vld [vmem:[#allocation17 + $0x14] ss:$8 sps:$4 sm:$0xff]  }
 0x367   :  { %2402 = vmatprep.subr.bf16.mxu1 %v11562_v22  ;;  %v9917_v22 = vld [vmem:[#allocation17 + $0x20] ss:$8 sps:$4 sm:$0xff]  }
 0x36a   :  { %2403 = vmatpush1.bf16.msra.mxu1 %v11560_v36  ;;  %v9915_v36 = vld [vmem:[#allocation17 + $0x24] ss:$8 sps:$4 sm:$0xff]  }
 0x36b   :  { %2404 = vmatprep.subr.bf16.mxu1 %v11572_v28  ;;  %v9920_v28 = vld [vmem:[#allocation17 + $0x30] ss:$8 sps:$4 sm:$0xff]  }
 0x36d   :  { %2252 = vmatmul.mubr.bf16.gmra.mrb[16].mxu1 %v9899_v29 }
 0x36e   :  { %2405 = vmatpush1.bf16.msra.mxu1 %v11570_v27  ;;  %2261 = vmatprep.mubr.bf16.mxu1 %v9900_v37  ;;  %v9918_v27 = vld [vmem:[#allocation17 + $0x34] ss:$8 sps:$4 sm:$0xff]  }
 0x36f   :  { %2406 = vmatprep.subr.bf16.mxu1 %v11582_v6  ;;  %v9923_v6 = vld [vmem:[#allocation17 + $0x40] ss:$8 sps:$4 sm:$0xff]  }
 0x372   :  { %2407 = vmatpush1.bf16.msra.mxu1 %v11580_v33  ;;  %v9921_v33 = vld [vmem:[#allocation17 + $0x44] ss:$8 sps:$4 sm:$0xff]  }
 0x373   :  { %2408 = vmatprep.subr.bf16.mxu1 %v11592_v39  ;;  %v9926_v39 = vld [vmem:[#allocation17 + $0x50] ss:$8 sps:$4 sm:$0xff]  }
 0x375   :  { %2262 = vmatmul.mubr.bf16.gmra.mrb[20].mxu1 %v9902_v24 }
 0x376   :  { %2409 = vmatpush1.bf16.msra.mxu1 %v11590_v11  ;;  %2271 = vmatprep.mubr.bf16.mxu1 %v9903_v58  ;;  %v9924_v11 = vld [vmem:[#allocation17 + $0x54] ss:$8 sps:$4 sm:$0xff]  }
 0x377   :  { %2410 = vmatprep.subr.bf16.mxu1 %v11602_v56  ;;  %v9929_v56 = vld [vmem:[#allocation17 + $0x60] ss:$8 sps:$4 sm:$0xff]  }
 0x37a   :  { %2411 = vmatpush1.bf16.msra.mxu1 %v11600_v50  ;;  %v9927_v50 = vld [vmem:[#allocation17 + $0x64] ss:$8 sps:$4 sm:$0xff]  }
 0x37b   :  { %2412 = vmatprep.subr.bf16.mxu1 %v11612_v61  ;;  %v9932_v61 = vld [vmem:[#allocation17 + $0x70] ss:$8 sps:$4 sm:$0xff]  }
 0x37d   :  { %2272 = vmatmul.mubr.bf16.gmra.mrb[24].mxu1 %v9905_v16 }
 0x37e   :  { %2413 = vmatpush1.bf16.msra.mxu1 %v11610_v53  ;;  %2281 = vmatprep.mubr.bf16.mxu1 %v9906_v43  ;;  %v9930_v53 = vld [vmem:[#allocation17 + $0x74] ss:$8 sps:$4 sm:$0xff]  }
 0x37f   :  { %2414 = vmatprep.subr.bf16.mxu1 %v11622_v63 }
 0x382   :  { %2415 = vmatpush1.bf16.msra.mxu1 %v11620_v10 }
 0x383   :  { %2416 = vmatprep.subr.bf16.mxu1 %v11632_v38 }
 0x385   :  { %2282 = vmatmul.mubr.bf16.gmra.mrb[28].mxu1 %v9908_v1 }
 0x386   :  { %2417 = vmatpush1.bf16.msra.mxu1 %v11630_v45  ;;  %2420 = vmatprep.mubr.bf16.mxu1 %v9911_v8 }
 0x387   :  { %2418 = vmatprep.subr.bf16.mxu1 %v11642_v21 }
 0x38a   :  { %2419 = vmatpush1.bf16.msra.mxu1 %v11640_v41 }
 0x38d   :  { %2421 = vmatmul.mubr.bf16.vlgmr.msra.gmra.mrb[32].mxu1 %v9909_v59 }
 0x38e   :  { %2430 = vmatprep.mubr.bf16.mxu1 %v9912_v34 }
 0x395   :  { %2431 = vmatmul.mubr.bf16.gmra.mrb[36].mxu1 %v9914_v23 }
 0x396   :  { %2440 = vmatprep.mubr.bf16.mxu1 %v9915_v36 }
 0x39d   :  { %2441 = vmatmul.mubr.bf16.gmra.mrb[40].mxu1 %v9917_v22 }
 0x39e   :  { %2450 = vmatprep.mubr.bf16.mxu1 %v9918_v27 }
 0x3a5   :  { %2451 = vmatmul.mubr.bf16.gmra.mrb[44].mxu1 %v9920_v28 }
 0x3a6   :  { %2460 = vmatprep.mubr.bf16.mxu1 %v9921_v33 }
 0x3ad   :  { %2461 = vmatmul.mubr.bf16.gmra.mrb[48].mxu1 %v9923_v6 }
 0x3ae   :  { %2470 = vmatprep.mubr.bf16.mxu1 %v9924_v11 }
 0x3b5   :  { %2471 = vmatmul.mubr.bf16.gmra.mrb[52].mxu1 %v9926_v39 }
 0x3b6   :  { %2480 = vmatprep.mubr.bf16.mxu1 %v9927_v50 }
 0x3bd   :  { %2481 = vmatmul.mubr.bf16.gmra.mrb[56].mxu1 %v9929_v56 }
 0x3be   :  { %2490 = vmatprep.mubr.bf16.mxu1 %v9930_v53 }
 0x3c5   :  { %2491 = vmatmul.mubr.bf16.gmra.mrb[60].mxu1 %v9932_v61 }
 0x3c6   :  { %3401 = vmatprep.mubr.bf16.mxu1 %v12912_v32 }
 0x420   :  { %v2213_v10 = vpop.f32.mrb[0].mxu1 }
 0x421   :  { %v2215_v63 = vpop.f32.mrb[1].mxu1 }
 0x422   :  { %v2217_v47 = vpop.f32.mrb[2].mxu1 }
 0x423   :  { %v2219_v30 = vpop.f32.mrb[3].mxu1 }
 0x428   :  { %v2223_v25 = vpop.f32.mrb[4].mxu1 }
 0x429   :  { %v2225_v35 = vpop.f32.mrb[5].mxu1 }
 0x42a   :  { %v2227_v62 = vpop.f32.mrb[6].mxu1 }
 0x42b   :  { %v2229_v60 = vpop.f32.mrb[7].mxu1 }
 0x430   :  { %v2233_v44 = vpop.f32.mrb[8].mxu1 }
 0x431   :  { %v2235_v9 = vpop.f32.mrb[9].mxu1 }
 0x432   :  { %v2237_v54 = vpop.f32.mrb[10].mxu1 }
 0x433   :  { %v2239_v14 = vpop.f32.mrb[11].mxu1 }
 0x438   :  { %v2243_v45 = vpop.f32.mrb[12].mxu1 }
 0x439   :  { %v2245_v38 = vpop.f32.mrb[13].mxu1 }
 0x43a   :  { %v2247_v15 = vpop.f32.mrb[14].mxu1 }
 0x43b   :  { %v2249_v19 = vpop.f32.mrb[15].mxu1 }
 0x440   :  { %v11679_v18 = vpop.f32.mrb[16].mxu1 }
 0x441   :  { %v11681_v31 = vpop.f32.mrb[17].mxu1 }
 0x442   :  { %v11683_v12 = vpop.f32.mrb[18].mxu1 }
 0x443   :  { %v11685_v13 = vpop.f32.mrb[19].mxu1 }
 0x448   :  { %v11687_v3 = vpop.f32.mrb[20].mxu1 }
 0x449   :  { %v11689_v0 = vpop.f32.mrb[21].mxu1 }
 0x44a   :  { %v11691_v20 = vpop.f32.mrb[22].mxu1 }
 0x44b   :  { %v11693_v17 = vpop.f32.mrb[23].mxu1 }
 0x450   :  { %v11695_v5 = vpop.f32.mrb[24].mxu1 }
 0x451   :  { %v11697_v26 = vpop.f32.mrb[25].mxu1 }
 0x452   :  { %v11699_v41 = vpop.f32.mrb[26].mxu1 }
 0x453   :  { %v11701_v21 = vpop.f32.mrb[27].mxu1 }
 0x458   :  { %v11703_v55 = vpop.f32.mrb[28].mxu1 }
 0x459   :  { %v11705_v40 = vpop.f32.mrb[29].mxu1 }
 0x45a   :  { %v11707_v51 = vpop.f32.mrb[30].mxu1 }
 0x45b   :  { %v11709_v52 = vpop.f32.mrb[31].mxu1 }
 0x460   :  { %v2422_v48 = vpop.f32.mrb[32].mxu1 }
 0x461   :  { %v11711_v57 = vmax.f32 %v2213_v10, %v2422_v48  ;;  %v2424_v49 = vpop.f32.mrb[33].mxu1 }
 0x462   :  { %v11713_v42 = vmax.f32 %v2215_v63, %v2424_v49  ;;  %v2426_v29 = vpop.f32.mrb[34].mxu1 }
 0x463   :  { %v11715_v37 = vmax.f32 %v2217_v47, %v2426_v29  ;;  %v2428_v24 = vpop.f32.mrb[35].mxu1 }
 0x464   :  { %v11717_v58 = vmax.f32 %v2219_v30, %v2428_v24 }
 0x465   :  { %v9619_v16 = vpack.i.bf16 %v11715_v37, %v11711_v57 }
 0x466   :  { %v9624_v1 = vpack.i.bf16 %v11717_v58, %v11713_v42 }
 0x467   :  { %9620 = vrot.lane.b32.xlu0 %v9619_v16, %s10453_s0 }
 0x468   :  { %v2432_v43 = vpop.f32.mrb[36].mxu1 }
 0x469   :  { %v11724_v8 = vmax.f32 %v2223_v25, %v2432_v43  ;;  %v2434_v59 = vpop.f32.mrb[37].mxu1 }
 0x46a   :  { %v11726_v34 = vmax.f32 %v2225_v35, %v2434_v59  ;;  %v2436_v23 = vpop.f32.mrb[38].mxu1 }
 0x46b   :  { %v11728_v36 = vmax.f32 %v2227_v62, %v2436_v23  ;;  %9625 = vrot.lane.b32.xlu0 %v9624_v1, %s10453_s0  ;;  %v2438_v22 = vpop.f32.mrb[39].mxu1 }
 0x46c   :  { %v11731_v27 = vmax.f32 %v2229_v60, %v2438_v22 }
 0x46d   :  { %v9629_v28 = vpack.i.bf16 %v11728_v36, %v11724_v8 }
 0x46e   :  { %v9634_v6 = vpack.i.bf16 %v11731_v27, %v11726_v34 }
 0x46f   :  { %9630 = vrot.lane.b32.xlu1 %v9629_v28, %s10453_s0 }
 0x470   :  { %v2442_v33 = vpop.f32.mrb[40].mxu1 }
 0x471   :  { %v11738_v11 = vmax.f32 %v2233_v44, %v2442_v33  ;;  %v2444_v39 = vpop.f32.mrb[41].mxu1 }
 0x472   :  { %v11740_v50 = vmax.f32 %v2235_v9, %v2444_v39  ;;  %v2446_v56 = vpop.f32.mrb[42].mxu1 }
 0x473   :  { %v11742_v53 = vmax.f32 %v2237_v54, %v2446_v56  ;;  %9635 = vrot.lane.b32.xlu1 %v9634_v6, %s10453_s0  ;;  %v2448_v61 = vpop.f32.mrb[43].mxu1 }
 0x474   :  { %v11745_v10 = vmax.f32 %v2239_v14, %v2448_v61 }
 0x475   :  { %v9639_v63 = vpack.i.bf16 %v11742_v53, %v11738_v11 }
 0x476   :  { %v9644_v47 = vpack.i.bf16 %v11745_v10, %v11740_v50 }
 0x477   :  { %9640 = vrot.lane.b32.xlu0 %v9639_v63, %s10453_s0 }
 0x478   :  { %9645 = vrot.lane.b32.xlu1 %v9644_v47, %s10453_s0  ;;  %v2452_v30 = vpop.f32.mrb[44].mxu1 }
 0x479   :  { %v11753_v25 = vmax.f32 %v2243_v45, %v2452_v30  ;;  %v2454_v35 = vpop.f32.mrb[45].mxu1 }
 0x47a   :  { %v11755_v62 = vmax.f32 %v2245_v38, %v2454_v35  ;;  %v2456_v60 = vpop.f32.mrb[46].mxu1 }
 0x47b   :  { %v11757_v44 = vmax.f32 %v2247_v15, %v2456_v60  ;;  %v2458_v9 = vpop.f32.mrb[47].mxu1 }
 0x47c   :  { %v11759_v54 = vmax.f32 %v2249_v19, %v2458_v9 }
 0x47d   :  { %v9649_v14 = vpack.i.bf16 %v11757_v44, %v11753_v25 }
 0x47e   :  { %v9654_v48 = vpack.i.bf16 %v11759_v54, %v11755_v62 }
 0x47f   :  { %9650 = vrot.lane.b32.xlu0 %v9649_v14, %s10453_s0 }
 0x480   :  { %9655 = vrot.lane.b32.xlu1 %v9654_v48, %s10453_s0  ;;  %v2462_v45 = vpop.f32.mrb[48].mxu1  ;;  %v9933_v48 = vld [vmem:[#allocation10 + $0x80] ss:$8 sps:$4 sm:$0xff]  }
 0x481   :  { %v11768_v38 = vmax.f32 %v11679_v18, %v2462_v45  ;;  %v2464_v49 = vpop.f32.mrb[49].mxu1  ;;  %v9935_v45 = vld [vmem:[#allocation10 + $0x84] ss:$8 sps:$4 sm:$0xff]  }
 0x482   :  { %v11771_v15 = vmax.f32 %v11681_v31, %v2464_v49  ;;  %v2466_v19 = vpop.f32.mrb[50].mxu1  ;;  %3369 = vmatprep.subr.bf16.mxu1 %v9935_v45 }
 0x483   :  { %v11774_v29 = vmax.f32 %v11683_v12, %v2466_v19  ;;  %v2468_v24 = vpop.f32.mrb[51].mxu1  ;;  %v9938_v19 = vld [vmem:[#allocation10 + $0x94] ss:$8 sps:$4 sm:$0xff]   ;;  %3370 = vmatpush1.bf16.msra.mxu1 %v9933_v48 }
 0x484   :  { %v11777_v16 = vmax.f32 %v11685_v13, %v2468_v24  ;;  %3371 = vmatprep.subr.bf16.mxu1 %v9938_v19  ;;  %v9944_v24 = vld [vmem:[#allocation10 + $0xb4] ss:$8 sps:$4 sm:$0xff]  }
 0x485   :  { %v9659_v43 = vpack.i.bf16 %v11774_v29, %v11768_v38 }
 0x486   :  { %v9664_v1 = vpack.i.bf16 %v11777_v16, %v11771_v15 }
 0x487   :  { %9660 = vrot.lane.b32.xlu0 %v9659_v43, %s10453_s0  ;;  %v9942_v43 = vld [vmem:[#allocation10 + $0xb0] ss:$8 sps:$4 sm:$0xff]  }
 0x488   :  { %9665 = vrot.lane.b32.xlu1 %v9664_v1, %s10453_s0  ;;  %v2472_v18 = vpop.f32.mrb[52].mxu1  ;;  %v9947_v1 = vld [vmem:[#allocation10 + $0xc4] ss:$8 sps:$4 sm:$0xff]  }
 0x489   :  { %v11786_v31 = vmax.f32 %v11687_v3, %v2472_v18  ;;  %v2474_v12 = vpop.f32.mrb[53].mxu1  ;;  %v9945_v18 = vld [vmem:[#allocation10 + $0xc0] ss:$8 sps:$4 sm:$0xff]  }
 0x48a   :  { %v11789_v59 = vmax.f32 %v11689_v0, %v2474_v12  ;;  %v2476_v13 = vpop.f32.mrb[54].mxu1  ;;  %v9950_v12 = vld [vmem:[#allocation10 + $0xd4] ss:$8 sps:$4 sm:$0xff]  }
 0x48b   :  { %v11792_v23 = vmax.f32 %v11691_v20, %v2476_v13  ;;  %v2478_v22 = vpop.f32.mrb[55].mxu1  ;;  %v9948_v13 = vld [vmem:[#allocation10 + $0xd0] ss:$8 sps:$4 sm:$0xff]  }
 0x48c   :  { %v11795_v28 = vmax.f32 %v11693_v17, %v2478_v22  ;;  %v9953_v22 = vld [vmem:[#allocation10 + $0xe4] ss:$8 sps:$4 sm:$0xff]  }
 0x48d   :  { %v9669_v33 = vpack.i.bf16 %v11792_v23, %v11786_v31 }
 0x48e   :  { %v9674_v6 = vpack.i.bf16 %v11795_v28, %v11789_v59 }
 0x48f   :  { %9670 = vrot.lane.b32.xlu0 %v9669_v33, %s10453_s0  ;;  %v9951_v33 = vld [vmem:[#allocation10 + $0xe0] ss:$8 sps:$4 sm:$0xff]  }
 0x490   :  { %9675 = vrot.lane.b32.xlu1 %v9674_v6, %s10453_s0  ;;  %v2482_v3 = vpop.f32.mrb[56].mxu1  ;;  %v9956_v6 = vld [vmem:[#allocation10 + $0xf4] ss:$8 sps:$4 sm:$0xff]  }
 0x491   :  { %v11804_v0 = vmax.f32 %v11695_v5, %v2482_v3  ;;  %v2484_v20 = vpop.f32.mrb[57].mxu1 }
 0x492   :  { %v11807_v39 = vmax.f32 %v11697_v26, %v2484_v20  ;;  %v2486_v17 = vpop.f32.mrb[58].mxu1  ;;  %v9954_v20 = vld [vmem:[#allocation10 + $0xf0] ss:$8 sps:$4 sm:$0xff]  }
 0x493   :  { %v11810_v56 = vmax.f32 %v11699_v41, %v2486_v17  ;;  %v2488_v61 = vpop.f32.mrb[59].mxu1 }
 0x494   :  { %v11813_v63 = vmax.f32 %v11701_v21, %v2488_v61 }
 0x495   :  { %v9679_v47 = vpack.i.bf16 %v11810_v56, %v11804_v0 }
 0x496   :  { %v9684_v30 = vpack.i.bf16 %v11813_v63, %v11807_v39 }
 0x497   :  { %9680 = vrot.lane.b32.xlu0 %v9679_v47, %s10453_s0 }
 0x498   :  { %9685 = vrot.lane.b32.xlu1 %v9684_v30, %s10453_s0  ;;  %v2492_v5 = vpop.f32.mrb[60].mxu1 }
 0x499   :  { %v11822_v26 = vmax.f32 %v11703_v55, %v2492_v5  ;;  %v2494_v41 = vpop.f32.mrb[61].mxu1 }
 0x49a   :  { %v11825_v35 = vmax.f32 %v11705_v40, %v2494_v41  ;;  %v2496_v21 = vpop.f32.mrb[62].mxu1  ;;  %v9936_v40 = vld [vmem:[#allocation10 + $0x90] ss:$8 sps:$4 sm:$0xff]  }
 0x49b   :  { %v11828_v60 = vmax.f32 %v11707_v51, %v2496_v21  ;;  %v2498_v9 = vpop.f32.mrb[63].mxu1  ;;  %v9941_v51 = vld [vmem:[#allocation10 + $0xa4] ss:$8 sps:$4 sm:$0xff]   ;;  %3372 = vmatpush1.bf16.msra.mxu1 %v9936_v40 }
 0x49c   :  { %v11831_v14 = vmax.f32 %v11709_v52, %v2498_v9  ;;  %v9939_v52 = vld [vmem:[#allocation10 + $0xa0] ss:$8 sps:$4 sm:$0xff]   ;;  %3373 = vmatprep.subr.bf16.mxu1 %v9941_v51 }
 0x49d   :  { %v9689_v49 = vpack.i.bf16 %v11828_v60, %v11822_v26 }
 0x49e   :  { %v9694_v55 = vpack.i.bf16 %v11831_v14, %v11825_v35 }
 0x49f   :  { %9690 = vrot.lane.b32.xlu0 %v9689_v49, %s10453_s0  ;;  %3374 = vmatpush1.bf16.msra.mxu1 %v9939_v52 }
 0x4a0   :  { %9695 = vrot.lane.b32.xlu1 %v9694_v55, %s10453_s0  ;;  %3375 = vmatprep.subr.bf16.mxu1 %v9944_v24 }
 0x4a3   :  { %3376 = vmatpush1.bf16.msra.mxu1 %v9942_v43 }
 0x4a4   :  { %3377 = vmatprep.subr.bf16.mxu1 %v9947_v1 }
 0x4a7   :  { %3378 = vmatpush1.bf16.msra.mxu1 %v9945_v18 }
 0x4a8   :  { %3379 = vmatprep.subr.bf16.mxu1 %v9950_v12 }
 0x4ab   :  { %3380 = vmatpush1.bf16.msra.mxu1 %v9948_v13 }
 0x4ac   :  { %3381 = vmatprep.subr.bf16.mxu1 %v9953_v22 }
 0x4af   :  { %3382 = vmatpush1.bf16.msra.mxu1 %v9951_v33 }
 0x4b0   :  { %3383 = vmatprep.subr.bf16.mxu1 %v9956_v6 }
 0x4b3   :  { %3384 = vmatpush1.bf16.msra.mxu1 %v9954_v20 }
 0x4d9   :  { %v9621_v3 = vpop.permute.xlu0 %9620 }
 0x4da   :  { %v9623_v17 = vunpack.i.h.bf16 %v9621_v3  ;;  %v9622_v61 = vunpack.i.l.bf16 %v9621_v3 }
 0x4dc   :  { %v11840_v47 = vmax.f32 %v11715_v37, %v9623_v17  ;;  %v11843_v30 = vmax.f32 %v11711_v57, %v9622_v61 }
 0x4dd   :  { %v9626_v5 = vpop.permute.xlu0 %9625 }
 0x4de   :  { %v9628_v41 = vunpack.i.h.bf16 %v9626_v5  ;;  %v9627_v21 = vunpack.i.l.bf16 %v9626_v5  ;;  %v9699_v9 = vpack.i.bf16 %v11840_v47, %v11843_v30 }
 0x4e0   :  { %v2678_v48 = vmax.f32 %v11717_v58, %v9628_v41  ;;  %v2677_v45 = vmax.f32 %v11713_v42, %v9627_v21  ;;  %9700 = vrot.lane.b32.xlu0 %v9699_v9, %s10453_s0 }
 0x4e1   :  { %v9631_v49 = vpop.permute.xlu1 %9630 }
 0x4e2   :  { %v9633_v19 = vunpack.i.h.bf16 %v9631_v49  ;;  %v9632_v55 = vunpack.i.l.bf16 %v9631_v49  ;;  %v9709_v37 = vpack.i.bf16 %v2678_v48, %v2677_v45 }
 0x4e4   :  { %v11851_v40 = vmax.f32 %v11728_v36, %v9633_v19  ;;  %v11854_v57 = vmax.f32 %v11724_v8, %v9632_v55  ;;  %9710 = vrot.lane.b32.xlu0 %v9709_v37, %s10454_s20  ;;  %9705 = vrot.lane.b32.xlu1 %v9709_v37, %s10430_s8 }
 0x4e5   :  { %v9636_v58 = vpop.permute.xlu1 %9635 }
 0x4e6   :  { %v9638_v51 = vunpack.i.h.bf16 %v9636_v58  ;;  %v9637_v42 = vunpack.i.l.bf16 %v9636_v58  ;;  %v9714_v52 = vpack.i.bf16 %v11851_v40, %v11854_v57 }
 0x4e8   :  { %9715 = vrot.lane.b32.xlu1 %v9714_v52, %s10453_s0  ;;  %v2679_v24 = vmax.f32 %v11726_v34, %v9637_v42  ;;  %v2680_v36 = vmax.f32 %v11731_v27, %v9638_v51  ;;  %v9959_v42 = vld [vmem:[#allocation10 + $0x4] ss:$8 sps:$4 sm:$0xff]  }
 0x4e9   :  { %v9641_v43 = vpop.permute.xlu0 %9640  ;;  %3562 = vmatprep.subr.bf16.mxu1 %v9959_v42 }
 0x4ea   :  { %v9643_v8 = vunpack.i.h.bf16 %v9641_v43  ;;  %v9642_v1 = vunpack.i.l.bf16 %v9641_v43  ;;  %v9646_v18 = vpop.permute.xlu1 %9645  ;;  %v9719_v12 = vpack.i.bf16 %v2680_v36, %v2679_v24 }
 0x4eb   :  { %v9648_v13 = vunpack.i.h.bf16 %v9646_v18  ;;  %v9647_v22 = vunpack.i.l.bf16 %v9646_v18 }
 0x4ec   :  { %v11864_v33 = vmax.f32 %v11742_v53, %v9643_v8  ;;  %v11867_v6 = vmax.f32 %v11738_v11, %v9642_v1  ;;  %9720 = vrot.lane.b32.xlu0 %v9719_v12, %s10430_s8  ;;  %9725 = vrot.lane.b32.xlu1 %v9719_v12, %s10454_s20 }
 0x4ed   :  { %v2681_v34 = vmax.f32 %v11740_v50, %v9647_v22  ;;  %v2682_v27 = vmax.f32 %v11745_v10, %v9648_v13 }
 0x4ee   :  { %v9729_v3 = vpack.i.bf16 %v11864_v33, %v11867_v6 }
 0x4ef   :  { %v9734_v20 = vpack.i.bf16 %v2682_v27, %v2681_v34 }
 0x4f0   :  { %9730 = vrot.lane.b32.xlu0 %v9729_v3, %s10453_s0 }
 0x4f1   :  { %v9651_v17 = vpop.permute.xlu0 %9650  ;;  %9735 = vrot.lane.b32.xlu1 %v9734_v20, %s10430_s8 }
 0x4f2   :  { %v9653_v53 = vunpack.i.h.bf16 %v9651_v17  ;;  %v9652_v11 = vunpack.i.l.bf16 %v9651_v17  ;;  %v9656_v61 = vpop.permute.xlu1 %9655 }
 0x4f3   :  { %v9658_v5 = vunpack.i.h.bf16 %v9656_v61  ;;  %v9657_v41 = vunpack.i.l.bf16 %v9656_v61 }
 0x4f4   :  { %v11878_v21 = vmax.f32 %v11757_v44, %v9653_v53  ;;  %v11881_v50 = vmax.f32 %v11753_v25, %v9652_v11  ;;  %9740 = vrot.lane.b32.xlu0 %v9734_v20, %s10454_s20 }
 0x4f5   :  { %v2683_v10 = vmax.f32 %v11755_v62, %v9657_v41  ;;  %v2684_v9 = vmax.f32 %v11759_v54, %v9658_v5 }
 0x4f6   :  { %v9744_v48 = vpack.i.bf16 %v11878_v21, %v11881_v50 }
 0x4f7   :  { %v9749_v45 = vpack.i.bf16 %v2684_v9, %v2683_v10 }
 0x4f8   :  { %9745 = vrot.lane.b32.xlu1 %v9744_v48, %s10453_s0 }
 0x4f9   :  { %v9661_v49 = vpop.permute.xlu0 %9660  ;;  %9750 = vrot.lane.b32.xlu0 %v9749_v45, %s10430_s8 }
 0x4fa   :  { %v9663_v44 = vunpack.i.h.bf16 %v9661_v49  ;;  %v9662_v19 = vunpack.i.l.bf16 %v9661_v49  ;;  %v9666_v55 = vpop.permute.xlu1 %9665 }
 0x4fb   :  { %v9668_v25 = vunpack.i.h.bf16 %v9666_v55  ;;  %v9667_v37 = vunpack.i.l.bf16 %v9666_v55 }
 0x4fc   :  { %v11891_v58 = vmax.f32 %v11774_v29, %v9663_v44  ;;  %v11894_v62 = vmax.f32 %v11768_v38, %v9662_v19  ;;  %9755 = vrot.lane.b32.xlu1 %v9749_v45, %s10454_s20 }
 0x4fd   :  { %v2685_v54 = vmax.f32 %v11771_v15, %v9667_v37  ;;  %v2686_v51 = vmax.f32 %v11777_v16, %v9668_v25 }
 0x4fe   :  { %v9759_v52 = vpack.i.bf16 %v11891_v58, %v11894_v62 }
 0x4ff   :  { %v9764_v24 = vpack.i.bf16 %v2686_v51, %v2685_v54 }
 0x500   :  { %9760 = vrot.lane.b32.xlu0 %v9759_v52, %s10453_s0 }
 0x501   :  { %v9671_v36 = vpop.permute.xlu0 %9670  ;;  %9765 = vrot.lane.b32.xlu1 %v9764_v24, %s10430_s8 }
 0x502   :  { %v9673_v29 = vunpack.i.h.bf16 %v9671_v36  ;;  %v9672_v38 = vunpack.i.l.bf16 %v9671_v36  ;;  %v9676_v43 = vpop.permute.xlu1 %9675 }
 0x503   :  { %v9678_v8 = vunpack.i.h.bf16 %v9676_v43  ;;  %v9677_v1 = vunpack.i.l.bf16 %v9676_v43 }
 0x504   :  { %v11904_v15 = vmax.f32 %v11792_v23, %v9673_v29  ;;  %v11907_v16 = vmax.f32 %v11786_v31, %v9672_v38  ;;  %9770 = vrot.lane.b32.xlu0 %v9764_v24, %s10454_s20 }
 0x505   :  { %v2687_v18 = vmax.f32 %v11789_v59, %v9677_v1  ;;  %v2688_v12 = vmax.f32 %v11795_v28, %v9678_v8  ;;  %v9957_v1 = vld [vmem:[#allocation10] ss:$8 sps:$4 sm:$0xff]  }
 0x506   :  { %v9774_v13 = vpack.i.bf16 %v11904_v15, %v11907_v16 }
 0x507   :  { %v9779_v22 = vpack.i.bf16 %v2688_v12, %v2687_v18  ;;  %v9962_v12 = vld [vmem:[#allocation10 + $0x14] ss:$8 sps:$4 sm:$0xff]  }
 0x508   :  { %9775 = vrot.lane.b32.xlu1 %v9774_v13, %s10453_s0 }
 0x509   :  { %v9681_v34 = vpop.permute.xlu0 %9680  ;;  %9780 = vrot.lane.b32.xlu0 %v9779_v22, %s10430_s8 }
 0x50a   :  { %v9683_v23 = vunpack.i.h.bf16 %v9681_v34  ;;  %v9682_v27 = vunpack.i.l.bf16 %v9681_v34  ;;  %v9686_v3 = vpop.permute.xlu1 %9685 }
 0x50b   :  { %v9688_v31 = vunpack.i.h.bf16 %v9686_v3  ;;  %v9687_v20 = vunpack.i.l.bf16 %v9686_v3 }
 0x50c   :  { %v11917_v17 = vmax.f32 %v11810_v56, %v9683_v23  ;;  %v11920_v59 = vmax.f32 %v11804_v0, %v9682_v27  ;;  %9785 = vrot.lane.b32.xlu1 %v9779_v22, %s10454_s20 }
 0x50d   :  { %v2689_v28 = vmax.f32 %v11807_v39, %v9687_v20  ;;  %v2690_v53 = vmax.f32 %v11813_v63, %v9688_v31  ;;  %v9960_v20 = vld [vmem:[#allocation10 + $0x10] ss:$8 sps:$4 sm:$0xff]  }
 0x50e   :  { %v9789_v11 = vpack.i.bf16 %v11917_v17, %v11920_v59 }
 0x50f   :  { %v9794_v61 = vpack.i.bf16 %v2690_v53, %v2689_v28 }
 0x510   :  { %9790 = vrot.lane.b32.xlu0 %v9789_v11, %s10453_s0  ;;  %v9965_v11 = vld [vmem:[#allocation10 + $0x24] ss:$8 sps:$4 sm:$0xff]  }
 0x511   :  { %v9691_v5 = vpop.permute.xlu0 %9690  ;;  %9795 = vrot.lane.b32.xlu1 %v9794_v61, %s10430_s8 }
 0x512   :  { %v9693_v56 = vunpack.i.h.bf16 %v9691_v5  ;;  %v9692_v41 = vunpack.i.l.bf16 %v9691_v5  ;;  %v9696_v10 = vpop.permute.xlu1 %9695 }
 0x513   :  { %v9698_v0 = vunpack.i.h.bf16 %v9696_v10  ;;  %v9697_v9 = vunpack.i.l.bf16 %v9696_v10 }
 0x514   :  { %v11930_v48 = vmax.f32 %v11828_v60, %v9693_v56  ;;  %v11933_v39 = vmax.f32 %v11822_v26, %v9692_v41  ;;  %9800 = vrot.lane.b32.xlu0 %v9794_v61, %s10454_s20 }
 0x515   :  { %v2691_v63 = vmax.f32 %v11825_v35, %v9697_v9  ;;  %v2692_v45 = vmax.f32 %v11831_v14, %v9698_v0 }
 0x516   :  { %v9804_v49 = vpack.i.bf16 %v11930_v48, %v11933_v39 }
 0x517   :  { %v9809_v44 = vpack.i.bf16 %v2692_v45, %v2691_v63 }
 0x518   :  { %9805 = vrot.lane.b32.xlu1 %v9804_v49, %s10453_s0 }
 0x519   :  { %9810 = vrot.lane.b32.xlu0 %v9809_v44, %s10430_s8 }
 0x51c   :  { %9815 = vrot.lane.b32.xlu1 %v9809_v44, %s10454_s20  ;;  %v9963_v44 = vld [vmem:[#allocation10 + $0x20] ss:$8 sps:$4 sm:$0xff]  }
 0x552   :  { %v9701_v60 = vpop.permute.xlu0 %9700 }
 0x553   :  { %v9703_v19 = vunpack.i.h.bf16 %v9701_v60  ;;  %v9702_v26 = vunpack.i.l.bf16 %v9701_v60 }
 0x555   :  { %v2871_v51 = vsel %vm2869_vm8, %v11840_v47, %v9703_v19  ;;  %v2870_v42 = vsel %vm2869_vm8, %v11843_v30, %v9702_v26 }
 0x556   :  { %v9711_v55 = vpop.permute.xlu0 %9710  ;;  %v9706_v35 = vpop.permute.xlu1 %9705 }
 0x557   :  { %v9713_v25 = vunpack.i.h.bf16 %v9711_v55  ;;  %v9712_v14 = vunpack.i.l.bf16 %v9711_v55  ;;  %v9708_v37 = vunpack.i.h.bf16 %v9706_v35  ;;  %v9707_v54 = vunpack.i.l.bf16 %v9706_v35  ;;  %v9968_v55 = vld [vmem:[#allocation10 + $0x34] ss:$8 sps:$4 sm:$0xff]  }
 0x559   :  { %v2888_v52 = vsel %vm2886_vm9, %v2871_v51, %v9708_v37  ;;  %v2887_v24 = vsel %vm2886_vm9, %v2870_v42, %v9707_v54 }
 0x55a   :  { %v11950_v36 = vsel %vm2903_vm10, %v2888_v52, %v9713_v25  ;;  %v11953_v29 = vsel %vm2903_vm10, %v2887_v24, %v9712_v14  ;;  %v9716_v38 = vpop.permute.xlu1 %9715 }
 0x55b   :  { %v3193_v43 = vrot.slane %v11950_v36, 1  ;;  %v3192_v8 = vrot.slane %v11953_v29, 1  ;;  %v3264_v47 = vpack.c.bf16 %v11950_v36, %v11953_v29  ;;  %v9718_v30 = vunpack.i.h.bf16 %v9716_v38 }
 0x55c   :  { %v9717_v18 = vunpack.i.l.bf16 %v9716_v38  ;;  %v9971_v38 = vld [vmem:[#allocation10 + $0x44] ss:$8 sps:$4 sm:$0xff]  }
 0x55d   :  { %v11963_v13 = vsel %vm971_vm2, %v3192_v8, %v3193_v43  ;;  %3402 = vmatmul.mubr.bf16.vlgmr.msra.gmra.mrb[64].mxu1 %v3264_v47  ;;  %v2873_v28 = vsel %vm2869_vm8, %v11851_v40, %v9718_v30 }
 0x55e   :  { %v9721_v22 = vpop.permute.xlu0 %9720  ;;  %v9726_v34 = vpop.permute.xlu1 %9725  ;;  %3411 = vmatprep.mubr.bf16.mxu1 %v12912_v32  ;;  %3563 = vmatpush1.bf16.msra.mxu1 %v9957_v1  ;;  %v2872_v53 = vsel %vm2869_vm8, %v11854_v57, %v9717_v18 }
 0x55f   :  { %v9723_v23 = vunpack.i.h.bf16 %v9721_v22  ;;  %v9722_v27 = vunpack.i.l.bf16 %v9721_v22  ;;  %v9728_v3 = vunpack.i.h.bf16 %v9726_v34  ;;  %v9727_v31 = vunpack.i.l.bf16 %v9726_v34  ;;  %3564 = vmatprep.subr.bf16.mxu1 %v9962_v12 }
 0x561   :  { %v2889_v61 = vsel %vm2886_vm9, %v2872_v53, %v9722_v27  ;;  %v2890_v5 = vsel %vm2886_vm9, %v2873_v28, %v9723_v23  ;;  %v9969_v27 = vld [vmem:[#allocation10 + $0x40] ss:$8 sps:$4 sm:$0xff]  }
 0x562   :  { %v9731_v56 = vpop.permute.xlu0 %9730  ;;  %v11973_v41 = vsel %vm2903_vm10, %v2889_v61, %v9727_v31  ;;  %v11976_v10 = vsel %vm2903_vm10, %v2890_v5, %v9728_v3  ;;  %3565 = vmatpush1.bf16.msra.mxu1 %v9960_v20  ;;  %v9974_v20 = vld [vmem:[#allocation10 + $0x54] ss:$8 sps:$4 sm:$0xff]  }
 0x563   :  { %v9733_v0 = vunpack.i.h.bf16 %v9731_v56  ;;  %v9732_v9 = vunpack.i.l.bf16 %v9731_v56  ;;  %v9736_v63 = vpop.permute.xlu1 %9735  ;;  %v3194_v57 = vrot.slane %v11973_v41, 1  ;;  %v3195_v49 = vrot.slane %v11976_v10, 1  ;;  %3566 = vmatprep.subr.bf16.mxu1 %v9965_v11 }
 0x564   :  { %v9738_v40 = vunpack.i.h.bf16 %v9736_v63  ;;  %v9737_v45 = vunpack.i.l.bf16 %v9736_v63  ;;  %v3265_v26 = vpack.c.bf16 %v11976_v10, %v11973_v41 }
 0x565   :  { %v2875_v60 = vsel %vm2869_vm8, %v11864_v33, %v9733_v0  ;;  %v2874_v19 = vsel %vm2869_vm8, %v11867_v6, %v9732_v9  ;;  %v11988_v25 = vsel %vm971_vm2, %v3193_v43, %v3194_v57  ;;  %v9966_v6 = vld [vmem:[#allocation10 + $0x30] ss:$8 sps:$4 sm:$0xff]   ;;  %v11997_v42 = vsel %vm971_vm2, %v3194_v57, %v3195_v49 }
 0x566   :  { %v9741_v35 = vpop.permute.xlu0 %9740  ;;  %3412 = vmatmul.mubr.bf16.gmra.mrb[68].mxu1 %v3265_v26  ;;  %v3675_v54 = vpack.c.bf16 %v11988_v25, %v11963_v13  ;;  %v2892_v33 = vsel %vm2886_vm9, %v2875_v60, %v9738_v40  ;;  %v2891_v51 = vsel %vm2886_vm9, %v2874_v19, %v9737_v45  ;;  %v9972_v0 = vld [vmem:[#allocation10 + $0x50] ss:$8 sps:$4 sm:$0xff]   ;;  %v9977_v40 = vld [vmem:[#allocation10 + $0x64] ss:$8 sps:$4 sm:$0xff]   ;;  %v3029_v13 = vand.u32 63, %v11293_v7 }
 0x567   :  { %v9743_v14 = vunpack.i.h.bf16 %v9741_v35  ;;  %v9742_v37 = vunpack.i.l.bf16 %v9741_v35  ;;  %3421 = vmatprep.mubr.bf16.mxu1 %v12912_v32  ;;  %3567 = vmatpush1.bf16.msra.mxu1 %v9963_v44  ;;  %v3925_v25 = vld [vmem:[#allocation11] sm:$0x3] }
 0x568   :  { %3568 = vmatprep.subr.bf16.mxu1 %v9968_v55  ;;  %vm9147_vm4 = vcmp.ne.s32.totalorder %v3029_v13, 63  ;;  %v12270_v7 = vrot.slane %v3925_v25, %v11478_v46 }
 0x569   :  { %v12000_v52 = vsel %vm2903_vm10, %v2891_v51, %v9742_v37  ;;  %v12003_v24 = vsel %vm2903_vm10, %v2892_v33, %v9743_v14  ;;  %v9975_v14 = vld [vmem:[#allocation10 + $0x60] ss:$8 sps:$4 sm:$0xff]   ;;  %v9980_v51 = vld [vmem:[#allocation10 + $0x74] ss:$8 sps:$4 sm:$0xff]   ;;  %vm8984_vm5 = vmpackc.low %vm9147_vm4, %vm10455_vm12 }
 0x56a   :  { %v9746_v43 = vpop.permute.xlu1 %9745  ;;  %v3196_v1 = vrot.slane %v12000_v52, 1  ;;  %v3197_v47 = vrot.slane %v12003_v24, 1  ;;  %v3266_v22 = vpack.c.bf16 %v12003_v24, %v12000_v52 }
 0x56b   :  { %v9748_v30 = vunpack.i.h.bf16 %v9746_v43  ;;  %v9747_v18 = vunpack.i.l.bf16 %v9746_v43  ;;  %v9751_v12 = vpop.permute.xlu0 %9750  ;;  %3569 = vmatpush1.bf16.msra.mxu1 %v9966_v6 }
 0x56c   :  { %v9753_v34 = vunpack.i.h.bf16 %v9751_v12  ;;  %v9752_v23 = vunpack.i.l.bf16 %v9751_v12  ;;  %3570 = vmatprep.subr.bf16.mxu1 %v9971_v38  ;;  %v12015_v28 = vsel %vm971_vm2, %v3195_v49, %v3196_v1  ;;  %v12021_v61 = vsel %vm971_vm2, %v3196_v1, %v3197_v47 }
 0x56d   :  { %v2877_v3 = vsel %vm2869_vm8, %v11878_v21, %v9748_v30  ;;  %v2876_v31 = vsel %vm2869_vm8, %v11881_v50, %v9747_v18  ;;  %v3676_v11 = vpack.c.bf16 %v12015_v28, %v11997_v42 }
 0x56e   :  { %v9756_v53 = vpop.permute.xlu1 %9755  ;;  %3422 = vmatmul.mubr.bf16.gmra.mrb[72].mxu1 %v3266_v22  ;;  %v2893_v56 = vsel %vm2886_vm9, %v2876_v31, %v9752_v23  ;;  %v2894_v50 = vsel %vm2886_vm9, %v2877_v3, %v9753_v34  ;;  %v9983_v34 = vld [vmem:[#allocation10 + $0x104] ss:$8 sps:$4 sm:$0xff]  }
 0x56f   :  { %v9758_v5 = vunpack.i.h.bf16 %v9756_v53  ;;  %v9757_v21 = vunpack.i.l.bf16 %v9756_v53  ;;  %3431 = vmatprep.mubr.bf16.mxu1 %v12912_v32  ;;  %3571 = vmatpush1.bf16.msra.mxu1 %v9969_v27 }
 0x570   :  { %3572 = vmatprep.subr.bf16.mxu1 %v9974_v20 }
 0x571   :  { %v12027_v9 = vsel %vm2903_vm10, %v2893_v56, %v9757_v21  ;;  %v12030_v63 = vsel %vm2903_vm10, %v2894_v50, %v9758_v5 }
 0x572   :  { %v9761_v45 = vpop.permute.xlu0 %9760  ;;  %v3198_v57 = vrot.slane %v12027_v9, 1  ;;  %v3199_v49 = vrot.slane %v12030_v63, 1  ;;  %v3267_v26 = vpack.c.bf16 %v12030_v63, %v12027_v9 }
 0x573   :  { %v9763_v44 = vunpack.i.h.bf16 %v9761_v45  ;;  %v9762_v60 = vunpack.i.l.bf16 %v9761_v45  ;;  %v9766_v19 = vpop.permute.xlu1 %9765  ;;  %3573 = vmatpush1.bf16.msra.mxu1 %v9972_v0 }
 0x574   :  { %v9768_v55 = vunpack.i.h.bf16 %v9766_v19  ;;  %v9767_v35 = vunpack.i.l.bf16 %v9766_v19  ;;  %3574 = vmatprep.subr.bf16.mxu1 %v9977_v40  ;;  %v12042_v6 = vsel %vm971_vm2, %v3197_v47, %v3198_v57  ;;  %v12048_v1 = vsel %vm971_vm2, %v3198_v57, %v3199_v49  ;;  %v9978_v47 = vld [vmem:[#allocation10 + $0x70] ss:$8 sps:$4 sm:$0xff]  }
 0x575   :  { %v2879_v37 = vsel %vm2869_vm8, %v11891_v58, %v9763_v44  ;;  %v2878_v33 = vsel %vm2869_vm8, %v11894_v62, %v9762_v60  ;;  %v3677_v43 = vpack.c.bf16 %v12042_v6, %v12021_v61 }
 0x576   :  { %v9771_v38 = vpop.permute.xlu0 %9770  ;;  %3432 = vmatmul.mubr.bf16.gmra.mrb[76].mxu1 %v3267_v26  ;;  %v2896_v18 = vsel %vm2886_vm9, %v2879_v37, %v9768_v55  ;;  %v2895_v62 = vsel %vm2886_vm9, %v2878_v33, %v9767_v35 }
 0x577   :  { %v9773_v30 = vunpack.i.h.bf16 %v9771_v38  ;;  %v9772_v58 = vunpack.i.l.bf16 %v9771_v38  ;;  %3441 = vmatprep.mubr.bf16.mxu1 %v12912_v32  ;;  %3575 = vmatpush1.bf16.msra.mxu1 %v9975_v14 }
 0x578   :  { %3576 = vmatprep.subr.bf16.mxu1 %v9980_v51 }
 0x579   :  { %v12054_v12 = vsel %vm2903_vm10, %v2895_v62, %v9772_v58  ;;  %v12057_v22 = vsel %vm2903_vm10, %v2896_v18, %v9773_v30 }
 0x57a   :  { %v9776_v23 = vpop.permute.xlu1 %9775  ;;  %v3200_v27 = vrot.slane %v12054_v12, 1  ;;  %v3201_v3 = vrot.slane %v12057_v22, 1  ;;  %v3268_v5 = vpack.c.bf16 %v12057_v22, %v12054_v12 }
 0x57b   :  { %v9778_v31 = vunpack.i.h.bf16 %v9776_v23  ;;  %v9777_v20 = vunpack.i.l.bf16 %v9776_v23  ;;  %v9781_v53 = vpop.permute.xlu0 %9780  ;;  %3577 = vmatpush1.bf16.msra.mxu1 %v9978_v47 }
 0x57c   :  { %v9783_v21 = vunpack.i.h.bf16 %v9781_v53  ;;  %v9782_v56 = vunpack.i.l.bf16 %v9781_v53  ;;  %3780 = vmatprep.subr.bf16.mxu1 %v9983_v34  ;;  %v12069_v40 = vsel %vm971_vm2, %v3199_v49, %v3200_v27  ;;  %v12075_v44 = vsel %vm971_vm2, %v3200_v27, %v3201_v3 }
 0x57d   :  { %v2881_v50 = vsel %vm2869_vm8, %v11904_v15, %v9778_v31  ;;  %v2880_v0 = vsel %vm2869_vm8, %v11907_v16, %v9777_v20  ;;  %v8981_v57 = vpack.c.bf16 %v12069_v40, %v12048_v1 }
 0x57e   :  { %v9786_v45 = vpop.permute.xlu1 %9785  ;;  %3442 = vmatmul.mubr.bf16.gmra.mrb[80].mxu1 %v3268_v5  ;;  %v2897_v15 = vsel %vm2886_vm9, %v2880_v0, %v9782_v56  ;;  %v2898_v16 = vsel %vm2886_vm9, %v2881_v50, %v9783_v21 }
 0x57f   :  { %v9788_v60 = vunpack.i.h.bf16 %v9786_v45  ;;  %v9787_v19 = vunpack.i.l.bf16 %v9786_v45  ;;  %3451 = vmatprep.mubr.bf16.mxu1 %v12912_v32 }
 0x581   :  { %v12081_v49 = vsel %vm2903_vm10, %v2897_v15, %v9787_v19  ;;  %v12084_v26 = vsel %vm2903_vm10, %v2898_v16, %v9788_v60 }
 0x582   :  { %v9791_v55 = vpop.permute.xlu0 %9790  ;;  %v3202_v35 = vrot.slane %v12081_v49, 1  ;;  %v3203_v14 = vrot.slane %v12084_v26, 1  ;;  %v3269_v38 = vpack.c.bf16 %v12084_v26, %v12081_v49 }
 0x583   :  { %v9793_v37 = vunpack.i.h.bf16 %v9791_v55  ;;  %v9792_v33 = vunpack.i.l.bf16 %v9791_v55  ;;  %v9796_v51 = vpop.permute.xlu1 %9795 }
 0x584   :  { %v9798_v30 = vunpack.i.h.bf16 %v9796_v51  ;;  %v9797_v58 = vunpack.i.l.bf16 %v9796_v51  ;;  %v12096_v47 = vsel %vm971_vm2, %v3201_v3, %v3202_v35  ;;  %v12102_v27 = vsel %vm971_vm2, %v3202_v35, %v3203_v14 }
 0x585   :  { %v2883_v18 = vsel %vm2869_vm8, %v11917_v17, %v9793_v37  ;;  %v2882_v62 = vsel %vm2869_vm8, %v11920_v59, %v9792_v33  ;;  %v3679_v23 = vpack.c.bf16 %v12096_v47, %v12075_v44 }
 0x586   :  { %v9801_v34 = vpop.permute.xlu0 %9800  ;;  %3452 = vmatmul.mubr.bf16.gmra.mrb[84].mxu1 %v3269_v38  ;;  %v2900_v17 = vsel %vm2886_vm9, %v2883_v18, %v9798_v30  ;;  %v2899_v53 = vsel %vm2886_vm9, %v2882_v62, %v9797_v58 }
 0x587   :  { %v9803_v31 = vunpack.i.h.bf16 %v9801_v34  ;;  %v9802_v20 = vunpack.i.l.bf16 %v9801_v34  ;;  %3461 = vmatprep.mubr.bf16.mxu1 %v12912_v32 }
 0x589   :  { %v12108_v59 = vsel %vm2903_vm10, %v2899_v53, %v9802_v20  ;;  %v12111_v3 = vsel %vm2903_vm10, %v2900_v17, %v9803_v31  ;;  %v2924_v20 = vand.u32 63, %v10733_v2 }
 0x58a   :  { %v9806_v5 = vpop.permute.xlu1 %9805  ;;  %v3204_v21 = vrot.slane %v12108_v59, 1  ;;  %v3205_v56 = vrot.slane %v12111_v3, 1  ;;  %v3270_v60 = vpack.c.bf16 %v12111_v3, %v12108_v59 }
 0x58b   :  { %v9808_v50 = vunpack.i.h.bf16 %v9806_v5  ;;  %v9807_v0 = vunpack.i.l.bf16 %v9806_v5  ;;  %v9811_v45 = vpop.permute.xlu0 %9810  ;;  %vm9144_vm11 = vcmp.ne.s32.totalorder %v2924_v20, 0 }
 0x58c   :  { %v9813_v19 = vunpack.i.h.bf16 %v9811_v45  ;;  %v9812_v15 = vunpack.i.l.bf16 %v9811_v45  ;;  %v12123_v35 = vsel %vm971_vm2, %v3203_v14, %v3204_v21  ;;  %v12129_v51 = vsel %vm971_vm2, %v3204_v21, %v3205_v56  ;;  %vm8956_vm13 = vmpackc.low %vm10455_vm12, %vm9144_vm11 }
 0x58d   :  { %v2885_v16 = vsel %vm2869_vm8, %v11930_v48, %v9808_v50  ;;  %v2884_v55 = vsel %vm2869_vm8, %v11933_v39, %v9807_v0  ;;  %v3680_v33 = vpack.c.bf16 %v12123_v35, %v12102_v27  ;;  %v3129_v50 = vrot.slane %v11950_v36, 7 }
 0x58e   :  { %v9816_v37 = vpop.permute.xlu1 %9815  ;;  %3462 = vmatmul.mubr.bf16.gmra.mrb[88].mxu1 %v3270_v60  ;;  %v2902_v48 = vsel %vm2886_vm9, %v2885_v16, %v9813_v19  ;;  %v2901_v58 = vsel %vm2886_vm9, %v2884_v55, %v9812_v15  ;;  %v3128_v0 = vrot.slane %v11953_v29, 7  ;;  %v9981_v60 = vld [vmem:[#allocation10 + $0x100] ss:$8 sps:$4 sm:$0xff]   ;;  %v9986_v15 = vld [vmem:[#allocation10 + $0x114] ss:$8 sps:$4 sm:$0xff]   ;;  %v3130_v36 = vrot.slane %v11973_v41, 7 }
 0x58f   :  { %v9818_v38 = vunpack.i.h.bf16 %v9816_v37  ;;  %v9817_v30 = vunpack.i.l.bf16 %v9816_v37  ;;  %3471 = vmatprep.mubr.bf16.mxu1 %v12912_v32  ;;  %v3131_v29 = vrot.slane %v11976_v10, 7  ;;  %v9984_v16 = vld [vmem:[#allocation10 + $0x110] ss:$8 sps:$4 sm:$0xff]   ;;  %v9989_v55 = vld [vmem:[#allocation10 + $0x124] ss:$8 sps:$4 sm:$0xff]   ;;  %v3132_v10 = vrot.slane %v12000_v52, 7 }
 0x590   :  { %v9992_v41 = vld [vmem:[#allocation10 + $0x134] ss:$8 sps:$4 sm:$0xff]  }
 0x591   :  { %v12135_v39 = vsel %vm2903_vm10, %v2901_v58, %v9817_v30  ;;  %v12138_v14 = vsel %vm2903_vm10, %v2902_v48, %v9818_v38  ;;  %v3156_v37 = vsel %vm842_vm1, %v3130_v36, %v3131_v29  ;;  %v3157_v38 = vsel %vm842_vm1, %v3129_v50, %v3130_v36  ;;  %v9987_v30 = vld [vmem:[#allocation10 + $0x120] ss:$8 sps:$4 sm:$0xff]   ;;  %v9998_v52 = vld [vmem:[#allocation10 + $0x154] ss:$8 sps:$4 sm:$0xff]  }
 0x592   :  { %v3206_v18 = vrot.slane %v12135_v39, 1  ;;  %v3207_v62 = vrot.slane %v12138_v14, 1  ;;  %v3271_v34 = vpack.c.bf16 %v12138_v14, %v12135_v39  ;;  %v3143_v5 = vrot.slane %v12138_v14, 7 }
 0x593   :  { %v3241_v48 = vpack.c.bf16 %v3156_v37, %v3157_v38  ;;  %v3133_v58 = vrot.slane %v12003_v24, 7  ;;  %v3155_v20 = vsel %vm842_vm1, %v3131_v29, %v3132_v10  ;;  %v3134_v24 = vrot.slane %v12027_v9, 7  ;;  %v9999_v29 = vld [vmem:[#allocation10 + $0x160] ss:$8 sps:$4 sm:$0xff]   ;;  %v10002_v38 = vld [vmem:[#allocation10 + $0x170] ss:$8 sps:$4 sm:$0xff]  }
 0x594   :  { %v12146_v31 = vsel %vm971_vm2, %v3205_v56, %v3206_v18  ;;  %v12153_v53 = vsel %vm971_vm2, %v3206_v18, %v3207_v62  ;;  %v12160_v21 = vsel %vm971_vm2, %v3207_v62, %v3192_v8  ;;  %v3159_v45 = vsel %vm842_vm1, %v3143_v5, %v3128_v0  ;;  %v9990_v18 = vld [vmem:[#allocation10 + $0x130] ss:$8 sps:$4 sm:$0xff]   ;;  %v9995_v62 = vld [vmem:[#allocation10 + $0x144] ss:$8 sps:$4 sm:$0xff]  }
 0x595   :  { %v3681_v17 = vpack.c.bf16 %v12146_v31, %v12129_v51  ;;  %v8985_v56 = vpack.c.bf16 %v12160_v21, %v12153_v53  ;;  %v3158_v8 = vsel %vm842_vm1, %v3128_v0, %v3129_v50  ;;  %v9993_v50 = vld [vmem:[#allocation10 + $0x140] ss:$8 sps:$4 sm:$0xff]   ;;  %v3153_v36 = vsel %vm842_vm1, %v3133_v58, %v3134_v24 }
 0x596   :  { %3472 = vmatmul.mubr.bf16.gmra.mrb[92].mxu1 %v3271_v34  ;;  %v8957_v19 = vpack.c.bf16 %v3158_v8, %v3159_v45  ;;  %v3154_v34 = vsel %vm842_vm1, %v3132_v10, %v3133_v58  ;;  %v3135_v45 = vrot.slane %v12030_v63, 7  ;;  %v9996_v8 = vld [vmem:[#allocation10 + $0x150] ss:$8 sps:$4 sm:$0xff]   ;;  %v10004_v63 = vld [vmem:[#allocation10 + $0x174] ss:$8 sps:$4 sm:$0xff]   ;;  %v3137_v37 = vrot.slane %v12057_v22, 7 }
 0x597   :  { %3594 = vmatprep.mubr.bf16.mxu1 %v12912_v32  ;;  %v3242_v0 = vpack.c.bf16 %v3154_v34, %v3155_v20  ;;  %v3139_v22 = vrot.slane %v12084_v26, 7  ;;  %v3141_v34 = vrot.slane %v12111_v3, 7 }
 0x59e   :  { %8958 = vmatmul.mubr.msk.bf16.vlgmr.msra.gmra.mrb[64].mxu1 %vm8956_vm13, %v8957_v19  ;;  %v10001_v19 = vld [vmem:[#allocation10 + $0x164] ss:$8 sps:$4 sm:$0xff]  }
 0x59f   :  { %3604 = vmatprep.mubr.bf16.mxu1 %v12912_v32  ;;  %3781 = vmatpush1.bf16.msra.mxu1 %v9981_v60  ;;  %v370_v60 = vadd.s32 64, %v10733_v2 }
 0x5a0   :  { %3782 = vmatprep.subr.bf16.mxu1 %v9986_v15  ;;  %v3152_v15 = vsel %vm842_vm1, %v3134_v24, %v3135_v45 }
 0x5a1   :  { %v3243_v9 = vpack.c.bf16 %v3152_v15, %v3153_v36 }
 0x5a3   :  { %3783 = vmatpush1.bf16.msra.mxu1 %v9984_v16  ;;  %v2980_v16 = vand.u32 63, %v370_v60 }
 0x5a4   :  { %3784 = vmatprep.subr.bf16.mxu1 %v9989_v55  ;;  %v3136_v55 = vrot.slane %v12054_v12, 7  ;;  %v3138_v12 = vrot.slane %v12081_v49, 7 }
 0x5a5   :  { %vm9145_vm14 = vcmp.ne.s32.totalorder %v2980_v16, 0 }
 0x5a6   :  { %3605 = vmatmul.mubr.bf16.gmra.mrb[68].mxu1 %v3241_v48  ;;  %v3151_v48 = vsel %vm842_vm1, %v3135_v45, %v3136_v55  ;;  %vm8960_vm15 = vmpackc.low %vm10455_vm12, %vm9145_vm14  ;;  %v3148_v10 = vsel %vm842_vm1, %v3138_v12, %v3139_v22  ;;  %v3149_v58 = vsel %vm842_vm1, %v3137_v37, %v3138_v12 }
 0x5a7   :  { %3614 = vmatprep.mubr.bf16.mxu1 %v12912_v32  ;;  %3785 = vmatpush1.bf16.msra.mxu1 %v9987_v30  ;;  %v3150_v30 = vsel %vm842_vm1, %v3136_v55, %v3137_v37 }
 0x5a8   :  { %3786 = vmatprep.subr.bf16.mxu1 %v9992_v41  ;;  %v8961_v41 = vpack.c.bf16 %v3150_v30, %v3151_v48 }
 0x5ab   :  { %3787 = vmatpush1.bf16.msra.mxu1 %v9990_v18  ;;  %v3245_v18 = vpack.c.bf16 %v3148_v10, %v3149_v58 }
 0x5ac   :  { %3788 = vmatprep.subr.bf16.mxu1 %v9995_v62  ;;  %v3140_v62 = vrot.slane %v12108_v59, 7 }
 0x5ae   :  { %3615 = vmatmul.mubr.bf16.gmra.mrb[72].mxu1 %v3242_v0  ;;  %v3146_v49 = vsel %vm842_vm1, %v3140_v62, %v3141_v34  ;;  %v3147_v26 = vsel %vm842_vm1, %v3139_v22, %v3140_v62 }
 0x5af   :  { %3624 = vmatprep.mubr.bf16.mxu1 %v12912_v32  ;;  %3789 = vmatpush1.bf16.msra.mxu1 %v9993_v50  ;;  %v3246_v20 = vpack.c.bf16 %v3146_v49, %v3147_v26  ;;  %v3142_v50 = vrot.slane %v12135_v39, 7  ;;  %v12236_v39 = vadd.s32 56, %v10733_v2 }
 0x5b0   :  { %3790 = vmatprep.subr.bf16.mxu1 %v9998_v52 }
 0x5b1   :  { %v3144_v59 = vsel %vm842_vm1, %v3142_v50, %v3143_v5  ;;  %v3145_v3 = vsel %vm842_vm1, %v3141_v34, %v3142_v50  ;;  %v2973_v14 = vand.u32 63, %v12236_v39 }
 0x5b2   :  { %v3247_v0 = vpack.c.bf16 %v3144_v59, %v3145_v3 }
 0x5b3   :  { %3791 = vmatpush1.bf16.msra.mxu1 %v9996_v8  ;;  %vm9146_vm0 = vcmp.ne.s32.totalorder %v2973_v14, 63 }
 0x5b4   :  { %3792 = vmatprep.subr.bf16.mxu1 %v10001_v19  ;;  %vm8980_vm3 = vmpackc.low %vm9146_vm0, %vm10455_vm12 }
 0x5b6   :  { %3625 = vmatmul.mubr.bf16.gmra.mrb[76].mxu1 %v3243_v9 }
 0x5b7   :  { %3634 = vmatprep.mubr.bf16.mxu1 %v12912_v32  ;;  %3793 = vmatpush1.bf16.msra.mxu1 %v9999_v29 }
 0x5b8   :  { %3794 = vmatprep.subr.bf16.mxu1 %v10004_v63 }
 0x5bb   :  { %3795 = vmatpush1.bf16.msra.mxu1 %v10002_v38 }
 0x5be   :  { %8962 = vmatmul.mubr.msk.bf16.gmra.mrb[80].mxu1 %vm8960_vm15, %v8961_v41  ;;  %vm5447_vm15 = vsmask.f32 7938 }
 0x5bf   :  { %3644 = vmatprep.mubr.bf16.mxu1 %v12912_v32 }
 0x5c6   :  { %3645 = vmatmul.mubr.bf16.gmra.mrb[84].mxu1 %v3245_v18 }
 0x5c7   :  { %3654 = vmatprep.mubr.bf16.mxu1 %v12912_v32 }
 0x5ce   :  { %3655 = vmatmul.mubr.bf16.gmra.mrb[88].mxu1 %v3246_v20 }
 0x5cf   :  { %3664 = vmatprep.mubr.bf16.mxu1 %v12912_v32 }
 0x5d6   :  { %3665 = vmatmul.mubr.bf16.gmra.mrb[92].mxu1 %v3247_v0 }
 0x5d7   :  { %3812 = vmatprep.mubr.bf16.mxu1 %v12912_v32 }
 0x5de   :  { %3813 = vmatmul.mubr.bf16.vlgmr.msra.gmra.mrb[64].mxu1 %v3675_v54  ;;  %v12267_v54 = vrot.slane %v3925_v25, %v11475_v4 }
 0x5df   :  { %3822 = vmatprep.mubr.bf16.mxu1 %v12912_v32 }
 0x5e6   :  { %3823 = vmatmul.mubr.bf16.gmra.mrb[68].mxu1 %v3676_v11 }
 0x5e7   :  { %3832 = vmatprep.mubr.bf16.mxu1 %v12912_v32 }
 0x5ee   :  { %3833 = vmatmul.mubr.bf16.gmra.mrb[72].mxu1 %v3677_v43 }
 0x5ef   :  { %3842 = vmatprep.mubr.bf16.mxu1 %v12912_v32 }
 0x5f6   :  { %8982 = vmatmul.mubr.msk.bf16.gmra.mrb[76].mxu1 %vm8980_vm3, %v8981_v57 }
 0x5f7   :  { %3852 = vmatprep.mubr.bf16.mxu1 %v12912_v32 }
 0x5fe   :  { %3853 = vmatmul.mubr.bf16.gmra.mrb[80].mxu1 %v3679_v23 }
 0x5ff   :  { %3862 = vmatprep.mubr.bf16.mxu1 %v12912_v32 }
 0x606   :  { %3863 = vmatmul.mubr.bf16.gmra.mrb[84].mxu1 %v3680_v33 }
 0x607   :  { %3872 = vmatprep.mubr.bf16.mxu1 %v12912_v32 }
 0x60e   :  { %3873 = vmatmul.mubr.bf16.gmra.mrb[88].mxu1 %v3681_v17 }
 0x60f   :  { %3882 = vmatprep.mubr.bf16.mxu1 %v12912_v32 }
 0x616   :  { %8986 = vmatmul.mubr.msk.bf16.gmra.mrb[92].mxu1 %vm8984_vm5, %v8985_v56 }
 0x617   :  { %4081 = vmatprep.mubr.bf16.mxu1 %v12912_v32 }
 0x6b1   :  { %v3814_v42 = vpop.f32.mrb[64].mxu1 }
 0x6b2   :  { %v3937_v28 = vadd.f32 %v12267_v54, %v3814_v42  ;;  %v3816_v11 = vpop.f32.mrb[65].mxu1 }
 0x6b3   :  { %v3938_v61 = vadd.f32 %v12270_v7, %v3816_v11  ;;  %v3818_v6 = vpop.f32.mrb[66].mxu1 }
 0x6b4   :  { %v3939_v43 = vadd.f32 %v12267_v54, %v3818_v6  ;;  %v3820_v1 = vpop.f32.mrb[67].mxu1  ;;  %v3969_v57 = vmax.f32 %v3937_v28, 0.0 }
 0x6b5   :  { %v3940_v40 = vadd.f32 %v12270_v7, %v3820_v1  ;;  %v3970_v47 = vmax.f32 %v3938_v61, 0.0 }
 0x6b6   :  { %v3971_v44 = vmax.f32 %v3939_v43, 0.0 }
 0x6b7   :  { %v3972_v23 = vmax.f32 %v3940_v40, 0.0 }
 0x6b8   :  { %v4001_v27 = vpack.c.bf16 %v3971_v44, %v3969_v57 }
 0x6b9   :  { %v4002_v35 = vpack.c.bf16 %v3972_v23, %v3970_v47  ;;  %v3824_v33 = vpop.f32.mrb[68].mxu1 }
 0x6ba   :  { %v3941_v51 = vadd.f32 %v12267_v54, %v3824_v33  ;;  %v3826_v31 = vpop.f32.mrb[69].mxu1 }
 0x6bb   :  { %v3942_v17 = vadd.f32 %v12270_v7, %v3826_v31  ;;  %v3828_v53 = vpop.f32.mrb[70].mxu1  ;;  %4049 = vmatprep.subr.bf16.mxu1 %v4002_v35  ;;  %4154 = vmatprep.subr.bf16.mxu0 %v4002_v35 }
 0x6bc   :  { %v3943_v5 = vadd.f32 %v12267_v54, %v3828_v53  ;;  %v3830_v21 = vpop.f32.mrb[71].mxu1  ;;  %4050 = vmatpush1.bf16.msra.mxu1 %v4001_v27  ;;  %4155 = vmatpush1.bf16.msra.mxu0 %v4001_v27  ;;  %v3973_v52 = vmax.f32 %v3941_v51, 0.0 }
 0x6bd   :  { %v3944_v56 = vadd.f32 %v12270_v7, %v3830_v21  ;;  %v3974_v45 = vmax.f32 %v3942_v17, 0.0 }
 0x6be   :  { %v3975_v24 = vmax.f32 %v3943_v5, 0.0 }
 0x6bf   :  { %v3976_v8 = vmax.f32 %v3944_v56, 0.0 }
 0x6c0   :  { %v4003_v60 = vpack.c.bf16 %v3975_v24, %v3973_v52 }
 0x6c1   :  { %v4004_v19 = vpack.c.bf16 %v3976_v8, %v3974_v45  ;;  %v3834_v15 = vpop.f32.mrb[72].mxu1 }
 0x6c2   :  { %v3945_v36 = vadd.f32 %v12267_v54, %v3834_v15  ;;  %v3836_v29 = vpop.f32.mrb[73].mxu1 }
 0x6c3   :  { %v3946_v9 = vadd.f32 %v12270_v7, %v3836_v29  ;;  %v3838_v16 = vpop.f32.mrb[74].mxu1  ;;  %4051 = vmatprep.subr.bf16.mxu1 %v4004_v19  ;;  %4156 = vmatprep.subr.bf16.mxu0 %v4004_v19 }
 0x6c4   :  { %v3947_v63 = vadd.f32 %v12267_v54, %v3838_v16  ;;  %v3840_v55 = vpop.f32.mrb[75].mxu1  ;;  %4052 = vmatpush1.bf16.msra.mxu1 %v4003_v60  ;;  %4157 = vmatpush1.bf16.msra.mxu0 %v4003_v60  ;;  %v3977_v38 = vmax.f32 %v3945_v36, 0.0 }
 0x6c5   :  { %v3948_v37 = vadd.f32 %v12270_v7, %v3840_v55  ;;  %v3978_v48 = vmax.f32 %v3946_v9, 0.0 }
 0x6c6   :  { %v3979_v30 = vmax.f32 %v3947_v63, 0.0 }
 0x6c7   :  { %v3980_v41 = vmax.f32 %v3948_v37, 0.0 }
 0x6c8   :  { %v4005_v12 = vpack.c.bf16 %v3979_v30, %v3977_v38 }
 0x6c9   :  { %v4006_v22 = vpack.c.bf16 %v3980_v41, %v3978_v48  ;;  %v3844_v10 = vpop.f32.mrb[76].mxu1 }
 0x6ca   :  { %v3949_v58 = vadd.f32 %v12267_v54, %v3844_v10  ;;  %v3846_v18 = vpop.f32.mrb[77].mxu1 }
 0x6cb   :  { %v3950_v62 = vadd.f32 %v12270_v7, %v3846_v18  ;;  %v3848_v34 = vpop.f32.mrb[78].mxu1  ;;  %4053 = vmatprep.subr.bf16.mxu1 %v4006_v22  ;;  %4158 = vmatprep.subr.bf16.mxu0 %v4006_v22 }
 0x6cc   :  { %v3951_v49 = vadd.f32 %v12267_v54, %v3848_v34  ;;  %v3850_v26 = vpop.f32.mrb[79].mxu1  ;;  %4054 = vmatpush1.bf16.msra.mxu1 %v4005_v12  ;;  %4159 = vmatpush1.bf16.msra.mxu0 %v4005_v12  ;;  %v3981_v50 = vmax.f32 %v3949_v58, 0.0 }
 0x6cd   :  { %v3952_v20 = vadd.f32 %v12270_v7, %v3850_v26  ;;  %v3982_v3 = vmax.f32 %v3950_v62, 0.0 }
 0x6ce   :  { %v3983_v59 = vmax.f32 %v3951_v49, 0.0 }
 0x6cf   :  { %v3984_v0 = vmax.f32 %v3952_v20, 0.0 }
 0x6d0   :  { %v4007_v14 = vpack.c.bf16 %v3983_v59, %v3981_v50 }
 0x6d1   :  { %v4008_v13 = vpack.c.bf16 %v3984_v0, %v3982_v3  ;;  %v3854_v25 = vpop.f32.mrb[80].mxu1 }
 0x6d2   :  { %v3953_v42 = vadd.f32 %v12267_v54, %v3854_v25  ;;  %v3856_v28 = vpop.f32.mrb[81].mxu1  ;;  %v10006_v25 = vld [vmem:[#allocation17] ss:$8 sps:$4 sm:$0xff]  }
 0x6d3   :  { %v3954_v11 = vadd.f32 %v12270_v7, %v3856_v28  ;;  %v3858_v61 = vpop.f32.mrb[82].mxu1  ;;  %4055 = vmatprep.subr.bf16.mxu1 %v4008_v13  ;;  %4160 = vmatprep.subr.bf16.mxu0 %v4008_v13  ;;  %v10005_v13 = vld [vmem:[#allocation16] ss:$8 sps:$4 sm:$0xff]  }
 0x6d4   :  { %v3955_v6 = vadd.f32 %v12267_v54, %v3858_v61  ;;  %v3860_v43 = vpop.f32.mrb[83].mxu1  ;;  %4056 = vmatpush1.bf16.msra.mxu1 %v4007_v14  ;;  %4161 = vmatpush1.bf16.msra.mxu0 %v4007_v14  ;;  %v3985_v40 = vmax.f32 %v3953_v42, 0.0  ;;  %v10009_v42 = vld [vmem:[#allocation16 + $0x20] ss:$8 sps:$4 sm:$0xff]   ;;  %v10012_v61 = vld [vmem:[#allocation17 + $0x30] ss:$8 sps:$4 sm:$0xff]  }
 0x6d5   :  { %v3956_v1 = vadd.f32 %v12270_v7, %v3860_v43  ;;  %v3986_v44 = vmax.f32 %v3954_v11, 0.0  ;;  %v10010_v28 = vld [vmem:[#allocation17 + $0x20] ss:$8 sps:$4 sm:$0xff]   ;;  %v10011_v11 = vld [vmem:[#allocation16 + $0x30] ss:$8 sps:$4 sm:$0xff]  }
 0x6d6   :  { %v3987_v57 = vmax.f32 %v3955_v6, 0.0 }
 0x6d7   :  { %v3988_v47 = vmax.f32 %v3956_v1, 0.0 }
 0x6d8   :  { %v4009_v23 = vpack.c.bf16 %v3987_v57, %v3985_v40 }
 0x6d9   :  { %v4010_v27 = vpack.c.bf16 %v3988_v47, %v3986_v44  ;;  %v3864_v35 = vpop.f32.mrb[84].mxu1 }
 0x6da   :  { %v3957_v33 = vadd.f32 %v12267_v54, %v3864_v35  ;;  %v3866_v51 = vpop.f32.mrb[85].mxu1 }
 0x6db   :  { %v3958_v31 = vadd.f32 %v12270_v7, %v3866_v51  ;;  %v3868_v17 = vpop.f32.mrb[86].mxu1  ;;  %4057 = vmatprep.subr.bf16.mxu1 %v4010_v27  ;;  %4162 = vmatprep.subr.bf16.mxu0 %v4010_v27 }
 0x6dc   :  { %v3959_v53 = vadd.f32 %v12267_v54, %v3868_v17  ;;  %v3870_v5 = vpop.f32.mrb[87].mxu1  ;;  %4058 = vmatpush1.bf16.msra.mxu1 %v4009_v23  ;;  %4163 = vmatpush1.bf16.msra.mxu0 %v4009_v23  ;;  %v3989_v56 = vmax.f32 %v3957_v33, 0.0 }
 0x6dd   :  { %v3960_v21 = vadd.f32 %v12270_v7, %v3870_v5  ;;  %v3990_v24 = vmax.f32 %v3958_v31, 0.0 }
 0x6de   :  { %v3991_v52 = vmax.f32 %v3959_v53, 0.0 }
 0x6df   :  { %v3992_v45 = vmax.f32 %v3960_v21, 0.0 }
 0x6e0   :  { %v4011_v8 = vpack.c.bf16 %v3991_v52, %v3989_v56 }
 0x6e1   :  { %v4012_v60 = vpack.c.bf16 %v3992_v45, %v3990_v24  ;;  %v3874_v19 = vpop.f32.mrb[88].mxu1 }
 0x6e2   :  { %v3961_v15 = vadd.f32 %v12267_v54, %v3874_v19  ;;  %v3876_v36 = vpop.f32.mrb[89].mxu1 }
 0x6e3   :  { %v3962_v29 = vadd.f32 %v12270_v7, %v3876_v36  ;;  %v3878_v9 = vpop.f32.mrb[90].mxu1  ;;  %4059 = vmatprep.subr.bf16.mxu1 %v4012_v60  ;;  %4164 = vmatprep.subr.bf16.mxu0 %v4012_v60 }
 0x6e4   :  { %v3963_v16 = vadd.f32 %v12267_v54, %v3878_v9  ;;  %v3880_v63 = vpop.f32.mrb[91].mxu1  ;;  %4060 = vmatpush1.bf16.msra.mxu1 %v4011_v8  ;;  %4165 = vmatpush1.bf16.msra.mxu0 %v4011_v8  ;;  %v3993_v37 = vmax.f32 %v3961_v15, 0.0 }
 0x6e5   :  { %v3964_v55 = vadd.f32 %v12270_v7, %v3880_v63  ;;  %v3994_v30 = vmax.f32 %v3962_v29, 0.0 }
 0x6e6   :  { %v3995_v38 = vmax.f32 %v3963_v16, 0.0 }
 0x6e7   :  { %v3996_v48 = vmax.f32 %v3964_v55, 0.0 }
 0x6e8   :  { %v4013_v41 = vpack.c.bf16 %v3995_v38, %v3993_v37 }
 0x6e9   :  { %v4014_v12 = vpack.c.bf16 %v3996_v48, %v3994_v30  ;;  %v3884_v22 = vpop.f32.mrb[92].mxu1 }
 0x6ea   :  { %v3965_v10 = vadd.f32 %v12267_v54, %v3884_v22  ;;  %v3886_v58 = vpop.f32.mrb[93].mxu1 }
 0x6eb   :  { %v3966_v18 = vadd.f32 %v12270_v7, %v3886_v58  ;;  %v3888_v62 = vpop.f32.mrb[94].mxu1  ;;  %4061 = vmatprep.subr.bf16.mxu1 %v4014_v12  ;;  %4166 = vmatprep.subr.bf16.mxu0 %v4014_v12 }
 0x6ec   :  { %v3967_v34 = vadd.f32 %v12267_v54, %v3888_v62  ;;  %v3890_v49 = vpop.f32.mrb[95].mxu1  ;;  %4062 = vmatpush1.bf16.msra.mxu1 %v4013_v41  ;;  %4167 = vmatpush1.bf16.msra.mxu0 %v4013_v41  ;;  %v3997_v20 = vmax.f32 %v3965_v10, 0.0  ;;  %v10007_v54 = vld [vmem:[#allocation16 + $0x10] ss:$8 sps:$4 sm:$0xff]  }
 0x6ed   :  { %v3968_v26 = vadd.f32 %v12270_v7, %v3890_v49  ;;  %v3998_v59 = vmax.f32 %v3966_v18, 0.0  ;;  %v10008_v7 = vld [vmem:[#allocation17 + $0x10] ss:$8 sps:$4 sm:$0xff]  }
 0x6ee   :  { %v3999_v50 = vmax.f32 %v3967_v34, 0.0 }
 0x6ef   :  { %v4000_v3 = vmax.f32 %v3968_v26, 0.0 }
 0x6f0   :  { %v4015_v0 = vpack.c.bf16 %v3999_v50, %v3997_v20 }
 0x6f1   :  { %v4016_v14 = vpack.c.bf16 %v4000_v3, %v3998_v59 }
 0x6f3   :  { %4063 = vmatprep.subr.bf16.mxu1 %v4016_v14  ;;  %4168 = vmatprep.subr.bf16.mxu0 %v4016_v14 }
 0x6f4   :  { %4064 = vmatpush1.bf16.msra.mxu1 %v4015_v0  ;;  %4169 = vmatpush1.bf16.msra.mxu0 %v4015_v0 }
 0x6f7   :  { %4082 = vmatmul.mubr.bf16.vlgmr.msra.gmra.mrb[96].mxu1 %v10005_v13  ;;  %4187 = vmatmul.mubr.bf16.vlgmr.msra.gmra.mrb[64].mxu0 %v10006_v25  ;;  %v10013_v25 = vld [vmem:[#allocation13 + $0x80] ss:$8 sps:$4 sm:$0xff]  }
 0x6f8   :  { %4091 = vmatprep.mubr.bf16.mxu1 %v12912_v32  ;;  %4196 = vmatprep.mubr.bf16.mxu0 %v12912_v32 }
 0x6ff   :  { %4092 = vmatmul.mubr.bf16.gmra.mrb[100].mxu1 %v10007_v54  ;;  %4197 = vmatmul.mubr.bf16.gmra.mrb[68].mxu0 %v10008_v7  ;;  %v10015_v54 = vld [vmem:[#allocation13 + $0x84] ss:$8 sps:$4 sm:$0xff]  }
 0x700   :  { %4101 = vmatprep.mubr.bf16.mxu1 %v12912_v32  ;;  %4206 = vmatprep.mubr.bf16.mxu0 %v12912_v32 }
 0x701   :  { %4644 = vmatprep.subr.bf16.mxu1 %v10015_v54 }
 0x702   :  { %4645 = vmatpush1.bf16.msra.mxu1 %v10013_v25 }
 0x707   :  { %4102 = vmatmul.mubr.bf16.gmra.mrb[104].mxu1 %v10009_v42  ;;  %4207 = vmatmul.mubr.bf16.gmra.mrb[72].mxu0 %v10010_v28  ;;  %v10018_v28 = vld [vmem:[#allocation13 + $0x94] ss:$8 sps:$4 sm:$0xff]  }
 0x708   :  { %4111 = vmatprep.mubr.bf16.mxu1 %v12912_v32  ;;  %4216 = vmatprep.mubr.bf16.mxu0 %v12912_v32 }
 0x709   :  { %4646 = vmatprep.subr.bf16.mxu1 %v10018_v28 }
 0x70f   :  { %4112 = vmatmul.mubr.bf16.gmra.mrb[108].mxu1 %v10011_v11  ;;  %4217 = vmatmul.mubr.bf16.gmra.mrb[76].mxu0 %v10012_v61  ;;  %v10016_v11 = vld [vmem:[#allocation13 + $0x90] ss:$8 sps:$4 sm:$0xff]  }
 0x710   :  { %4676 = vmatprep.mubr.bf16.mxu1 %v12912_v32  ;;  %5164 = vmatprep.mubr.bf16.mxu0 %v12912_v32 }
 0x711   :  { %4647 = vmatpush1.bf16.msra.mxu1 %v10016_v11 }
 0x7ca   :  { %v4083_v6 = vpop.f32.mrb[96].mxu1  ;;  %v4188_v43 = vpop.f32.mrb[64].mxu0 }
 0x7cb   :  { %v12312_v1 = vmax.f32 %v4083_v6, %v4188_v43  ;;  %v4085_v40 = vpop.f32.mrb[97].mxu1  ;;  %v4190_v57 = vpop.f32.mrb[65].mxu0  ;;  %v10021_v6 = vld [vmem:[#allocation13 + $0xa4] ss:$8 sps:$4 sm:$0xff]   ;;  %v10019_v43 = vld [vmem:[#allocation13 + $0xa0] ss:$8 sps:$4 sm:$0xff]  }
 0x7cc   :  { %v12314_v44 = vmax.f32 %v4085_v40, %v4190_v57  ;;  %v4087_v47 = vpop.f32.mrb[98].mxu1  ;;  %v4192_v23 = vpop.f32.mrb[66].mxu0  ;;  %4648 = vmatprep.subr.bf16.mxu1 %v10021_v6  ;;  %v10024_v57 = vld [vmem:[#allocation13 + $0xb4] ss:$8 sps:$4 sm:$0xff]  }
 0x7cd   :  { %v12316_v27 = vmax.f32 %v4087_v47, %v4192_v23  ;;  %v4089_v35 = vpop.f32.mrb[99].mxu1  ;;  %v4194_v33 = vpop.f32.mrb[67].mxu0  ;;  %4649 = vmatpush1.bf16.msra.mxu1 %v10019_v43  ;;  %v10022_v47 = vld [vmem:[#allocation13 + $0xb0] ss:$8 sps:$4 sm:$0xff]   ;;  %v10027_v23 = vld [vmem:[#allocation13 + $0xc4] ss:$8 sps:$4 sm:$0xff]  }
 0x7ce   :  { %v12318_v51 = vmax.f32 %v4089_v35, %v4194_v33  ;;  %4650 = vmatprep.subr.bf16.mxu1 %v10024_v57  ;;  %v10025_v35 = vld [vmem:[#allocation13 + $0xc0] ss:$8 sps:$4 sm:$0xff]   ;;  %v10030_v33 = vld [vmem:[#allocation13 + $0xd4] ss:$8 sps:$4 sm:$0xff]  }
 0x7cf   :  { %v9839_v59 = vpack.i.bf16 %v12316_v27, %v12312_v1 }
 0x7d0   :  { %v9819_v31 = vpack.i.bf16 %v12318_v51, %v12314_v44 }
 0x7d1   :  { %4651 = vmatpush1.bf16.msra.mxu1 %v10022_v47 }
 0x7d2   :  { %v4198_v17 = vpop.f32.mrb[68].mxu0  ;;  %9820 = vrot.lane.b32.xlu0 %v9819_v31, %s10430_s8  ;;  %v4093_v53 = vpop.f32.mrb[100].mxu1  ;;  %4652 = vmatprep.subr.bf16.mxu1 %v10027_v23  ;;  %v10028_v31 = vld [vmem:[#allocation13 + $0xd0] ss:$8 sps:$4 sm:$0xff]  }
 0x7d3   :  { %v12323_v5 = vmax.f32 %v4093_v53, %v4198_v17  ;;  %v4095_v21 = vpop.f32.mrb[101].mxu1  ;;  %v4200_v56 = vpop.f32.mrb[69].mxu0  ;;  %v10033_v17 = vld [vmem:[#allocation13 + $0xe4] ss:$8 sps:$4 sm:$0xff]   ;;  %v10031_v53 = vld [vmem:[#allocation13 + $0xe0] ss:$8 sps:$4 sm:$0xff]  }
 0x7d4   :  { %v12325_v52 = vmax.f32 %v4095_v21, %v4200_v56  ;;  %v4097_v24 = vpop.f32.mrb[102].mxu1  ;;  %v4202_v45 = vpop.f32.mrb[70].mxu0  ;;  %v10036_v21 = vld [vmem:[#allocation13 + $0xf4] ss:$8 sps:$4 sm:$0xff]   ;;  %v10034_v56 = vld [vmem:[#allocation13 + $0xf0] ss:$8 sps:$4 sm:$0xff]  }
 0x7d5   :  { %v12327_v8 = vmax.f32 %v4097_v24, %v4202_v45  ;;  %v4099_v60 = vpop.f32.mrb[103].mxu1  ;;  %v4204_v19 = vpop.f32.mrb[71].mxu0  ;;  %4653 = vmatpush1.bf16.msra.mxu1 %v10025_v35  ;;  %v10039_v24 = vld [vmem:[#allocation13 + $0x4] ss:$8 sps:$4 sm:$0xff]  }
 0x7d6   :  { %v12329_v15 = vmax.f32 %v4099_v60, %v4204_v19  ;;  %4654 = vmatprep.subr.bf16.mxu1 %v10030_v33  ;;  %v10045_v33 = vld [vmem:[#allocation13 + $0x24] ss:$8 sps:$4 sm:$0xff]  }
 0x7d7   :  { %v9849_v7 = vpack.i.bf16 %v12327_v8, %v12323_v5 }
 0x7d8   :  { %v9824_v36 = vpack.i.bf16 %v12329_v15, %v12325_v52 }
 0x7d9   :  { %4655 = vmatpush1.bf16.msra.mxu1 %v10028_v31 }
 0x7da   :  { %v4208_v29 = vpop.f32.mrb[72].mxu0  ;;  %9825 = vrot.lane.b32.xlu1 %v9824_v36, %s10430_s8  ;;  %v4103_v9 = vpop.f32.mrb[104].mxu1  ;;  %4656 = vmatprep.subr.bf16.mxu1 %v10033_v17 }
 0x7db   :  { %v12334_v16 = vmax.f32 %v4103_v9, %v4208_v29  ;;  %v4105_v63 = vpop.f32.mrb[105].mxu1  ;;  %v4210_v55 = vpop.f32.mrb[73].mxu0 }
 0x7dc   :  { %v12336_v37 = vmax.f32 %v4105_v63, %v4210_v55  ;;  %v4107_v38 = vpop.f32.mrb[106].mxu1  ;;  %v4212_v30 = vpop.f32.mrb[74].mxu0 }
 0x7dd   :  { %v12338_v48 = vmax.f32 %v4107_v38, %v4212_v30  ;;  %v4109_v41 = vpop.f32.mrb[107].mxu1  ;;  %v4214_v12 = vpop.f32.mrb[75].mxu0  ;;  %4657 = vmatpush1.bf16.msra.mxu1 %v10031_v53 }
 0x7de   :  { %v12340_v22 = vmax.f32 %v4109_v41, %v4214_v12  ;;  %4658 = vmatprep.subr.bf16.mxu1 %v10036_v21  ;;  %v10043_v21 = vld [vmem:[#allocation13 + $0x20] ss:$8 sps:$4 sm:$0xff]  }
 0x7df   :  { %v9859_v61 = vpack.i.bf16 %v12338_v48, %v12334_v16 }
 0x7e0   :  { %v9829_v10 = vpack.i.bf16 %v12340_v22, %v12336_v37 }
 0x7e1   :  { %4659 = vmatpush1.bf16.msra.mxu1 %v10034_v56 }
 0x7e2   :  { %v4218_v58 = vpop.f32.mrb[76].mxu0  ;;  %9830 = vrot.lane.b32.xlu0 %v9829_v10, %s10430_s8  ;;  %v4113_v18 = vpop.f32.mrb[108].mxu1  ;;  %4797 = vmatprep.subr.bf16.mxu1 %v10039_v24 }
 0x7e3   :  { %v12345_v62 = vmax.f32 %v4113_v18, %v4218_v58  ;;  %v4115_v34 = vpop.f32.mrb[109].mxu1  ;;  %v4220_v49 = vpop.f32.mrb[77].mxu0 }
 0x7e4   :  { %v12347_v26 = vmax.f32 %v4115_v34, %v4220_v49  ;;  %v4117_v20 = vpop.f32.mrb[110].mxu1  ;;  %v4222_v50 = vpop.f32.mrb[78].mxu0 }
 0x7e5   :  { %v12351_v3 = vmax.f32 %v4117_v20, %v4222_v50  ;;  %v4119_v0 = vpop.f32.mrb[111].mxu1  ;;  %v4224_v14 = vpop.f32.mrb[79].mxu0 }
 0x7e6   :  { %v12353_v13 = vmax.f32 %v4119_v0, %v4224_v14  ;;  %9840 = vrot.lane.b32.xlu0 %v9839_v59, %s10430_s8 }
 0x7e7   :  { %v9869_v40 = vpack.i.bf16 %v12351_v3, %v12345_v62 }
 0x7e8   :  { %v9834_v42 = vpack.i.bf16 %v12353_v13, %v12347_v26 }
 0x7ea   :  { %9850 = vrot.lane.b32.xlu0 %v9849_v7, %s10430_s8  ;;  %9835 = vrot.lane.b32.xlu1 %v9834_v42, %s10430_s8 }
 0x7ee   :  { %9860 = vrot.lane.b32.xlu0 %v9859_v61, %s10430_s8 }
 0x7f2   :  { %9870 = vrot.lane.b32.xlu0 %v9869_v40, %s10430_s8  ;;  %v10042_v40 = vld [vmem:[#allocation13 + $0x14] ss:$8 sps:$4 sm:$0xff]  }
 0x844   :  { %v9821_v45 = vpop.permute.xlu0 %9820 }
 0x845   :  { %v9823_v60 = vunpack.i.h.bf16 %v9821_v45  ;;  %v9822_v19 = vunpack.i.l.bf16 %v9821_v45 }
 0x847   :  { %v4315_v36 = vmax.f32 %v12314_v44, %v9822_v19  ;;  %v4316_v29 = vmax.f32 %v12318_v51, %v9823_v60  ;;  %v10046_v60 = vld [vmem:[#allocation13 + $0x30] ss:$8 sps:$4 sm:$0xff]  }
 0x849   :  { %v9844_v9 = vpack.i.bf16 %v4316_v29, %v4315_v36 }
 0x84b   :  { %9845 = vrot.lane.b32.xlu1 %v9844_v9, %s10430_s8 }
 0x84c   :  { %v9826_v63 = vpop.permute.xlu1 %9825 }
 0x84d   :  { %v9828_v55 = vunpack.i.h.bf16 %v9826_v63  ;;  %v9827_v38 = vunpack.i.l.bf16 %v9826_v63  ;;  %v10051_v63 = vld [vmem:[#allocation13 + $0x44] ss:$8 sps:$4 sm:$0xff]  }
 0x84f   :  { %v4317_v30 = vmax.f32 %v12325_v52, %v9827_v38  ;;  %v4318_v41 = vmax.f32 %v12329_v15, %v9828_v55 }
 0x851   :  { %v9854_v12 = vpack.i.bf16 %v4318_v41, %v4317_v30  ;;  %v10049_v41 = vld [vmem:[#allocation13 + $0x40] ss:$8 sps:$4 sm:$0xff]  }
 0x853   :  { %9855 = vrot.lane.b32.xlu1 %v9854_v12, %s10430_s8 }
 0x854   :  { %v9831_v10 = vpop.permute.xlu0 %9830 }
 0x855   :  { %v9833_v58 = vunpack.i.h.bf16 %v9831_v10  ;;  %v9832_v18 = vunpack.i.l.bf16 %v9831_v10 }
 0x857   :  { %v4319_v44 = vmax.f32 %v12336_v37, %v9832_v18  ;;  %v4320_v51 = vmax.f32 %v12340_v22, %v9833_v58  ;;  %v10052_v18 = vld [vmem:[#allocation13 + $0x50] ss:$8 sps:$4 sm:$0xff]  }
 0x858   :  { %v9841_v0 = vpop.permute.xlu0 %9840 }
 0x859   :  { %v9864_v34 = vpack.i.bf16 %v4320_v51, %v4319_v44  ;;  %v9843_v14 = vunpack.i.h.bf16 %v9841_v0  ;;  %v9842_v25 = vunpack.i.l.bf16 %v9841_v0  ;;  %v10060_v0 = vld [vmem:[#allocation13 + $0x74] ss:$8 sps:$4 sm:$0xff]  }
 0x85b   :  { %9865 = vrot.lane.b32.xlu1 %v9864_v34, %s10430_s8  ;;  %v4276_v37 = vmax.f32 %v12316_v27, %v9843_v14  ;;  %v4275_v22 = vmax.f32 %v12312_v1, %v9842_v25  ;;  %v10040_v1 = vld [vmem:[#allocation13 + $0x10] ss:$8 sps:$4 sm:$0xff]  }
 0x85c   :  { %v9836_v49 = vpop.permute.xlu1 %9835  ;;  %v9851_v28 = vpop.permute.xlu0 %9850 }
 0x85d   :  { %v9838_v20 = vunpack.i.h.bf16 %v9836_v49  ;;  %v9837_v50 = vunpack.i.l.bf16 %v9836_v49  ;;  %v9853_v61 = vunpack.i.h.bf16 %v9851_v28  ;;  %v9852_v6 = vunpack.i.l.bf16 %v9851_v28 }
 0x85f   :  { %v4321_v52 = vmax.f32 %v12347_v26, %v9837_v50  ;;  %v4322_v15 = vmax.f32 %v12353_v13, %v9838_v20  ;;  %v10037_v13 = vld [vmem:[#allocation13] ss:$8 sps:$4 sm:$0xff]   ;;  %v4278_v57 = vmax.f32 %v12327_v8, %v9853_v61  ;;  %v4277_v47 = vmax.f32 %v12323_v5, %v9852_v6  ;;  %v10048_v5 = vld [vmem:[#allocation13 + $0x34] ss:$8 sps:$4 sm:$0xff]   ;;  %v10057_v20 = vld [vmem:[#allocation13 + $0x64] ss:$8 sps:$4 sm:$0xff]  }
 0x860   :  { %v9861_v31 = vpop.permute.xlu0 %9860 }
 0x861   :  { %v9874_v59 = vpack.i.bf16 %v4322_v15, %v4321_v52  ;;  %v9863_v56 = vunpack.i.h.bf16 %v9861_v31  ;;  %v9862_v24 = vunpack.i.l.bf16 %v9861_v31  ;;  %v10055_v15 = vld [vmem:[#allocation13 + $0x60] ss:$8 sps:$4 sm:$0xff]  }
 0x863   :  { %9875 = vrot.lane.b32.xlu1 %v9874_v59, %s10430_s8  ;;  %v4280_v19 = vmax.f32 %v12338_v48, %v9863_v56  ;;  %v4279_v36 = vmax.f32 %v12334_v16, %v9862_v24  ;;  %v10054_v16 = vld [vmem:[#allocation13 + $0x54] ss:$8 sps:$4 sm:$0xff]   ;;  %v10070_v56 = vld [vmem:[#allocation13 + $0x130] ss:$8 sps:$4 sm:$0xff]   ;;  %v10075_v24 = vld [vmem:[#allocation13 + $0x144] ss:$8 sps:$4 sm:$0xff]  }
 0x864   :  { %v9871_v55 = vpop.permute.xlu0 %9870 }
 0x865   :  { %v9873_v12 = vunpack.i.h.bf16 %v9871_v55  ;;  %v9872_v10 = vunpack.i.l.bf16 %v9871_v55 }
 0x867   :  { %v4282_v44 = vmax.f32 %v12351_v3, %v9873_v12  ;;  %v4281_v51 = vmax.f32 %v12345_v62, %v9872_v10  ;;  %v4367_v3 = vand.u32 31, %v10733_v2  ;;  %v10084_v10 = vld [vmem:[#allocation13 + $0x174] ss:$8 sps:$4 sm:$0xff]  }
 0x869   :  { %vm9148_vm6 = vcmp.ne.s32.totalorder %v4367_v3, 0 }
 0x86a   :  { %vm9028_vm7 = vmpackc.low %vm10455_vm12, %vm9148_vm6 }
 0x8bd   :  { %v9846_v54 = vpop.permute.xlu1 %9845 }
 0x8be   :  { %v9848_v7 = vunpack.i.h.bf16 %v9846_v54  ;;  %v9847_v42 = vunpack.i.l.bf16 %v9846_v54  ;;  %v10058_v54 = vld [vmem:[#allocation13 + $0x70] ss:$8 sps:$4 sm:$0xff]  }
 0x8c0   :  { %v12383_v11 = vsel %vm2886_vm9, %v4276_v37, %v9848_v7  ;;  %v12386_v26 = vsel %vm2886_vm9, %v4275_v22, %v9847_v42  ;;  %v10063_v37 = vld [vmem:[#allocation13 + $0x104] ss:$8 sps:$4 sm:$0xff]   ;;  %v10061_v42 = vld [vmem:[#allocation13 + $0x100] ss:$8 sps:$4 sm:$0xff]  }
 0x8c1   :  { %v4543_v43 = vpack.c.bf16 %v12383_v11, %v12386_v26  ;;  %v4468_v14 = vrot.slane %v12383_v11, 7  ;;  %v4467_v25 = vrot.slane %v12386_v26, 7 }
 0x8c3   :  { %4677 = vmatmul.mubr.bf16.vlgmr.msra.gmra.mrb[112].mxu1 %v4543_v43  ;;  %v4481_v7 = vsel %vm842_vm1, %v4467_v25, %v4468_v14  ;;  %v10064_v43 = vld [vmem:[#allocation13 + $0x110] ss:$8 sps:$4 sm:$0xff]  }
 0x8c4   :  { %4798 = vmatpush1.bf16.msra.mxu1 %v10037_v13  ;;  %4686 = vmatprep.mubr.bf16.mxu1 %v12912_v32  ;;  %v10066_v13 = vld [vmem:[#allocation13 + $0x114] ss:$8 sps:$4 sm:$0xff]  }
 0x8c5   :  { %v9856_v27 = vpop.permute.xlu1 %9855  ;;  %4799 = vmatprep.subr.bf16.mxu1 %v10042_v40  ;;  %v10069_v40 = vld [vmem:[#allocation13 + $0x124] ss:$8 sps:$4 sm:$0xff]  }
 0x8c6   :  { %v9858_v23 = vunpack.i.h.bf16 %v9856_v27  ;;  %v9857_v35 = vunpack.i.l.bf16 %v9856_v27  ;;  %v366_v27 = vadd.s32 32, %v10733_v2 }
 0x8c8   :  { %v12394_v17 = vsel %vm2886_vm9, %v4277_v47, %v9857_v35  ;;  %v12397_v53 = vsel %vm2886_vm9, %v4278_v57, %v9858_v23  ;;  %4800 = vmatpush1.bf16.msra.mxu1 %v10040_v1  ;;  %v10067_v47 = vld [vmem:[#allocation13 + $0x120] ss:$8 sps:$4 sm:$0xff]   ;;  %v10072_v35 = vld [vmem:[#allocation13 + $0x134] ss:$8 sps:$4 sm:$0xff]  }
 0x8c9   :  { %v4544_v8 = vpack.c.bf16 %v12397_v53, %v12394_v17  ;;  %4801 = vmatprep.subr.bf16.mxu1 %v10045_v33  ;;  %v4469_v61 = vrot.slane %v12394_v17, 7  ;;  %v4470_v6 = vrot.slane %v12397_v53, 7  ;;  %v4395_v33 = vand.u32 31, %v366_v27 }
 0x8cb   :  { %4687 = vmatmul.mubr.bf16.gmra.mrb[116].mxu1 %v4544_v8  ;;  %v4479_v1 = vsel %vm842_vm1, %v4469_v61, %v4470_v6  ;;  %v4480_v57 = vsel %vm842_vm1, %v4468_v14, %v4469_v61  ;;  %vm9149_vm8 = vcmp.ne.s32.totalorder %v4395_v33, 0  ;;  %v4416_v14 = vand.u32 31, %v12236_v39 }
 0x8cc   :  { %4802 = vmatpush1.bf16.msra.mxu1 %v10043_v21  ;;  %4696 = vmatprep.mubr.bf16.mxu1 %v12912_v32  ;;  %v4524_v23 = vpack.c.bf16 %v4479_v1, %v4480_v57  ;;  %vm9032_vm10 = vmpackc.low %vm10455_vm12, %vm9149_vm8 }
 0x8cd   :  { %v9866_v45 = vpop.permute.xlu1 %9865  ;;  %4803 = vmatprep.subr.bf16.mxu1 %v10048_v5  ;;  %vm9151_vm13 = vcmp.ne.s32.totalorder %v4416_v14, 31 }
 0x8ce   :  { %v9868_v29 = vunpack.i.h.bf16 %v9866_v45  ;;  %v9867_v9 = vunpack.i.l.bf16 %v9866_v45  ;;  %v10073_v45 = vld [vmem:[#allocation13 + $0x140] ss:$8 sps:$4 sm:$0xff]   ;;  %vm9056_vm14 = vmpackc.low %vm9151_vm13, %vm10455_vm12 }
 0x8d0   :  { %v12405_v38 = vsel %vm2886_vm9, %v4279_v36, %v9867_v9  ;;  %v12408_v30 = vsel %vm2886_vm9, %v4280_v19, %v9868_v29  ;;  %4804 = vmatpush1.bf16.msra.mxu1 %v10046_v60  ;;  %v10078_v19 = vld [vmem:[#allocation13 + $0x154] ss:$8 sps:$4 sm:$0xff]   ;;  %v10076_v29 = vld [vmem:[#allocation13 + $0x150] ss:$8 sps:$4 sm:$0xff]   ;;  %v10081_v9 = vld [vmem:[#allocation13 + $0x164] ss:$8 sps:$4 sm:$0xff]  }
 0x8d1   :  { %v4545_v48 = vpack.c.bf16 %v12408_v30, %v12405_v38  ;;  %4805 = vmatprep.subr.bf16.mxu1 %v10051_v63  ;;  %v4471_v31 = vrot.slane %v12405_v38, 7  ;;  %v4472_v21 = vrot.slane %v12408_v30, 7 }
 0x8d3   :  { %4697 = vmatmul.mubr.bf16.gmra.mrb[120].mxu1 %v4545_v48  ;;  %v4477_v8 = vsel %vm842_vm1, %v4471_v31, %v4472_v21  ;;  %v4478_v5 = vsel %vm842_vm1, %v4470_v6, %v4471_v31  ;;  %v4501_v48 = vrot.slane %v12394_v17, 1 }
 0x8d4   :  { %4806 = vmatpush1.bf16.msra.mxu1 %v10049_v41  ;;  %4706 = vmatprep.mubr.bf16.mxu1 %v12912_v32  ;;  %v9033_v60 = vpack.c.bf16 %v4477_v8, %v4478_v5  ;;  %v10079_v41 = vld [vmem:[#allocation13 + $0x160] ss:$8 sps:$4 sm:$0xff]  }
 0x8d5   :  { %v9876_v58 = vpop.permute.xlu1 %9875  ;;  %4807 = vmatprep.subr.bf16.mxu1 %v10054_v16  ;;  %v4500_v16 = vrot.slane %v12383_v11, 1  ;;  %v4503_v11 = vrot.slane %v12405_v38, 1  ;;  %v4504_v38 = vrot.slane %v12408_v30, 1 }
 0x8d6   :  { %v9878_v34 = vunpack.i.h.bf16 %v9876_v58  ;;  %v9877_v49 = vunpack.i.l.bf16 %v9876_v58  ;;  %v4499_v58 = vrot.slane %v12386_v26, 1  ;;  %v4502_v26 = vrot.slane %v12397_v53, 1 }
 0x8d7   :  { %v4509_v3 = vsel %vm971_vm2, %v4503_v11, %v4504_v38 }
 0x8d8   :  { %v12416_v50 = vsel %vm2886_vm9, %v4282_v44, %v9878_v34  ;;  %v12419_v52 = vsel %vm2886_vm9, %v4281_v51, %v9877_v49  ;;  %4808 = vmatpush1.bf16.msra.mxu1 %v10052_v18  ;;  %v10082_v18 = vld [vmem:[#allocation13 + $0x170] ss:$8 sps:$4 sm:$0xff]   ;;  %v365_v44 = vadd.s32 24, %v10733_v2  ;;  %v4512_v51 = vsel %vm971_vm2, %v4500_v16, %v4501_v48 }
 0x8d9   :  { %v4546_v59 = vpack.c.bf16 %v12416_v50, %v12419_v52  ;;  %4809 = vmatprep.subr.bf16.mxu1 %v10057_v20  ;;  %v4474_v62 = vrot.slane %v12416_v50, 7  ;;  %v4473_v36 = vrot.slane %v12419_v52, 7  ;;  %v4513_v34 = vsel %vm971_vm2, %v4499_v58, %v4500_v16 }
 0x8da   :  { %v4870_v17 = vpack.c.bf16 %v4512_v51, %v4513_v34  ;;  %v4388_v49 = vand.u32 31, %v365_v44  ;;  %v4510_v20 = vsel %vm971_vm2, %v4502_v26, %v4503_v11 }
 0x8db   :  { %4707 = vmatmul.mubr.bf16.gmra.mrb[124].mxu1 %v4546_v59  ;;  %v4482_v22 = vsel %vm842_vm1, %v4474_v62, %v4467_v25  ;;  %v4475_v63 = vsel %vm842_vm1, %v4473_v36, %v4474_v62  ;;  %v4476_v55 = vsel %vm842_vm1, %v4472_v21, %v4473_v36  ;;  %v4506_v25 = vrot.slane %v12416_v50, 1 }
 0x8dc   :  { %4810 = vmatpush1.bf16.msra.mxu1 %v10055_v15  ;;  %4829 = vmatprep.mubr.bf16.mxu1 %v12912_v32  ;;  %v9029_v28 = vpack.c.bf16 %v4481_v7, %v4482_v22  ;;  %v4526_v12 = vpack.c.bf16 %v4475_v63, %v4476_v55  ;;  %vm9150_vm1 = vcmp.ne.s32.totalorder %v4388_v49, 31  ;;  %v4511_v15 = vsel %vm971_vm2, %v4501_v48, %v4502_v26 }
 0x8dd   :  { %4811 = vmatprep.subr.bf16.mxu1 %v10060_v0  ;;  %vm9052_vm11 = vmpackc.low %vm9150_vm1, %vm10455_vm12  ;;  %v9053_v59 = vpack.c.bf16 %v4510_v20, %v4511_v15  ;;  %v4505_v0 = vrot.slane %v12419_v52, 1  ;;  %v4514_v52 = vsel %vm971_vm2, %v4506_v25, %v4499_v58  ;;  %vm5272_vm12 = vsmask.f32 256 }
 0x8df   :  { %v4508_v53 = vsel %vm971_vm2, %v4504_v38, %v4505_v0  ;;  %v4507_v30 = vsel %vm971_vm2, %v4505_v0, %v4506_v25  ;;  %vm5271_vm2 = vcmask 1040384  }
 0x8e0   :  { %4812 = vmatpush1.bf16.msra.mxu1 %v10058_v54  ;;  %v4872_v62 = vpack.c.bf16 %v4508_v53, %v4509_v3  ;;  %v9057_v54 = vpack.c.bf16 %v4514_v52, %v4507_v30  ;;  %vm12547_vm0 = vmand %vm5271_vm2, %vm5447_vm15 }
 0x8e1   :  { %4971 = vmatprep.subr.bf16.mxu1 %v10063_v37  ;;  %v5060_v37 = vld [vmem:[#allocation14] sm:$0x3] }
 0x8e2   :  { %v5065_v22 = vrot.slane %v5060_v37, %v11475_v4  ;;  %v5069_v39 = vrot.slane %v5060_v37, %v11478_v46  ;;  %v10086_v37 = vld [vmem:[#allocation16 + $0x10] ss:$8 sps:$4 sm:$0xff]  }
 0x8e3   :  { %9030 = vmatmul.mubr.msk.bf16.vlgmr.msra.gmra.mrb[112].mxu1 %vm9028_vm7, %v9029_v28 }
 0x8e4   :  { %4972 = vmatpush1.bf16.msra.mxu1 %v10061_v42  ;;  %4839 = vmatprep.mubr.bf16.mxu1 %v12912_v32 }
 0x8e5   :  { %4973 = vmatprep.subr.bf16.mxu1 %v10066_v13 }
 0x8e8   :  { %4974 = vmatpush1.bf16.msra.mxu1 %v10064_v43 }
 0x8e9   :  { %4975 = vmatprep.subr.bf16.mxu1 %v10069_v40 }
 0x8eb   :  { %4840 = vmatmul.mubr.bf16.gmra.mrb[116].mxu1 %v4524_v23 }
 0x8ec   :  { %4976 = vmatpush1.bf16.msra.mxu1 %v10067_v47  ;;  %4849 = vmatprep.mubr.bf16.mxu1 %v12912_v32 }
 0x8ed   :  { %4977 = vmatprep.subr.bf16.mxu1 %v10072_v35 }
 0x8f0   :  { %4978 = vmatpush1.bf16.msra.mxu1 %v10070_v56 }
 0x8f1   :  { %4979 = vmatprep.subr.bf16.mxu1 %v10075_v24 }
 0x8f3   :  { %9034 = vmatmul.mubr.msk.bf16.gmra.mrb[120].mxu1 %vm9032_vm10, %v9033_v60 }
 0x8f4   :  { %4980 = vmatpush1.bf16.msra.mxu1 %v10073_v45  ;;  %4859 = vmatprep.mubr.bf16.mxu1 %v12912_v32 }
 0x8f5   :  { %4981 = vmatprep.subr.bf16.mxu1 %v10078_v19 }
 0x8f8   :  { %4982 = vmatpush1.bf16.msra.mxu1 %v10076_v29 }
 0x8f9   :  { %4983 = vmatprep.subr.bf16.mxu1 %v10081_v9 }
 0x8fb   :  { %4860 = vmatmul.mubr.bf16.gmra.mrb[124].mxu1 %v4526_v12 }
 0x8fc   :  { %4984 = vmatpush1.bf16.msra.mxu1 %v10079_v41  ;;  %5003 = vmatprep.mubr.bf16.mxu1 %v12912_v32 }
 0x8fd   :  { %4985 = vmatprep.subr.bf16.mxu1 %v10084_v10 }
 0x900   :  { %4986 = vmatpush1.bf16.msra.mxu1 %v10082_v18 }
 0x903   :  { %5004 = vmatmul.mubr.bf16.vlgmr.msra.gmra.mrb[112].mxu1 %v4870_v17 }
 0x904   :  { %5013 = vmatprep.mubr.bf16.mxu1 %v12912_v32 }
 0x90b   :  { %9054 = vmatmul.mubr.msk.bf16.gmra.mrb[116].mxu1 %vm9052_vm11, %v9053_v59 }
 0x90c   :  { %5023 = vmatprep.mubr.bf16.mxu1 %v12912_v32 }
 0x913   :  { %5024 = vmatmul.mubr.bf16.gmra.mrb[120].mxu1 %v4872_v62 }
 0x914   :  { %5033 = vmatprep.mubr.bf16.mxu1 %v12912_v32 }
 0x91b   :  { %9058 = vmatmul.mubr.msk.bf16.gmra.mrb[124].mxu1 %vm9056_vm14, %v9057_v54  ;;  %v10085_v54 = vld [vmem:[#allocation16] ss:$8 sps:$4 sm:$0xff]  }
 0x9d6   :  { %v5005_v50 = vpop.f32.mrb[112].mxu1 }
 0x9d7   :  { %v5072_v7 = vadd.f32 %v5065_v22, %v5005_v50  ;;  %v5007_v42 = vpop.f32.mrb[113].mxu1 }
 0x9d8   :  { %v5073_v28 = vadd.f32 %v5069_v39, %v5007_v42  ;;  %v5009_v13 = vpop.f32.mrb[114].mxu1 }
 0x9d9   :  { %v5074_v61 = vadd.f32 %v5065_v22, %v5009_v13  ;;  %v5011_v6 = vpop.f32.mrb[115].mxu1  ;;  %v5088_v40 = vmax.f32 %v5072_v7, 0.0 }
 0x9da   :  { %v5075_v43 = vadd.f32 %v5069_v39, %v5011_v6  ;;  %v5089_v1 = vmax.f32 %v5073_v28, 0.0 }
 0x9db   :  { %v5090_v27 = vmax.f32 %v5074_v61, 0.0 }
 0x9dc   :  { %v5091_v57 = vmax.f32 %v5075_v43, 0.0 }
 0x9dd   :  { %v5104_v47 = vpack.c.bf16 %v5090_v27, %v5088_v40  ;;  %v10456_v40 = vmov 1966171168  }
 0x9de   :  { %v5105_v23 = vpack.c.bf16 %v5091_v57, %v5089_v1  ;;  %v5015_v35 = vpop.f32.mrb[116].mxu1  ;;  %v5279_v27 = vunpack.c.l.s4 %v10456_v40 }
 0x9df   :  { %v5076_v33 = vadd.f32 %v5065_v22, %v5015_v35  ;;  %v5017_v31 = vpop.f32.mrb[117].mxu1 }
 0x9e0   :  { %v5077_v21 = vadd.f32 %v5069_v39, %v5017_v31  ;;  %v5019_v56 = vpop.f32.mrb[118].mxu1  ;;  %5132 = vmatprep.subr.bf16.mxu0 %v5105_v23  ;;  %v5280_v57 = vunpack.c.0.s8 %v5279_v27 }
 0x9e1   :  { %v5078_v24 = vadd.f32 %v5065_v22, %v5019_v56  ;;  %v5021_v8 = vpop.f32.mrb[119].mxu1  ;;  %5133 = vmatpush1.bf16.msra.mxu0 %v5104_v47  ;;  %v5092_v45 = vmax.f32 %v5076_v33, 0.0 }
 0x9e2   :  { %v5079_v5 = vadd.f32 %v5069_v39, %v5021_v8  ;;  %v5093_v19 = vmax.f32 %v5077_v21, 0.0  ;;  %v12501_v56 = vsub.s32 %v5280_v57, %v10733_v2  ;;  %v5396_v57 = vld [vmem:[#allocation2 + $0xb] sm:$0x1] }
 0x9e3   :  { %v5094_v60 = vmax.f32 %v5078_v24, 0.0 }
 0x9e4   :  { %v5095_v36 = vmax.f32 %v5079_v5, 0.0  ;;  %v5274_v5 = vld [vmem:[#allocation2] sm:$0x1] }
 0x9e5   :  { %v5106_v29 = vpack.c.bf16 %v5094_v60, %v5092_v45 }
 0x9e6   :  { %v5107_v9 = vpack.c.bf16 %v5095_v36, %v5093_v19  ;;  %v5025_v63 = vpop.f32.mrb[120].mxu1  ;;  %v5351_v19 = vld [vmem:[#allocation2 + $0x8] sm:$0x1] }
 0x9e7   :  { %v5080_v55 = vadd.f32 %v5065_v22, %v5025_v63  ;;  %v5027_v41 = vpop.f32.mrb[121].mxu1 }
 0x9e8   :  { %v5081_v12 = vadd.f32 %v5069_v39, %v5027_v41  ;;  %v5029_v10 = vpop.f32.mrb[122].mxu1  ;;  %5134 = vmatprep.subr.bf16.mxu0 %v5107_v9 }
 0x9e9   :  { %v5082_v48 = vadd.f32 %v5065_v22, %v5029_v10  ;;  %v5031_v16 = vpop.f32.mrb[123].mxu1  ;;  %5135 = vmatpush1.bf16.msra.mxu0 %v5106_v29  ;;  %v5096_v18 = vmax.f32 %v5080_v55, 0.0 }
 0x9ea   :  { %v5083_v58 = vadd.f32 %v5069_v39, %v5031_v16  ;;  %v5097_v51 = vmax.f32 %v5081_v12, 0.0  ;;  %v5298_v12 = vld [vmem:[#allocation2 + $0x1] sm:$0x1] }
 0x9eb   :  { %v5098_v44 = vmax.f32 %v5082_v48, 0.0 }
 0x9ec   :  { %v5099_v34 = vmax.f32 %v5083_v58, 0.0 }
 0x9ed   :  { %v5108_v17 = vpack.c.bf16 %v5098_v44, %v5096_v18  ;;  %v5310_v18 = vld [vmem:[#allocation2 + $0x2] sm:$0x1]  ;;  %v5324_v44 = vld [vmem:[#allocation2 + $0x4] sm:$0x1] }
 0x9ee   :  { %v5109_v49 = vpack.c.bf16 %v5099_v34, %v5097_v51  ;;  %v5035_v11 = vpop.f32.mrb[124].mxu1 }
 0x9ef   :  { %v5084_v26 = vadd.f32 %v5065_v22, %v5035_v11  ;;  %v5037_v20 = vpop.f32.mrb[125].mxu1 }
 0x9f0   :  { %v5085_v15 = vadd.f32 %v5069_v39, %v5037_v20  ;;  %v5039_v59 = vpop.f32.mrb[126].mxu1  ;;  %5136 = vmatprep.subr.bf16.mxu0 %v5109_v49 }
 0x9f1   :  { %v5086_v0 = vadd.f32 %v5065_v22, %v5039_v59  ;;  %v5041_v38 = vpop.f32.mrb[127].mxu1  ;;  %5137 = vmatpush1.bf16.msra.mxu0 %v5108_v17  ;;  %v5100_v3 = vmax.f32 %v5084_v26, 0.0  ;;  %v10087_v22 = vld [vmem:[#allocation17] ss:$8 sps:$4 sm:$0xff]   ;;  %v5333_v59 = vld [vmem:[#allocation2 + $0x5] sm:$0x1] }
 0x9f2   :  { %v5087_v53 = vadd.f32 %v5069_v39, %v5041_v38  ;;  %v5101_v14 = vmax.f32 %v5085_v15, 0.0  ;;  %v10088_v39 = vld [vmem:[#allocation17 + $0x10] ss:$8 sps:$4 sm:$0xff]   ;;  %v5319_v15 = vld [vmem:[#allocation2 + $0x3] sm:$0x1] }
 0x9f3   :  { %v5102_v62 = vmax.f32 %v5086_v0, 0.0 }
 0x9f4   :  { %v5103_v25 = vmax.f32 %v5087_v53, 0.0 }
 0x9f5   :  { %v5110_v30 = vpack.c.bf16 %v5102_v62, %v5100_v3 }
 0x9f6   :  { %v5111_v52 = vpack.c.bf16 %v5103_v25, %v5101_v14 }
 0x9f8   :  { %5138 = vmatprep.subr.bf16.mxu0 %v5111_v52 }
 0x9f9   :  { %5139 = vmatpush1.bf16.msra.mxu0 %v5110_v30 }
 0x9fa   :  { %5205 = vmatprep.subr.bf16.mxu0 %v5105_v23 }
 0x9fc   :  { %9061 = vmatmul.mubr.msk.bf16.vlgmr.msra.gmra.mrb[80].mxu0 %vm2886_vm9, %v10085_v54 }
 0x9fd   :  { %5206 = vmatpush1.bf16.msra.mxu0 %v5104_v47  ;;  %5174 = vmatprep.mubr.bf16.mxu0 %v12912_v32 }
 0x9fe   :  { %5207 = vmatprep.subr.bf16.mxu0 %v5107_v9 }
 0xa01   :  { %5208 = vmatpush1.bf16.msra.mxu0 %v5106_v29 }
 0xa02   :  { %5209 = vmatprep.subr.bf16.mxu0 %v5109_v49 }
 0xa04   :  { %9062 = vmatmul.mubr.msk.bf16.gmra.mrb[84].mxu0 %vm2886_vm9, %v10086_v37 }
 0xa05   :  { %5210 = vmatpush1.bf16.msra.mxu0 %v5108_v17  ;;  %5237 = vmatprep.mubr.bf16.mxu0 %v12912_v32 }
 0xa06   :  { %5211 = vmatprep.subr.bf16.mxu0 %v5111_v52  ;;  %v5375_v52 = vld [vmem:[#allocation2 + $0x9] sm:$0x1] }
 0xa09   :  { %5212 = vmatpush1.bf16.msra.mxu0 %v5110_v30  ;;  %v5338_v30 = vld [vmem:[#allocation2 + $0x6] sm:$0x1] }
 0xa0c   :  { %9065 = vmatmul.mubr.msk.bf16.vlgmr.msra.gmra.mrb[88].mxu0 %vm2886_vm9, %v10087_v22 }
 0xa0d   :  { %5247 = vmatprep.mubr.bf16.mxu0 %v12912_v32 }
 0xa14   :  { %9066 = vmatmul.mubr.msk.bf16.gmra.mrb[92].mxu0 %vm2886_vm9, %v10088_v39  ;;  %vm12504_vm9 = vmand %vm5271_vm2, %vm5272_vm12 }
 0xacf   :  { %v5166_v50 = vpop.f32.mrb[80].mxu0 }
 0xad0   :  { %v5168_v7 = vpop.f32.mrb[81].mxu0 }
 0xad1   :  { %v5170_v42 = vpop.f32.mrb[82].mxu0 }
 0xad2   :  { %v5172_v28 = vpop.f32.mrb[83].mxu0 }
 0xad7   :  { %v5176_v13 = vpop.f32.mrb[84].mxu0 }
 0xad8   :  { %v5178_v61 = vpop.f32.mrb[85].mxu0 }
 0xad9   :  { %v12496_v6 = vpop.f32.mrb[86].mxu0 }
 0xada   :  { %v12498_v43 = vpop.f32.mrb[87].mxu0 }
 0xadf   :  { %v5239_v1 = vpop.f32.mrb[88].mxu0 }
 0xae0   :  { %v5258_v47 = vmax.f32 %v5166_v50, %v5239_v1  ;;  %v5241_v23 = vpop.f32.mrb[89].mxu0  ;;  %v5387_v50 = vld [vmem:[#allocation2 + $0xa] sm:$0x1] }
 0xae1   :  { %v5259_v32 = vmax.f32 %v5168_v7, %v5241_v23  ;;  %v5243_v35 = vpop.f32.mrb[90].mxu0  ;;  %v5401_v7 = vld [vmem:[#allocation2 + $0xc] sm:$0x1] }
 0xae2   :  { %v5260_v33 = vmax.f32 %v5170_v42, %v5243_v35  ;;  %v5245_v31 = vpop.f32.mrb[91].mxu0 }
 0xae3   :  { %v5266_v21 = vmax.f32 %v5258_v47, %v5259_v32  ;;  %v5261_v24 = vmax.f32 %v5172_v28, %v5245_v31  ;;  %v5347_v28 = vld [vmem:[#allocation2 + $0x7] sm:$0x1]  ;;  %v5410_v47 = vld [vmem:[#allocation2 + $0xd] sm:$0x1]  ;;  %v5415_v31 = vld [vmem:[#allocation2 + $0xe] sm:$0x1] }
 0xae5   :  { %v5270_v45 = vpack.c.bf16 %v5266_v21, %v5266_v21  ;;  %v5267_v60 = vmax.f32 %v5260_v33, %v5261_v24 }
 0xae7   :  { %v5275_v36 = vsel %vm12504_vm9, %v5270_v45, %v5274_v5  ;;  %v5284_v29 = vrot.slane %v5270_v45, %v12501_v56  ;;  %v5350_v9 = vpack.c.bf16 %v5267_v60, %v5267_v60  ;;  %v5249_v63 = vpop.f32.mrb[92].mxu0 }
 0xae8   :  { %5276 = vst [vmem:[#allocation2] sm:$0x1] %v5275_v36  ;;  %v5262_v2 = vmax.f32 %v5176_v13, %v5249_v63  ;;  %v5251_v55 = vpop.f32.mrb[93].mxu0  ;;  %v5424_v36 = vld [vmem:[#allocation2 + $0xf] sm:$0x1] }
 0xae9   :  { %v5291_v41 = vrot.slane %v5284_v29, %v12501_v56  ;;  %v5301_v10 = vcombine.high %v5284_v29, %v5284_v29  ;;  %v5352_v48 = vsel %vm12504_vm9, %v5350_v9, %v5351_v19  ;;  %v5361_v16 = vrot.slane %v5350_v9, %v12501_v56  ;;  %v5253_v58 = vpop.f32.mrb[94].mxu0 }
 0xaea   :  { %5353 = vst [vmem:[#allocation2 + $0x8] sm:$0x1] %v5352_v48  ;;  %v5263_v51 = vmax.f32 %v5178_v61, %v5251_v55  ;;  %v5264_v34 = vmax.f32 %v12496_v6, %v5253_v58  ;;  %v5255_v17 = vpop.f32.mrb[95].mxu0 }
 0xaeb   :  { %v5293_v49 = vshrl.u32 %v5291_v41, 16  ;;  %v5308_v11 = vrot.slane %v5301_v10, %v12501_v56  ;;  %v5322_v26 = vcombine.high %v5291_v41, %v5291_v41  ;;  %v5368_v20 = vrot.slane %v5361_v16, %v12501_v56 }
 0xaec   :  { %v5378_v0 = vcombine.high %v5361_v16, %v5361_v16  ;;  %v5268_v38 = vmax.f32 %v5262_v2, %v5263_v51  ;;  %v5265_v53 = vmax.f32 %v12498_v43, %v5255_v17 }
 0xaed   :  { %v5299_v3 = vsel %vm12504_vm9, %v5293_v49, %v5298_v12  ;;  %v5311_v62 = vsel %vm12504_vm9, %v5308_v11, %v5310_v18  ;;  %v5314_v14 = vshrl.u32 %v5308_v11, 16  ;;  %v5325_v25 = vsel %vm12504_vm9, %v5322_v26, %v5324_v44 }
 0xaee   :  { %5300 = vst [vmem:[#allocation2 + $0x1] sm:$0x1] %v5299_v3  ;;  %5312 = vst [vmem:[#allocation2 + $0x2] sm:$0x1] %v5311_v62  ;;  %v5328_v54 = vshrl.u32 %v5322_v26, 16  ;;  %v5336_v37 = vcombine.high %v5308_v11, %v5308_v11  ;;  %v5370_v22 = vshrl.u32 %v5368_v20, 16  ;;  %v5385_v39 = vrot.slane %v5378_v0, %v12501_v56 }
 0xaef   :  { %5326 = vst [vmem:[#allocation2 + $0x4] sm:$0x1] %v5325_v25  ;;  %v5320_v42 = vsel %vm12504_vm9, %v5314_v14, %v5319_v15  ;;  %v5399_v13 = vcombine.high %v5368_v20, %v5368_v20  ;;  %v5427_v61 = vpack.c.bf16 %v5268_v38, %v5268_v38  ;;  %v5269_v6 = vmax.f32 %v5264_v34, %v5265_v53  ;;  %v5449_v16 = vld [vmem:[#allocation2] sm:$0x1] }
 0xaf0   :  { %5321 = vst [vmem:[#allocation2 + $0x3] sm:$0x1] %v5320_v42  ;;  %v5334_v43 = vsel %vm12504_vm9, %v5328_v54, %v5333_v59  ;;  %v5339_v40 = vsel %vm12504_vm9, %v5336_v37, %v5338_v30  ;;  %v5342_v27 = vshrl.u32 %v5336_v37, 16  ;;  %v5376_v1 = vsel %vm12504_vm9, %v5370_v22, %v5375_v52 }
 0xaf1   :  { %5335 = vst [vmem:[#allocation2 + $0x5] sm:$0x1] %v5334_v43  ;;  %5340 = vst [vmem:[#allocation2 + $0x6] sm:$0x1] %v5339_v40  ;;  %v5388_v23 = vsel %vm12504_vm9, %v5385_v39, %v5387_v50  ;;  %v5391_v32 = vshrl.u32 %v5385_v39, 16  ;;  %v5402_v35 = vsel %vm12504_vm9, %v5399_v13, %v5401_v7  ;;  %v5405_v33 = vshrl.u32 %v5399_v13, 16 }
 0xaf2   :  { %5377 = vst [vmem:[#allocation2 + $0x9] sm:$0x1] %v5376_v1  ;;  %v5348_v21 = vsel %vm12504_vm9, %v5342_v27, %v5347_v28  ;;  %5389 = vst [vmem:[#allocation2 + $0xa] sm:$0x1] %v5388_v23  ;;  %v5413_v24 = vcombine.high %v5385_v39, %v5385_v39  ;;  %v5435_v5 = vrot.slane %v5427_v61, %v12501_v56  ;;  %v5518_v38 = vld [vmem:[#allocation2 + $0x8] sm:$0x1] }
 0xaf3   :  { %5403 = vst [vmem:[#allocation2 + $0xc] sm:$0x1] %v5402_v35  ;;  %v5498_v45 = vpack.c.bf16 %v5269_v6, %v5269_v6  ;;  %5349 = vst [vmem:[#allocation2 + $0x7] sm:$0x1] %v5348_v21  ;;  %v5397_v60 = vsel %vm12504_vm9, %v5391_v32, %v5396_v57  ;;  %v5411_v19 = vsel %vm12504_vm9, %v5405_v33, %v5410_v47 }
 0xaf4   :  { %5398 = vst [vmem:[#allocation2 + $0xb] sm:$0x1] %v5397_v60  ;;  %5412 = vst [vmem:[#allocation2 + $0xd] sm:$0x1] %v5411_v19  ;;  %v5416_v9 = vsel %vm12504_vm9, %v5413_v24, %v5415_v31  ;;  %v5419_v63 = vshrl.u32 %v5413_v24, 16  ;;  %v5442_v2 = vrot.slane %v5435_v5, %v12501_v56  ;;  %v5455_v55 = vcombine.high %v5435_v5, %v5435_v5 }
 0xaf5   :  { %5417 = vst [vmem:[#allocation2 + $0xe] sm:$0x1] %v5416_v9  ;;  %v5452_v41 = vld [vmem:[#allocation2 + $0x1] sm:$0x1]  ;;  %v5506_v12 = vrot.slane %v5498_v45, %v12501_v56  ;;  %v5467_v44 = vld [vmem:[#allocation2 + $0x2] sm:$0x1] }
 0xaf6   :  { %v5425_v10 = vsel %vm12504_vm9, %v5419_v63, %v5424_v36  ;;  %v5444_v48 = vshll.u32 %v5442_v2, 16  ;;  %v5453_v58 = vsel %vm12547_vm0, %v5427_v61, %v5452_v41  ;;  %v5462_v18 = vrot.slane %v5455_v55, %v12501_v56  ;;  %v5479_v17 = vld [vmem:[#allocation2 + $0x4] sm:$0x1] }
 0xaf7   :  { %5426 = vst [vmem:[#allocation2 + $0xf] sm:$0x1] %v5425_v10  ;;  %5454 = vst [vmem:[#allocation2 + $0x1] sm:$0x1] %v5453_v58  ;;  %v5471_v51 = vld [vmem:[#allocation2 + $0x3] sm:$0x1]  ;;  %v5474_v34 = vcombine.high %v5442_v2, %v5442_v2  ;;  %v5513_v49 = vrot.slane %v5506_v12, %v12501_v56  ;;  %v5524_v11 = vcombine.high %v5506_v12, %v5506_v12 }
 0xaf8   :  { %v5450_v8 = vsel %vm12547_vm0, %v5444_v48, %v5449_v16  ;;  %v5464_v26 = vshll.u32 %v5462_v18, 16  ;;  %v5472_v20 = vsel %vm12547_vm0, %v5462_v18, %v5471_v51  ;;  %v5483_v15 = vld [vmem:[#allocation2 + $0x5] sm:$0x1]  ;;  %v5486_v59 = vcombine.high %v5462_v18, %v5462_v18  ;;  %v5491_v0 = vld [vmem:[#allocation2 + $0x6] sm:$0x1] }
 0xaf9   :  { %5451 = vst [vmem:[#allocation2] sm:$0x1] %v5450_v8  ;;  %5473 = vst [vmem:[#allocation2 + $0x3] sm:$0x1] %v5472_v20  ;;  %v5476_v53 = vshll.u32 %v5474_v34, 16  ;;  %v5484_v3 = vsel %vm12547_vm0, %v5474_v34, %v5483_v15  ;;  %v5515_v62 = vshll.u32 %v5513_v49, 16  ;;  %v5531_v25 = vrot.slane %v5524_v11, %v12501_v56 }
 0xafa   :  { %v5521_v14 = vld [vmem:[#allocation2 + $0x9] sm:$0x1]  ;;  %v5536_v30 = vld [vmem:[#allocation2 + $0xa] sm:$0x1]  ;;  %v5468_v52 = vsel %vm12547_vm0, %v5464_v26, %v5467_v44  ;;  %5485 = vst [vmem:[#allocation2 + $0x5] sm:$0x1] %v5484_v3  ;;  %v5543_v39 = vcombine.high %v5513_v49, %v5513_v49 }
 0xafb   :  { %v5488_v54 = vshll.u32 %v5486_v59, 16  ;;  %v5495_v37 = vld [vmem:[#allocation2 + $0x7] sm:$0x1]  ;;  %v5522_v22 = vsel %vm12547_vm0, %v5498_v45, %v5521_v14  ;;  %v5548_v50 = vld [vmem:[#allocation2 + $0xc] sm:$0x1]  ;;  %v5480_v7 = vsel %vm12547_vm0, %v5476_v53, %v5479_v17  ;;  %v5519_v28 = vsel %vm12547_vm0, %v5515_v62, %v5518_v38 }
 0xafc   :  { %5469 = vst [vmem:[#allocation2 + $0x2] sm:$0x1] %v5468_v52  ;;  %v5496_v42 = vsel %vm12547_vm0, %v5486_v59, %v5495_v37  ;;  %5523 = vst [vmem:[#allocation2 + $0x9] sm:$0x1] %v5522_v22  ;;  %v5533_v13 = vshll.u32 %v5531_v25, 16  ;;  %v5545_v27 = vshll.u32 %v5543_v39, 16  ;;  %v5555_v47 = vcombine.high %v5531_v25, %v5531_v25 }
 0xafd   :  { %v5540_v61 = vld [vmem:[#allocation2 + $0xb] sm:$0x1]  ;;  %v5552_v6 = vld [vmem:[#allocation2 + $0xd] sm:$0x1]  ;;  %5481 = vst [vmem:[#allocation2 + $0x4] sm:$0x1] %v5480_v7  ;;  %v5492_v43 = vsel %vm12547_vm0, %v5488_v54, %v5491_v0 }
 0xafe   :  { %5497 = vst [vmem:[#allocation2 + $0x7] sm:$0x1] %v5496_v42  ;;  %5520 = vst [vmem:[#allocation2 + $0x8] sm:$0x1] %v5519_v28  ;;  %v5541_v40 = vsel %vm12547_vm0, %v5531_v25, %v5540_v61  ;;  %v5553_v1 = vsel %vm12547_vm0, %v5543_v39, %v5552_v6  ;;  %v5537_v57 = vsel %vm12547_vm0, %v5533_v13, %v5536_v30  ;;  %v5560_v32 = vld [vmem:[#allocation2 + $0xe] sm:$0x1] }
 0xaff   :  { %5493 = vst [vmem:[#allocation2 + $0x6] sm:$0x1] %v5492_v43  ;;  %5542 = vst [vmem:[#allocation2 + $0xb] sm:$0x1] %v5541_v40  ;;  %v5549_v23 = vsel %vm12547_vm0, %v5545_v27, %v5548_v50  ;;  %v5564_v35 = vld [vmem:[#allocation2 + $0xf] sm:$0x1] }
 0xb00   :  { %5554 = vst [vmem:[#allocation2 + $0xd] sm:$0x1] %v5553_v1  ;;  %5538 = vst [vmem:[#allocation2 + $0xa] sm:$0x1] %v5537_v57  ;;  %v5557_v33 = vshll.u32 %v5555_v47, 16  ;;  %v5565_v31 = vsel %vm12547_vm0, %v5555_v47, %v5564_v35 }
 0xb01   :  { %5550 = vst [vmem:[#allocation2 + $0xc] sm:$0x1] %v5549_v23  ;;  %5566 = vst [vmem:[#allocation2 + $0xf] sm:$0x1] %v5565_v31 }
 0xb02   :  { %v5561_v21 = vsel %vm12547_vm0, %v5557_v33, %v5560_v32 }
 0xb03   :  { %5562 = vst [vmem:[#allocation2 + $0xe] sm:$0x1] %v5561_v21 }
 0xb06   :  { %v12592_v24 = vld [vmem:[#allocation2] sm:$0xff] }
 0xb0a   :  { %v12594_v5 = vld [vmem:[#allocation2 + $0x8] sm:$0xff] }
 0xb0b   :  { %10413 = dma.done.wait [#allocation4], 32768 }
 0xb0c   :  { %10414 = vsyncadd [#allocation4], 4294934528  ;;  %v12598_v45 = vrot.slane %v12592_v24, %v12501_v56  ;;  %v12606_v36 = vld [vmem:[#allocation20] sm:$0xf]  ;;  %v12608_v29 = vld [vmem:[#allocation20 + $0x4] sm:$0xf] }
 0xb0d   :  { %v12610_v9 = vld [vmem:[#allocation20 + $0x8] sm:$0xf]  ;;  %v12612_v63 = vld [vmem:[#allocation20 + $0xc] sm:$0xf]  ;;  %v12614_v2 = vld [vmem:[#allocation20 + $0x10] sm:$0xf] }
 0xb0e   :  { %v5858_v60 = vcombine.high %v12598_v45, %v12598_v45  ;;  %v12616_v55 = vld [vmem:[#allocation20 + $0x14] sm:$0xf]  ;;  %v12618_v41 = vld [vmem:[#allocation20 + $0x18] sm:$0xf]  ;;  %v12620_v12 = vld [vmem:[#allocation20 + $0x1c] sm:$0xf] }
 0xb0f   :  { %v12622_v10 = vld [vmem:[#allocation20 + $0x20] sm:$0xf]  ;;  %v12624_v48 = vld [vmem:[#allocation20 + $0x24] sm:$0xf]  ;;  %v12626_v16 = vld [vmem:[#allocation20 + $0x28] sm:$0xf] }
 0xb10   :  { %v12603_v19 = vrot.slane %v5858_v60, %v12501_v56  ;;  %v12628_v58 = vld [vmem:[#allocation20 + $0x2c] sm:$0xf]  ;;  %v12630_v18 = vld [vmem:[#allocation20 + $0x30] sm:$0xf]  ;;  %v12632_v44 = vld [vmem:[#allocation20 + $0x34] sm:$0xf] }
 0xb11   :  { %v12634_v51 = vld [vmem:[#allocation20 + $0x38] sm:$0xf]  ;;  %v12636_v34 = vld [vmem:[#allocation20 + $0x3c] sm:$0xf]  ;;  %v12638_v17 = vld [vmem:[#allocation20 + $0x40] sm:$0xf] }
 0xb12   :  { %5989 = vmatprep.mubr.bf16.mxu0 %v12603_v19  ;;  %12947 = vst [vmem:[#allocation43_spill] sm:$0xff] %v12634_v51  ;;  %12948 = vst [vmem:[#allocation46_spill] sm:$0xff] %v12636_v34  ;;  %v12640_v49 = vld [vmem:[#allocation20 + $0x44] sm:$0xf]  ;;  %v12642_v11 = vld [vmem:[#allocation20 + $0x48] sm:$0xf] }
 0xb13   :  { %v12644_v8 = vld [vmem:[#allocation20 + $0x4c] sm:$0xf]  ;;  %v12646_v26 = vld [vmem:[#allocation20 + $0x50] sm:$0xf]  ;;  %v12648_v20 = vld [vmem:[#allocation20 + $0x54] sm:$0xf] }
 0xb14   :  { %v12650_v15 = vld [vmem:[#allocation20 + $0x58] sm:$0xf]  ;;  %v12652_v59 = vld [vmem:[#allocation20 + $0x5c] sm:$0xf]  ;;  %v12654_v0 = vld [vmem:[#allocation20 + $0x60] sm:$0xf] }
 0xb15   :  { %v12656_v38 = vld [vmem:[#allocation20 + $0x64] sm:$0xf]  ;;  %v12658_v53 = vld [vmem:[#allocation20 + $0x68] sm:$0xf]  ;;  %v12660_v3 = vld [vmem:[#allocation20 + $0x6c] sm:$0xf] }
 0xb16   :  { %v12662_v62 = vld [vmem:[#allocation20 + $0x70] sm:$0xf]  ;;  %v12664_v14 = vld [vmem:[#allocation20 + $0x74] sm:$0xf]  ;;  %v12666_v25 = vld [vmem:[#allocation20 + $0x78] sm:$0xf] }
 0xb17   :  { %v12668_v30 = vld [vmem:[#allocation20 + $0x7c] sm:$0xf]  ;;  %v5574_v52 = vld [vmem:[#allocation3 + $0x8] sm:$0xff]  ;;  %v5576_v37 = vld [vmem:[#allocation3 + $0x18] sm:$0xff] }
 0xb18   :  { %5957 = vmatprep.subr.bf16.mxu0 %v5574_v52  ;;  %v5573_v54 = vld [vmem:[#allocation3] sm:$0xff]  ;;  %v5575_v22 = vld [vmem:[#allocation3 + $0x10] sm:$0xff]  ;;  %v5578_v39 = vld [vmem:[#allocation3 + $0x28] sm:$0xff] }
 0xb19   :  { %5958 = vmatpush1.bf16.msra.mxu0 %v5573_v54  ;;  %v5577_v50 = vld [vmem:[#allocation3 + $0x20] sm:$0xff]  ;;  %v5580_v7 = vld [vmem:[#allocation3 + $0x38] sm:$0xff]  ;;  %v5579_v42 = vld [vmem:[#allocation3 + $0x30] sm:$0xff] }
 0xb1a   :  { %5959 = vmatprep.subr.bf16.mxu0 %v5576_v37  ;;  %v5582_v28 = vld [vmem:[#allocation3 + $0x48] sm:$0xff]  ;;  %v5581_v13 = vld [vmem:[#allocation3 + $0x40] sm:$0xff]  ;;  %v5584_v61 = vld [vmem:[#allocation3 + $0x58] sm:$0xff] }
 0xb1b   :  { %v5583_v6 = vld [vmem:[#allocation3 + $0x50] sm:$0xff]  ;;  %v5586_v43 = vld [vmem:[#allocation3 + $0x68] sm:$0xff]  ;;  %v5585_v40 = vld [vmem:[#allocation3 + $0x60] sm:$0xff] }
 0xb1c   :  { %v5588_v27 = vld [vmem:[#allocation3 + $0x78] sm:$0xff]  ;;  %v5587_v1 = vld [vmem:[#allocation3 + $0x70] sm:$0xff]  ;;  %v5590_v57 = vld [vmem:[#allocation3 + $0x88] sm:$0xff] }
 0xb1d   :  { %5960 = vmatpush1.bf16.msra.mxu0 %v5575_v22  ;;  %v5589_v47 = vld [vmem:[#allocation3 + $0x80] sm:$0xff]  ;;  %v5592_v23 = vld [vmem:[#allocation3 + $0x98] sm:$0xff]  ;;  %v5591_v32 = vld [vmem:[#allocation3 + $0x90] sm:$0xff] }
 0xb1e   :  { %5961 = vmatprep.subr.bf16.mxu0 %v5578_v39  ;;  %v5594_v35 = vld [vmem:[#allocation3 + $0xa8] sm:$0xff]  ;;  %v5593_v33 = vld [vmem:[#allocation3 + $0xa0] sm:$0xff]  ;;  %v5596_v31 = vld [vmem:[#allocation3 + $0xb8] sm:$0xff] }
 0xb1f   :  { %v5595_v21 = vld [vmem:[#allocation3 + $0xb0] sm:$0xff]  ;;  %v5598_v60 = vld [vmem:[#allocation3 + $0xc8] sm:$0xff]  ;;  %v5597_v52 = vld [vmem:[#allocation3 + $0xc0] sm:$0xff] }
 0xb20   :  { %v5600_v54 = vld [vmem:[#allocation3 + $0xd8] sm:$0xff]  ;;  %v5599_v37 = vld [vmem:[#allocation3 + $0xd0] sm:$0xff]  ;;  %v5602_v22 = vld [vmem:[#allocation3 + $0xe8] sm:$0xff] }
 0xb21   :  { %5962 = vmatpush1.bf16.msra.mxu0 %v5577_v50  ;;  %v5601_v39 = vld [vmem:[#allocation3 + $0xe0] sm:$0xff]  ;;  %v5604_v50 = vld [vmem:[#allocation3 + $0xf8] sm:$0xff] }
 0xb22   :  { %5963 = vmatprep.subr.bf16.mxu0 %v5580_v7  ;;  %v5603_v7 = vld [vmem:[#allocation3 + $0xf0] sm:$0xff] }
 0xb25   :  { %5964 = vmatpush1.bf16.msra.mxu0 %v5579_v42  ;;  %v5606_v42 = vld [vmem:[#allocation3 + $0x108] sm:$0xff] }
 0xb26   :  { %5965 = vmatprep.subr.bf16.mxu0 %v5582_v28  ;;  %v12672_v28 = vrot.slane %v12598_v45, %v12501_v56  ;;  %v5609_v45 = vld [vmem:[#allocation3 + $0x120] sm:$0xff] }
 0xb29   :  { %5966 = vmatpush1.bf16.msra.mxu0 %v5581_v13  ;;  %v12676_v13 = vcombine.high %v12603_v19, %v12603_v19 }
 0xb2a   :  { %5967 = vmatprep.subr.bf16.mxu0 %v5584_v61  ;;  %v5605_v61 = vld [vmem:[#allocation3 + $0x100] sm:$0xff] }
 0xb2d   :  { %5968 = vmatpush1.bf16.msra.mxu0 %v5583_v6  ;;  %v5608_v6 = vld [vmem:[#allocation3 + $0x118] sm:$0xff] }
 0xb2e   :  { %5969 = vmatprep.subr.bf16.mxu0 %v5586_v43  ;;  %v5607_v43 = vld [vmem:[#allocation3 + $0x110] sm:$0xff] }
 0xb31   :  { %5970 = vmatpush1.bf16.msra.mxu0 %v5585_v40  ;;  %v5610_v40 = vld [vmem:[#allocation3 + $0x128] sm:$0xff] }
 0xb32   :  { %5971 = vmatprep.subr.bf16.mxu0 %v5588_v27  ;;  %v5612_v27 = vld [vmem:[#allocation3 + $0x138] sm:$0xff] }
 0xb35   :  { %5972 = vmatpush1.bf16.msra.mxu0 %v5587_v1  ;;  %v5611_v1 = vld [vmem:[#allocation3 + $0x130] sm:$0xff] }
 0xb36   :  { %5973 = vmatprep.subr.bf16.mxu0 %v5590_v57  ;;  %v5614_v57 = vld [vmem:[#allocation3 + $0x148] sm:$0xff] }
 0xb39   :  { %5974 = vmatpush1.bf16.msra.mxu0 %v5589_v47  ;;  %v5613_v47 = vld [vmem:[#allocation3 + $0x140] sm:$0xff] }
 0xb3a   :  { %5975 = vmatprep.subr.bf16.mxu0 %v5592_v23  ;;  %v5616_v23 = vld [vmem:[#allocation3 + $0x158] sm:$0xff] }
 0xb3d   :  { %5976 = vmatpush1.bf16.msra.mxu0 %v5591_v32  ;;  %v5615_v32 = vld [vmem:[#allocation3 + $0x150] sm:$0xff] }
 0xb3e   :  { %5977 = vmatprep.subr.bf16.mxu0 %v5594_v35  ;;  %v5618_v35 = vld [vmem:[#allocation3 + $0x168] sm:$0xff] }
 0xb41   :  { %5978 = vmatpush1.bf16.msra.mxu0 %v5593_v33  ;;  %v5617_v33 = vld [vmem:[#allocation3 + $0x160] sm:$0xff] }
 0xb42   :  { %5979 = vmatprep.subr.bf16.mxu0 %v5596_v31  ;;  %v5620_v31 = vld [vmem:[#allocation3 + $0x178] sm:$0xff] }
 0xb45   :  { %5980 = vmatpush1.bf16.msra.mxu0 %v5595_v21  ;;  %v5619_v21 = vld [vmem:[#allocation3 + $0x170] sm:$0xff] }
 0xb46   :  { %5981 = vmatprep.subr.bf16.mxu0 %v5598_v60  ;;  %v5622_v60 = vld [vmem:[#allocation3 + $0x188] sm:$0xff] }
 0xb49   :  { %5982 = vmatpush1.bf16.msra.mxu0 %v5597_v52  ;;  %v5621_v52 = vld [vmem:[#allocation3 + $0x180] sm:$0xff] }
 0xb4a   :  { %5983 = vmatprep.subr.bf16.mxu0 %v5600_v54  ;;  %v5624_v54 = vld [vmem:[#allocation3 + $0x198] sm:$0xff] }
 0xb4d   :  { %5984 = vmatpush1.bf16.msra.mxu0 %v5599_v37  ;;  %v5623_v37 = vld [vmem:[#allocation3 + $0x190] sm:$0xff] }
 0xb4e   :  { %5985 = vmatprep.subr.bf16.mxu0 %v5602_v22  ;;  %v5626_v22 = vld [vmem:[#allocation3 + $0x1a8] sm:$0xff] }
 0xb51   :  { %5986 = vmatpush1.bf16.msra.mxu0 %v5601_v39  ;;  %v5625_v39 = vld [vmem:[#allocation3 + $0x1a0] sm:$0xff] }
 0xb52   :  { %5987 = vmatprep.subr.bf16.mxu0 %v5604_v50  ;;  %v5628_v50 = vld [vmem:[#allocation3 + $0x1b8] sm:$0xff] }
 0xb55   :  { %5988 = vmatpush1.bf16.msra.mxu0 %v5603_v7  ;;  %v5627_v7 = vld [vmem:[#allocation3 + $0x1b0] sm:$0xff] }
 0xb56   :  { %5998 = vmatprep.subr.bf16.mxu0 %v5606_v42  ;;  %v5630_v42 = vld [vmem:[#allocation3 + $0x1c8] sm:$0xff] }
 0xb58   :  { %5990 = vmatmul.mubr.bf16.vlgmr.msra.gmra.mrb[96].mxu0 %v12672_v28 }
 0xb59   :  { %5999 = vmatpush1.bf16.msra.mxu0 %v5605_v61  ;;  %6030 = vmatprep.mubr.bf16.mxu0 %v12676_v13  ;;  %v5629_v61 = vld [vmem:[#allocation3 + $0x1c0] sm:$0xff] }
 0xb5a   :  { %6000 = vmatprep.subr.bf16.mxu0 %v5608_v6  ;;  %v5632_v6 = vld [vmem:[#allocation3 + $0x1d8] sm:$0xff] }
 0xb5d   :  { %6001 = vmatpush1.bf16.msra.mxu0 %v5607_v43  ;;  %v5843_v43 = vcombine.high %v12592_v24, %v12592_v24  ;;  %v12689_v24 = vcombine.high %v12672_v28, %v12672_v28 }
 0xb5e   :  { %6002 = vmatprep.subr.bf16.mxu0 %v5610_v40  ;;  %v5631_v40 = vld [vmem:[#allocation3 + $0x1d0] sm:$0xff] }
 0xb61   :  { %6003 = vmatpush1.bf16.msra.mxu0 %v5609_v45  ;;  %v5634_v45 = vld [vmem:[#allocation3 + $0x1e8] sm:$0xff] }
 0xb62   :  { %6004 = vmatprep.subr.bf16.mxu0 %v5612_v27  ;;  %v12683_v27 = vrot.slane %v5843_v43, %v12501_v56  ;;  %v5651_v43 = vld [vmem:[#allocation3 + $0x270] sm:$0xff] }
 0xb65   :  { %6005 = vmatpush1.bf16.msra.mxu0 %v5611_v1  ;;  %v5633_v1 = vld [vmem:[#allocation3 + $0x1e0] sm:$0xff] }
 0xb66   :  { %6006 = vmatprep.subr.bf16.mxu0 %v5614_v57  ;;  %v5636_v57 = vld [vmem:[#allocation3 + $0x1f8] sm:$0xff] }
 0xb69   :  { %6007 = vmatpush1.bf16.msra.mxu0 %v5613_v47  ;;  %v5859_v47 = vcombine.high %v12683_v27, %v12683_v27 }
 0xb6a   :  { %6008 = vmatprep.subr.bf16.mxu0 %v5616_v23  ;;  %v5635_v23 = vld [vmem:[#allocation3 + $0x1f0] sm:$0xff] }
 0xb6d   :  { %6009 = vmatpush1.bf16.msra.mxu0 %v5615_v32  ;;  %v5638_v32 = vld [vmem:[#allocation3 + $0x208] sm:$0xff] }
 0xb6e   :  { %6010 = vmatprep.subr.bf16.mxu0 %v5618_v35  ;;  %v12692_v35 = vrot.slane %v5859_v47, %v12501_v56  ;;  %v5658_v47 = vld [vmem:[#allocation3 + $0x2a8] sm:$0xff] }
 0xb71   :  { %6011 = vmatpush1.bf16.msra.mxu0 %v5617_v33  ;;  %v5637_v33 = vld [vmem:[#allocation3 + $0x200] sm:$0xff] }
 0xb72   :  { %6012 = vmatprep.subr.bf16.mxu0 %v5620_v31  ;;  %v5640_v31 = vld [vmem:[#allocation3 + $0x218] sm:$0xff] }
 0xb75   :  { %6013 = vmatpush1.bf16.msra.mxu0 %v5619_v21  ;;  %v5639_v21 = vld [vmem:[#allocation3 + $0x210] sm:$0xff] }
 0xb76   :  { %6014 = vmatprep.subr.bf16.mxu0 %v5622_v60  ;;  %v5642_v60 = vld [vmem:[#allocation3 + $0x228] sm:$0xff] }
 0xb79   :  { %6015 = vmatpush1.bf16.msra.mxu0 %v5621_v52  ;;  %v5641_v52 = vld [vmem:[#allocation3 + $0x220] sm:$0xff] }
 0xb7a   :  { %6016 = vmatprep.subr.bf16.mxu0 %v5624_v54  ;;  %v5644_v54 = vld [vmem:[#allocation3 + $0x238] sm:$0xff] }
 0xb7d   :  { %6017 = vmatpush1.bf16.msra.mxu0 %v5623_v37  ;;  %v5643_v37 = vld [vmem:[#allocation3 + $0x230] sm:$0xff] }
 0xb7e   :  { %6018 = vmatprep.subr.bf16.mxu0 %v5626_v22  ;;  %v5646_v22 = vld [vmem:[#allocation3 + $0x248] sm:$0xff] }
 0xb81   :  { %6019 = vmatpush1.bf16.msra.mxu0 %v5625_v39  ;;  %v5645_v39 = vld [vmem:[#allocation3 + $0x240] sm:$0xff] }
 0xb82   :  { %6020 = vmatprep.subr.bf16.mxu0 %v5628_v50  ;;  %v5648_v50 = vld [vmem:[#allocation3 + $0x258] sm:$0xff] }
 0xb85   :  { %6021 = vmatpush1.bf16.msra.mxu0 %v5627_v7  ;;  %v5647_v7 = vld [vmem:[#allocation3 + $0x250] sm:$0xff] }
 0xb86   :  { %6022 = vmatprep.subr.bf16.mxu0 %v5630_v42  ;;  %v5650_v42 = vld [vmem:[#allocation3 + $0x268] sm:$0xff] }
 0xb89   :  { %6023 = vmatpush1.bf16.msra.mxu0 %v5629_v61  ;;  %v5649_v61 = vld [vmem:[#allocation3 + $0x260] sm:$0xff] }
 0xb8a   :  { %6024 = vmatprep.subr.bf16.mxu0 %v5632_v6  ;;  %v5652_v6 = vld [vmem:[#allocation3 + $0x278] sm:$0xff] }
 0xb8d   :  { %6025 = vmatpush1.bf16.msra.mxu0 %v5631_v40  ;;  %v5654_v40 = vld [vmem:[#allocation3 + $0x288] sm:$0xff] }
 0xb8e   :  { %6026 = vmatprep.subr.bf16.mxu0 %v5634_v45  ;;  %v5653_v45 = vld [vmem:[#allocation3 + $0x280] sm:$0xff] }
 0xb91   :  { %6027 = vmatpush1.bf16.msra.mxu0 %v5633_v1  ;;  %v5656_v1 = vld [vmem:[#allocation3 + $0x298] sm:$0xff] }
 0xb92   :  { %6028 = vmatprep.subr.bf16.mxu0 %v5636_v57  ;;  %v5655_v57 = vld [vmem:[#allocation3 + $0x290] sm:$0xff] }
 0xb95   :  { %6029 = vmatpush1.bf16.msra.mxu0 %v5635_v23  ;;  %v5657_v23 = vld [vmem:[#allocation3 + $0x2a0] sm:$0xff] }
 0xb96   :  { %6039 = vmatprep.subr.bf16.mxu0 %v5638_v32  ;;  %v5660_v32 = vld [vmem:[#allocation3 + $0x2b8] sm:$0xff] }
 0xb98   :  { %6031 = vmatmul.mubr.bf16.vlgmr.msra.gmra.mrb[96].mxu0 %v12689_v24 }
 0xb99   :  { %6040 = vmatpush1.bf16.msra.mxu0 %v5637_v33  ;;  %6071 = vmatprep.mubr.bf16.mxu0 %v12692_v35  ;;  %v5659_v33 = vld [vmem:[#allocation3 + $0x2b0] sm:$0xff] }
 0xb9a   :  { %6041 = vmatprep.subr.bf16.mxu0 %v5640_v31  ;;  %v5662_v31 = vld [vmem:[#allocation3 + $0x2c8] sm:$0xff] }
 0xb9d   :  { %6042 = vmatpush1.bf16.msra.mxu0 %v5639_v21  ;;  %v5661_v21 = vld [vmem:[#allocation3 + $0x2c0] sm:$0xff] }
 0xb9e   :  { %6043 = vmatprep.subr.bf16.mxu0 %v5642_v60  ;;  %v5664_v60 = vld [vmem:[#allocation3 + $0x2d8] sm:$0xff] }
 0xba1   :  { %6044 = vmatpush1.bf16.msra.mxu0 %v5641_v52  ;;  %v5663_v52 = vld [vmem:[#allocation3 + $0x2d0] sm:$0xff] }
 0xba2   :  { %6045 = vmatprep.subr.bf16.mxu0 %v5644_v54  ;;  %v5666_v54 = vld [vmem:[#allocation3 + $0x2e8] sm:$0xff] }
 0xba5   :  { %6046 = vmatpush1.bf16.msra.mxu0 %v5643_v37  ;;  %v5665_v37 = vld [vmem:[#allocation3 + $0x2e0] sm:$0xff] }
 0xba6   :  { %6047 = vmatprep.subr.bf16.mxu0 %v5646_v22  ;;  %v5668_v22 = vld [vmem:[#allocation3 + $0x2f8] sm:$0xff] }
 0xba9   :  { %6048 = vmatpush1.bf16.msra.mxu0 %v5645_v39  ;;  %v5667_v39 = vld [vmem:[#allocation3 + $0x2f0] sm:$0xff] }
 0xbaa   :  { %6049 = vmatprep.subr.bf16.mxu0 %v5648_v50  ;;  %v5670_v50 = vld [vmem:[#allocation3 + $0x308] sm:$0xff] }
 0xbad   :  { %6050 = vmatpush1.bf16.msra.mxu0 %v5647_v7  ;;  %v12698_v7 = vrot.slane %v12683_v27, %v12501_v56  ;;  %v5673_v27 = vld [vmem:[#allocation3 + $0x320] sm:$0xff] }
 0xbae   :  { %6051 = vmatprep.subr.bf16.mxu0 %v5650_v42  ;;  %v12702_v42 = vcombine.high %v12692_v35, %v12692_v35 }
 0xbb1   :  { %6052 = vmatpush1.bf16.msra.mxu0 %v5649_v61  ;;  %v5669_v61 = vld [vmem:[#allocation3 + $0x300] sm:$0xff] }
 0xbb2   :  { %6053 = vmatprep.subr.bf16.mxu0 %v5652_v6  ;;  %v5672_v6 = vld [vmem:[#allocation3 + $0x318] sm:$0xff] }
 0xbb5   :  { %6054 = vmatpush1.bf16.msra.mxu0 %v5651_v43  ;;  %v5671_v43 = vld [vmem:[#allocation3 + $0x310] sm:$0xff] }
 0xbb6   :  { %6055 = vmatprep.subr.bf16.mxu0 %v5654_v40  ;;  %v5674_v40 = vld [vmem:[#allocation3 + $0x328] sm:$0xff] }
 0xbb9   :  { %6056 = vmatpush1.bf16.msra.mxu0 %v5653_v45  ;;  %v5676_v45 = vld [vmem:[#allocation3 + $0x338] sm:$0xff] }
 0xbba   :  { %6057 = vmatprep.subr.bf16.mxu0 %v5656_v1  ;;  %v5675_v1 = vld [vmem:[#allocation3 + $0x330] sm:$0xff] }
 0xbbd   :  { %6058 = vmatpush1.bf16.msra.mxu0 %v5655_v57  ;;  %v5678_v57 = vld [vmem:[#allocation3 + $0x348] sm:$0xff] }
 0xbbe   :  { %6059 = vmatprep.subr.bf16.mxu0 %v5658_v47  ;;  %v5677_v47 = vld [vmem:[#allocation3 + $0x340] sm:$0xff] }
 0xbc1   :  { %6060 = vmatpush1.bf16.msra.mxu0 %v5657_v23  ;;  %v5680_v23 = vld [vmem:[#allocation3 + $0x358] sm:$0xff] }
 0xbc2   :  { %6061 = vmatprep.subr.bf16.mxu0 %v5660_v32  ;;  %v5679_v32 = vld [vmem:[#allocation3 + $0x350] sm:$0xff] }
 0xbc5   :  { %6062 = vmatpush1.bf16.msra.mxu0 %v5659_v33  ;;  %v5682_v33 = vld [vmem:[#allocation3 + $0x368] sm:$0xff] }
 0xbc6   :  { %6063 = vmatprep.subr.bf16.mxu0 %v5662_v31  ;;  %v5681_v31 = vld [vmem:[#allocation3 + $0x360] sm:$0xff] }
 0xbc9   :  { %6064 = vmatpush1.bf16.msra.mxu0 %v5661_v21  ;;  %v5684_v21 = vld [vmem:[#allocation3 + $0x378] sm:$0xff] }
 0xbca   :  { %6065 = vmatprep.subr.bf16.mxu0 %v5664_v60  ;;  %v5683_v60 = vld [vmem:[#allocation3 + $0x370] sm:$0xff] }
 0xbcd   :  { %6066 = vmatpush1.bf16.msra.mxu0 %v5663_v52  ;;  %v5686_v52 = vld [vmem:[#allocation3 + $0x388] sm:$0xff] }
 0xbce   :  { %6067 = vmatprep.subr.bf16.mxu0 %v5666_v54  ;;  %v5685_v54 = vld [vmem:[#allocation3 + $0x380] sm:$0xff] }
 0xbd1   :  { %6068 = vmatpush1.bf16.msra.mxu0 %v5665_v37  ;;  %v5688_v37 = vld [vmem:[#allocation3 + $0x398] sm:$0xff] }
 0xbd2   :  { %6069 = vmatprep.subr.bf16.mxu0 %v5668_v22  ;;  %v5687_v22 = vld [vmem:[#allocation3 + $0x390] sm:$0xff] }
 0xbd5   :  { %6070 = vmatpush1.bf16.msra.mxu0 %v5667_v39  ;;  %v5690_v39 = vld [vmem:[#allocation3 + $0x3a8] sm:$0xff] }
 0xbd6   :  { %6080 = vmatprep.subr.bf16.mxu0 %v5670_v50  ;;  %v5689_v50 = vld [vmem:[#allocation3 + $0x3a0] sm:$0xff] }
 0xbd8   :  { %6072 = vmatmul.mubr.bf16.vlgmr.msra.gmra.mrb[96].mxu0 %v12698_v7 }
 0xbd9   :  { %6081 = vmatpush1.bf16.msra.mxu0 %v5669_v61  ;;  %6112 = vmatprep.mubr.bf16.mxu0 %v12702_v42  ;;  %v5692_v61 = vld [vmem:[#allocation3 + $0x3b8] sm:$0xff] }
 0xbda   :  { %6082 = vmatprep.subr.bf16.mxu0 %v5672_v6  ;;  %v5691_v6 = vld [vmem:[#allocation3 + $0x3b0] sm:$0xff] }
 0xbdd   :  { %6083 = vmatpush1.bf16.msra.mxu0 %v5671_v43  ;;  %v5694_v43 = vld [vmem:[#allocation3 + $0x3c8] sm:$0xff] }
 0xbde   :  { %6084 = vmatprep.subr.bf16.mxu0 %v5674_v40  ;;  %v5693_v40 = vld [vmem:[#allocation3 + $0x3c0] sm:$0xff] }
 0xbe1   :  { %6085 = vmatpush1.bf16.msra.mxu0 %v5673_v27  ;;  %v5696_v27 = vld [vmem:[#allocation3 + $0x3d8] sm:$0xff] }
 0xbe2   :  { %6086 = vmatprep.subr.bf16.mxu0 %v5676_v45  ;;  %v5695_v45 = vld [vmem:[#allocation3 + $0x3d0] sm:$0xff] }
 0xbe5   :  { %6087 = vmatpush1.bf16.msra.mxu0 %v5675_v1  ;;  %v5698_v1 = vld [vmem:[#allocation3 + $0x3e8] sm:$0xff] }
 0xbe6   :  { %6088 = vmatprep.subr.bf16.mxu0 %v5678_v57  ;;  %v12708_v57 = vrot.slane %v12594_v5, %v12501_v56 }
 0xbe9   :  { %6089 = vmatpush1.bf16.msra.mxu0 %v5677_v47  ;;  %v5697_v47 = vld [vmem:[#allocation3 + $0x3e0] sm:$0xff] }
 0xbea   :  { %6090 = vmatprep.subr.bf16.mxu0 %v5680_v23  ;;  %v5700_v23 = vld [vmem:[#allocation3 + $0x3f8] sm:$0xff] }
 0xbed   :  { %6091 = vmatpush1.bf16.msra.mxu0 %v5679_v32  ;;  %v5907_v32 = vcombine.high %v12708_v57, %v12708_v57 }
 0xbee   :  { %6092 = vmatprep.subr.bf16.mxu0 %v5682_v33  ;;  %v5699_v33 = vld [vmem:[#allocation3 + $0x3f0] sm:$0xff] }
 0xbf1   :  { %6093 = vmatpush1.bf16.msra.mxu0 %v5681_v31  ;;  %v5702_v31 = vld [vmem:[#allocation3 + $0x408] sm:$0xff] }
 0xbf2   :  { %6094 = vmatprep.subr.bf16.mxu0 %v5684_v21  ;;  %v12714_v21 = vcombine.high %v12698_v7, %v12698_v7 }
 0xbf5   :  { %6095 = vmatpush1.bf16.msra.mxu0 %v5683_v60  ;;  %v12717_v60 = vrot.slane %v5907_v32, %v12501_v56  ;;  %v5718_v32 = vld [vmem:[#allocation3 + $0x488] sm:$0xff] }
 0xbf6   :  { %6096 = vmatprep.subr.bf16.mxu0 %v5686_v52  ;;  %v5701_v52 = vld [vmem:[#allocation3 + $0x400] sm:$0xff] }
 0xbf9   :  { %6097 = vmatpush1.bf16.msra.mxu0 %v5685_v54  ;;  %v5704_v54 = vld [vmem:[#allocation3 + $0x418] sm:$0xff] }
 0xbfa   :  { %6098 = vmatprep.subr.bf16.mxu0 %v5688_v37  ;;  %v5703_v37 = vld [vmem:[#allocation3 + $0x410] sm:$0xff] }
 0xbfd   :  { %6099 = vmatpush1.bf16.msra.mxu0 %v5687_v22  ;;  %v5706_v22 = vld [vmem:[#allocation3 + $0x428] sm:$0xff] }
 0xbfe   :  { %6100 = vmatprep.subr.bf16.mxu0 %v5690_v39  ;;  %v5705_v39 = vld [vmem:[#allocation3 + $0x420] sm:$0xff] }
 0xc01   :  { %6101 = vmatpush1.bf16.msra.mxu0 %v5689_v50  ;;  %v5708_v50 = vld [vmem:[#allocation3 + $0x438] sm:$0xff] }
 0xc02   :  { %6102 = vmatprep.subr.bf16.mxu0 %v5692_v61  ;;  %v5707_v61 = vld [vmem:[#allocation3 + $0x430] sm:$0xff] }
 0xc05   :  { %6103 = vmatpush1.bf16.msra.mxu0 %v5691_v6  ;;  %v5710_v6 = vld [vmem:[#allocation3 + $0x448] sm:$0xff] }
 0xc06   :  { %6104 = vmatprep.subr.bf16.mxu0 %v5694_v43  ;;  %v5709_v43 = vld [vmem:[#allocation3 + $0x440] sm:$0xff] }
 0xc09   :  { %6105 = vmatpush1.bf16.msra.mxu0 %v5693_v40  ;;  %v5712_v40 = vld [vmem:[#allocation3 + $0x458] sm:$0xff] }
 0xc0a   :  { %6106 = vmatprep.subr.bf16.mxu0 %v5696_v27  ;;  %v5711_v27 = vld [vmem:[#allocation3 + $0x450] sm:$0xff] }
 0xc0d   :  { %6107 = vmatpush1.bf16.msra.mxu0 %v5695_v45  ;;  %v5714_v45 = vld [vmem:[#allocation3 + $0x468] sm:$0xff] }
 0xc0e   :  { %6108 = vmatprep.subr.bf16.mxu0 %v5698_v1  ;;  %v5713_v1 = vld [vmem:[#allocation3 + $0x460] sm:$0xff] }
 0xc11   :  { %6109 = vmatpush1.bf16.msra.mxu0 %v5697_v47  ;;  %v5716_v47 = vld [vmem:[#allocation3 + $0x478] sm:$0xff] }
 0xc12   :  { %6110 = vmatprep.subr.bf16.mxu0 %v5700_v23  ;;  %v5715_v23 = vld [vmem:[#allocation3 + $0x470] sm:$0xff] }
 0xc15   :  { %6111 = vmatpush1.bf16.msra.mxu0 %v5699_v33  ;;  %v5717_v33 = vld [vmem:[#allocation3 + $0x480] sm:$0xff] }
 0xc16   :  { %6121 = vmatprep.subr.bf16.mxu0 %v5702_v31  ;;  %v5720_v31 = vld [vmem:[#allocation3 + $0x498] sm:$0xff] }
 0xc18   :  { %6113 = vmatmul.mubr.bf16.vlgmr.msra.gmra.mrb[96].mxu0 %v12714_v21 }
 0xc19   :  { %6122 = vmatpush1.bf16.msra.mxu0 %v5701_v52  ;;  %6153 = vmatprep.mubr.bf16.mxu0 %v12717_v60  ;;  %v5719_v52 = vld [vmem:[#allocation3 + $0x490] sm:$0xff] }
 0xc1a   :  { %6123 = vmatprep.subr.bf16.mxu0 %v5704_v54  ;;  %v5722_v54 = vld [vmem:[#allocation3 + $0x4a8] sm:$0xff] }
 0xc1d   :  { %6124 = vmatpush1.bf16.msra.mxu0 %v5703_v37  ;;  %v5721_v37 = vld [vmem:[#allocation3 + $0x4a0] sm:$0xff] }
 0xc1e   :  { %6125 = vmatprep.subr.bf16.mxu0 %v5706_v22  ;;  %v5724_v22 = vld [vmem:[#allocation3 + $0x4b8] sm:$0xff] }
 0xc21   :  { %6126 = vmatpush1.bf16.msra.mxu0 %v5705_v39  ;;  %v5723_v39 = vld [vmem:[#allocation3 + $0x4b0] sm:$0xff] }
 0xc22   :  { %6127 = vmatprep.subr.bf16.mxu0 %v5708_v50  ;;  %v5726_v50 = vld [vmem:[#allocation3 + $0x4c8] sm:$0xff] }
 0xc25   :  { %6128 = vmatpush1.bf16.msra.mxu0 %v5707_v61  ;;  %v5725_v61 = vld [vmem:[#allocation3 + $0x4c0] sm:$0xff] }
 0xc26   :  { %6129 = vmatprep.subr.bf16.mxu0 %v5710_v6  ;;  %v5728_v6 = vld [vmem:[#allocation3 + $0x4d8] sm:$0xff] }
 0xc29   :  { %6130 = vmatpush1.bf16.msra.mxu0 %v5709_v43  ;;  %v5727_v43 = vld [vmem:[#allocation3 + $0x4d0] sm:$0xff] }
 0xc2a   :  { %6131 = vmatprep.subr.bf16.mxu0 %v5712_v40  ;;  %v5730_v40 = vld [vmem:[#allocation3 + $0x4e8] sm:$0xff] }
 0xc2d   :  { %6132 = vmatpush1.bf16.msra.mxu0 %v5711_v27  ;;  %v5729_v27 = vld [vmem:[#allocation3 + $0x4e0] sm:$0xff] }
 0xc2e   :  { %6133 = vmatprep.subr.bf16.mxu0 %v5714_v45  ;;  %v5732_v45 = vld [vmem:[#allocation3 + $0x4f8] sm:$0xff] }
 0xc31   :  { %6134 = vmatpush1.bf16.msra.mxu0 %v5713_v1  ;;  %v5731_v1 = vld [vmem:[#allocation3 + $0x4f0] sm:$0xff] }
 0xc32   :  { %6135 = vmatprep.subr.bf16.mxu0 %v5716_v47  ;;  %v5734_v47 = vld [vmem:[#allocation3 + $0x508] sm:$0xff] }
 0xc35   :  { %6136 = vmatpush1.bf16.msra.mxu0 %v5715_v23  ;;  %v12723_v23 = vrot.slane %v12708_v57, %v12501_v56  ;;  %v5737_v57 = vld [vmem:[#allocation3 + $0x520] sm:$0xff] }
 0xc36   :  { %6137 = vmatprep.subr.bf16.mxu0 %v5718_v32  ;;  %v12727_v32 = vcombine.high %v12717_v60, %v12717_v60 }
 0xc39   :  { %6138 = vmatpush1.bf16.msra.mxu0 %v5717_v33  ;;  %v5733_v33 = vld [vmem:[#allocation3 + $0x500] sm:$0xff] }
 0xc3a   :  { %6139 = vmatprep.subr.bf16.mxu0 %v5720_v31  ;;  %v5736_v31 = vld [vmem:[#allocation3 + $0x518] sm:$0xff] }
 0xc3d   :  { %6140 = vmatpush1.bf16.msra.mxu0 %v5719_v52  ;;  %v5735_v52 = vld [vmem:[#allocation3 + $0x510] sm:$0xff] }
 0xc3e   :  { %6141 = vmatprep.subr.bf16.mxu0 %v5722_v54  ;;  %v5738_v54 = vld [vmem:[#allocation3 + $0x528] sm:$0xff] }
 0xc41   :  { %6142 = vmatpush1.bf16.msra.mxu0 %v5721_v37  ;;  %v5740_v37 = vld [vmem:[#allocation3 + $0x538] sm:$0xff] }
 0xc42   :  { %6143 = vmatprep.subr.bf16.mxu0 %v5724_v22  ;;  %v5739_v22 = vld [vmem:[#allocation3 + $0x530] sm:$0xff] }
 0xc45   :  { %6144 = vmatpush1.bf16.msra.mxu0 %v5723_v39  ;;  %v5742_v39 = vld [vmem:[#allocation3 + $0x548] sm:$0xff] }
 0xc46   :  { %6145 = vmatprep.subr.bf16.mxu0 %v5726_v50  ;;  %v5741_v50 = vld [vmem:[#allocation3 + $0x540] sm:$0xff] }
 0xc49   :  { %6146 = vmatpush1.bf16.msra.mxu0 %v5725_v61  ;;  %v5744_v61 = vld [vmem:[#allocation3 + $0x558] sm:$0xff] }
 0xc4a   :  { %6147 = vmatprep.subr.bf16.mxu0 %v5728_v6  ;;  %v5743_v6 = vld [vmem:[#allocation3 + $0x550] sm:$0xff] }
 0xc4d   :  { %6148 = vmatpush1.bf16.msra.mxu0 %v5727_v43  ;;  %v5746_v43 = vld [vmem:[#allocation3 + $0x568] sm:$0xff] }
 0xc4e   :  { %6149 = vmatprep.subr.bf16.mxu0 %v5730_v40  ;;  %v5745_v40 = vld [vmem:[#allocation3 + $0x560] sm:$0xff] }
 0xc51   :  { %6150 = vmatpush1.bf16.msra.mxu0 %v5729_v27  ;;  %v5748_v27 = vld [vmem:[#allocation3 + $0x578] sm:$0xff] }
 0xc52   :  { %6151 = vmatprep.subr.bf16.mxu0 %v5732_v45  ;;  %v5747_v45 = vld [vmem:[#allocation3 + $0x570] sm:$0xff] }
 0xc55   :  { %6152 = vmatpush1.bf16.msra.mxu0 %v5731_v1  ;;  %v5750_v1 = vld [vmem:[#allocation3 + $0x588] sm:$0xff] }
 0xc56   :  { %6162 = vmatprep.subr.bf16.mxu0 %v5734_v47  ;;  %v5749_v47 = vld [vmem:[#allocation3 + $0x580] sm:$0xff] }
 0xc58   :  { %6154 = vmatmul.mubr.bf16.vlgmr.msra.gmra.mrb[96].mxu0 %v12723_v23 }
 0xc59   :  { %6163 = vmatpush1.bf16.msra.mxu0 %v5733_v33  ;;  %6194 = vmatprep.mubr.bf16.mxu0 %v12727_v32  ;;  %v5752_v33 = vld [vmem:[#allocation3 + $0x598] sm:$0xff] }
 0xc5a   :  { %6164 = vmatprep.subr.bf16.mxu0 %v5736_v31  ;;  %v5751_v31 = vld [vmem:[#allocation3 + $0x590] sm:$0xff] }
 0xc5d   :  { %6165 = vmatpush1.bf16.msra.mxu0 %v5735_v52  ;;  %v5754_v52 = vld [vmem:[#allocation3 + $0x5a8] sm:$0xff] }
 0xc5e   :  { %6166 = vmatprep.subr.bf16.mxu0 %v5738_v54  ;;  %v5753_v54 = vld [vmem:[#allocation3 + $0x5a0] sm:$0xff] }
 0xc61   :  { %6167 = vmatpush1.bf16.msra.mxu0 %v5737_v57  ;;  %v5756_v57 = vld [vmem:[#allocation3 + $0x5b8] sm:$0xff] }
 0xc62   :  { %6168 = vmatprep.subr.bf16.mxu0 %v5740_v37  ;;  %v5755_v37 = vld [vmem:[#allocation3 + $0x5b0] sm:$0xff] }
 0xc65   :  { %6169 = vmatpush1.bf16.msra.mxu0 %v5739_v22  ;;  %v5758_v22 = vld [vmem:[#allocation3 + $0x5c8] sm:$0xff] }
 0xc66   :  { %6170 = vmatprep.subr.bf16.mxu0 %v5742_v39  ;;  %v5757_v39 = vld [vmem:[#allocation3 + $0x5c0] sm:$0xff] }
 0xc69   :  { %6171 = vmatpush1.bf16.msra.mxu0 %v5741_v50  ;;  %v5760_v50 = vld [vmem:[#allocation3 + $0x5d8] sm:$0xff] }
 0xc6a   :  { %6172 = vmatprep.subr.bf16.mxu0 %v5744_v61  ;;  %v5892_v61 = vcombine.high %v12594_v5, %v12594_v5  ;;  %v12740_v5 = vcombine.high %v12723_v23, %v12723_v23 }
 0xc6d   :  { %6173 = vmatpush1.bf16.msra.mxu0 %v5743_v6  ;;  %v5759_v6 = vld [vmem:[#allocation3 + $0x5d0] sm:$0xff] }
 0xc6e   :  { %6174 = vmatprep.subr.bf16.mxu0 %v5746_v43  ;;  %v5762_v43 = vld [vmem:[#allocation3 + $0x5e8] sm:$0xff] }
 0xc71   :  { %6175 = vmatpush1.bf16.msra.mxu0 %v5745_v40  ;;  %v12734_v40 = vrot.slane %v5892_v61, %v12501_v56  ;;  %v5774_v61 = vld [vmem:[#allocation3 + $0x648] sm:$0xff] }
 0xc72   :  { %6176 = vmatprep.subr.bf16.mxu0 %v5748_v27  ;;  %v5761_v27 = vld [vmem:[#allocation3 + $0x5e0] sm:$0xff] }
 0xc75   :  { %6177 = vmatpush1.bf16.msra.mxu0 %v5747_v45  ;;  %v5764_v45 = vld [vmem:[#allocation3 + $0x5f8] sm:$0xff] }
 0xc76   :  { %6178 = vmatprep.subr.bf16.mxu0 %v5750_v1  ;;  %v5908_v1 = vcombine.high %v12734_v40, %v12734_v40 }
 0xc79   :  { %6179 = vmatpush1.bf16.msra.mxu0 %v5749_v47  ;;  %v5763_v47 = vld [vmem:[#allocation3 + $0x5f0] sm:$0xff] }
 0xc7a   :  { %6180 = vmatprep.subr.bf16.mxu0 %v5752_v33  ;;  %v5766_v33 = vld [vmem:[#allocation3 + $0x608] sm:$0xff] }
 0xc7d   :  { %6181 = vmatpush1.bf16.msra.mxu0 %v5751_v31  ;;  %v12743_v31 = vrot.slane %v5908_v1, %v12501_v56  ;;  %v5777_v1 = vld [vmem:[#allocation3 + $0x660] sm:$0xff] }
 0xc7e   :  { %6182 = vmatprep.subr.bf16.mxu0 %v5754_v52  ;;  %v5765_v52 = vld [vmem:[#allocation3 + $0x600] sm:$0xff] }
 0xc81   :  { %6183 = vmatpush1.bf16.msra.mxu0 %v5753_v54  ;;  %v5768_v54 = vld [vmem:[#allocation3 + $0x618] sm:$0xff] }
 0xc82   :  { %6184 = vmatprep.subr.bf16.mxu0 %v5756_v57  ;;  %v5767_v57 = vld [vmem:[#allocation3 + $0x610] sm:$0xff] }
 0xc85   :  { %6185 = vmatpush1.bf16.msra.mxu0 %v5755_v37  ;;  %v5770_v37 = vld [vmem:[#allocation3 + $0x628] sm:$0xff] }
 0xc86   :  { %6186 = vmatprep.subr.bf16.mxu0 %v5758_v22  ;;  %v5769_v22 = vld [vmem:[#allocation3 + $0x620] sm:$0xff] }
 0xc89   :  { %6187 = vmatpush1.bf16.msra.mxu0 %v5757_v39  ;;  %v5772_v39 = vld [vmem:[#allocation3 + $0x638] sm:$0xff] }
 0xc8a   :  { %6188 = vmatprep.subr.bf16.mxu0 %v5760_v50  ;;  %v5771_v50 = vld [vmem:[#allocation3 + $0x630] sm:$0xff] }
 0xc8d   :  { %6189 = vmatpush1.bf16.msra.mxu0 %v5759_v6  ;;  %v5773_v6 = vld [vmem:[#allocation3 + $0x640] sm:$0xff] }
 0xc8e   :  { %6190 = vmatprep.subr.bf16.mxu0 %v5762_v43  ;;  %v5776_v43 = vld [vmem:[#allocation3 + $0x658] sm:$0xff] }
 0xc91   :  { %6191 = vmatpush1.bf16.msra.mxu0 %v5761_v27  ;;  %v5775_v27 = vld [vmem:[#allocation3 + $0x650] sm:$0xff] }
 0xc92   :  { %6192 = vmatprep.subr.bf16.mxu0 %v5764_v45  ;;  %v5778_v45 = vld [vmem:[#allocation3 + $0x668] sm:$0xff] }
 0xc95   :  { %6193 = vmatpush1.bf16.msra.mxu0 %v5763_v47  ;;  %v5780_v47 = vld [vmem:[#allocation3 + $0x678] sm:$0xff] }
 0xc96   :  { %6203 = vmatprep.subr.bf16.mxu0 %v5766_v33  ;;  %v5779_v33 = vld [vmem:[#allocation3 + $0x670] sm:$0xff] }
 0xc98   :  { %6195 = vmatmul.mubr.bf16.vlgmr.msra.gmra.mrb[96].mxu0 %v12740_v5 }
 0xc99   :  { %6204 = vmatpush1.bf16.msra.mxu0 %v5765_v52  ;;  %6235 = vmatprep.mubr.bf16.mxu0 %v12743_v31  ;;  %v5782_v52 = vld [vmem:[#allocation3 + $0x688] sm:$0xff] }
 0xc9a   :  { %6205 = vmatprep.subr.bf16.mxu0 %v5768_v54  ;;  %v5781_v54 = vld [vmem:[#allocation3 + $0x680] sm:$0xff] }
 0xc9d   :  { %6206 = vmatpush1.bf16.msra.mxu0 %v5767_v57  ;;  %v5784_v57 = vld [vmem:[#allocation3 + $0x698] sm:$0xff] }
 0xc9e   :  { %6207 = vmatprep.subr.bf16.mxu0 %v5770_v37  ;;  %v5783_v37 = vld [vmem:[#allocation3 + $0x690] sm:$0xff] }
 0xca1   :  { %6208 = vmatpush1.bf16.msra.mxu0 %v5769_v22  ;;  %v5786_v22 = vld [vmem:[#allocation3 + $0x6a8] sm:$0xff] }
 0xca2   :  { %6209 = vmatprep.subr.bf16.mxu0 %v5772_v39  ;;  %v5785_v39 = vld [vmem:[#allocation3 + $0x6a0] sm:$0xff] }
 0xca5   :  { %6210 = vmatpush1.bf16.msra.mxu0 %v5771_v50  ;;  %v5788_v50 = vld [vmem:[#allocation3 + $0x6b8] sm:$0xff] }
 0xca6   :  { %6211 = vmatprep.subr.bf16.mxu0 %v5774_v61  ;;  %v5787_v61 = vld [vmem:[#allocation3 + $0x6b0] sm:$0xff] }
 0xca9   :  { %6212 = vmatpush1.bf16.msra.mxu0 %v5773_v6  ;;  %v5790_v6 = vld [vmem:[#allocation3 + $0x6c8] sm:$0xff] }
 0xcaa   :  { %6213 = vmatprep.subr.bf16.mxu0 %v5776_v43  ;;  %v5789_v43 = vld [vmem:[#allocation3 + $0x6c0] sm:$0xff] }
 0xcad   :  { %6214 = vmatpush1.bf16.msra.mxu0 %v5775_v27  ;;  %v5792_v27 = vld [vmem:[#allocation3 + $0x6d8] sm:$0xff] }
 0xcae   :  { %6215 = vmatprep.subr.bf16.mxu0 %v5778_v45  ;;  %v5791_v45 = vld [vmem:[#allocation3 + $0x6d0] sm:$0xff] }
 0xcb1   :  { %6216 = vmatpush1.bf16.msra.mxu0 %v5777_v1  ;;  %v5794_v1 = vld [vmem:[#allocation3 + $0x6e8] sm:$0xff] }
 0xcb2   :  { %6217 = vmatprep.subr.bf16.mxu0 %v5780_v47  ;;  %v5793_v47 = vld [vmem:[#allocation3 + $0x6e0] sm:$0xff] }
 0xcb5   :  { %6218 = vmatpush1.bf16.msra.mxu0 %v5779_v33  ;;  %v5796_v33 = vld [vmem:[#allocation3 + $0x6f8] sm:$0xff] }
 0xcb6   :  { %6219 = vmatprep.subr.bf16.mxu0 %v5782_v52  ;;  %v5795_v52 = vld [vmem:[#allocation3 + $0x6f0] sm:$0xff] }
 0xcb9   :  { %6220 = vmatpush1.bf16.msra.mxu0 %v5781_v54  ;;  %v5798_v54 = vld [vmem:[#allocation3 + $0x708] sm:$0xff] }
 0xcba   :  { %6221 = vmatprep.subr.bf16.mxu0 %v5784_v57  ;;  %v12749_v57 = vrot.slane %v12734_v40, %v12501_v56  ;;  %v5801_v56 = vld [vmem:[#allocation3 + $0x720] sm:$0xff]  ;;  %v5804_v40 = vld [vmem:[#allocation3 + $0x738] sm:$0xff] }
 0xcbd   :  { %6222 = vmatpush1.bf16.msra.mxu0 %v5783_v37  ;;  %v12753_v37 = vcombine.high %v12743_v31, %v12743_v31 }
 0xcbe   :  { %6223 = vmatprep.subr.bf16.mxu0 %v5786_v22  ;;  %v5797_v22 = vld [vmem:[#allocation3 + $0x700] sm:$0xff] }
 0xcc1   :  { %6224 = vmatpush1.bf16.msra.mxu0 %v5785_v39  ;;  %v5800_v39 = vld [vmem:[#allocation3 + $0x718] sm:$0xff] }
 0xcc2   :  { %6225 = vmatprep.subr.bf16.mxu0 %v5788_v50  ;;  %v5799_v50 = vld [vmem:[#allocation3 + $0x710] sm:$0xff] }
 0xcc5   :  { %6226 = vmatpush1.bf16.msra.mxu0 %v5787_v61  ;;  %v5802_v61 = vld [vmem:[#allocation3 + $0x728] sm:$0xff] }
 0xcc6   :  { %6227 = vmatprep.subr.bf16.mxu0 %v5790_v6  ;;  %v5803_v6 = vld [vmem:[#allocation3 + $0x730] sm:$0xff] }
 0xcc9   :  { %6228 = vmatpush1.bf16.msra.mxu0 %v5789_v43  ;;  %v5806_v43 = vld [vmem:[#allocation3 + $0x748] sm:$0xff] }
 0xcca   :  { %6229 = vmatprep.subr.bf16.mxu0 %v5792_v27  ;;  %v5805_v27 = vld [vmem:[#allocation3 + $0x740] sm:$0xff] }
 0xccd   :  { %6230 = vmatpush1.bf16.msra.mxu0 %v5791_v45  ;;  %v5808_v45 = vld [vmem:[#allocation3 + $0x758] sm:$0xff] }
 0xcce   :  { %6231 = vmatprep.subr.bf16.mxu0 %v5794_v1  ;;  %v5807_v1 = vld [vmem:[#allocation3 + $0x750] sm:$0xff] }
 0xcd1   :  { %6232 = vmatpush1.bf16.msra.mxu0 %v5793_v47  ;;  %v5810_v47 = vld [vmem:[#allocation3 + $0x768] sm:$0xff] }
 0xcd2   :  { %6233 = vmatprep.subr.bf16.mxu0 %v5796_v33  ;;  %v5809_v33 = vld [vmem:[#allocation3 + $0x760] sm:$0xff] }
 0xcd5   :  { %6234 = vmatpush1.bf16.msra.mxu0 %v5795_v52  ;;  %v5812_v52 = vld [vmem:[#allocation3 + $0x778] sm:$0xff] }
 0xcd6   :  { %6244 = vmatprep.subr.bf16.mxu0 %v5798_v54  ;;  %v5811_v54 = vld [vmem:[#allocation3 + $0x770] sm:$0xff] }
 0xcd8   :  { %6236 = vmatmul.mubr.bf16.vlgmr.msra.gmra.mrb[96].mxu0 %v12749_v57 }
 0xcd9   :  { %6245 = vmatpush1.bf16.msra.mxu0 %v5797_v22  ;;  %6276 = vmatprep.mubr.bf16.mxu0 %v12753_v37  ;;  %v5814_v22 = vld [vmem:[#allocation3 + $0x788] sm:$0xff] }
 0xcda   :  { %6246 = vmatprep.subr.bf16.mxu0 %v5800_v39  ;;  %v5813_v39 = vld [vmem:[#allocation3 + $0x780] sm:$0xff] }
 0xcdd   :  { %6247 = vmatpush1.bf16.msra.mxu0 %v5799_v50  ;;  %v5816_v50 = vld [vmem:[#allocation3 + $0x798] sm:$0xff] }
 0xcde   :  { %6248 = vmatprep.subr.bf16.mxu0 %v5802_v61  ;;  %v5815_v61 = vld [vmem:[#allocation3 + $0x790] sm:$0xff] }
 0xce1   :  { %6249 = vmatpush1.bf16.msra.mxu0 %v5801_v56  ;;  %v5818_v56 = vld [vmem:[#allocation3 + $0x7a8] sm:$0xff] }
 0xce2   :  { %6250 = vmatprep.subr.bf16.mxu0 %v5804_v40  ;;  %v5817_v40 = vld [vmem:[#allocation3 + $0x7a0] sm:$0xff] }
 0xce5   :  { %6251 = vmatpush1.bf16.msra.mxu0 %v5803_v6  ;;  %v5820_v6 = vld [vmem:[#allocation3 + $0x7b8] sm:$0xff] }
 0xce6   :  { %6252 = vmatprep.subr.bf16.mxu0 %v5806_v43  ;;  %v5819_v43 = vld [vmem:[#allocation3 + $0x7b0] sm:$0xff] }
 0xce9   :  { %6253 = vmatpush1.bf16.msra.mxu0 %v5805_v27  ;;  %v5822_v27 = vld [vmem:[#allocation3 + $0x7c8] sm:$0xff] }
 0xcea   :  { %6254 = vmatprep.subr.bf16.mxu0 %v5808_v45  ;;  %v5821_v45 = vld [vmem:[#allocation3 + $0x7c0] sm:$0xff] }
 0xced   :  { %6255 = vmatpush1.bf16.msra.mxu0 %v5807_v1  ;;  %v5824_v1 = vld [vmem:[#allocation3 + $0x7d8] sm:$0xff] }
 0xcee   :  { %6256 = vmatprep.subr.bf16.mxu0 %v5810_v47  ;;  %v5823_v47 = vld [vmem:[#allocation3 + $0x7d0] sm:$0xff] }
 0xcf1   :  { %6257 = vmatpush1.bf16.msra.mxu0 %v5809_v33  ;;  %v5826_v33 = vld [vmem:[#allocation3 + $0x7e8] sm:$0xff] }
 0xcf2   :  { %6258 = vmatprep.subr.bf16.mxu0 %v5812_v52  ;;  %v5825_v52 = vld [vmem:[#allocation3 + $0x7e0] sm:$0xff] }
 0xcf5   :  { %6259 = vmatpush1.bf16.msra.mxu0 %v5811_v54  ;;  %v5828_v54 = vld [vmem:[#allocation3 + $0x7f8] sm:$0xff] }
 0xcf6   :  { %6260 = vmatprep.subr.bf16.mxu0 %v5814_v22  ;;  %v5827_v22 = vld [vmem:[#allocation3 + $0x7f0] sm:$0xff] }
 0xcf9   :  { %6261 = vmatpush1.bf16.msra.mxu0 %v5813_v39  ;;  %v12759_v39 = vcombine.high %v12749_v57, %v12749_v57 }
 0xcfa   :  { %6262 = vmatprep.subr.bf16.mxu0 %v5816_v50  ;;  %v5829_v50 = vld [vmem:[#allocation19] sm:$0x3] }
 0xcfb   :  { %12949 = vst [vmem:[#allocation44_spill] sm:$0xff] %v12759_v39 }
 0xcfd   :  { %6263 = vmatpush1.bf16.msra.mxu0 %v5815_v61  ;;  %v5834_v61 = vrot.slane %v5829_v50, %v11475_v4 }
 0xcfe   :  { %6264 = vmatprep.subr.bf16.mxu0 %v5818_v56  ;;  %v5838_v56 = vrot.slane %v5829_v50, %v11478_v46 }
 0xd01   :  { %6265 = vmatpush1.bf16.msra.mxu0 %v5817_v40 }
 0xd02   :  { %6266 = vmatprep.subr.bf16.mxu0 %v5820_v6 }
 0xd05   :  { %6267 = vmatpush1.bf16.msra.mxu0 %v5819_v43 }
 0xd06   :  { %6268 = vmatprep.subr.bf16.mxu0 %v5822_v27 }
 0xd09   :  { %6269 = vmatpush1.bf16.msra.mxu0 %v5821_v45 }
 0xd0a   :  { %6270 = vmatprep.subr.bf16.mxu0 %v5824_v1 }
 0xd0d   :  { %6271 = vmatpush1.bf16.msra.mxu0 %v5823_v47 }
 0xd0e   :  { %6272 = vmatprep.subr.bf16.mxu0 %v5826_v33 }
 0xd11   :  { %6273 = vmatpush1.bf16.msra.mxu0 %v5825_v52 }
 0xd12   :  { %6274 = vmatprep.subr.bf16.mxu0 %v5828_v54 }
 0xd15   :  { %6275 = vmatpush1.bf16.msra.mxu0 %v5827_v22 }
 0xd18   :  { %6277 = vmatmul.mubr.bf16.vlgmr.msra.gmra.mrb[96].mxu0 %v12759_v39 }
 0xdeb   :  { %v6278_v40 = vpop.f32.mrb[96].mxu0 }
 0xdec   :  { %v9240_v6 = vadd.f32 %v6278_v40, %v5834_v61  ;;  %v6280_v43 = vpop.f32.mrb[97].mxu0 }
 0xded   :  { %v9241_v27 = vadd.f32 %v6280_v43, %v5838_v56  ;;  %v6282_v45 = vpop.f32.mrb[98].mxu0 }
 0xdee   :  { %v6285_v1 = vmax.f32 %v9240_v6, 0.0  ;;  %v6283_v47 = vpop.f32.mrb[99].mxu0 }
 0xdef   :  { %v6286_v33 = vmax.f32 %v9241_v27, 0.0 }
 0xdf0   :  { %v12764_v52 = vpack.c.bf16 %v6285_v1, %v6285_v1 }
 0xdf1   :  { %v12766_v54 = vpack.c.bf16 %v6286_v33, %v6286_v33 }
 0xdf2   :  { %10415 = dma.done.wait [#allocation4 + $0x1], 32768 }
 0xdf3   :  { %10416 = vsyncadd [#allocation4 + $0x1], 4294934528  ;;  %6623 = vmatprep.mubr.bf16.mxu1 %v12603_v19  ;;  %v6324_v22 = vld [vmem:[#allocation3 + $0x808] sm:$0xff]  ;;  %v6323_v51 = vld [vmem:[#allocation3 + $0x800] sm:$0xff] }
 0xdf4   :  { %v6326_v34 = vld [vmem:[#allocation3 + $0x818] sm:$0xff]  ;;  %6591 = vmatprep.subr.bf16.mxu1 %v6324_v22  ;;  %v6325_v50 = vld [vmem:[#allocation3 + $0x810] sm:$0xff]  ;;  %v6328_v61 = vld [vmem:[#allocation3 + $0x828] sm:$0xff] }
 0xdf5   :  { %6592 = vmatpush1.bf16.msra.mxu1 %v6323_v51  ;;  %v6327_v56 = vld [vmem:[#allocation3 + $0x820] sm:$0xff]  ;;  %v6330_v40 = vld [vmem:[#allocation3 + $0x838] sm:$0xff]  ;;  %v6329_v6 = vld [vmem:[#allocation3 + $0x830] sm:$0xff] }
 0xdf6   :  { %6593 = vmatprep.subr.bf16.mxu1 %v6326_v34  ;;  %v6332_v43 = vld [vmem:[#allocation3 + $0x848] sm:$0xff]  ;;  %v6331_v27 = vld [vmem:[#allocation3 + $0x840] sm:$0xff]  ;;  %v6334_v45 = vld [vmem:[#allocation3 + $0x858] sm:$0xff] }
 0xdf7   :  { %v6333_v1 = vld [vmem:[#allocation3 + $0x850] sm:$0xff]  ;;  %v6336_v47 = vld [vmem:[#allocation3 + $0x868] sm:$0xff]  ;;  %v6335_v51 = vld [vmem:[#allocation3 + $0x860] sm:$0xff] }
 0xdf8   :  { %v6338_v34 = vld [vmem:[#allocation3 + $0x878] sm:$0xff]  ;;  %v6337_v33 = vld [vmem:[#allocation3 + $0x870] sm:$0xff]  ;;  %v6340_v22 = vld [vmem:[#allocation3 + $0x888] sm:$0xff] }
 0xdf9   :  { %6594 = vmatpush1.bf16.msra.mxu1 %v6325_v50  ;;  %v6339_v50 = vld [vmem:[#allocation3 + $0x880] sm:$0xff] }
 0xdfa   :  { %6595 = vmatprep.subr.bf16.mxu1 %v6328_v61  ;;  %v6342_v61 = vld [vmem:[#allocation3 + $0x898] sm:$0xff] }
 0xdfd   :  { %6596 = vmatpush1.bf16.msra.mxu1 %v6327_v56  ;;  %v6341_v56 = vld [vmem:[#allocation3 + $0x890] sm:$0xff] }
 0xdfe   :  { %6597 = vmatprep.subr.bf16.mxu1 %v6330_v40  ;;  %v6344_v40 = vld [vmem:[#allocation3 + $0x8a8] sm:$0xff] }
 0xe01   :  { %6598 = vmatpush1.bf16.msra.mxu1 %v6329_v6  ;;  %v6343_v6 = vld [vmem:[#allocation3 + $0x8a0] sm:$0xff] }
 0xe02   :  { %6599 = vmatprep.subr.bf16.mxu1 %v6332_v43  ;;  %v6346_v43 = vld [vmem:[#allocation3 + $0x8b8] sm:$0xff] }
 0xe05   :  { %6600 = vmatpush1.bf16.msra.mxu1 %v6331_v27  ;;  %v6345_v27 = vld [vmem:[#allocation3 + $0x8b0] sm:$0xff] }
 0xe06   :  { %6601 = vmatprep.subr.bf16.mxu1 %v6334_v45  ;;  %v6348_v45 = vld [vmem:[#allocation3 + $0x8c8] sm:$0xff] }
 0xe09   :  { %6602 = vmatpush1.bf16.msra.mxu1 %v6333_v1  ;;  %v6347_v1 = vld [vmem:[#allocation3 + $0x8c0] sm:$0xff] }
 0xe0a   :  { %6603 = vmatprep.subr.bf16.mxu1 %v6336_v47  ;;  %v6350_v47 = vld [vmem:[#allocation3 + $0x8d8] sm:$0xff] }
 0xe0d   :  { %6604 = vmatpush1.bf16.msra.mxu1 %v6335_v51  ;;  %v6349_v51 = vld [vmem:[#allocation3 + $0x8d0] sm:$0xff] }
 0xe0e   :  { %6605 = vmatprep.subr.bf16.mxu1 %v6338_v34  ;;  %v6352_v34 = vld [vmem:[#allocation3 + $0x8e8] sm:$0xff] }
 0xe11   :  { %6606 = vmatpush1.bf16.msra.mxu1 %v6337_v33  ;;  %v6351_v33 = vld [vmem:[#allocation3 + $0x8e0] sm:$0xff] }
 0xe12   :  { %6607 = vmatprep.subr.bf16.mxu1 %v6340_v22  ;;  %v6354_v22 = vld [vmem:[#allocation3 + $0x8f8] sm:$0xff] }
 0xe15   :  { %6608 = vmatpush1.bf16.msra.mxu1 %v6339_v50  ;;  %v6353_v50 = vld [vmem:[#allocation3 + $0x8f0] sm:$0xff] }
 0xe16   :  { %6609 = vmatprep.subr.bf16.mxu1 %v6342_v61  ;;  %v6356_v61 = vld [vmem:[#allocation3 + $0x908] sm:$0xff] }
 0xe19   :  { %6610 = vmatpush1.bf16.msra.mxu1 %v6341_v56  ;;  %v6355_v56 = vld [vmem:[#allocation3 + $0x900] sm:$0xff] }
 0xe1a   :  { %6611 = vmatprep.subr.bf16.mxu1 %v6344_v40  ;;  %v6358_v40 = vld [vmem:[#allocation3 + $0x918] sm:$0xff] }
 0xe1d   :  { %6612 = vmatpush1.bf16.msra.mxu1 %v6343_v6  ;;  %v6357_v6 = vld [vmem:[#allocation3 + $0x910] sm:$0xff] }
 0xe1e   :  { %6613 = vmatprep.subr.bf16.mxu1 %v6346_v43  ;;  %v6360_v43 = vld [vmem:[#allocation3 + $0x928] sm:$0xff] }
 0xe21   :  { %6614 = vmatpush1.bf16.msra.mxu1 %v6345_v27  ;;  %v6359_v27 = vld [vmem:[#allocation3 + $0x920] sm:$0xff] }
 0xe22   :  { %6615 = vmatprep.subr.bf16.mxu1 %v6348_v45  ;;  %v6362_v45 = vld [vmem:[#allocation3 + $0x938] sm:$0xff] }
 0xe25   :  { %6616 = vmatpush1.bf16.msra.mxu1 %v6347_v1  ;;  %v6361_v1 = vld [vmem:[#allocation3 + $0x930] sm:$0xff] }
 0xe26   :  { %6617 = vmatprep.subr.bf16.mxu1 %v6350_v47  ;;  %v6364_v47 = vld [vmem:[#allocation3 + $0x948] sm:$0xff] }
 0xe29   :  { %6618 = vmatpush1.bf16.msra.mxu1 %v6349_v51  ;;  %v6363_v51 = vld [vmem:[#allocation3 + $0x940] sm:$0xff] }
 0xe2a   :  { %6619 = vmatprep.subr.bf16.mxu1 %v6352_v34  ;;  %v6366_v34 = vld [vmem:[#allocation3 + $0x958] sm:$0xff] }
 0xe2d   :  { %6620 = vmatpush1.bf16.msra.mxu1 %v6351_v33  ;;  %v6365_v33 = vld [vmem:[#allocation3 + $0x950] sm:$0xff] }
 0xe2e   :  { %6621 = vmatprep.subr.bf16.mxu1 %v6354_v22  ;;  %v6368_v22 = vld [vmem:[#allocation3 + $0x968] sm:$0xff] }
 0xe31   :  { %6622 = vmatpush1.bf16.msra.mxu1 %v6353_v50  ;;  %v6367_v50 = vld [vmem:[#allocation3 + $0x960] sm:$0xff] }
 0xe32   :  { %6632 = vmatprep.subr.bf16.mxu1 %v6356_v61  ;;  %v6370_v61 = vld [vmem:[#allocation3 + $0x978] sm:$0xff] }
 0xe34   :  { %6624 = vmatmul.mubr.bf16.vlgmr.msra.gmra.mrb[128].mxu1 %v12672_v28 }
 0xe35   :  { %6633 = vmatpush1.bf16.msra.mxu1 %v6355_v56  ;;  %6664 = vmatprep.mubr.bf16.mxu1 %v12676_v13  ;;  %v6369_v56 = vld [vmem:[#allocation3 + $0x970] sm:$0xff] }
 0xe36   :  { %6634 = vmatprep.subr.bf16.mxu1 %v6358_v40  ;;  %v6372_v40 = vld [vmem:[#allocation3 + $0x988] sm:$0xff] }
 0xe39   :  { %6635 = vmatpush1.bf16.msra.mxu1 %v6357_v6  ;;  %v6371_v6 = vld [vmem:[#allocation3 + $0x980] sm:$0xff] }
 0xe3a   :  { %6636 = vmatprep.subr.bf16.mxu1 %v6360_v43  ;;  %v6374_v43 = vld [vmem:[#allocation3 + $0x998] sm:$0xff] }
 0xe3d   :  { %6637 = vmatpush1.bf16.msra.mxu1 %v6359_v27  ;;  %v6373_v27 = vld [vmem:[#allocation3 + $0x990] sm:$0xff] }
 0xe3e   :  { %6638 = vmatprep.subr.bf16.mxu1 %v6362_v45  ;;  %v6376_v45 = vld [vmem:[#allocation3 + $0x9a8] sm:$0xff] }
 0xe41   :  { %6639 = vmatpush1.bf16.msra.mxu1 %v6361_v1  ;;  %v6375_v1 = vld [vmem:[#allocation3 + $0x9a0] sm:$0xff] }
 0xe42   :  { %6640 = vmatprep.subr.bf16.mxu1 %v6364_v47  ;;  %v6378_v47 = vld [vmem:[#allocation3 + $0x9b8] sm:$0xff] }
 0xe45   :  { %6641 = vmatpush1.bf16.msra.mxu1 %v6363_v51  ;;  %v6377_v51 = vld [vmem:[#allocation3 + $0x9b0] sm:$0xff] }
 0xe46   :  { %6642 = vmatprep.subr.bf16.mxu1 %v6366_v34  ;;  %v6380_v34 = vld [vmem:[#allocation3 + $0x9c8] sm:$0xff] }
 0xe49   :  { %6643 = vmatpush1.bf16.msra.mxu1 %v6365_v33  ;;  %v6379_v33 = vld [vmem:[#allocation3 + $0x9c0] sm:$0xff] }
 0xe4a   :  { %6644 = vmatprep.subr.bf16.mxu1 %v6368_v22  ;;  %v6382_v22 = vld [vmem:[#allocation3 + $0x9d8] sm:$0xff] }
 0xe4d   :  { %6645 = vmatpush1.bf16.msra.mxu1 %v6367_v50  ;;  %v6381_v50 = vld [vmem:[#allocation3 + $0x9d0] sm:$0xff] }
 0xe4e   :  { %6646 = vmatprep.subr.bf16.mxu1 %v6370_v61  ;;  %v6384_v61 = vld [vmem:[#allocation3 + $0x9e8] sm:$0xff] }
 0xe51   :  { %6647 = vmatpush1.bf16.msra.mxu1 %v6369_v56  ;;  %v6383_v56 = vld [vmem:[#allocation3 + $0x9e0] sm:$0xff] }
 0xe52   :  { %6648 = vmatprep.subr.bf16.mxu1 %v6372_v40  ;;  %v6386_v40 = vld [vmem:[#allocation3 + $0x9f8] sm:$0xff] }
 0xe55   :  { %6649 = vmatpush1.bf16.msra.mxu1 %v6371_v6  ;;  %v6385_v6 = vld [vmem:[#allocation3 + $0x9f0] sm:$0xff] }
 0xe56   :  { %6650 = vmatprep.subr.bf16.mxu1 %v6374_v43  ;;  %v6388_v43 = vld [vmem:[#allocation3 + $0xa08] sm:$0xff] }
 0xe59   :  { %6651 = vmatpush1.bf16.msra.mxu1 %v6373_v27  ;;  %v6387_v27 = vld [vmem:[#allocation3 + $0xa00] sm:$0xff] }
 0xe5a   :  { %6652 = vmatprep.subr.bf16.mxu1 %v6376_v45  ;;  %v6390_v45 = vld [vmem:[#allocation3 + $0xa18] sm:$0xff] }
 0xe5d   :  { %6653 = vmatpush1.bf16.msra.mxu1 %v6375_v1  ;;  %v6389_v1 = vld [vmem:[#allocation3 + $0xa10] sm:$0xff] }
 0xe5e   :  { %6654 = vmatprep.subr.bf16.mxu1 %v6378_v47  ;;  %v6392_v47 = vld [vmem:[#allocation3 + $0xa28] sm:$0xff] }
 0xe61   :  { %6655 = vmatpush1.bf16.msra.mxu1 %v6377_v51  ;;  %v6391_v51 = vld [vmem:[#allocation3 + $0xa20] sm:$0xff] }
 0xe62   :  { %6656 = vmatprep.subr.bf16.mxu1 %v6380_v34  ;;  %v6394_v34 = vld [vmem:[#allocation3 + $0xa38] sm:$0xff] }
 0xe65   :  { %6657 = vmatpush1.bf16.msra.mxu1 %v6379_v33  ;;  %v6393_v33 = vld [vmem:[#allocation3 + $0xa30] sm:$0xff] }
 0xe66   :  { %6658 = vmatprep.subr.bf16.mxu1 %v6382_v22  ;;  %v6396_v22 = vld [vmem:[#allocation3 + $0xa48] sm:$0xff] }
 0xe69   :  { %6659 = vmatpush1.bf16.msra.mxu1 %v6381_v50  ;;  %v6395_v50 = vld [vmem:[#allocation3 + $0xa40] sm:$0xff] }
 0xe6a   :  { %6660 = vmatprep.subr.bf16.mxu1 %v6384_v61  ;;  %v6398_v61 = vld [vmem:[#allocation3 + $0xa58] sm:$0xff] }
 0xe6d   :  { %6661 = vmatpush1.bf16.msra.mxu1 %v6383_v56  ;;  %v6397_v56 = vld [vmem:[#allocation3 + $0xa50] sm:$0xff] }
 0xe6e   :  { %6662 = vmatprep.subr.bf16.mxu1 %v6386_v40  ;;  %v6400_v40 = vld [vmem:[#allocation3 + $0xa68] sm:$0xff] }
 0xe71   :  { %6663 = vmatpush1.bf16.msra.mxu1 %v6385_v6  ;;  %v6399_v6 = vld [vmem:[#allocation3 + $0xa60] sm:$0xff] }
 0xe72   :  { %6673 = vmatprep.subr.bf16.mxu1 %v6388_v43  ;;  %v6402_v43 = vld [vmem:[#allocation3 + $0xa78] sm:$0xff] }
 0xe74   :  { %6665 = vmatmul.mubr.bf16.vlgmr.msra.gmra.mrb[128].mxu1 %v12689_v24 }
 0xe75   :  { %6674 = vmatpush1.bf16.msra.mxu1 %v6387_v27  ;;  %6705 = vmatprep.mubr.bf16.mxu1 %v12692_v35  ;;  %v6401_v27 = vld [vmem:[#allocation3 + $0xa70] sm:$0xff] }
 0xe76   :  { %6675 = vmatprep.subr.bf16.mxu1 %v6390_v45  ;;  %v6404_v45 = vld [vmem:[#allocation3 + $0xa88] sm:$0xff] }
 0xe79   :  { %6676 = vmatpush1.bf16.msra.mxu1 %v6389_v1  ;;  %v6403_v1 = vld [vmem:[#allocation3 + $0xa80] sm:$0xff] }
 0xe7a   :  { %6677 = vmatprep.subr.bf16.mxu1 %v6392_v47  ;;  %v6406_v47 = vld [vmem:[#allocation3 + $0xa98] sm:$0xff] }
 0xe7d   :  { %6678 = vmatpush1.bf16.msra.mxu1 %v6391_v51  ;;  %v6405_v51 = vld [vmem:[#allocation3 + $0xa90] sm:$0xff] }
 0xe7e   :  { %6679 = vmatprep.subr.bf16.mxu1 %v6394_v34  ;;  %v6408_v34 = vld [vmem:[#allocation3 + $0xaa8] sm:$0xff] }
 0xe81   :  { %6680 = vmatpush1.bf16.msra.mxu1 %v6393_v33  ;;  %v6407_v33 = vld [vmem:[#allocation3 + $0xaa0] sm:$0xff] }
 0xe82   :  { %6681 = vmatprep.subr.bf16.mxu1 %v6396_v22  ;;  %v6410_v22 = vld [vmem:[#allocation3 + $0xab8] sm:$0xff] }
 0xe85   :  { %6682 = vmatpush1.bf16.msra.mxu1 %v6395_v50  ;;  %v6409_v50 = vld [vmem:[#allocation3 + $0xab0] sm:$0xff] }
 0xe86   :  { %6683 = vmatprep.subr.bf16.mxu1 %v6398_v61  ;;  %v6412_v61 = vld [vmem:[#allocation3 + $0xac8] sm:$0xff] }
 0xe89   :  { %6684 = vmatpush1.bf16.msra.mxu1 %v6397_v56  ;;  %v6411_v56 = vld [vmem:[#allocation3 + $0xac0] sm:$0xff] }
 0xe8a   :  { %6685 = vmatprep.subr.bf16.mxu1 %v6400_v40  ;;  %v6414_v40 = vld [vmem:[#allocation3 + $0xad8] sm:$0xff] }
 0xe8d   :  { %6686 = vmatpush1.bf16.msra.mxu1 %v6399_v6  ;;  %v6413_v6 = vld [vmem:[#allocation3 + $0xad0] sm:$0xff] }
 0xe8e   :  { %6687 = vmatprep.subr.bf16.mxu1 %v6402_v43  ;;  %v6416_v43 = vld [vmem:[#allocation3 + $0xae8] sm:$0xff] }
 0xe91   :  { %6688 = vmatpush1.bf16.msra.mxu1 %v6401_v27  ;;  %v6415_v27 = vld [vmem:[#allocation3 + $0xae0] sm:$0xff] }
 0xe92   :  { %6689 = vmatprep.subr.bf16.mxu1 %v6404_v45  ;;  %v6418_v45 = vld [vmem:[#allocation3 + $0xaf8] sm:$0xff] }
 0xe95   :  { %6690 = vmatpush1.bf16.msra.mxu1 %v6403_v1  ;;  %v6417_v1 = vld [vmem:[#allocation3 + $0xaf0] sm:$0xff] }
 0xe96   :  { %6691 = vmatprep.subr.bf16.mxu1 %v6406_v47  ;;  %v6420_v47 = vld [vmem:[#allocation3 + $0xb08] sm:$0xff] }
 0xe99   :  { %6692 = vmatpush1.bf16.msra.mxu1 %v6405_v51  ;;  %v6419_v51 = vld [vmem:[#allocation3 + $0xb00] sm:$0xff] }
 0xe9a   :  { %6693 = vmatprep.subr.bf16.mxu1 %v6408_v34  ;;  %v6422_v34 = vld [vmem:[#allocation3 + $0xb18] sm:$0xff] }
 0xe9d   :  { %6694 = vmatpush1.bf16.msra.mxu1 %v6407_v33  ;;  %v6421_v33 = vld [vmem:[#allocation3 + $0xb10] sm:$0xff] }
 0xe9e   :  { %6695 = vmatprep.subr.bf16.mxu1 %v6410_v22  ;;  %v6424_v22 = vld [vmem:[#allocation3 + $0xb28] sm:$0xff] }
 0xea1   :  { %6696 = vmatpush1.bf16.msra.mxu1 %v6409_v50  ;;  %v6423_v50 = vld [vmem:[#allocation3 + $0xb20] sm:$0xff] }
 0xea2   :  { %6697 = vmatprep.subr.bf16.mxu1 %v6412_v61  ;;  %v6426_v61 = vld [vmem:[#allocation3 + $0xb38] sm:$0xff] }
 0xea5   :  { %6698 = vmatpush1.bf16.msra.mxu1 %v6411_v56  ;;  %v6425_v56 = vld [vmem:[#allocation3 + $0xb30] sm:$0xff] }
 0xea6   :  { %6699 = vmatprep.subr.bf16.mxu1 %v6414_v40  ;;  %v6428_v40 = vld [vmem:[#allocation3 + $0xb48] sm:$0xff] }
 0xea9   :  { %6700 = vmatpush1.bf16.msra.mxu1 %v6413_v6  ;;  %v6427_v6 = vld [vmem:[#allocation3 + $0xb40] sm:$0xff] }
 0xeaa   :  { %6701 = vmatprep.subr.bf16.mxu1 %v6416_v43  ;;  %v6430_v43 = vld [vmem:[#allocation3 + $0xb58] sm:$0xff] }
 0xead   :  { %6702 = vmatpush1.bf16.msra.mxu1 %v6415_v27  ;;  %v6429_v27 = vld [vmem:[#allocation3 + $0xb50] sm:$0xff] }
 0xeae   :  { %6703 = vmatprep.subr.bf16.mxu1 %v6418_v45  ;;  %v6432_v45 = vld [vmem:[#allocation3 + $0xb68] sm:$0xff] }
 0xeb1   :  { %6704 = vmatpush1.bf16.msra.mxu1 %v6417_v1  ;;  %v6431_v1 = vld [vmem:[#allocation3 + $0xb60] sm:$0xff] }
 0xeb2   :  { %6714 = vmatprep.subr.bf16.mxu1 %v6420_v47  ;;  %v6434_v47 = vld [vmem:[#allocation3 + $0xb78] sm:$0xff] }
 0xeb4   :  { %6706 = vmatmul.mubr.bf16.vlgmr.msra.gmra.mrb[128].mxu1 %v12698_v7 }
 0xeb5   :  { %6715 = vmatpush1.bf16.msra.mxu1 %v6419_v51  ;;  %6746 = vmatprep.mubr.bf16.mxu1 %v12702_v42  ;;  %v6433_v51 = vld [vmem:[#allocation3 + $0xb70] sm:$0xff] }
 0xeb6   :  { %6716 = vmatprep.subr.bf16.mxu1 %v6422_v34  ;;  %v6436_v34 = vld [vmem:[#allocation3 + $0xb88] sm:$0xff] }
 0xeb9   :  { %6717 = vmatpush1.bf16.msra.mxu1 %v6421_v33  ;;  %v6435_v33 = vld [vmem:[#allocation3 + $0xb80] sm:$0xff] }
 0xeba   :  { %6718 = vmatprep.subr.bf16.mxu1 %v6424_v22  ;;  %v6438_v22 = vld [vmem:[#allocation3 + $0xb98] sm:$0xff] }
 0xebd   :  { %6719 = vmatpush1.bf16.msra.mxu1 %v6423_v50  ;;  %v6437_v50 = vld [vmem:[#allocation3 + $0xb90] sm:$0xff] }
 0xebe   :  { %6720 = vmatprep.subr.bf16.mxu1 %v6426_v61  ;;  %v6440_v61 = vld [vmem:[#allocation3 + $0xba8] sm:$0xff] }
 0xec1   :  { %6721 = vmatpush1.bf16.msra.mxu1 %v6425_v56  ;;  %v6439_v56 = vld [vmem:[#allocation3 + $0xba0] sm:$0xff] }
 0xec2   :  { %6722 = vmatprep.subr.bf16.mxu1 %v6428_v40  ;;  %v6442_v40 = vld [vmem:[#allocation3 + $0xbb8] sm:$0xff] }
 0xec5   :  { %6723 = vmatpush1.bf16.msra.mxu1 %v6427_v6  ;;  %v6441_v6 = vld [vmem:[#allocation3 + $0xbb0] sm:$0xff] }
 0xec6   :  { %6724 = vmatprep.subr.bf16.mxu1 %v6430_v43  ;;  %v6444_v43 = vld [vmem:[#allocation3 + $0xbc8] sm:$0xff] }
 0xec9   :  { %6725 = vmatpush1.bf16.msra.mxu1 %v6429_v27  ;;  %v6443_v27 = vld [vmem:[#allocation3 + $0xbc0] sm:$0xff] }
 0xeca   :  { %6726 = vmatprep.subr.bf16.mxu1 %v6432_v45  ;;  %v6446_v45 = vld [vmem:[#allocation3 + $0xbd8] sm:$0xff] }
 0xecd   :  { %6727 = vmatpush1.bf16.msra.mxu1 %v6431_v1  ;;  %v6445_v1 = vld [vmem:[#allocation3 + $0xbd0] sm:$0xff] }
 0xece   :  { %6728 = vmatprep.subr.bf16.mxu1 %v6434_v47  ;;  %v6448_v47 = vld [vmem:[#allocation3 + $0xbe8] sm:$0xff] }
 0xed1   :  { %6729 = vmatpush1.bf16.msra.mxu1 %v6433_v51  ;;  %v6447_v51 = vld [vmem:[#allocation3 + $0xbe0] sm:$0xff] }
 0xed2   :  { %6730 = vmatprep.subr.bf16.mxu1 %v6436_v34  ;;  %v6450_v34 = vld [vmem:[#allocation3 + $0xbf8] sm:$0xff] }
 0xed5   :  { %6731 = vmatpush1.bf16.msra.mxu1 %v6435_v33  ;;  %v6449_v33 = vld [vmem:[#allocation3 + $0xbf0] sm:$0xff] }
 0xed6   :  { %6732 = vmatprep.subr.bf16.mxu1 %v6438_v22  ;;  %v6452_v22 = vld [vmem:[#allocation3 + $0xc08] sm:$0xff] }
 0xed9   :  { %6733 = vmatpush1.bf16.msra.mxu1 %v6437_v50  ;;  %v6451_v50 = vld [vmem:[#allocation3 + $0xc00] sm:$0xff] }
 0xeda   :  { %6734 = vmatprep.subr.bf16.mxu1 %v6440_v61  ;;  %v6454_v61 = vld [vmem:[#allocation3 + $0xc18] sm:$0xff] }
 0xedd   :  { %6735 = vmatpush1.bf16.msra.mxu1 %v6439_v56  ;;  %v6453_v56 = vld [vmem:[#allocation3 + $0xc10] sm:$0xff] }
 0xede   :  { %6736 = vmatprep.subr.bf16.mxu1 %v6442_v40  ;;  %v6456_v40 = vld [vmem:[#allocation3 + $0xc28] sm:$0xff] }
 0xee1   :  { %6737 = vmatpush1.bf16.msra.mxu1 %v6441_v6  ;;  %v6455_v6 = vld [vmem:[#allocation3 + $0xc20] sm:$0xff] }
 0xee2   :  { %6738 = vmatprep.subr.bf16.mxu1 %v6444_v43  ;;  %v6458_v43 = vld [vmem:[#allocation3 + $0xc38] sm:$0xff] }
 0xee5   :  { %6739 = vmatpush1.bf16.msra.mxu1 %v6443_v27  ;;  %v6457_v27 = vld [vmem:[#allocation3 + $0xc30] sm:$0xff] }
 0xee6   :  { %6740 = vmatprep.subr.bf16.mxu1 %v6446_v45  ;;  %v6460_v45 = vld [vmem:[#allocation3 + $0xc48] sm:$0xff] }
 0xee9   :  { %6741 = vmatpush1.bf16.msra.mxu1 %v6445_v1  ;;  %v6459_v1 = vld [vmem:[#allocation3 + $0xc40] sm:$0xff] }
 0xeea   :  { %6742 = vmatprep.subr.bf16.mxu1 %v6448_v47  ;;  %v6462_v47 = vld [vmem:[#allocation3 + $0xc58] sm:$0xff] }
 0xeed   :  { %6743 = vmatpush1.bf16.msra.mxu1 %v6447_v51  ;;  %v6461_v51 = vld [vmem:[#allocation3 + $0xc50] sm:$0xff] }
 0xeee   :  { %6744 = vmatprep.subr.bf16.mxu1 %v6450_v34  ;;  %v6464_v34 = vld [vmem:[#allocation3 + $0xc68] sm:$0xff] }
 0xef1   :  { %6745 = vmatpush1.bf16.msra.mxu1 %v6449_v33  ;;  %v6463_v33 = vld [vmem:[#allocation3 + $0xc60] sm:$0xff] }
 0xef2   :  { %6755 = vmatprep.subr.bf16.mxu1 %v6452_v22  ;;  %v6466_v22 = vld [vmem:[#allocation3 + $0xc78] sm:$0xff] }
 0xef4   :  { %6747 = vmatmul.mubr.bf16.vlgmr.msra.gmra.mrb[128].mxu1 %v12714_v21 }
 0xef5   :  { %6756 = vmatpush1.bf16.msra.mxu1 %v6451_v50  ;;  %6787 = vmatprep.mubr.bf16.mxu1 %v12717_v60  ;;  %v6465_v50 = vld [vmem:[#allocation3 + $0xc70] sm:$0xff] }
 0xef6   :  { %6757 = vmatprep.subr.bf16.mxu1 %v6454_v61  ;;  %v6468_v61 = vld [vmem:[#allocation3 + $0xc88] sm:$0xff] }
 0xef9   :  { %6758 = vmatpush1.bf16.msra.mxu1 %v6453_v56  ;;  %v6467_v56 = vld [vmem:[#allocation3 + $0xc80] sm:$0xff] }
 0xefa   :  { %6759 = vmatprep.subr.bf16.mxu1 %v6456_v40  ;;  %v6470_v40 = vld [vmem:[#allocation3 + $0xc98] sm:$0xff] }
 0xefd   :  { %6760 = vmatpush1.bf16.msra.mxu1 %v6455_v6  ;;  %v6469_v6 = vld [vmem:[#allocation3 + $0xc90] sm:$0xff] }
 0xefe   :  { %6761 = vmatprep.subr.bf16.mxu1 %v6458_v43  ;;  %v6472_v43 = vld [vmem:[#allocation3 + $0xca8] sm:$0xff] }
 0xf01   :  { %6762 = vmatpush1.bf16.msra.mxu1 %v6457_v27  ;;  %v6471_v27 = vld [vmem:[#allocation3 + $0xca0] sm:$0xff] }
 0xf02   :  { %6763 = vmatprep.subr.bf16.mxu1 %v6460_v45  ;;  %v6474_v45 = vld [vmem:[#allocation3 + $0xcb8] sm:$0xff] }
 0xf05   :  { %6764 = vmatpush1.bf16.msra.mxu1 %v6459_v1  ;;  %v6473_v1 = vld [vmem:[#allocation3 + $0xcb0] sm:$0xff] }
 0xf06   :  { %6765 = vmatprep.subr.bf16.mxu1 %v6462_v47  ;;  %v6476_v47 = vld [vmem:[#allocation3 + $0xcc8] sm:$0xff] }
 0xf09   :  { %6766 = vmatpush1.bf16.msra.mxu1 %v6461_v51  ;;  %v6475_v51 = vld [vmem:[#allocation3 + $0xcc0] sm:$0xff] }
 0xf0a   :  { %6767 = vmatprep.subr.bf16.mxu1 %v6464_v34  ;;  %v6478_v34 = vld [vmem:[#allocation3 + $0xcd8] sm:$0xff] }
 0xf0d   :  { %6768 = vmatpush1.bf16.msra.mxu1 %v6463_v33  ;;  %v6477_v33 = vld [vmem:[#allocation3 + $0xcd0] sm:$0xff] }
 0xf0e   :  { %6769 = vmatprep.subr.bf16.mxu1 %v6466_v22  ;;  %v6480_v22 = vld [vmem:[#allocation3 + $0xce8] sm:$0xff] }
 0xf11   :  { %6770 = vmatpush1.bf16.msra.mxu1 %v6465_v50  ;;  %v6479_v50 = vld [vmem:[#allocation3 + $0xce0] sm:$0xff] }
 0xf12   :  { %6771 = vmatprep.subr.bf16.mxu1 %v6468_v61  ;;  %v6482_v61 = vld [vmem:[#allocation3 + $0xcf8] sm:$0xff] }
 0xf15   :  { %6772 = vmatpush1.bf16.msra.mxu1 %v6467_v56  ;;  %v6481_v56 = vld [vmem:[#allocation3 + $0xcf0] sm:$0xff] }
 0xf16   :  { %6773 = vmatprep.subr.bf16.mxu1 %v6470_v40  ;;  %v6484_v40 = vld [vmem:[#allocation3 + $0xd08] sm:$0xff] }
 0xf19   :  { %6774 = vmatpush1.bf16.msra.mxu1 %v6469_v6  ;;  %v6483_v6 = vld [vmem:[#allocation3 + $0xd00] sm:$0xff] }
 0xf1a   :  { %6775 = vmatprep.subr.bf16.mxu1 %v6472_v43  ;;  %v6486_v43 = vld [vmem:[#allocation3 + $0xd18] sm:$0xff] }
 0xf1d   :  { %6776 = vmatpush1.bf16.msra.mxu1 %v6471_v27  ;;  %v6485_v27 = vld [vmem:[#allocation3 + $0xd10] sm:$0xff] }
 0xf1e   :  { %6777 = vmatprep.subr.bf16.mxu1 %v6474_v45  ;;  %v6488_v45 = vld [vmem:[#allocation3 + $0xd28] sm:$0xff] }
 0xf21   :  { %6778 = vmatpush1.bf16.msra.mxu1 %v6473_v1  ;;  %v6487_v1 = vld [vmem:[#allocation3 + $0xd20] sm:$0xff] }
 0xf22   :  { %6779 = vmatprep.subr.bf16.mxu1 %v6476_v47  ;;  %v6490_v47 = vld [vmem:[#allocation3 + $0xd38] sm:$0xff] }
 0xf25   :  { %6780 = vmatpush1.bf16.msra.mxu1 %v6475_v51  ;;  %v6489_v51 = vld [vmem:[#allocation3 + $0xd30] sm:$0xff] }
 0xf26   :  { %6781 = vmatprep.subr.bf16.mxu1 %v6478_v34  ;;  %v6492_v34 = vld [vmem:[#allocation3 + $0xd48] sm:$0xff] }
 0xf29   :  { %6782 = vmatpush1.bf16.msra.mxu1 %v6477_v33  ;;  %v6491_v33 = vld [vmem:[#allocation3 + $0xd40] sm:$0xff] }
 0xf2a   :  { %6783 = vmatprep.subr.bf16.mxu1 %v6480_v22  ;;  %v6494_v22 = vld [vmem:[#allocation3 + $0xd58] sm:$0xff] }
 0xf2d   :  { %6784 = vmatpush1.bf16.msra.mxu1 %v6479_v50  ;;  %v6493_v50 = vld [vmem:[#allocation3 + $0xd50] sm:$0xff] }
 0xf2e   :  { %6785 = vmatprep.subr.bf16.mxu1 %v6482_v61  ;;  %v6496_v61 = vld [vmem:[#allocation3 + $0xd68] sm:$0xff] }
 0xf31   :  { %6786 = vmatpush1.bf16.msra.mxu1 %v6481_v56  ;;  %v6495_v56 = vld [vmem:[#allocation3 + $0xd60] sm:$0xff] }
 0xf32   :  { %6796 = vmatprep.subr.bf16.mxu1 %v6484_v40  ;;  %v6498_v40 = vld [vmem:[#allocation3 + $0xd78] sm:$0xff] }
 0xf34   :  { %6788 = vmatmul.mubr.bf16.vlgmr.msra.gmra.mrb[128].mxu1 %v12723_v23 }
 0xf35   :  { %6797 = vmatpush1.bf16.msra.mxu1 %v6483_v6  ;;  %6828 = vmatprep.mubr.bf16.mxu1 %v12727_v32  ;;  %v6497_v6 = vld [vmem:[#allocation3 + $0xd70] sm:$0xff] }
 0xf36   :  { %6798 = vmatprep.subr.bf16.mxu1 %v6486_v43  ;;  %v6500_v43 = vld [vmem:[#allocation3 + $0xd88] sm:$0xff] }
 0xf39   :  { %6799 = vmatpush1.bf16.msra.mxu1 %v6485_v27  ;;  %v6499_v27 = vld [vmem:[#allocation3 + $0xd80] sm:$0xff] }
 0xf3a   :  { %6800 = vmatprep.subr.bf16.mxu1 %v6488_v45  ;;  %v6502_v45 = vld [vmem:[#allocation3 + $0xd98] sm:$0xff] }
 0xf3d   :  { %6801 = vmatpush1.bf16.msra.mxu1 %v6487_v1  ;;  %v6501_v1 = vld [vmem:[#allocation3 + $0xd90] sm:$0xff] }
 0xf3e   :  { %6802 = vmatprep.subr.bf16.mxu1 %v6490_v47  ;;  %v6504_v47 = vld [vmem:[#allocation3 + $0xda8] sm:$0xff] }
 0xf41   :  { %6803 = vmatpush1.bf16.msra.mxu1 %v6489_v51  ;;  %v6503_v51 = vld [vmem:[#allocation3 + $0xda0] sm:$0xff] }
 0xf42   :  { %6804 = vmatprep.subr.bf16.mxu1 %v6492_v34  ;;  %v6506_v34 = vld [vmem:[#allocation3 + $0xdb8] sm:$0xff] }
 0xf45   :  { %6805 = vmatpush1.bf16.msra.mxu1 %v6491_v33  ;;  %v6505_v33 = vld [vmem:[#allocation3 + $0xdb0] sm:$0xff] }
 0xf46   :  { %6806 = vmatprep.subr.bf16.mxu1 %v6494_v22  ;;  %v6508_v22 = vld [vmem:[#allocation3 + $0xdc8] sm:$0xff] }
 0xf49   :  { %6807 = vmatpush1.bf16.msra.mxu1 %v6493_v50  ;;  %v6507_v50 = vld [vmem:[#allocation3 + $0xdc0] sm:$0xff] }
 0xf4a   :  { %6808 = vmatprep.subr.bf16.mxu1 %v6496_v61  ;;  %v6510_v61 = vld [vmem:[#allocation3 + $0xdd8] sm:$0xff] }
 0xf4d   :  { %6809 = vmatpush1.bf16.msra.mxu1 %v6495_v56  ;;  %v6509_v56 = vld [vmem:[#allocation3 + $0xdd0] sm:$0xff] }
 0xf4e   :  { %6810 = vmatprep.subr.bf16.mxu1 %v6498_v40  ;;  %v6512_v40 = vld [vmem:[#allocation3 + $0xde8] sm:$0xff] }
 0xf51   :  { %6811 = vmatpush1.bf16.msra.mxu1 %v6497_v6  ;;  %v6511_v6 = vld [vmem:[#allocation3 + $0xde0] sm:$0xff] }
 0xf52   :  { %6812 = vmatprep.subr.bf16.mxu1 %v6500_v43  ;;  %v6514_v43 = vld [vmem:[#allocation3 + $0xdf8] sm:$0xff] }
 0xf55   :  { %6813 = vmatpush1.bf16.msra.mxu1 %v6499_v27  ;;  %v6513_v27 = vld [vmem:[#allocation3 + $0xdf0] sm:$0xff] }
 0xf56   :  { %6814 = vmatprep.subr.bf16.mxu1 %v6502_v45  ;;  %v6516_v45 = vld [vmem:[#allocation3 + $0xe08] sm:$0xff] }
 0xf59   :  { %6815 = vmatpush1.bf16.msra.mxu1 %v6501_v1  ;;  %v6515_v1 = vld [vmem:[#allocation3 + $0xe00] sm:$0xff] }
 0xf5a   :  { %6816 = vmatprep.subr.bf16.mxu1 %v6504_v47  ;;  %v6518_v47 = vld [vmem:[#allocation3 + $0xe18] sm:$0xff] }
 0xf5d   :  { %6817 = vmatpush1.bf16.msra.mxu1 %v6503_v51  ;;  %v10089_v51 = vld [vmem:[#allocation20 + $0xc0] sm:$0xff]  }
 0xf5e   :  { %6818 = vmatprep.subr.bf16.mxu1 %v6506_v34  ;;  %v10090_v34 = vld [vmem:[#allocation20 + $0x80] sm:$0xff]   ;;  %9152 = vmatprep.subr.bf16.mxu0 %v10089_v51 }
 0xf5f   :  { %9153 = vmatpush3.bf16.msra.mxu0 %v10090_v34  ;;  %v10097_v51 = vld [vmem:[#allocation20 + $0xe0] sm:$0xff]  }
 0xf60   :  { %v6523_v34 = vld [vmem:[#allocation3 + $0xe40] sm:$0xff] }
 0xf61   :  { %6819 = vmatpush1.bf16.msra.mxu1 %v6505_v33  ;;  %v10091_v33 = vld [vmem:[#allocation20 + $0xc8] sm:$0xff]  }
 0xf62   :  { %6820 = vmatprep.subr.bf16.mxu1 %v6508_v22  ;;  %v6517_v22 = vld [vmem:[#allocation3 + $0xe10] sm:$0xff]  ;;  %9154 = vmatprep.subr.bf16.mxu0 %v10091_v33  ;;  %v6526_v33 = vld [vmem:[#allocation3 + $0xe58] sm:$0xff] }
 0xf65   :  { %6821 = vmatpush1.bf16.msra.mxu1 %v6507_v50  ;;  %v6520_v50 = vld [vmem:[#allocation3 + $0xe28] sm:$0xff] }
 0xf66   :  { %6822 = vmatprep.subr.bf16.mxu1 %v6510_v61  ;;  %v10092_v61 = vld [vmem:[#allocation20 + $0x88] sm:$0xff]  }
 0xf67   :  { %9155 = vmatpush3.bf16.msra.mxu0 %v10092_v61  ;;  %v6525_v61 = vld [vmem:[#allocation3 + $0xe50] sm:$0xff] }
 0xf69   :  { %6823 = vmatpush1.bf16.msra.mxu1 %v6509_v56  ;;  %v10093_v56 = vld [vmem:[#allocation20 + $0xd0] sm:$0xff]  }
 0xf6a   :  { %6824 = vmatprep.subr.bf16.mxu1 %v6512_v40  ;;  %v6519_v40 = vld [vmem:[#allocation3 + $0xe20] sm:$0xff]  ;;  %9156 = vmatprep.subr.bf16.mxu0 %v10093_v56  ;;  %v6528_v56 = vld [vmem:[#allocation3 + $0xe68] sm:$0xff] }
 0xf6d   :  { %6825 = vmatpush1.bf16.msra.mxu1 %v6511_v6  ;;  %v6522_v6 = vld [vmem:[#allocation3 + $0xe38] sm:$0xff] }
 0xf6e   :  { %6826 = vmatprep.subr.bf16.mxu1 %v6514_v43  ;;  %v10094_v43 = vld [vmem:[#allocation20 + $0x90] sm:$0xff]  }
 0xf6f   :  { %9157 = vmatpush3.bf16.msra.mxu0 %v10094_v43  ;;  %v6530_v43 = vld [vmem:[#allocation3 + $0xe78] sm:$0xff] }
 0xf71   :  { %6827 = vmatpush1.bf16.msra.mxu1 %v6513_v27  ;;  %v10095_v27 = vld [vmem:[#allocation20 + $0xd8] sm:$0xff]  }
 0xf72   :  { %6837 = vmatprep.subr.bf16.mxu1 %v6516_v45  ;;  %v6521_v45 = vld [vmem:[#allocation3 + $0xe30] sm:$0xff]  ;;  %9158 = vmatprep.subr.bf16.mxu0 %v10095_v27 }
 0xf73   :  { %v6529_v27 = vld [vmem:[#allocation3 + $0xe70] sm:$0xff] }
 0xf74   :  { %6829 = vmatmul.mubr.bf16.vlgmr.msra.gmra.mrb[128].mxu1 %v12740_v5 }
 0xf75   :  { %6838 = vmatpush1.bf16.msra.mxu1 %v6515_v1  ;;  %6869 = vmatprep.mubr.bf16.mxu1 %v12743_v31  ;;  %v6524_v1 = vld [vmem:[#allocation3 + $0xe48] sm:$0xff] }
 0xf76   :  { %6839 = vmatprep.subr.bf16.mxu1 %v6518_v47  ;;  %v10096_v47 = vld [vmem:[#allocation20 + $0x98] sm:$0xff]  }
 0xf77   :  { %9159 = vmatpush3.bf16.msra.mxu0 %v10096_v47  ;;  %v6534_v47 = vld [vmem:[#allocation3 + $0xe98] sm:$0xff] }
 0xf78   :  { %9160 = vmatprep.subr.bf16.mxu0 %v10097_v51  ;;  %v6533_v51 = vld [vmem:[#allocation3 + $0xe90] sm:$0xff] }
 0xf79   :  { %6840 = vmatpush1.bf16.msra.mxu1 %v6517_v22  ;;  %v10098_v22 = vld [vmem:[#allocation20 + $0xa0] sm:$0xff]  }
 0xf7a   :  { %6841 = vmatprep.subr.bf16.mxu1 %v6520_v50  ;;  %v10099_v50 = vld [vmem:[#allocation20 + $0xe8] sm:$0xff]  }
 0xf7b   :  { %9161 = vmatpush3.bf16.msra.mxu0 %v10098_v22  ;;  %v6538_v22 = vld [vmem:[#allocation3 + $0xeb8] sm:$0xff] }
 0xf7c   :  { %9162 = vmatprep.subr.bf16.mxu0 %v10099_v50  ;;  %v6537_v50 = vld [vmem:[#allocation3 + $0xeb0] sm:$0xff] }
 0xf7d   :  { %6842 = vmatpush1.bf16.msra.mxu1 %v6519_v40  ;;  %v10100_v40 = vld [vmem:[#allocation20 + $0xa8] sm:$0xff]  }
 0xf7e   :  { %6843 = vmatprep.subr.bf16.mxu1 %v6522_v6  ;;  %v6527_v6 = vld [vmem:[#allocation3 + $0xe60] sm:$0xff] }
 0xf7f   :  { %9163 = vmatpush3.bf16.msra.mxu0 %v10100_v40  ;;  %v6542_v40 = vld [vmem:[#allocation3 + $0xed8] sm:$0xff] }
 0xf81   :  { %6844 = vmatpush1.bf16.msra.mxu1 %v6521_v45  ;;  %v6532_v45 = vld [vmem:[#allocation3 + $0xe88] sm:$0xff] }
 0xf82   :  { %6845 = vmatprep.subr.bf16.mxu1 %v6524_v1  ;;  %v6531_v1 = vld [vmem:[#allocation3 + $0xe80] sm:$0xff] }
 0xf85   :  { %6846 = vmatpush1.bf16.msra.mxu1 %v6523_v34  ;;  %v6536_v34 = vld [vmem:[#allocation3 + $0xea8] sm:$0xff] }
 0xf86   :  { %6847 = vmatprep.subr.bf16.mxu1 %v6526_v33  ;;  %v6535_v33 = vld [vmem:[#allocation3 + $0xea0] sm:$0xff] }
 0xf89   :  { %6848 = vmatpush1.bf16.msra.mxu1 %v6525_v61  ;;  %v6540_v61 = vld [vmem:[#allocation3 + $0xec8] sm:$0xff] }
 0xf8a   :  { %6849 = vmatprep.subr.bf16.mxu1 %v6528_v56  ;;  %v6539_v56 = vld [vmem:[#allocation3 + $0xec0] sm:$0xff] }
 0xf8d   :  { %6850 = vmatpush1.bf16.msra.mxu1 %v6527_v6  ;;  %v6541_v6 = vld [vmem:[#allocation3 + $0xed0] sm:$0xff] }
 0xf8e   :  { %6851 = vmatprep.subr.bf16.mxu1 %v6530_v43  ;;  %v6544_v43 = vld [vmem:[#allocation3 + $0xee8] sm:$0xff] }
 0xf91   :  { %6852 = vmatpush1.bf16.msra.mxu1 %v6529_v27  ;;  %v6543_v27 = vld [vmem:[#allocation3 + $0xee0] sm:$0xff] }
 0xf92   :  { %6853 = vmatprep.subr.bf16.mxu1 %v6532_v45  ;;  %v6546_v45 = vld [vmem:[#allocation3 + $0xef8] sm:$0xff] }
 0xf95   :  { %6854 = vmatpush1.bf16.msra.mxu1 %v6531_v1  ;;  %v6545_v1 = vld [vmem:[#allocation3 + $0xef0] sm:$0xff] }
 0xf96   :  { %6855 = vmatprep.subr.bf16.mxu1 %v6534_v47  ;;  %v6548_v47 = vld [vmem:[#allocation3 + $0xf08] sm:$0xff] }
 0xf99   :  { %6856 = vmatpush1.bf16.msra.mxu1 %v6533_v51  ;;  %v6547_v51 = vld [vmem:[#allocation3 + $0xf00] sm:$0xff] }
 0xf9a   :  { %6857 = vmatprep.subr.bf16.mxu1 %v6536_v34  ;;  %v6550_v34 = vld [vmem:[#allocation3 + $0xf18] sm:$0xff] }
 0xf9d   :  { %6858 = vmatpush1.bf16.msra.mxu1 %v6535_v33  ;;  %v6549_v33 = vld [vmem:[#allocation3 + $0xf10] sm:$0xff] }
 0xf9e   :  { %6859 = vmatprep.subr.bf16.mxu1 %v6538_v22  ;;  %v6552_v22 = vld [vmem:[#allocation3 + $0xf28] sm:$0xff] }
 0xfa1   :  { %6860 = vmatpush1.bf16.msra.mxu1 %v6537_v50  ;;  %v6551_v50 = vld [vmem:[#allocation3 + $0xf20] sm:$0xff] }
 0xfa2   :  { %6861 = vmatprep.subr.bf16.mxu1 %v6540_v61  ;;  %v6554_v61 = vld [vmem:[#allocation3 + $0xf38] sm:$0xff] }
 0xfa5   :  { %6862 = vmatpush1.bf16.msra.mxu1 %v6539_v56  ;;  %v6553_v56 = vld [vmem:[#allocation3 + $0xf30] sm:$0xff] }
 0xfa6   :  { %6863 = vmatprep.subr.bf16.mxu1 %v6542_v40  ;;  %v6556_v40 = vld [vmem:[#allocation3 + $0xf48] sm:$0xff] }
 0xfa9   :  { %6864 = vmatpush1.bf16.msra.mxu1 %v6541_v6  ;;  %v6555_v6 = vld [vmem:[#allocation3 + $0xf40] sm:$0xff] }
 0xfaa   :  { %6865 = vmatprep.subr.bf16.mxu1 %v6544_v43  ;;  %v6558_v43 = vld [vmem:[#allocation3 + $0xf58] sm:$0xff] }
 0xfad   :  { %6866 = vmatpush1.bf16.msra.mxu1 %v6543_v27  ;;  %v6557_v27 = vld [vmem:[#allocation3 + $0xf50] sm:$0xff] }
 0xfae   :  { %6867 = vmatprep.subr.bf16.mxu1 %v6546_v45  ;;  %v6560_v45 = vld [vmem:[#allocation3 + $0xf68] sm:$0xff] }
 0xfb1   :  { %6868 = vmatpush1.bf16.msra.mxu1 %v6545_v1  ;;  %v6559_v1 = vld [vmem:[#allocation3 + $0xf60] sm:$0xff] }
 0xfb2   :  { %6878 = vmatprep.subr.bf16.mxu1 %v6548_v47  ;;  %v6562_v47 = vld [vmem:[#allocation3 + $0xf78] sm:$0xff] }
 0xfb4   :  { %6870 = vmatmul.mubr.bf16.vlgmr.msra.gmra.mrb[128].mxu1 %v12749_v57 }
 0xfb5   :  { %6879 = vmatpush1.bf16.msra.mxu1 %v6547_v51  ;;  %6910 = vmatprep.mubr.bf16.mxu1 %v12753_v37  ;;  %v6561_v51 = vld [vmem:[#allocation3 + $0xf70] sm:$0xff] }
 0xfb6   :  { %6880 = vmatprep.subr.bf16.mxu1 %v6550_v34  ;;  %v6564_v34 = vld [vmem:[#allocation3 + $0xf88] sm:$0xff] }
 0xfb9   :  { %6881 = vmatpush1.bf16.msra.mxu1 %v6549_v33  ;;  %v6563_v33 = vld [vmem:[#allocation3 + $0xf80] sm:$0xff] }
 0xfba   :  { %6882 = vmatprep.subr.bf16.mxu1 %v6552_v22  ;;  %v6566_v22 = vld [vmem:[#allocation3 + $0xf98] sm:$0xff] }
 0xfbd   :  { %6883 = vmatpush1.bf16.msra.mxu1 %v6551_v50  ;;  %v6565_v50 = vld [vmem:[#allocation3 + $0xf90] sm:$0xff] }
 0xfbe   :  { %6884 = vmatprep.subr.bf16.mxu1 %v6554_v61  ;;  %v6568_v61 = vld [vmem:[#allocation3 + $0xfa8] sm:$0xff] }
 0xfc1   :  { %6885 = vmatpush1.bf16.msra.mxu1 %v6553_v56  ;;  %v6567_v56 = vld [vmem:[#allocation3 + $0xfa0] sm:$0xff] }
 0xfc2   :  { %6886 = vmatprep.subr.bf16.mxu1 %v6556_v40  ;;  %v6570_v40 = vld [vmem:[#allocation3 + $0xfb8] sm:$0xff] }
 0xfc5   :  { %6887 = vmatpush1.bf16.msra.mxu1 %v6555_v6  ;;  %v6569_v6 = vld [vmem:[#allocation3 + $0xfb0] sm:$0xff] }
 0xfc6   :  { %6888 = vmatprep.subr.bf16.mxu1 %v6558_v43  ;;  %v6572_v43 = vld [vmem:[#allocation3 + $0xfc8] sm:$0xff] }
 0xfc9   :  { %6889 = vmatpush1.bf16.msra.mxu1 %v6557_v27  ;;  %v6571_v27 = vld [vmem:[#allocation3 + $0xfc0] sm:$0xff] }
 0xfca   :  { %6890 = vmatprep.subr.bf16.mxu1 %v6560_v45  ;;  %v6574_v45 = vld [vmem:[#allocation3 + $0xfd8] sm:$0xff] }
 0xfcd   :  { %6891 = vmatpush1.bf16.msra.mxu1 %v6559_v1  ;;  %v6573_v1 = vld [vmem:[#allocation3 + $0xfd0] sm:$0xff] }
 0xfce   :  { %6892 = vmatprep.subr.bf16.mxu1 %v6562_v47  ;;  %v6576_v47 = vld [vmem:[#allocation3 + $0xfe8] sm:$0xff] }
 0xfd1   :  { %6893 = vmatpush1.bf16.msra.mxu1 %v6561_v51  ;;  %v6575_v51 = vld [vmem:[#allocation3 + $0xfe0] sm:$0xff] }
 0xfd2   :  { %6894 = vmatprep.subr.bf16.mxu1 %v6564_v34  ;;  %v6578_v34 = vld [vmem:[#allocation3 + $0xff8] sm:$0xff] }
 0xfd5   :  { %6895 = vmatpush1.bf16.msra.mxu1 %v6563_v33  ;;  %v6577_v33 = vld [vmem:[#allocation3 + $0xff0] sm:$0xff] }
 0xfd6   :  { %6896 = vmatprep.subr.bf16.mxu1 %v6566_v22  ;;  %v10101_v22 = vld [vmem:[#allocation20 + $0xf0] sm:$0xff]  }
 0xfd7   :  { %9164 = vmatprep.subr.bf16.mxu0 %v10101_v22 }
 0xfd9   :  { %6897 = vmatpush1.bf16.msra.mxu1 %v6565_v50  ;;  %v10102_v50 = vld [vmem:[#allocation20 + $0xb0] sm:$0xff]  }
 0xfda   :  { %6898 = vmatprep.subr.bf16.mxu1 %v6568_v61  ;;  %9165 = vmatpush3.bf16.msra.mxu0 %v10102_v50  ;;  %v10103_v61 = vld [vmem:[#allocation20 + $0xf8] sm:$0xff]  }
 0xfdb   :  { %9166 = vmatprep.subr.bf16.mxu0 %v10103_v61  ;;  %v9091_v61 = vcombine.low %v12606_v36, %v12608_v29  ;;  %v9093_v36 = vcombine.low %v12614_v2, %v12616_v55  ;;  %v9102_v29 = vcombine.low %v12650_v15, %v12652_v59  ;;  %v9104_v2 = vcombine.low %v12658_v53, %v12660_v3 }
 0xfdc   :  { %v9096_v55 = vcombine.low %v12626_v16, %v12628_v58 }
 0xfdd   :  { %6899 = vmatpush1.bf16.msra.mxu1 %v6567_v56  ;;  %v10104_v56 = vld [vmem:[#allocation20 + $0xb8] sm:$0xff]  }
 0xfde   :  { %6900 = vmatprep.subr.bf16.mxu1 %v6570_v40  ;;  %9167 = vmatpush3.bf16.msra.mxu0 %v10104_v56  ;;  %v9099_v40 = vcombine.low %v12638_v17, %v12640_v49  ;;  %v9100_v17 = vcombine.low %v12642_v11, %v12644_v8  ;;  %v9092_v49 = vcombine.low %v12610_v9, %v12612_v63  ;;  %v12951_v8 = vld [vmem:[#allocation43_spill] sm:$0xff] }
 0xfdf   :  { %v9094_v11 = vcombine.low %v12618_v41, %v12620_v12  ;;  %v9103_v9 = vcombine.low %v12654_v0, %v12656_v38  ;;  %v9095_v63 = vcombine.low %v12622_v10, %v12624_v48  ;;  %v9105_v41 = vcombine.low %v12662_v62, %v12664_v14  ;;  %v12950_v48 = vld [vmem:[#allocation46_spill] sm:$0xff] }
 0xfe0   :  { %9174 = vmatprep.subr.bf16.mxu0 %v9099_v40  ;;  %v9101_v40 = vcombine.low %v12646_v26, %v12648_v20  ;;  %v9097_v12 = vcombine.low %v12630_v18, %v12632_v44  ;;  %v9106_v10 = vcombine.low %v12666_v25, %v12668_v30  ;;  %v9098_v26 = vcombine.low %v12951_v8, %v12950_v48 }
 0xfe1   :  { %6901 = vmatpush1.bf16.msra.mxu1 %v6569_v6  ;;  %v6579_v6 = vld [vmem:[#allocation19 + $0x2] sm:$0x3] }
 0xfe2   :  { %6902 = vmatprep.subr.bf16.mxu1 %v6572_v43  ;;  %v6584_v43 = vrot.slane %v6579_v6, %v11475_v4 }
 0xfe5   :  { %6903 = vmatpush1.bf16.msra.mxu1 %v6571_v27  ;;  %v6588_v27 = vrot.slane %v6579_v6, %v11478_v46 }
 0xfe6   :  { %6904 = vmatprep.subr.bf16.mxu1 %v6574_v45 }
 0xfe9   :  { %6905 = vmatpush1.bf16.msra.mxu1 %v6573_v1 }
 0xfea   :  { %6906 = vmatprep.subr.bf16.mxu1 %v6576_v47 }
 0xfed   :  { %6907 = vmatpush1.bf16.msra.mxu1 %v6575_v51 }
 0xfee   :  { %6908 = vmatprep.subr.bf16.mxu1 %v6578_v34 }
 0xff1   :  { %6909 = vmatpush1.bf16.msra.mxu1 %v6577_v33 }
 0xff4   :  { %6911 = vmatmul.mubr.bf16.vlgmr.msra.gmra.mrb[128].mxu1 %v12759_v39 }
0x10c7   :  { %v6912_v45 = vpop.f32.mrb[128].mxu1 }
0x10c8   :  { %v9242_v1 = vadd.f32 %v6912_v45, %v6584_v43  ;;  %v6914_v47 = vpop.f32.mrb[129].mxu1 }
0x10c9   :  { %v9243_v51 = vadd.f32 %v6914_v47, %v6588_v27  ;;  %v6916_v34 = vpop.f32.mrb[130].mxu1 }
0x10ca   :  { %v6919_v33 = vmax.f32 %v9242_v1, 0.0  ;;  %v6917_v22 = vpop.f32.mrb[131].mxu1 }
0x10cb   :  { %v6920_v50 = vmax.f32 %v9243_v51, 0.0 }
0x10cc   :  { %v6921_v56 = vpack.c.bf16 %v6919_v33, %v6919_v33 }
0x10cd   :  { %v6922_v39 = vpack.c.bf16 %v6920_v50, %v6920_v50 }
0x10cf   :  { %7083 = vmatprep.mubr.bf16.mxu0 %v6922_v39 }
0x10d0   :  { %7084 = vmatmul.mubr.bf16.vlgmr.msra.gmra.mrb[100].mxu0 %v6921_v56 }
0x10d1   :  { %9175 = vmatpush3.bf16.msra.mxu0 %v9091_v61  ;;  %7219 = vmatprep.mubr.bf16.mxu0 %v12766_v54 }
0x10d2   :  { %9176 = vmatprep.subr.bf16.mxu0 %v9100_v17 }
0x10d5   :  { %9177 = vmatpush3.bf16.msra.mxu0 %v9092_v49 }
0x10d6   :  { %9178 = vmatprep.subr.bf16.mxu0 %v9101_v40 }
0x10d9   :  { %9179 = vmatpush3.bf16.msra.mxu0 %v9093_v36 }
0x10da   :  { %9180 = vmatprep.subr.bf16.mxu0 %v9102_v29 }
0x10dd   :  { %9181 = vmatpush3.bf16.msra.mxu0 %v9094_v11 }
0x10de   :  { %9182 = vmatprep.subr.bf16.mxu0 %v9103_v9 }
0x10e1   :  { %9183 = vmatpush3.bf16.msra.mxu0 %v9095_v63 }
0x10e2   :  { %9184 = vmatprep.subr.bf16.mxu0 %v9104_v2 }
0x10e5   :  { %9185 = vmatpush3.bf16.msra.mxu0 %v9096_v55 }
0x10e6   :  { %9186 = vmatprep.subr.bf16.mxu0 %v9105_v41 }
0x10e9   :  { %9187 = vmatpush3.bf16.msra.mxu0 %v9097_v12 }
0x10ea   :  { %9188 = vmatprep.subr.bf16.mxu0 %v9106_v10 }
0x10ed   :  { %9189 = vmatpush3.bf16.msra.mxu0 %v9098_v26 }
0x10f0   :  { %7220 = vmatmul.mubr.bf16.vlgmr.msra.gmra.mrb[104].mxu0 %v12764_v52 }
0x11a3   :  { %v9168_v16 = vpop.f32.mrb[100].mxu0 }
0x11a4   :  { %v9169_v58 = vpop.f32.mrb[101].mxu0 }
0x11a5   :  { %v9170_v20 = vadd.f32 %v9169_v58, %v9168_v16  ;;  %v9171_v15 = vpop.f32.mrb[102].mxu0 }
0x11a6   :  { %v9172_v59 = vpop.f32.mrb[103].mxu0 }
0x11c3   :  { %v9190_v0 = vpop.f32.mrb[104].mxu0 }
0x11c4   :  { %v9191_v38 = vpop.f32.mrb[105].mxu0 }
0x11c5   :  { %v9192_v18 = vadd.f32 %v9191_v38, %v9190_v0  ;;  %v9193_v44 = vpop.f32.mrb[106].mxu0 }
0x11c6   :  { %v9194_v53 = vpop.f32.mrb[107].mxu0 }
0x11c7   :  { %v12820_v3 = vadd.f32 %v9192_v18, %v9170_v20 }
0x11c8   :  { %10417 = dma.done.wait [#allocation4 + $0x2], 32768 }
0x11c9   :  { %10418 = vsyncadd [#allocation4 + $0x2], 4294934528  ;;  %7529 = vmatprep.mubr.bf16.mxu1 %v12603_v19  ;;  %v7230_v62 = vld [vmem:[#allocation3 + $0x1008] sm:$0xff]  ;;  %v7229_v14 = vld [vmem:[#allocation3 + $0x1000] sm:$0xff] }
0x11ca   :  { %v7232_v25 = vld [vmem:[#allocation3 + $0x1018] sm:$0xff]  ;;  %7497 = vmatprep.subr.bf16.mxu1 %v7230_v62  ;;  %v7231_v30 = vld [vmem:[#allocation3 + $0x1010] sm:$0xff]  ;;  %v7234_v39 = vld [vmem:[#allocation3 + $0x1028] sm:$0xff] }
0x11cb   :  { %7498 = vmatpush1.bf16.msra.mxu1 %v7229_v14  ;;  %v7233_v52 = vld [vmem:[#allocation3 + $0x1020] sm:$0xff]  ;;  %v7236_v54 = vld [vmem:[#allocation3 + $0x1038] sm:$0xff]  ;;  %v7235_v6 = vld [vmem:[#allocation3 + $0x1030] sm:$0xff] }
0x11cc   :  { %7499 = vmatprep.subr.bf16.mxu1 %v7232_v25  ;;  %v7238_v43 = vld [vmem:[#allocation3 + $0x1048] sm:$0xff]  ;;  %v7237_v27 = vld [vmem:[#allocation3 + $0x1040] sm:$0xff]  ;;  %v7240_v45 = vld [vmem:[#allocation3 + $0x1058] sm:$0xff] }
0x11cd   :  { %v7239_v1 = vld [vmem:[#allocation3 + $0x1050] sm:$0xff]  ;;  %v7242_v47 = vld [vmem:[#allocation3 + $0x1068] sm:$0xff]  ;;  %v7241_v51 = vld [vmem:[#allocation3 + $0x1060] sm:$0xff] }
0x11ce   :  { %v7244_v34 = vld [vmem:[#allocation3 + $0x1078] sm:$0xff]  ;;  %v7243_v33 = vld [vmem:[#allocation3 + $0x1070] sm:$0xff]  ;;  %v7246_v22 = vld [vmem:[#allocation3 + $0x1088] sm:$0xff] }
0x11cf   :  { %7500 = vmatpush1.bf16.msra.mxu1 %v7231_v30  ;;  %v7245_v50 = vld [vmem:[#allocation3 + $0x1080] sm:$0xff]  ;;  %v7248_v61 = vld [vmem:[#allocation3 + $0x1098] sm:$0xff]  ;;  %v7247_v56 = vld [vmem:[#allocation3 + $0x1090] sm:$0xff] }
0x11d0   :  { %7501 = vmatprep.subr.bf16.mxu1 %v7234_v39  ;;  %v7250_v17 = vld [vmem:[#allocation3 + $0x10a8] sm:$0xff]  ;;  %v7249_v49 = vld [vmem:[#allocation3 + $0x10a0] sm:$0xff]  ;;  %v7252_v40 = vld [vmem:[#allocation3 + $0x10b8] sm:$0xff] }
0x11d1   :  { %v7251_v36 = vld [vmem:[#allocation3 + $0x10b0] sm:$0xff]  ;;  %v7254_v29 = vld [vmem:[#allocation3 + $0x10c8] sm:$0xff]  ;;  %v7253_v11 = vld [vmem:[#allocation3 + $0x10c0] sm:$0xff] }
0x11d2   :  { %v7256_v9 = vld [vmem:[#allocation3 + $0x10d8] sm:$0xff]  ;;  %v7255_v63 = vld [vmem:[#allocation3 + $0x10d0] sm:$0xff]  ;;  %v7258_v2 = vld [vmem:[#allocation3 + $0x10e8] sm:$0xff] }
0x11d3   :  { %7502 = vmatpush1.bf16.msra.mxu1 %v7233_v52  ;;  %v7257_v55 = vld [vmem:[#allocation3 + $0x10e0] sm:$0xff]  ;;  %v7260_v41 = vld [vmem:[#allocation3 + $0x10f8] sm:$0xff]  ;;  %v7259_v12 = vld [vmem:[#allocation3 + $0x10f0] sm:$0xff] }
0x11d4   :  { %7503 = vmatprep.subr.bf16.mxu1 %v7236_v54  ;;  %v7262_v10 = vld [vmem:[#allocation3 + $0x1108] sm:$0xff]  ;;  %v7261_v48 = vld [vmem:[#allocation3 + $0x1100] sm:$0xff]  ;;  %v7264_v8 = vld [vmem:[#allocation3 + $0x1118] sm:$0xff] }
0x11d5   :  { %v7263_v26 = vld [vmem:[#allocation3 + $0x1110] sm:$0xff]  ;;  %v7266_v16 = vld [vmem:[#allocation3 + $0x1128] sm:$0xff]  ;;  %v7265_v58 = vld [vmem:[#allocation3 + $0x1120] sm:$0xff] }
0x11d6   :  { %v7268_v20 = vld [vmem:[#allocation3 + $0x1138] sm:$0xff]  ;;  %v7267_v15 = vld [vmem:[#allocation3 + $0x1130] sm:$0xff]  ;;  %v7270_v59 = vld [vmem:[#allocation3 + $0x1148] sm:$0xff] }
0x11d7   :  { %7504 = vmatpush1.bf16.msra.mxu1 %v7235_v6  ;;  %v7269_v0 = vld [vmem:[#allocation3 + $0x1140] sm:$0xff]  ;;  %v7272_v38 = vld [vmem:[#allocation3 + $0x1158] sm:$0xff]  ;;  %v7271_v18 = vld [vmem:[#allocation3 + $0x1150] sm:$0xff] }
0x11d8   :  { %7505 = vmatprep.subr.bf16.mxu1 %v7238_v43  ;;  %v7274_v44 = vld [vmem:[#allocation3 + $0x1168] sm:$0xff]  ;;  %v7273_v53 = vld [vmem:[#allocation3 + $0x1160] sm:$0xff]  ;;  %v7276_v62 = vld [vmem:[#allocation3 + $0x1178] sm:$0xff] }
0x11d9   :  { %v7275_v14 = vld [vmem:[#allocation3 + $0x1170] sm:$0xff]  ;;  %v7278_v25 = vld [vmem:[#allocation3 + $0x1188] sm:$0xff]  ;;  %v7277_v30 = vld [vmem:[#allocation3 + $0x1180] sm:$0xff] }
0x11da   :  { %v7280_v39 = vld [vmem:[#allocation3 + $0x1198] sm:$0xff]  ;;  %v7279_v52 = vld [vmem:[#allocation3 + $0x1190] sm:$0xff]  ;;  %v7282_v54 = vld [vmem:[#allocation3 + $0x11a8] sm:$0xff] }
0x11db   :  { %7506 = vmatpush1.bf16.msra.mxu1 %v7237_v27  ;;  %v7281_v6 = vld [vmem:[#allocation3 + $0x11a0] sm:$0xff]  ;;  %v7284_v43 = vld [vmem:[#allocation3 + $0x11b8] sm:$0xff]  ;;  %v7283_v27 = vld [vmem:[#allocation3 + $0x11b0] sm:$0xff] }
0x11dc   :  { %7507 = vmatprep.subr.bf16.mxu1 %v7240_v45  ;;  %v7286_v45 = vld [vmem:[#allocation3 + $0x11c8] sm:$0xff] }
0x11df   :  { %7508 = vmatpush1.bf16.msra.mxu1 %v7239_v1  ;;  %v7285_v1 = vld [vmem:[#allocation3 + $0x11c0] sm:$0xff] }
0x11e0   :  { %7509 = vmatprep.subr.bf16.mxu1 %v7242_v47  ;;  %v7288_v47 = vld [vmem:[#allocation3 + $0x11d8] sm:$0xff] }
0x11e3   :  { %7510 = vmatpush1.bf16.msra.mxu1 %v7241_v51  ;;  %v7287_v51 = vld [vmem:[#allocation3 + $0x11d0] sm:$0xff] }
0x11e4   :  { %7511 = vmatprep.subr.bf16.mxu1 %v7244_v34  ;;  %v7290_v34 = vld [vmem:[#allocation3 + $0x11e8] sm:$0xff] }
0x11e7   :  { %7512 = vmatpush1.bf16.msra.mxu1 %v7243_v33  ;;  %v7289_v33 = vld [vmem:[#allocation3 + $0x11e0] sm:$0xff] }
0x11e8   :  { %7513 = vmatprep.subr.bf16.mxu1 %v7246_v22  ;;  %v7292_v22 = vld [vmem:[#allocation3 + $0x11f8] sm:$0xff] }
0x11eb   :  { %7514 = vmatpush1.bf16.msra.mxu1 %v7245_v50  ;;  %v7291_v50 = vld [vmem:[#allocation3 + $0x11f0] sm:$0xff] }
0x11ec   :  { %7515 = vmatprep.subr.bf16.mxu1 %v7248_v61  ;;  %v7294_v61 = vld [vmem:[#allocation3 + $0x1208] sm:$0xff] }
0x11ef   :  { %7516 = vmatpush1.bf16.msra.mxu1 %v7247_v56  ;;  %v7293_v56 = vld [vmem:[#allocation3 + $0x1200] sm:$0xff] }
0x11f0   :  { %7517 = vmatprep.subr.bf16.mxu1 %v7250_v17  ;;  %v7296_v17 = vld [vmem:[#allocation3 + $0x1218] sm:$0xff] }
0x11f3   :  { %7518 = vmatpush1.bf16.msra.mxu1 %v7249_v49  ;;  %v7295_v49 = vld [vmem:[#allocation3 + $0x1210] sm:$0xff] }
0x11f4   :  { %7519 = vmatprep.subr.bf16.mxu1 %v7252_v40  ;;  %v7298_v40 = vld [vmem:[#allocation3 + $0x1228] sm:$0xff] }
0x11f7   :  { %7520 = vmatpush1.bf16.msra.mxu1 %v7251_v36  ;;  %v7297_v36 = vld [vmem:[#allocation3 + $0x1220] sm:$0xff] }
0x11f8   :  { %7521 = vmatprep.subr.bf16.mxu1 %v7254_v29  ;;  %v7300_v29 = vld [vmem:[#allocation3 + $0x1238] sm:$0xff] }
0x11fb   :  { %7522 = vmatpush1.bf16.msra.mxu1 %v7253_v11  ;;  %v7299_v11 = vld [vmem:[#allocation3 + $0x1230] sm:$0xff] }
0x11fc   :  { %7523 = vmatprep.subr.bf16.mxu1 %v7256_v9  ;;  %v7302_v9 = vld [vmem:[#allocation3 + $0x1248] sm:$0xff] }
0x11ff   :  { %7524 = vmatpush1.bf16.msra.mxu1 %v7255_v63  ;;  %v7301_v63 = vld [vmem:[#allocation3 + $0x1240] sm:$0xff] }
0x1200   :  { %7525 = vmatprep.subr.bf16.mxu1 %v7258_v2  ;;  %v7304_v2 = vld [vmem:[#allocation3 + $0x1258] sm:$0xff] }
0x1203   :  { %7526 = vmatpush1.bf16.msra.mxu1 %v7257_v55  ;;  %v7303_v55 = vld [vmem:[#allocation3 + $0x1250] sm:$0xff] }
0x1204   :  { %7527 = vmatprep.subr.bf16.mxu1 %v7260_v41  ;;  %v7306_v41 = vld [vmem:[#allocation3 + $0x1268] sm:$0xff] }
0x1207   :  { %7528 = vmatpush1.bf16.msra.mxu1 %v7259_v12  ;;  %v7305_v12 = vld [vmem:[#allocation3 + $0x1260] sm:$0xff] }
0x1208   :  { %7538 = vmatprep.subr.bf16.mxu1 %v7262_v10  ;;  %v7308_v10 = vld [vmem:[#allocation3 + $0x1278] sm:$0xff] }
0x120a   :  { %7530 = vmatmul.mubr.bf16.vlgmr.msra.gmra.mrb[132].mxu1 %v12672_v28 }
0x120b   :  { %7539 = vmatpush1.bf16.msra.mxu1 %v7261_v48  ;;  %7570 = vmatprep.mubr.bf16.mxu1 %v12676_v13  ;;  %v7307_v48 = vld [vmem:[#allocation3 + $0x1270] sm:$0xff] }
0x120c   :  { %7540 = vmatprep.subr.bf16.mxu1 %v7264_v8  ;;  %v7310_v8 = vld [vmem:[#allocation3 + $0x1288] sm:$0xff] }
0x120f   :  { %7541 = vmatpush1.bf16.msra.mxu1 %v7263_v26  ;;  %v7309_v26 = vld [vmem:[#allocation3 + $0x1280] sm:$0xff] }
0x1210   :  { %7542 = vmatprep.subr.bf16.mxu1 %v7266_v16  ;;  %v7312_v16 = vld [vmem:[#allocation3 + $0x1298] sm:$0xff] }
0x1213   :  { %7543 = vmatpush1.bf16.msra.mxu1 %v7265_v58  ;;  %v7311_v58 = vld [vmem:[#allocation3 + $0x1290] sm:$0xff] }
0x1214   :  { %7544 = vmatprep.subr.bf16.mxu1 %v7268_v20  ;;  %v7314_v20 = vld [vmem:[#allocation3 + $0x12a8] sm:$0xff] }
0x1217   :  { %7545 = vmatpush1.bf16.msra.mxu1 %v7267_v15  ;;  %v7313_v15 = vld [vmem:[#allocation3 + $0x12a0] sm:$0xff] }
0x1218   :  { %7546 = vmatprep.subr.bf16.mxu1 %v7270_v59  ;;  %v7316_v59 = vld [vmem:[#allocation3 + $0x12b8] sm:$0xff] }
0x121b   :  { %7547 = vmatpush1.bf16.msra.mxu1 %v7269_v0  ;;  %v7315_v0 = vld [vmem:[#allocation3 + $0x12b0] sm:$0xff] }
0x121c   :  { %7548 = vmatprep.subr.bf16.mxu1 %v7272_v38  ;;  %v7318_v38 = vld [vmem:[#allocation3 + $0x12c8] sm:$0xff] }
0x121f   :  { %7549 = vmatpush1.bf16.msra.mxu1 %v7271_v18  ;;  %v7317_v18 = vld [vmem:[#allocation3 + $0x12c0] sm:$0xff] }
0x1220   :  { %7550 = vmatprep.subr.bf16.mxu1 %v7274_v44  ;;  %v7320_v44 = vld [vmem:[#allocation3 + $0x12d8] sm:$0xff] }
0x1223   :  { %7551 = vmatpush1.bf16.msra.mxu1 %v7273_v53  ;;  %v7319_v53 = vld [vmem:[#allocation3 + $0x12d0] sm:$0xff] }
0x1224   :  { %7552 = vmatprep.subr.bf16.mxu1 %v7276_v62  ;;  %v7322_v62 = vld [vmem:[#allocation3 + $0x12e8] sm:$0xff] }
0x1227   :  { %7553 = vmatpush1.bf16.msra.mxu1 %v7275_v14  ;;  %v7321_v14 = vld [vmem:[#allocation3 + $0x12e0] sm:$0xff] }
0x1228   :  { %7554 = vmatprep.subr.bf16.mxu1 %v7278_v25  ;;  %v7324_v25 = vld [vmem:[#allocation3 + $0x12f8] sm:$0xff] }
0x122b   :  { %7555 = vmatpush1.bf16.msra.mxu1 %v7277_v30  ;;  %v7323_v30 = vld [vmem:[#allocation3 + $0x12f0] sm:$0xff] }
0x122c   :  { %7556 = vmatprep.subr.bf16.mxu1 %v7280_v39  ;;  %v7326_v39 = vld [vmem:[#allocation3 + $0x1308] sm:$0xff] }
0x122f   :  { %7557 = vmatpush1.bf16.msra.mxu1 %v7279_v52  ;;  %v7325_v52 = vld [vmem:[#allocation3 + $0x1300] sm:$0xff] }
0x1230   :  { %7558 = vmatprep.subr.bf16.mxu1 %v7282_v54  ;;  %v7328_v54 = vld [vmem:[#allocation3 + $0x1318] sm:$0xff] }
0x1233   :  { %7559 = vmatpush1.bf16.msra.mxu1 %v7281_v6  ;;  %v7327_v6 = vld [vmem:[#allocation3 + $0x1310] sm:$0xff] }
0x1234   :  { %7560 = vmatprep.subr.bf16.mxu1 %v7284_v43  ;;  %v7330_v43 = vld [vmem:[#allocation3 + $0x1328] sm:$0xff] }
0x1237   :  { %7561 = vmatpush1.bf16.msra.mxu1 %v7283_v27  ;;  %v7329_v27 = vld [vmem:[#allocation3 + $0x1320] sm:$0xff] }
0x1238   :  { %7562 = vmatprep.subr.bf16.mxu1 %v7286_v45  ;;  %v7332_v45 = vld [vmem:[#allocation3 + $0x1338] sm:$0xff] }
0x123b   :  { %7563 = vmatpush1.bf16.msra.mxu1 %v7285_v1  ;;  %v7331_v1 = vld [vmem:[#allocation3 + $0x1330] sm:$0xff] }
0x123c   :  { %7564 = vmatprep.subr.bf16.mxu1 %v7288_v47  ;;  %v7334_v47 = vld [vmem:[#allocation3 + $0x1348] sm:$0xff] }
0x123f   :  { %7565 = vmatpush1.bf16.msra.mxu1 %v7287_v51  ;;  %v7333_v51 = vld [vmem:[#allocation3 + $0x1340] sm:$0xff] }
0x1240   :  { %7566 = vmatprep.subr.bf16.mxu1 %v7290_v34  ;;  %v7336_v34 = vld [vmem:[#allocation3 + $0x1358] sm:$0xff] }
0x1243   :  { %7567 = vmatpush1.bf16.msra.mxu1 %v7289_v33  ;;  %v7335_v33 = vld [vmem:[#allocation3 + $0x1350] sm:$0xff] }
0x1244   :  { %7568 = vmatprep.subr.bf16.mxu1 %v7292_v22  ;;  %v7338_v22 = vld [vmem:[#allocation3 + $0x1368] sm:$0xff] }
0x1247   :  { %7569 = vmatpush1.bf16.msra.mxu1 %v7291_v50  ;;  %v7337_v50 = vld [vmem:[#allocation3 + $0x1360] sm:$0xff] }
0x1248   :  { %7579 = vmatprep.subr.bf16.mxu1 %v7294_v61  ;;  %v7340_v61 = vld [vmem:[#allocation3 + $0x1378] sm:$0xff] }
0x124a   :  { %7571 = vmatmul.mubr.bf16.vlgmr.msra.gmra.mrb[132].mxu1 %v12689_v24 }
0x124b   :  { %7580 = vmatpush1.bf16.msra.mxu1 %v7293_v56  ;;  %7611 = vmatprep.mubr.bf16.mxu1 %v12692_v35  ;;  %v7339_v56 = vld [vmem:[#allocation3 + $0x1370] sm:$0xff] }
0x124c   :  { %7581 = vmatprep.subr.bf16.mxu1 %v7296_v17  ;;  %v7342_v17 = vld [vmem:[#allocation3 + $0x1388] sm:$0xff] }
0x124f   :  { %7582 = vmatpush1.bf16.msra.mxu1 %v7295_v49  ;;  %v7341_v49 = vld [vmem:[#allocation3 + $0x1380] sm:$0xff] }
0x1250   :  { %7583 = vmatprep.subr.bf16.mxu1 %v7298_v40  ;;  %v7344_v40 = vld [vmem:[#allocation3 + $0x1398] sm:$0xff] }
0x1253   :  { %7584 = vmatpush1.bf16.msra.mxu1 %v7297_v36  ;;  %v7343_v36 = vld [vmem:[#allocation3 + $0x1390] sm:$0xff] }
0x1254   :  { %7585 = vmatprep.subr.bf16.mxu1 %v7300_v29  ;;  %v7346_v29 = vld [vmem:[#allocation3 + $0x13a8] sm:$0xff] }
0x1257   :  { %7586 = vmatpush1.bf16.msra.mxu1 %v7299_v11  ;;  %v7345_v11 = vld [vmem:[#allocation3 + $0x13a0] sm:$0xff] }
0x1258   :  { %7587 = vmatprep.subr.bf16.mxu1 %v7302_v9  ;;  %v7348_v9 = vld [vmem:[#allocation3 + $0x13b8] sm:$0xff] }
0x125b   :  { %7588 = vmatpush1.bf16.msra.mxu1 %v7301_v63  ;;  %v7347_v63 = vld [vmem:[#allocation3 + $0x13b0] sm:$0xff] }
0x125c   :  { %7589 = vmatprep.subr.bf16.mxu1 %v7304_v2  ;;  %v7350_v2 = vld [vmem:[#allocation3 + $0x13c8] sm:$0xff] }
0x125f   :  { %7590 = vmatpush1.bf16.msra.mxu1 %v7303_v55  ;;  %v7349_v55 = vld [vmem:[#allocation3 + $0x13c0] sm:$0xff] }
0x1260   :  { %7591 = vmatprep.subr.bf16.mxu1 %v7306_v41  ;;  %v7352_v41 = vld [vmem:[#allocation3 + $0x13d8] sm:$0xff] }
0x1263   :  { %7592 = vmatpush1.bf16.msra.mxu1 %v7305_v12  ;;  %v7351_v12 = vld [vmem:[#allocation3 + $0x13d0] sm:$0xff] }
0x1264   :  { %7593 = vmatprep.subr.bf16.mxu1 %v7308_v10  ;;  %v7354_v10 = vld [vmem:[#allocation3 + $0x13e8] sm:$0xff] }
0x1267   :  { %7594 = vmatpush1.bf16.msra.mxu1 %v7307_v48  ;;  %v7353_v48 = vld [vmem:[#allocation3 + $0x13e0] sm:$0xff] }
0x1268   :  { %7595 = vmatprep.subr.bf16.mxu1 %v7310_v8  ;;  %v7356_v8 = vld [vmem:[#allocation3 + $0x13f8] sm:$0xff] }
0x126b   :  { %7596 = vmatpush1.bf16.msra.mxu1 %v7309_v26  ;;  %v7355_v26 = vld [vmem:[#allocation3 + $0x13f0] sm:$0xff] }
0x126c   :  { %7597 = vmatprep.subr.bf16.mxu1 %v7312_v16  ;;  %v7358_v16 = vld [vmem:[#allocation3 + $0x1408] sm:$0xff] }
0x126f   :  { %7598 = vmatpush1.bf16.msra.mxu1 %v7311_v58  ;;  %v7357_v58 = vld [vmem:[#allocation3 + $0x1400] sm:$0xff] }
0x1270   :  { %7599 = vmatprep.subr.bf16.mxu1 %v7314_v20  ;;  %v7360_v20 = vld [vmem:[#allocation3 + $0x1418] sm:$0xff] }
0x1273   :  { %7600 = vmatpush1.bf16.msra.mxu1 %v7313_v15  ;;  %v7359_v15 = vld [vmem:[#allocation3 + $0x1410] sm:$0xff] }
0x1274   :  { %7601 = vmatprep.subr.bf16.mxu1 %v7316_v59  ;;  %v7362_v59 = vld [vmem:[#allocation3 + $0x1428] sm:$0xff] }
0x1277   :  { %7602 = vmatpush1.bf16.msra.mxu1 %v7315_v0  ;;  %v7361_v0 = vld [vmem:[#allocation3 + $0x1420] sm:$0xff] }
0x1278   :  { %7603 = vmatprep.subr.bf16.mxu1 %v7318_v38  ;;  %v7364_v38 = vld [vmem:[#allocation3 + $0x1438] sm:$0xff] }
0x127b   :  { %7604 = vmatpush1.bf16.msra.mxu1 %v7317_v18  ;;  %v7363_v18 = vld [vmem:[#allocation3 + $0x1430] sm:$0xff] }
0x127c   :  { %7605 = vmatprep.subr.bf16.mxu1 %v7320_v44  ;;  %v7366_v44 = vld [vmem:[#allocation3 + $0x1448] sm:$0xff] }
0x127f   :  { %7606 = vmatpush1.bf16.msra.mxu1 %v7319_v53  ;;  %v7365_v53 = vld [vmem:[#allocation3 + $0x1440] sm:$0xff] }
0x1280   :  { %7607 = vmatprep.subr.bf16.mxu1 %v7322_v62  ;;  %v7368_v62 = vld [vmem:[#allocation3 + $0x1458] sm:$0xff] }
0x1283   :  { %7608 = vmatpush1.bf16.msra.mxu1 %v7321_v14  ;;  %v7367_v14 = vld [vmem:[#allocation3 + $0x1450] sm:$0xff] }
0x1284   :  { %7609 = vmatprep.subr.bf16.mxu1 %v7324_v25  ;;  %v7370_v25 = vld [vmem:[#allocation3 + $0x1468] sm:$0xff] }
0x1287   :  { %7610 = vmatpush1.bf16.msra.mxu1 %v7323_v30  ;;  %v7369_v30 = vld [vmem:[#allocation3 + $0x1460] sm:$0xff] }
0x1288   :  { %7620 = vmatprep.subr.bf16.mxu1 %v7326_v39  ;;  %v7372_v39 = vld [vmem:[#allocation3 + $0x1478] sm:$0xff] }
0x128a   :  { %7612 = vmatmul.mubr.bf16.vlgmr.msra.gmra.mrb[132].mxu1 %v12698_v7 }
0x128b   :  { %7621 = vmatpush1.bf16.msra.mxu1 %v7325_v52  ;;  %7652 = vmatprep.mubr.bf16.mxu1 %v12702_v42  ;;  %v7371_v52 = vld [vmem:[#allocation3 + $0x1470] sm:$0xff] }
0x128c   :  { %7622 = vmatprep.subr.bf16.mxu1 %v7328_v54  ;;  %v7374_v54 = vld [vmem:[#allocation3 + $0x1488] sm:$0xff] }
0x128f   :  { %7623 = vmatpush1.bf16.msra.mxu1 %v7327_v6  ;;  %v7373_v6 = vld [vmem:[#allocation3 + $0x1480] sm:$0xff] }
0x1290   :  { %7624 = vmatprep.subr.bf16.mxu1 %v7330_v43  ;;  %v7376_v43 = vld [vmem:[#allocation3 + $0x1498] sm:$0xff] }
0x1293   :  { %7625 = vmatpush1.bf16.msra.mxu1 %v7329_v27  ;;  %v7375_v27 = vld [vmem:[#allocation3 + $0x1490] sm:$0xff] }
0x1294   :  { %7626 = vmatprep.subr.bf16.mxu1 %v7332_v45  ;;  %v7378_v45 = vld [vmem:[#allocation3 + $0x14a8] sm:$0xff] }
0x1297   :  { %7627 = vmatpush1.bf16.msra.mxu1 %v7331_v1  ;;  %v7377_v1 = vld [vmem:[#allocation3 + $0x14a0] sm:$0xff] }
0x1298   :  { %7628 = vmatprep.subr.bf16.mxu1 %v7334_v47  ;;  %v7380_v47 = vld [vmem:[#allocation3 + $0x14b8] sm:$0xff] }
0x129b   :  { %7629 = vmatpush1.bf16.msra.mxu1 %v7333_v51  ;;  %v7379_v51 = vld [vmem:[#allocation3 + $0x14b0] sm:$0xff] }
0x129c   :  { %7630 = vmatprep.subr.bf16.mxu1 %v7336_v34  ;;  %v7382_v34 = vld [vmem:[#allocation3 + $0x14c8] sm:$0xff] }
0x129f   :  { %7631 = vmatpush1.bf16.msra.mxu1 %v7335_v33  ;;  %v7381_v33 = vld [vmem:[#allocation3 + $0x14c0] sm:$0xff] }
0x12a0   :  { %7632 = vmatprep.subr.bf16.mxu1 %v7338_v22  ;;  %v7384_v22 = vld [vmem:[#allocation3 + $0x14d8] sm:$0xff] }
0x12a3   :  { %7633 = vmatpush1.bf16.msra.mxu1 %v7337_v50  ;;  %v7383_v50 = vld [vmem:[#allocation3 + $0x14d0] sm:$0xff] }
0x12a4   :  { %7634 = vmatprep.subr.bf16.mxu1 %v7340_v61  ;;  %v7386_v61 = vld [vmem:[#allocation3 + $0x14e8] sm:$0xff] }
0x12a7   :  { %7635 = vmatpush1.bf16.msra.mxu1 %v7339_v56  ;;  %v7385_v56 = vld [vmem:[#allocation3 + $0x14e0] sm:$0xff] }
0x12a8   :  { %7636 = vmatprep.subr.bf16.mxu1 %v7342_v17  ;;  %v7388_v17 = vld [vmem:[#allocation3 + $0x14f8] sm:$0xff] }
0x12ab   :  { %7637 = vmatpush1.bf16.msra.mxu1 %v7341_v49  ;;  %v7387_v49 = vld [vmem:[#allocation3 + $0x14f0] sm:$0xff] }
0x12ac   :  { %7638 = vmatprep.subr.bf16.mxu1 %v7344_v40  ;;  %v7390_v40 = vld [vmem:[#allocation3 + $0x1508] sm:$0xff] }
0x12af   :  { %7639 = vmatpush1.bf16.msra.mxu1 %v7343_v36  ;;  %v7389_v36 = vld [vmem:[#allocation3 + $0x1500] sm:$0xff] }
0x12b0   :  { %7640 = vmatprep.subr.bf16.mxu1 %v7346_v29  ;;  %v7392_v29 = vld [vmem:[#allocation3 + $0x1518] sm:$0xff] }
0x12b3   :  { %7641 = vmatpush1.bf16.msra.mxu1 %v7345_v11  ;;  %v7391_v11 = vld [vmem:[#allocation3 + $0x1510] sm:$0xff] }
0x12b4   :  { %7642 = vmatprep.subr.bf16.mxu1 %v7348_v9  ;;  %v7394_v9 = vld [vmem:[#allocation3 + $0x1528] sm:$0xff] }
0x12b7   :  { %7643 = vmatpush1.bf16.msra.mxu1 %v7347_v63  ;;  %v7393_v63 = vld [vmem:[#allocation3 + $0x1520] sm:$0xff] }
0x12b8   :  { %7644 = vmatprep.subr.bf16.mxu1 %v7350_v2  ;;  %v7396_v2 = vld [vmem:[#allocation3 + $0x1538] sm:$0xff] }
0x12bb   :  { %7645 = vmatpush1.bf16.msra.mxu1 %v7349_v55  ;;  %v7395_v55 = vld [vmem:[#allocation3 + $0x1530] sm:$0xff] }
0x12bc   :  { %7646 = vmatprep.subr.bf16.mxu1 %v7352_v41  ;;  %v7398_v41 = vld [vmem:[#allocation3 + $0x1548] sm:$0xff] }
0x12bf   :  { %7647 = vmatpush1.bf16.msra.mxu1 %v7351_v12  ;;  %v7397_v12 = vld [vmem:[#allocation3 + $0x1540] sm:$0xff] }
0x12c0   :  { %7648 = vmatprep.subr.bf16.mxu1 %v7354_v10  ;;  %v7400_v10 = vld [vmem:[#allocation3 + $0x1558] sm:$0xff] }
0x12c3   :  { %7649 = vmatpush1.bf16.msra.mxu1 %v7353_v48  ;;  %v7399_v48 = vld [vmem:[#allocation3 + $0x1550] sm:$0xff] }
0x12c4   :  { %7650 = vmatprep.subr.bf16.mxu1 %v7356_v8  ;;  %v7402_v8 = vld [vmem:[#allocation3 + $0x1568] sm:$0xff] }
0x12c7   :  { %7651 = vmatpush1.bf16.msra.mxu1 %v7355_v26  ;;  %v7401_v26 = vld [vmem:[#allocation3 + $0x1560] sm:$0xff] }
0x12c8   :  { %7661 = vmatprep.subr.bf16.mxu1 %v7358_v16  ;;  %v7404_v16 = vld [vmem:[#allocation3 + $0x1578] sm:$0xff] }
0x12ca   :  { %7653 = vmatmul.mubr.bf16.vlgmr.msra.gmra.mrb[132].mxu1 %v12714_v21 }
0x12cb   :  { %7662 = vmatpush1.bf16.msra.mxu1 %v7357_v58  ;;  %7693 = vmatprep.mubr.bf16.mxu1 %v12717_v60  ;;  %v7403_v58 = vld [vmem:[#allocation3 + $0x1570] sm:$0xff] }
0x12cc   :  { %7663 = vmatprep.subr.bf16.mxu1 %v7360_v20  ;;  %v7406_v20 = vld [vmem:[#allocation3 + $0x1588] sm:$0xff] }
0x12cf   :  { %7664 = vmatpush1.bf16.msra.mxu1 %v7359_v15  ;;  %v7405_v15 = vld [vmem:[#allocation3 + $0x1580] sm:$0xff] }
0x12d0   :  { %7665 = vmatprep.subr.bf16.mxu1 %v7362_v59  ;;  %v7408_v59 = vld [vmem:[#allocation3 + $0x1598] sm:$0xff] }
0x12d3   :  { %7666 = vmatpush1.bf16.msra.mxu1 %v7361_v0  ;;  %v7407_v0 = vld [vmem:[#allocation3 + $0x1590] sm:$0xff] }
0x12d4   :  { %7667 = vmatprep.subr.bf16.mxu1 %v7364_v38  ;;  %v7410_v38 = vld [vmem:[#allocation3 + $0x15a8] sm:$0xff] }
0x12d7   :  { %7668 = vmatpush1.bf16.msra.mxu1 %v7363_v18  ;;  %v7409_v18 = vld [vmem:[#allocation3 + $0x15a0] sm:$0xff] }
0x12d8   :  { %7669 = vmatprep.subr.bf16.mxu1 %v7366_v44  ;;  %v7412_v44 = vld [vmem:[#allocation3 + $0x15b8] sm:$0xff] }
0x12db   :  { %7670 = vmatpush1.bf16.msra.mxu1 %v7365_v53  ;;  %v7411_v53 = vld [vmem:[#allocation3 + $0x15b0] sm:$0xff] }
0x12dc   :  { %7671 = vmatprep.subr.bf16.mxu1 %v7368_v62  ;;  %v7414_v62 = vld [vmem:[#allocation3 + $0x15c8] sm:$0xff] }
0x12df   :  { %7672 = vmatpush1.bf16.msra.mxu1 %v7367_v14  ;;  %v7413_v14 = vld [vmem:[#allocation3 + $0x15c0] sm:$0xff] }
0x12e0   :  { %7673 = vmatprep.subr.bf16.mxu1 %v7370_v25  ;;  %v7416_v25 = vld [vmem:[#allocation3 + $0x15d8] sm:$0xff] }
0x12e3   :  { %7674 = vmatpush1.bf16.msra.mxu1 %v7369_v30  ;;  %v7415_v30 = vld [vmem:[#allocation3 + $0x15d0] sm:$0xff] }
0x12e4   :  { %7675 = vmatprep.subr.bf16.mxu1 %v7372_v39  ;;  %v7418_v39 = vld [vmem:[#allocation3 + $0x15e8] sm:$0xff] }
0x12e7   :  { %7676 = vmatpush1.bf16.msra.mxu1 %v7371_v52  ;;  %v7417_v52 = vld [vmem:[#allocation3 + $0x15e0] sm:$0xff] }
0x12e8   :  { %7677 = vmatprep.subr.bf16.mxu1 %v7374_v54  ;;  %v7420_v54 = vld [vmem:[#allocation3 + $0x15f8] sm:$0xff] }
0x12eb   :  { %7678 = vmatpush1.bf16.msra.mxu1 %v7373_v6  ;;  %v7419_v6 = vld [vmem:[#allocation3 + $0x15f0] sm:$0xff] }
0x12ec   :  { %7679 = vmatprep.subr.bf16.mxu1 %v7376_v43  ;;  %v7422_v43 = vld [vmem:[#allocation3 + $0x1608] sm:$0xff] }
0x12ef   :  { %7680 = vmatpush1.bf16.msra.mxu1 %v7375_v27  ;;  %v7421_v27 = vld [vmem:[#allocation3 + $0x1600] sm:$0xff] }
0x12f0   :  { %7681 = vmatprep.subr.bf16.mxu1 %v7378_v45  ;;  %v7424_v45 = vld [vmem:[#allocation3 + $0x1618] sm:$0xff] }
0x12f3   :  { %7682 = vmatpush1.bf16.msra.mxu1 %v7377_v1  ;;  %v10105_v1 = vld [vmem:[#allocation20 + $0x140] sm:$0xff]  }
0x12f4   :  { %7683 = vmatprep.subr.bf16.mxu1 %v7380_v47  ;;  %v10106_v47 = vld [vmem:[#allocation20 + $0x100] sm:$0xff]   ;;  %9196 = vmatprep.subr.bf16.mxu0 %v10105_v1 }
0x12f5   :  { %9197 = vmatpush3.bf16.msra.mxu0 %v10106_v47  ;;  %v7457_v1 = vld [vmem:[#allocation3 + $0x1720] sm:$0xff]  ;;  %v7460_v47 = vld [vmem:[#allocation3 + $0x1738] sm:$0xff] }
0x12f7   :  { %7684 = vmatpush1.bf16.msra.mxu1 %v7379_v51  ;;  %v10107_v51 = vld [vmem:[#allocation20 + $0x148] sm:$0xff]  }
0x12f8   :  { %7685 = vmatprep.subr.bf16.mxu1 %v7382_v34  ;;  %v7423_v34 = vld [vmem:[#allocation3 + $0x1610] sm:$0xff]  ;;  %9198 = vmatprep.subr.bf16.mxu0 %v10107_v51 }
0x12f9   :  { %v7459_v51 = vld [vmem:[#allocation3 + $0x1730] sm:$0xff] }
0x12fb   :  { %7686 = vmatpush1.bf16.msra.mxu1 %v7381_v33  ;;  %v7426_v33 = vld [vmem:[#allocation3 + $0x1628] sm:$0xff] }
0x12fc   :  { %7687 = vmatprep.subr.bf16.mxu1 %v7384_v22  ;;  %v10108_v22 = vld [vmem:[#allocation20 + $0x108] sm:$0xff]  }
0x12fd   :  { %9199 = vmatpush3.bf16.msra.mxu0 %v10108_v22  ;;  %v7464_v22 = vld [vmem:[#allocation3 + $0x1758] sm:$0xff] }
0x12ff   :  { %7688 = vmatpush1.bf16.msra.mxu1 %v7383_v50  ;;  %v10109_v50 = vld [vmem:[#allocation20 + $0x150] sm:$0xff]  }
0x1300   :  { %7689 = vmatprep.subr.bf16.mxu1 %v7386_v61  ;;  %v7425_v61 = vld [vmem:[#allocation3 + $0x1620] sm:$0xff]  ;;  %9200 = vmatprep.subr.bf16.mxu0 %v10109_v50  ;;  %v7463_v50 = vld [vmem:[#allocation3 + $0x1750] sm:$0xff] }
0x1303   :  { %7690 = vmatpush1.bf16.msra.mxu1 %v7385_v56  ;;  %v7428_v56 = vld [vmem:[#allocation3 + $0x1638] sm:$0xff] }
0x1304   :  { %7691 = vmatprep.subr.bf16.mxu1 %v7388_v17  ;;  %v10110_v17 = vld [vmem:[#allocation20 + $0x110] sm:$0xff]  }
0x1305   :  { %9201 = vmatpush3.bf16.msra.mxu0 %v10110_v17  ;;  %v7468_v17 = vld [vmem:[#allocation3 + $0x1778] sm:$0xff] }
0x1307   :  { %7692 = vmatpush1.bf16.msra.mxu1 %v7387_v49  ;;  %v10111_v49 = vld [vmem:[#allocation20 + $0x158] sm:$0xff]  }
0x1308   :  { %7702 = vmatprep.subr.bf16.mxu1 %v7390_v40  ;;  %v7427_v40 = vld [vmem:[#allocation3 + $0x1630] sm:$0xff]  ;;  %9202 = vmatprep.subr.bf16.mxu0 %v10111_v49 }
0x1309   :  { %v7467_v49 = vld [vmem:[#allocation3 + $0x1770] sm:$0xff] }
0x130a   :  { %7694 = vmatmul.mubr.bf16.vlgmr.msra.gmra.mrb[132].mxu1 %v12723_v23 }
0x130b   :  { %7703 = vmatpush1.bf16.msra.mxu1 %v7389_v36  ;;  %7734 = vmatprep.mubr.bf16.mxu1 %v12727_v32  ;;  %v7430_v36 = vld [vmem:[#allocation3 + $0x1648] sm:$0xff] }
0x130c   :  { %7704 = vmatprep.subr.bf16.mxu1 %v7392_v29  ;;  %v10112_v29 = vld [vmem:[#allocation20 + $0x118] sm:$0xff]  }
0x130d   :  { %9203 = vmatpush3.bf16.msra.mxu0 %v10112_v29  ;;  %v7472_v29 = vld [vmem:[#allocation3 + $0x1798] sm:$0xff] }
0x130f   :  { %7705 = vmatpush1.bf16.msra.mxu1 %v7391_v11  ;;  %v10113_v11 = vld [vmem:[#allocation20 + $0x160] sm:$0xff]  }
0x1310   :  { %7706 = vmatprep.subr.bf16.mxu1 %v7394_v9  ;;  %v7429_v9 = vld [vmem:[#allocation3 + $0x1640] sm:$0xff]  ;;  %9204 = vmatprep.subr.bf16.mxu0 %v10113_v11  ;;  %v7471_v11 = vld [vmem:[#allocation3 + $0x1790] sm:$0xff] }
0x1313   :  { %7707 = vmatpush1.bf16.msra.mxu1 %v7393_v63  ;;  %v7432_v63 = vld [vmem:[#allocation3 + $0x1658] sm:$0xff] }
0x1314   :  { %7708 = vmatprep.subr.bf16.mxu1 %v7396_v2  ;;  %v10114_v2 = vld [vmem:[#allocation20 + $0x120] sm:$0xff]  }
0x1315   :  { %9205 = vmatpush3.bf16.msra.mxu0 %v10114_v2  ;;  %v7476_v2 = vld [vmem:[#allocation3 + $0x17b8] sm:$0xff] }
0x1317   :  { %7709 = vmatpush1.bf16.msra.mxu1 %v7395_v55  ;;  %v10115_v55 = vld [vmem:[#allocation20 + $0x168] sm:$0xff]  }
0x1318   :  { %7710 = vmatprep.subr.bf16.mxu1 %v7398_v41  ;;  %v7431_v41 = vld [vmem:[#allocation3 + $0x1650] sm:$0xff]  ;;  %9206 = vmatprep.subr.bf16.mxu0 %v10115_v55 }
0x1319   :  { %v7475_v55 = vld [vmem:[#allocation3 + $0x17b0] sm:$0xff] }
0x131b   :  { %7711 = vmatpush1.bf16.msra.mxu1 %v7397_v12  ;;  %v7434_v12 = vld [vmem:[#allocation3 + $0x1668] sm:$0xff] }
0x131c   :  { %7712 = vmatprep.subr.bf16.mxu1 %v7400_v10  ;;  %v10116_v10 = vld [vmem:[#allocation20 + $0x128] sm:$0xff]  }
0x131d   :  { %9207 = vmatpush3.bf16.msra.mxu0 %v10116_v10  ;;  %v7480_v10 = vld [vmem:[#allocation3 + $0x17d8] sm:$0xff] }
0x131f   :  { %7713 = vmatpush1.bf16.msra.mxu1 %v7399_v48  ;;  %v7433_v48 = vld [vmem:[#allocation3 + $0x1660] sm:$0xff] }
0x1320   :  { %7714 = vmatprep.subr.bf16.mxu1 %v7402_v8  ;;  %v7436_v8 = vld [vmem:[#allocation3 + $0x1678] sm:$0xff] }
0x1323   :  { %7715 = vmatpush1.bf16.msra.mxu1 %v7401_v26  ;;  %v7435_v26 = vld [vmem:[#allocation3 + $0x1670] sm:$0xff] }
0x1324   :  { %7716 = vmatprep.subr.bf16.mxu1 %v7404_v16  ;;  %v7438_v16 = vld [vmem:[#allocation3 + $0x1688] sm:$0xff] }
0x1327   :  { %7717 = vmatpush1.bf16.msra.mxu1 %v7403_v58  ;;  %v7437_v58 = vld [vmem:[#allocation3 + $0x1680] sm:$0xff] }
0x1328   :  { %7718 = vmatprep.subr.bf16.mxu1 %v7406_v20  ;;  %v7440_v20 = vld [vmem:[#allocation3 + $0x1698] sm:$0xff] }
0x132b   :  { %7719 = vmatpush1.bf16.msra.mxu1 %v7405_v15  ;;  %v7439_v15 = vld [vmem:[#allocation3 + $0x1690] sm:$0xff] }
0x132c   :  { %7720 = vmatprep.subr.bf16.mxu1 %v7408_v59  ;;  %v7442_v59 = vld [vmem:[#allocation3 + $0x16a8] sm:$0xff] }
0x132f   :  { %7721 = vmatpush1.bf16.msra.mxu1 %v7407_v0  ;;  %v7441_v0 = vld [vmem:[#allocation3 + $0x16a0] sm:$0xff] }
0x1330   :  { %7722 = vmatprep.subr.bf16.mxu1 %v7410_v38  ;;  %v7444_v38 = vld [vmem:[#allocation3 + $0x16b8] sm:$0xff] }
0x1333   :  { %7723 = vmatpush1.bf16.msra.mxu1 %v7409_v18  ;;  %v7443_v18 = vld [vmem:[#allocation3 + $0x16b0] sm:$0xff] }
0x1334   :  { %7724 = vmatprep.subr.bf16.mxu1 %v7412_v44  ;;  %v7446_v44 = vld [vmem:[#allocation3 + $0x16c8] sm:$0xff] }
0x1337   :  { %7725 = vmatpush1.bf16.msra.mxu1 %v7411_v53  ;;  %v7445_v53 = vld [vmem:[#allocation3 + $0x16c0] sm:$0xff] }
0x1338   :  { %7726 = vmatprep.subr.bf16.mxu1 %v7414_v62  ;;  %v7448_v62 = vld [vmem:[#allocation3 + $0x16d8] sm:$0xff] }
0x133b   :  { %7727 = vmatpush1.bf16.msra.mxu1 %v7413_v14  ;;  %v7447_v14 = vld [vmem:[#allocation3 + $0x16d0] sm:$0xff] }
0x133c   :  { %7728 = vmatprep.subr.bf16.mxu1 %v7416_v25  ;;  %v7450_v25 = vld [vmem:[#allocation3 + $0x16e8] sm:$0xff] }
0x133f   :  { %7729 = vmatpush1.bf16.msra.mxu1 %v7415_v30  ;;  %v7449_v30 = vld [vmem:[#allocation3 + $0x16e0] sm:$0xff] }
0x1340   :  { %7730 = vmatprep.subr.bf16.mxu1 %v7418_v39  ;;  %v7452_v39 = vld [vmem:[#allocation3 + $0x16f8] sm:$0xff] }
0x1343   :  { %7731 = vmatpush1.bf16.msra.mxu1 %v7417_v52  ;;  %v7451_v52 = vld [vmem:[#allocation3 + $0x16f0] sm:$0xff] }
0x1344   :  { %7732 = vmatprep.subr.bf16.mxu1 %v7420_v54  ;;  %v7454_v54 = vld [vmem:[#allocation3 + $0x1708] sm:$0xff] }
0x1347   :  { %7733 = vmatpush1.bf16.msra.mxu1 %v7419_v6  ;;  %v7453_v6 = vld [vmem:[#allocation3 + $0x1700] sm:$0xff] }
0x1348   :  { %7743 = vmatprep.subr.bf16.mxu1 %v7422_v43  ;;  %v7456_v43 = vld [vmem:[#allocation3 + $0x1718] sm:$0xff] }
0x134a   :  { %7735 = vmatmul.mubr.bf16.vlgmr.msra.gmra.mrb[132].mxu1 %v12740_v5 }
0x134b   :  { %7744 = vmatpush1.bf16.msra.mxu1 %v7421_v27  ;;  %7775 = vmatprep.mubr.bf16.mxu1 %v12743_v31  ;;  %v7455_v27 = vld [vmem:[#allocation3 + $0x1710] sm:$0xff] }
0x134c   :  { %7745 = vmatprep.subr.bf16.mxu1 %v7424_v45  ;;  %v7458_v45 = vld [vmem:[#allocation3 + $0x1728] sm:$0xff] }
0x134f   :  { %7746 = vmatpush1.bf16.msra.mxu1 %v7423_v34  ;;  %v7462_v34 = vld [vmem:[#allocation3 + $0x1748] sm:$0xff] }
0x1350   :  { %7747 = vmatprep.subr.bf16.mxu1 %v7426_v33  ;;  %v7461_v33 = vld [vmem:[#allocation3 + $0x1740] sm:$0xff] }
0x1353   :  { %7748 = vmatpush1.bf16.msra.mxu1 %v7425_v61  ;;  %v7466_v61 = vld [vmem:[#allocation3 + $0x1768] sm:$0xff] }
0x1354   :  { %7749 = vmatprep.subr.bf16.mxu1 %v7428_v56  ;;  %v7465_v56 = vld [vmem:[#allocation3 + $0x1760] sm:$0xff] }
0x1357   :  { %7750 = vmatpush1.bf16.msra.mxu1 %v7427_v40  ;;  %v7470_v40 = vld [vmem:[#allocation3 + $0x1788] sm:$0xff] }
0x1358   :  { %7751 = vmatprep.subr.bf16.mxu1 %v7430_v36  ;;  %v7469_v36 = vld [vmem:[#allocation3 + $0x1780] sm:$0xff] }
0x135b   :  { %7752 = vmatpush1.bf16.msra.mxu1 %v7429_v9  ;;  %v7474_v9 = vld [vmem:[#allocation3 + $0x17a8] sm:$0xff] }
0x135c   :  { %7753 = vmatprep.subr.bf16.mxu1 %v7432_v63  ;;  %v7473_v63 = vld [vmem:[#allocation3 + $0x17a0] sm:$0xff] }
0x135f   :  { %7754 = vmatpush1.bf16.msra.mxu1 %v7431_v41  ;;  %v7478_v41 = vld [vmem:[#allocation3 + $0x17c8] sm:$0xff] }
0x1360   :  { %7755 = vmatprep.subr.bf16.mxu1 %v7434_v12  ;;  %v7477_v12 = vld [vmem:[#allocation3 + $0x17c0] sm:$0xff] }
0x1363   :  { %7756 = vmatpush1.bf16.msra.mxu1 %v7433_v48  ;;  %v7479_v48 = vld [vmem:[#allocation3 + $0x17d0] sm:$0xff] }
0x1364   :  { %7757 = vmatprep.subr.bf16.mxu1 %v7436_v8  ;;  %v7482_v8 = vld [vmem:[#allocation3 + $0x17e8] sm:$0xff] }
0x1367   :  { %7758 = vmatpush1.bf16.msra.mxu1 %v7435_v26  ;;  %v7481_v26 = vld [vmem:[#allocation3 + $0x17e0] sm:$0xff] }
0x1368   :  { %7759 = vmatprep.subr.bf16.mxu1 %v7438_v16  ;;  %v7484_v16 = vld [vmem:[#allocation3 + $0x17f8] sm:$0xff] }
0x136b   :  { %7760 = vmatpush1.bf16.msra.mxu1 %v7437_v58  ;;  %v7483_v58 = vld [vmem:[#allocation3 + $0x17f0] sm:$0xff] }
0x136c   :  { %7761 = vmatprep.subr.bf16.mxu1 %v7440_v20  ;;  %v12952_v20 = vld [vmem:[#allocation44_spill] sm:$0xff] }
0x136f   :  { %7762 = vmatpush1.bf16.msra.mxu1 %v7439_v15  ;;  %v10117_v15 = vld [vmem:[#allocation20 + $0x170] sm:$0xff]  }
0x1370   :  { %7763 = vmatprep.subr.bf16.mxu1 %v7442_v59  ;;  %v10118_v59 = vld [vmem:[#allocation20 + $0x130] sm:$0xff]   ;;  %9208 = vmatprep.subr.bf16.mxu0 %v10117_v15 }
0x1371   :  { %9209 = vmatpush3.bf16.msra.mxu0 %v10118_v59 }
0x1373   :  { %7764 = vmatpush1.bf16.msra.mxu1 %v7441_v0  ;;  %v10119_v0 = vld [vmem:[#allocation20 + $0x178] sm:$0xff]  }
0x1374   :  { %7765 = vmatprep.subr.bf16.mxu1 %v7444_v38  ;;  %v10120_v38 = vld [vmem:[#allocation20 + $0x138] sm:$0xff]   ;;  %9210 = vmatprep.subr.bf16.mxu0 %v10119_v0 }
0x1375   :  { %9211 = vmatpush3.bf16.msra.mxu0 %v10120_v38 }
0x1377   :  { %7766 = vmatpush1.bf16.msra.mxu1 %v7443_v18  ;;  %v7485_v18 = vld [vmem:[#allocation19 + $0x4] sm:$0x3] }
0x1378   :  { %7767 = vmatprep.subr.bf16.mxu1 %v7446_v44  ;;  %v7490_v44 = vrot.slane %v7485_v18, %v11475_v4 }
0x137b   :  { %7768 = vmatpush1.bf16.msra.mxu1 %v7445_v53  ;;  %v7494_v53 = vrot.slane %v7485_v18, %v11478_v46 }
0x137c   :  { %7769 = vmatprep.subr.bf16.mxu1 %v7448_v62 }
0x137f   :  { %7770 = vmatpush1.bf16.msra.mxu1 %v7447_v14 }
0x1380   :  { %7771 = vmatprep.subr.bf16.mxu1 %v7450_v25 }
0x1383   :  { %7772 = vmatpush1.bf16.msra.mxu1 %v7449_v30 }
0x1384   :  { %7773 = vmatprep.subr.bf16.mxu1 %v7452_v39 }
0x1387   :  { %7774 = vmatpush1.bf16.msra.mxu1 %v7451_v52 }
0x1388   :  { %7784 = vmatprep.subr.bf16.mxu1 %v7454_v54 }
0x138a   :  { %7776 = vmatmul.mubr.bf16.vlgmr.msra.gmra.mrb[132].mxu1 %v12749_v57 }
0x138b   :  { %7785 = vmatpush1.bf16.msra.mxu1 %v7453_v6  ;;  %7816 = vmatprep.mubr.bf16.mxu1 %v12753_v37 }
0x138c   :  { %7786 = vmatprep.subr.bf16.mxu1 %v7456_v43 }
0x138f   :  { %7787 = vmatpush1.bf16.msra.mxu1 %v7455_v27 }
0x1390   :  { %7788 = vmatprep.subr.bf16.mxu1 %v7458_v45 }
0x1393   :  { %7789 = vmatpush1.bf16.msra.mxu1 %v7457_v1 }
0x1394   :  { %7790 = vmatprep.subr.bf16.mxu1 %v7460_v47 }
0x1397   :  { %7791 = vmatpush1.bf16.msra.mxu1 %v7459_v51 }
0x1398   :  { %7792 = vmatprep.subr.bf16.mxu1 %v7462_v34 }
0x139b   :  { %7793 = vmatpush1.bf16.msra.mxu1 %v7461_v33 }
0x139c   :  { %7794 = vmatprep.subr.bf16.mxu1 %v7464_v22 }
0x139f   :  { %7795 = vmatpush1.bf16.msra.mxu1 %v7463_v50 }
0x13a0   :  { %7796 = vmatprep.subr.bf16.mxu1 %v7466_v61 }
0x13a3   :  { %7797 = vmatpush1.bf16.msra.mxu1 %v7465_v56 }
0x13a4   :  { %7798 = vmatprep.subr.bf16.mxu1 %v7468_v17 }
0x13a7   :  { %7799 = vmatpush1.bf16.msra.mxu1 %v7467_v49 }
0x13a8   :  { %7800 = vmatprep.subr.bf16.mxu1 %v7470_v40 }
0x13ab   :  { %7801 = vmatpush1.bf16.msra.mxu1 %v7469_v36 }
0x13ac   :  { %7802 = vmatprep.subr.bf16.mxu1 %v7472_v29 }
0x13af   :  { %7803 = vmatpush1.bf16.msra.mxu1 %v7471_v11 }
0x13b0   :  { %7804 = vmatprep.subr.bf16.mxu1 %v7474_v9 }
0x13b3   :  { %7805 = vmatpush1.bf16.msra.mxu1 %v7473_v63 }
0x13b4   :  { %7806 = vmatprep.subr.bf16.mxu1 %v7476_v2 }
0x13b7   :  { %7807 = vmatpush1.bf16.msra.mxu1 %v7475_v55 }
0x13b8   :  { %7808 = vmatprep.subr.bf16.mxu1 %v7478_v41 }
0x13bb   :  { %7809 = vmatpush1.bf16.msra.mxu1 %v7477_v12 }
0x13bc   :  { %7810 = vmatprep.subr.bf16.mxu1 %v7480_v10 }
0x13bf   :  { %7811 = vmatpush1.bf16.msra.mxu1 %v7479_v48 }
0x13c0   :  { %7812 = vmatprep.subr.bf16.mxu1 %v7482_v8 }
0x13c3   :  { %7813 = vmatpush1.bf16.msra.mxu1 %v7481_v26 }
0x13c4   :  { %7814 = vmatprep.subr.bf16.mxu1 %v7484_v16 }
0x13c7   :  { %7815 = vmatpush1.bf16.msra.mxu1 %v7483_v58 }
0x13ca   :  { %7817 = vmatmul.mubr.bf16.vlgmr.msra.gmra.mrb[132].mxu1 %v12952_v20 }
0x149d   :  { %v7818_v62 = vpop.f32.mrb[132].mxu1 }
0x149e   :  { %v9244_v14 = vadd.f32 %v7818_v62, %v7490_v44  ;;  %v7820_v25 = vpop.f32.mrb[133].mxu1 }
0x149f   :  { %v9245_v30 = vadd.f32 %v7820_v25, %v7494_v53  ;;  %v7822_v39 = vpop.f32.mrb[134].mxu1 }
0x14a0   :  { %v7825_v52 = vmax.f32 %v9244_v14, 0.0  ;;  %v7823_v54 = vpop.f32.mrb[135].mxu1 }
0x14a1   :  { %v7826_v6 = vmax.f32 %v9245_v30, 0.0 }
0x14a2   :  { %v7827_v27 = vpack.c.bf16 %v7825_v52, %v7825_v52 }
0x14a3   :  { %v7828_v43 = vpack.c.bf16 %v7826_v6, %v7826_v6 }
0x14a5   :  { %7989 = vmatprep.mubr.bf16.mxu0 %v7828_v43 }
0x14a6   :  { %7990 = vmatmul.mubr.bf16.vlgmr.msra.gmra.mrb[108].mxu0 %v7827_v27 }
0x1579   :  { %v9212_v45 = vpop.f32.mrb[108].mxu0 }
0x157a   :  { %v9213_v1 = vpop.f32.mrb[109].mxu0 }
0x157b   :  { %v9214_v47 = vadd.f32 %v9213_v1, %v9212_v45  ;;  %v9215_v51 = vpop.f32.mrb[110].mxu0 }
0x157c   :  { %v9216_v34 = vpop.f32.mrb[111].mxu0 }
0x157d   :  { %v12841_v33 = vadd.f32 %v9214_v47, %v12820_v3 }
0x157e   :  { %10419 = dma.done.wait [#allocation4 + $0x3], 32768 }
0x157f   :  { %10420 = vsyncadd [#allocation4 + $0x3], 4294934528  ;;  %8300 = vmatprep.mubr.bf16.mxu0 %v12603_v19  ;;  %v8001_v22 = vld [vmem:[#allocation3 + $0x1808] sm:$0xff]  ;;  %v8000_v50 = vld [vmem:[#allocation3 + $0x1800] sm:$0xff]  ;;  %s10457_s8 = smov [#allocation23]   ;;  %vm8777_vm3 = vcmask 66560  }
0x1580   :  { %v8003_v61 = vld [vmem:[#allocation3 + $0x1818] sm:$0xff]  ;;  %8268 = vmatprep.subr.bf16.mxu0 %v8001_v22  ;;  %v8002_v56 = vld [vmem:[#allocation3 + $0x1810] sm:$0xff]  ;;  %v8005_v17 = vld [vmem:[#allocation3 + $0x1828] sm:$0xff]  ;;  %s8785_s28 = sshll.u32 %s10457_s8, 4  ;;  %s8786_s28 = int_to_ptr.vmem [resolvable:$true] %s8785_s28 }
0x1581   :  { %8269 = vmatpush1.bf16.msra.mxu0 %v8000_v50  ;;  %v8004_v49 = vld [vmem:[#allocation3 + $0x1820] sm:$0xff]  ;;  %v8007_v40 = vld [vmem:[#allocation3 + $0x1838] sm:$0xff]  ;;  %v8006_v3 = vld [vmem:[#allocation3 + $0x1830] sm:$0xff]  ;;  %s10379_s19 = scalar_lea.vmem %s8786_s28, 32  ;;  %p10384_p5 = scmp.lt.s32.totalorder %s8786_s28, %s8786_s28 }
0x1582   :  { %8270 = vmatprep.subr.bf16.mxu0 %v8003_v61  ;;  %v8009_v36 = vld [vmem:[#allocation3 + $0x1848] sm:$0xff]  ;;  %v8008_v29 = vld [vmem:[#allocation3 + $0x1840] sm:$0xff]  ;;  %v8011_v19 = vld [vmem:[#allocation3 + $0x1858] sm:$0xff]  ;;  %p10380_p4 = scmp.ne.s32.totalorder %s8786_s28, %s10379_s19  ;;  %p10385_p6 = scmp.lt.s32.totalorder %s10379_s19, %s10379_s19 }
0x1583   :  { %v8010_v11 = vld [vmem:[#allocation3 + $0x1850] sm:$0xff]  ;;  %v8013_v9 = vld [vmem:[#allocation3 + $0x1868] sm:$0xff]  ;;  %v8012_v63 = vld [vmem:[#allocation3 + $0x1860] sm:$0xff] }
0x1584   :  { %v8015_v2 = vld [vmem:[#allocation3 + $0x1878] sm:$0xff]  ;;  %v8014_v55 = vld [vmem:[#allocation3 + $0x1870] sm:$0xff]  ;;  %v8017_v41 = vld [vmem:[#allocation3 + $0x1888] sm:$0xff]  ;;  %p10386_p7 = por %p10385_p6, %p10384_p5 }
0x1585   :  { %8271 = vmatpush1.bf16.msra.mxu0 %v8002_v56  ;;  %v8016_v12 = vld [vmem:[#allocation3 + $0x1880] sm:$0xff]  ;;  %v8019_v10 = vld [vmem:[#allocation3 + $0x1898] sm:$0xff]  ;;  %v8018_v48 = vld [vmem:[#allocation3 + $0x1890] sm:$0xff] }
0x1586   :  { %8272 = vmatprep.subr.bf16.mxu0 %v8005_v17  ;;  %v8021_v8 = vld [vmem:[#allocation3 + $0x18a8] sm:$0xff]  ;;  %v8020_v26 = vld [vmem:[#allocation3 + $0x18a0] sm:$0xff]  ;;  %v8023_v16 = vld [vmem:[#allocation3 + $0x18b8] sm:$0xff]  ;;  %p10387_p8 = pnand %p10386_p7, %p10380_p4 }
0x1587   :  { %v8022_v58 = vld [vmem:[#allocation3 + $0x18b0] sm:$0xff]  ;;  %v8025_v15 = vld [vmem:[#allocation3 + $0x18c8] sm:$0xff]  ;;  %v8024_v59 = vld [vmem:[#allocation3 + $0x18c0] sm:$0xff] }
0x1588   :  { %v8027_v0 = vld [vmem:[#allocation3 + $0x18d8] sm:$0xff]  ;;  %v8026_v38 = vld [vmem:[#allocation3 + $0x18d0] sm:$0xff]  ;;  %v8029_v18 = vld [vmem:[#allocation3 + $0x18e8] sm:$0xff] }
0x1589   :  { %8273 = vmatpush1.bf16.msra.mxu0 %v8004_v49  ;;  %v8028_v44 = vld [vmem:[#allocation3 + $0x18e0] sm:$0xff]  ;;  %v8031_v53 = vld [vmem:[#allocation3 + $0x18f8] sm:$0xff]  ;;  %v8030_v62 = vld [vmem:[#allocation3 + $0x18f0] sm:$0xff] }
0x158a   :  { %8274 = vmatprep.subr.bf16.mxu0 %v8007_v40  ;;  %v8033_v14 = vld [vmem:[#allocation3 + $0x1908] sm:$0xff]  ;;  %v8032_v25 = vld [vmem:[#allocation3 + $0x1900] sm:$0xff]  ;;  %v8035_v30 = vld [vmem:[#allocation3 + $0x1918] sm:$0xff] }
0x158b   :  { %v8034_v39 = vld [vmem:[#allocation3 + $0x1910] sm:$0xff]  ;;  %v8037_v52 = vld [vmem:[#allocation3 + $0x1928] sm:$0xff]  ;;  %v8036_v54 = vld [vmem:[#allocation3 + $0x1920] sm:$0xff] }
0x158c   :  { %v8039_v6 = vld [vmem:[#allocation3 + $0x1938] sm:$0xff]  ;;  %v8038_v43 = vld [vmem:[#allocation3 + $0x1930] sm:$0xff]  ;;  %v8041_v27 = vld [vmem:[#allocation3 + $0x1948] sm:$0xff] }
0x158d   :  { %8275 = vmatpush1.bf16.msra.mxu0 %v8006_v3  ;;  %v8040_v45 = vld [vmem:[#allocation3 + $0x1940] sm:$0xff]  ;;  %v8043_v1 = vld [vmem:[#allocation3 + $0x1958] sm:$0xff]  ;;  %v8045_v47 = vld [vmem:[#allocation3 + $0x1968] sm:$0xff] }
0x158e   :  { %8276 = vmatprep.subr.bf16.mxu0 %v8009_v36  ;;  %v8047_v51 = vld [vmem:[#allocation3 + $0x1978] sm:$0xff]  ;;  %v8046_v34 = vld [vmem:[#allocation3 + $0x1970] sm:$0xff]  ;;  %v8049_v22 = vld [vmem:[#allocation3 + $0x1988] sm:$0xff] }
0x158f   :  { %v8048_v50 = vld [vmem:[#allocation3 + $0x1980] sm:$0xff]  ;;  %v8051_v61 = vld [vmem:[#allocation3 + $0x1998] sm:$0xff]  ;;  %v8050_v56 = vld [vmem:[#allocation3 + $0x1990] sm:$0xff] }
0x1590   :  { %v8053_v17 = vld [vmem:[#allocation3 + $0x19a8] sm:$0xff]  ;;  %v8052_v49 = vld [vmem:[#allocation3 + $0x19a0] sm:$0xff]  ;;  %v8055_v40 = vld [vmem:[#allocation3 + $0x19b8] sm:$0xff] }
0x1591   :  { %8277 = vmatpush1.bf16.msra.mxu0 %v8008_v29  ;;  %v8054_v3 = vld [vmem:[#allocation3 + $0x19b0] sm:$0xff]  ;;  %v8057_v36 = vld [vmem:[#allocation3 + $0x19c8] sm:$0xff]  ;;  %v8056_v29 = vld [vmem:[#allocation3 + $0x19c0] sm:$0xff] }
0x1592   :  { %8278 = vmatprep.subr.bf16.mxu0 %v8011_v19  ;;  %v8059_v19 = vld [vmem:[#allocation3 + $0x19d8] sm:$0xff] }
0x1595   :  { %8279 = vmatpush1.bf16.msra.mxu0 %v8010_v11  ;;  %v8058_v11 = vld [vmem:[#allocation3 + $0x19d0] sm:$0xff] }
0x1596   :  { %8280 = vmatprep.subr.bf16.mxu0 %v8013_v9  ;;  %v8061_v9 = vld [vmem:[#allocation3 + $0x19e8] sm:$0xff] }
0x1599   :  { %8281 = vmatpush1.bf16.msra.mxu0 %v8012_v63  ;;  %v8060_v63 = vld [vmem:[#allocation3 + $0x19e0] sm:$0xff] }
0x159a   :  { %8282 = vmatprep.subr.bf16.mxu0 %v8015_v2  ;;  %v8063_v2 = vld [vmem:[#allocation3 + $0x19f8] sm:$0xff] }
0x159d   :  { %8283 = vmatpush1.bf16.msra.mxu0 %v8014_v55  ;;  %v8062_v55 = vld [vmem:[#allocation3 + $0x19f0] sm:$0xff] }
0x159e   :  { %8284 = vmatprep.subr.bf16.mxu0 %v8017_v41  ;;  %v8065_v41 = vld [vmem:[#allocation3 + $0x1a08] sm:$0xff] }
0x15a1   :  { %8285 = vmatpush1.bf16.msra.mxu0 %v8016_v12  ;;  %v8064_v12 = vld [vmem:[#allocation3 + $0x1a00] sm:$0xff] }
0x15a2   :  { %8286 = vmatprep.subr.bf16.mxu0 %v8019_v10  ;;  %v8067_v10 = vld [vmem:[#allocation3 + $0x1a18] sm:$0xff] }
0x15a5   :  { %8287 = vmatpush1.bf16.msra.mxu0 %v8018_v48  ;;  %v8066_v48 = vld [vmem:[#allocation3 + $0x1a10] sm:$0xff] }
0x15a6   :  { %8288 = vmatprep.subr.bf16.mxu0 %v8021_v8  ;;  %v8069_v8 = vld [vmem:[#allocation3 + $0x1a28] sm:$0xff] }
0x15a9   :  { %8289 = vmatpush1.bf16.msra.mxu0 %v8020_v26  ;;  %v8068_v26 = vld [vmem:[#allocation3 + $0x1a20] sm:$0xff] }
0x15aa   :  { %8290 = vmatprep.subr.bf16.mxu0 %v8023_v16  ;;  %v8071_v16 = vld [vmem:[#allocation3 + $0x1a38] sm:$0xff] }
0x15ad   :  { %8291 = vmatpush1.bf16.msra.mxu0 %v8022_v58  ;;  %v8070_v58 = vld [vmem:[#allocation3 + $0x1a30] sm:$0xff] }
0x15ae   :  { %8292 = vmatprep.subr.bf16.mxu0 %v8025_v15  ;;  %v8073_v15 = vld [vmem:[#allocation3 + $0x1a48] sm:$0xff] }
0x15b1   :  { %8293 = vmatpush1.bf16.msra.mxu0 %v8024_v59  ;;  %v8072_v59 = vld [vmem:[#allocation3 + $0x1a40] sm:$0xff] }
0x15b2   :  { %8294 = vmatprep.subr.bf16.mxu0 %v8027_v0  ;;  %v8075_v0 = vld [vmem:[#allocation3 + $0x1a58] sm:$0xff] }
0x15b5   :  { %8295 = vmatpush1.bf16.msra.mxu0 %v8026_v38  ;;  %v8077_v38 = vld [vmem:[#allocation3 + $0x1a68] sm:$0xff] }
0x15b6   :  { %8296 = vmatprep.subr.bf16.mxu0 %v8029_v18  ;;  %v8079_v18 = vld [vmem:[#allocation3 + $0x1a78] sm:$0xff] }
0x15b9   :  { %8297 = vmatpush1.bf16.msra.mxu0 %v8028_v44  ;;  %v8078_v44 = vld [vmem:[#allocation3 + $0x1a70] sm:$0xff] }
0x15ba   :  { %8298 = vmatprep.subr.bf16.mxu0 %v8031_v53  ;;  %v8081_v53 = vld [vmem:[#allocation3 + $0x1a88] sm:$0xff] }
0x15bd   :  { %8299 = vmatpush1.bf16.msra.mxu0 %v8030_v62  ;;  %v8080_v62 = vld [vmem:[#allocation3 + $0x1a80] sm:$0xff] }
0x15be   :  { %8309 = vmatprep.subr.bf16.mxu0 %v8033_v14  ;;  %v8083_v14 = vld [vmem:[#allocation3 + $0x1a98] sm:$0xff] }
0x15c0   :  { %8301 = vmatmul.mubr.bf16.vlgmr.msra.gmra.mrb[112].mxu0 %v12672_v28  ;;  %v8042_v28 = vld [vmem:[#allocation3 + $0x1950] sm:$0xff] }
0x15c1   :  { %8310 = vmatpush1.bf16.msra.mxu0 %v8032_v25  ;;  %8341 = vmatprep.mubr.bf16.mxu0 %v12676_v13  ;;  %v8044_v13 = vld [vmem:[#allocation3 + $0x1960] sm:$0xff]  ;;  %v8082_v25 = vld [vmem:[#allocation3 + $0x1a90] sm:$0xff] }
0x15c2   :  { %8311 = vmatprep.subr.bf16.mxu0 %v8035_v30  ;;  %v8085_v30 = vld [vmem:[#allocation3 + $0x1aa8] sm:$0xff] }
0x15c5   :  { %8312 = vmatpush1.bf16.msra.mxu0 %v8034_v39  ;;  %v8084_v39 = vld [vmem:[#allocation3 + $0x1aa0] sm:$0xff] }
0x15c6   :  { %8313 = vmatprep.subr.bf16.mxu0 %v8037_v52  ;;  %v8087_v52 = vld [vmem:[#allocation3 + $0x1ab8] sm:$0xff] }
0x15c9   :  { %8314 = vmatpush1.bf16.msra.mxu0 %v8036_v54  ;;  %v8086_v54 = vld [vmem:[#allocation3 + $0x1ab0] sm:$0xff] }
0x15ca   :  { %8315 = vmatprep.subr.bf16.mxu0 %v8039_v6  ;;  %v8089_v6 = vld [vmem:[#allocation3 + $0x1ac8] sm:$0xff] }
0x15cd   :  { %8316 = vmatpush1.bf16.msra.mxu0 %v8038_v43  ;;  %v8088_v43 = vld [vmem:[#allocation3 + $0x1ac0] sm:$0xff] }
0x15ce   :  { %8317 = vmatprep.subr.bf16.mxu0 %v8041_v27  ;;  %v8091_v27 = vld [vmem:[#allocation3 + $0x1ad8] sm:$0xff] }
0x15d1   :  { %8318 = vmatpush1.bf16.msra.mxu0 %v8040_v45  ;;  %v8090_v45 = vld [vmem:[#allocation3 + $0x1ad0] sm:$0xff] }
0x15d2   :  { %8319 = vmatprep.subr.bf16.mxu0 %v8043_v1  ;;  %v8093_v1 = vld [vmem:[#allocation3 + $0x1ae8] sm:$0xff] }
0x15d5   :  { %8320 = vmatpush1.bf16.msra.mxu0 %v8042_v28  ;;  %v8092_v28 = vld [vmem:[#allocation3 + $0x1ae0] sm:$0xff] }
0x15d6   :  { %8321 = vmatprep.subr.bf16.mxu0 %v8045_v47  ;;  %v8095_v47 = vld [vmem:[#allocation3 + $0x1af8] sm:$0xff] }
0x15d9   :  { %8322 = vmatpush1.bf16.msra.mxu0 %v8044_v13  ;;  %v8094_v13 = vld [vmem:[#allocation3 + $0x1af0] sm:$0xff] }
0x15da   :  { %8323 = vmatprep.subr.bf16.mxu0 %v8047_v51  ;;  %v8097_v51 = vld [vmem:[#allocation3 + $0x1b08] sm:$0xff] }
0x15dd   :  { %8324 = vmatpush1.bf16.msra.mxu0 %v8046_v34  ;;  %v8096_v34 = vld [vmem:[#allocation3 + $0x1b00] sm:$0xff] }
0x15de   :  { %8325 = vmatprep.subr.bf16.mxu0 %v8049_v22  ;;  %v8099_v22 = vld [vmem:[#allocation3 + $0x1b18] sm:$0xff] }
0x15e1   :  { %8326 = vmatpush1.bf16.msra.mxu0 %v8048_v50  ;;  %v8098_v50 = vld [vmem:[#allocation3 + $0x1b10] sm:$0xff] }
0x15e2   :  { %8327 = vmatprep.subr.bf16.mxu0 %v8051_v61  ;;  %v8101_v61 = vld [vmem:[#allocation3 + $0x1b28] sm:$0xff] }
0x15e5   :  { %8328 = vmatpush1.bf16.msra.mxu0 %v8050_v56  ;;  %v8100_v56 = vld [vmem:[#allocation3 + $0x1b20] sm:$0xff] }
0x15e6   :  { %8329 = vmatprep.subr.bf16.mxu0 %v8053_v17  ;;  %v8103_v17 = vld [vmem:[#allocation3 + $0x1b38] sm:$0xff] }
0x15e9   :  { %8330 = vmatpush1.bf16.msra.mxu0 %v8052_v49  ;;  %v8102_v49 = vld [vmem:[#allocation3 + $0x1b30] sm:$0xff] }
0x15ea   :  { %8331 = vmatprep.subr.bf16.mxu0 %v8055_v40  ;;  %v8105_v40 = vld [vmem:[#allocation3 + $0x1b48] sm:$0xff] }
0x15ed   :  { %8332 = vmatpush1.bf16.msra.mxu0 %v8054_v3  ;;  %v8104_v3 = vld [vmem:[#allocation3 + $0x1b40] sm:$0xff] }
0x15ee   :  { %8333 = vmatprep.subr.bf16.mxu0 %v8057_v36  ;;  %v8107_v36 = vld [vmem:[#allocation3 + $0x1b58] sm:$0xff] }
0x15f1   :  { %8334 = vmatpush1.bf16.msra.mxu0 %v8056_v29  ;;  %v8109_v29 = vld [vmem:[#allocation3 + $0x1b68] sm:$0xff] }
0x15f2   :  { %8335 = vmatprep.subr.bf16.mxu0 %v8059_v19  ;;  %v8111_v19 = vld [vmem:[#allocation3 + $0x1b78] sm:$0xff] }
0x15f5   :  { %8336 = vmatpush1.bf16.msra.mxu0 %v8058_v11  ;;  %v8110_v11 = vld [vmem:[#allocation3 + $0x1b70] sm:$0xff] }
0x15f6   :  { %8337 = vmatprep.subr.bf16.mxu0 %v8061_v9  ;;  %v8113_v9 = vld [vmem:[#allocation3 + $0x1b88] sm:$0xff] }
0x15f9   :  { %8338 = vmatpush1.bf16.msra.mxu0 %v8060_v63  ;;  %v8112_v63 = vld [vmem:[#allocation3 + $0x1b80] sm:$0xff] }
0x15fa   :  { %8339 = vmatprep.subr.bf16.mxu0 %v8063_v2  ;;  %v8115_v2 = vld [vmem:[#allocation3 + $0x1b98] sm:$0xff] }
0x15fd   :  { %8340 = vmatpush1.bf16.msra.mxu0 %v8062_v55  ;;  %v8114_v55 = vld [vmem:[#allocation3 + $0x1b90] sm:$0xff] }
0x15fe   :  { %8350 = vmatprep.subr.bf16.mxu0 %v8065_v41  ;;  %v8117_v41 = vld [vmem:[#allocation3 + $0x1ba8] sm:$0xff] }
0x1600   :  { %8342 = vmatmul.mubr.bf16.vlgmr.msra.gmra.mrb[112].mxu0 %v12689_v24  ;;  %v8074_v24 = vld [vmem:[#allocation3 + $0x1a50] sm:$0xff] }
0x1601   :  { %8351 = vmatpush1.bf16.msra.mxu0 %v8064_v12  ;;  %8382 = vmatprep.mubr.bf16.mxu0 %v12692_v35  ;;  %v8076_v35 = vld [vmem:[#allocation3 + $0x1a60] sm:$0xff] }
0x1602   :  { %8352 = vmatprep.subr.bf16.mxu0 %v8067_v10  ;;  %v8116_v12 = vld [vmem:[#allocation3 + $0x1ba0] sm:$0xff]  ;;  %v8119_v10 = vld [vmem:[#allocation3 + $0x1bb8] sm:$0xff] }
0x1605   :  { %8353 = vmatpush1.bf16.msra.mxu0 %v8066_v48  ;;  %v8118_v48 = vld [vmem:[#allocation3 + $0x1bb0] sm:$0xff] }
0x1606   :  { %8354 = vmatprep.subr.bf16.mxu0 %v8069_v8  ;;  %v8121_v8 = vld [vmem:[#allocation3 + $0x1bc8] sm:$0xff] }
0x1609   :  { %8355 = vmatpush1.bf16.msra.mxu0 %v8068_v26  ;;  %v8120_v26 = vld [vmem:[#allocation3 + $0x1bc0] sm:$0xff] }
0x160a   :  { %8356 = vmatprep.subr.bf16.mxu0 %v8071_v16  ;;  %v8123_v16 = vld [vmem:[#allocation3 + $0x1bd8] sm:$0xff] }
0x160d   :  { %8357 = vmatpush1.bf16.msra.mxu0 %v8070_v58  ;;  %v8122_v58 = vld [vmem:[#allocation3 + $0x1bd0] sm:$0xff] }
0x160e   :  { %8358 = vmatprep.subr.bf16.mxu0 %v8073_v15  ;;  %v8125_v15 = vld [vmem:[#allocation3 + $0x1be8] sm:$0xff] }
0x1611   :  { %8359 = vmatpush1.bf16.msra.mxu0 %v8072_v59  ;;  %v8124_v59 = vld [vmem:[#allocation3 + $0x1be0] sm:$0xff] }
0x1612   :  { %8360 = vmatprep.subr.bf16.mxu0 %v8075_v0  ;;  %v8127_v0 = vld [vmem:[#allocation3 + $0x1bf8] sm:$0xff] }
0x1615   :  { %8361 = vmatpush1.bf16.msra.mxu0 %v8074_v24  ;;  %v8126_v24 = vld [vmem:[#allocation3 + $0x1bf0] sm:$0xff] }
0x1616   :  { %8362 = vmatprep.subr.bf16.mxu0 %v8077_v38  ;;  %v8129_v38 = vld [vmem:[#allocation3 + $0x1c08] sm:$0xff] }
0x1619   :  { %8363 = vmatpush1.bf16.msra.mxu0 %v8076_v35  ;;  %v8128_v35 = vld [vmem:[#allocation3 + $0x1c00] sm:$0xff] }
0x161a   :  { %8364 = vmatprep.subr.bf16.mxu0 %v8079_v18  ;;  %v8131_v18 = vld [vmem:[#allocation3 + $0x1c18] sm:$0xff] }
0x161d   :  { %8365 = vmatpush1.bf16.msra.mxu0 %v8078_v44  ;;  %v8130_v44 = vld [vmem:[#allocation3 + $0x1c10] sm:$0xff] }
0x161e   :  { %8366 = vmatprep.subr.bf16.mxu0 %v8081_v53  ;;  %v8133_v53 = vld [vmem:[#allocation3 + $0x1c28] sm:$0xff] }
0x1621   :  { %8367 = vmatpush1.bf16.msra.mxu0 %v8080_v62  ;;  %v8132_v62 = vld [vmem:[#allocation3 + $0x1c20] sm:$0xff] }
0x1622   :  { %8368 = vmatprep.subr.bf16.mxu0 %v8083_v14  ;;  %v8135_v14 = vld [vmem:[#allocation3 + $0x1c38] sm:$0xff] }
0x1625   :  { %8369 = vmatpush1.bf16.msra.mxu0 %v8082_v25  ;;  %v8134_v25 = vld [vmem:[#allocation3 + $0x1c30] sm:$0xff] }
0x1626   :  { %8370 = vmatprep.subr.bf16.mxu0 %v8085_v30  ;;  %v8137_v30 = vld [vmem:[#allocation3 + $0x1c48] sm:$0xff] }
0x1629   :  { %8371 = vmatpush1.bf16.msra.mxu0 %v8084_v39  ;;  %v8136_v39 = vld [vmem:[#allocation3 + $0x1c40] sm:$0xff] }
0x162a   :  { %8372 = vmatprep.subr.bf16.mxu0 %v8087_v52  ;;  %v8139_v52 = vld [vmem:[#allocation3 + $0x1c58] sm:$0xff] }
0x162d   :  { %8373 = vmatpush1.bf16.msra.mxu0 %v8086_v54  ;;  %v8141_v54 = vld [vmem:[#allocation3 + $0x1c68] sm:$0xff] }
0x162e   :  { %8374 = vmatprep.subr.bf16.mxu0 %v8089_v6  ;;  %v8143_v6 = vld [vmem:[#allocation3 + $0x1c78] sm:$0xff] }
0x1631   :  { %8375 = vmatpush1.bf16.msra.mxu0 %v8088_v43  ;;  %v8142_v43 = vld [vmem:[#allocation3 + $0x1c70] sm:$0xff] }
0x1632   :  { %8376 = vmatprep.subr.bf16.mxu0 %v8091_v27  ;;  %v8145_v27 = vld [vmem:[#allocation3 + $0x1c88] sm:$0xff] }
0x1635   :  { %8377 = vmatpush1.bf16.msra.mxu0 %v8090_v45  ;;  %v8144_v45 = vld [vmem:[#allocation3 + $0x1c80] sm:$0xff] }
0x1636   :  { %8378 = vmatprep.subr.bf16.mxu0 %v8093_v1  ;;  %v8147_v1 = vld [vmem:[#allocation3 + $0x1c98] sm:$0xff] }
0x1639   :  { %8379 = vmatpush1.bf16.msra.mxu0 %v8092_v28  ;;  %v8146_v28 = vld [vmem:[#allocation3 + $0x1c90] sm:$0xff] }
0x163a   :  { %8380 = vmatprep.subr.bf16.mxu0 %v8095_v47  ;;  %v8149_v47 = vld [vmem:[#allocation3 + $0x1ca8] sm:$0xff] }
0x163d   :  { %8381 = vmatpush1.bf16.msra.mxu0 %v8094_v13  ;;  %v8148_v13 = vld [vmem:[#allocation3 + $0x1ca0] sm:$0xff] }
0x163e   :  { %8391 = vmatprep.subr.bf16.mxu0 %v8097_v51  ;;  %v8151_v51 = vld [vmem:[#allocation3 + $0x1cb8] sm:$0xff] }
0x1640   :  { %8383 = vmatmul.mubr.bf16.vlgmr.msra.gmra.mrb[112].mxu0 %v12698_v7  ;;  %v8106_v7 = vld [vmem:[#allocation3 + $0x1b50] sm:$0xff] }
0x1641   :  { %8392 = vmatpush1.bf16.msra.mxu0 %v8096_v34  ;;  %8423 = vmatprep.mubr.bf16.mxu0 %v12702_v42  ;;  %v8108_v42 = vld [vmem:[#allocation3 + $0x1b60] sm:$0xff]  ;;  %v8150_v34 = vld [vmem:[#allocation3 + $0x1cb0] sm:$0xff] }
0x1642   :  { %8393 = vmatprep.subr.bf16.mxu0 %v8099_v22  ;;  %v8153_v22 = vld [vmem:[#allocation3 + $0x1cc8] sm:$0xff] }
0x1645   :  { %8394 = vmatpush1.bf16.msra.mxu0 %v8098_v50  ;;  %v8152_v50 = vld [vmem:[#allocation3 + $0x1cc0] sm:$0xff] }
0x1646   :  { %8395 = vmatprep.subr.bf16.mxu0 %v8101_v61  ;;  %v8155_v61 = vld [vmem:[#allocation3 + $0x1cd8] sm:$0xff] }
0x1649   :  { %8396 = vmatpush1.bf16.msra.mxu0 %v8100_v56  ;;  %v8154_v56 = vld [vmem:[#allocation3 + $0x1cd0] sm:$0xff] }
0x164a   :  { %8397 = vmatprep.subr.bf16.mxu0 %v8103_v17  ;;  %v8157_v17 = vld [vmem:[#allocation3 + $0x1ce8] sm:$0xff] }
0x164d   :  { %8398 = vmatpush1.bf16.msra.mxu0 %v8102_v49  ;;  %v8156_v49 = vld [vmem:[#allocation3 + $0x1ce0] sm:$0xff] }
0x164e   :  { %8399 = vmatprep.subr.bf16.mxu0 %v8105_v40  ;;  %v8159_v40 = vld [vmem:[#allocation3 + $0x1cf8] sm:$0xff] }
0x1651   :  { %8400 = vmatpush1.bf16.msra.mxu0 %v8104_v3  ;;  %v8158_v3 = vld [vmem:[#allocation3 + $0x1cf0] sm:$0xff] }
0x1652   :  { %8401 = vmatprep.subr.bf16.mxu0 %v8107_v36  ;;  %v8161_v36 = vld [vmem:[#allocation3 + $0x1d08] sm:$0xff] }
0x1655   :  { %8402 = vmatpush1.bf16.msra.mxu0 %v8106_v7  ;;  %v8160_v7 = vld [vmem:[#allocation3 + $0x1d00] sm:$0xff] }
0x1656   :  { %8403 = vmatprep.subr.bf16.mxu0 %v8109_v29  ;;  %v8163_v29 = vld [vmem:[#allocation3 + $0x1d18] sm:$0xff] }
0x1659   :  { %8404 = vmatpush1.bf16.msra.mxu0 %v8108_v42  ;;  %v8162_v42 = vld [vmem:[#allocation3 + $0x1d10] sm:$0xff] }
0x165a   :  { %8405 = vmatprep.subr.bf16.mxu0 %v8111_v19  ;;  %v8165_v19 = vld [vmem:[#allocation3 + $0x1d28] sm:$0xff] }
0x165d   :  { %8406 = vmatpush1.bf16.msra.mxu0 %v8110_v11  ;;  %v8164_v11 = vld [vmem:[#allocation3 + $0x1d20] sm:$0xff] }
0x165e   :  { %8407 = vmatprep.subr.bf16.mxu0 %v8113_v9  ;;  %v8167_v9 = vld [vmem:[#allocation3 + $0x1d38] sm:$0xff] }
0x1661   :  { %8408 = vmatpush1.bf16.msra.mxu0 %v8112_v63  ;;  %v8166_v63 = vld [vmem:[#allocation3 + $0x1d30] sm:$0xff] }
0x1662   :  { %8409 = vmatprep.subr.bf16.mxu0 %v8115_v2  ;;  %v8169_v2 = vld [vmem:[#allocation3 + $0x1d48] sm:$0xff] }
0x1665   :  { %8410 = vmatpush1.bf16.msra.mxu0 %v8114_v55  ;;  %v8168_v55 = vld [vmem:[#allocation3 + $0x1d40] sm:$0xff] }
0x1666   :  { %8411 = vmatprep.subr.bf16.mxu0 %v8117_v41  ;;  %v8171_v41 = vld [vmem:[#allocation3 + $0x1d58] sm:$0xff] }
0x1669   :  { %8412 = vmatpush1.bf16.msra.mxu0 %v8116_v12  ;;  %v8173_v12 = vld [vmem:[#allocation3 + $0x1d68] sm:$0xff] }
0x166a   :  { %8413 = vmatprep.subr.bf16.mxu0 %v8119_v10  ;;  %v8175_v10 = vld [vmem:[#allocation3 + $0x1d78] sm:$0xff] }
0x166d   :  { %8414 = vmatpush1.bf16.msra.mxu0 %v8118_v48  ;;  %v8174_v48 = vld [vmem:[#allocation3 + $0x1d70] sm:$0xff] }
0x166e   :  { %8415 = vmatprep.subr.bf16.mxu0 %v8121_v8  ;;  %v8177_v8 = vld [vmem:[#allocation3 + $0x1d88] sm:$0xff] }
0x1671   :  { %8416 = vmatpush1.bf16.msra.mxu0 %v8120_v26  ;;  %v8176_v26 = vld [vmem:[#allocation3 + $0x1d80] sm:$0xff] }
0x1672   :  { %8417 = vmatprep.subr.bf16.mxu0 %v8123_v16  ;;  %v8179_v16 = vld [vmem:[#allocation3 + $0x1d98] sm:$0xff] }
0x1675   :  { %8418 = vmatpush1.bf16.msra.mxu0 %v8122_v58  ;;  %v8178_v58 = vld [vmem:[#allocation3 + $0x1d90] sm:$0xff] }
0x1676   :  { %8419 = vmatprep.subr.bf16.mxu0 %v8125_v15  ;;  %v8181_v15 = vld [vmem:[#allocation3 + $0x1da8] sm:$0xff] }
0x1679   :  { %8420 = vmatpush1.bf16.msra.mxu0 %v8124_v59  ;;  %v8180_v59 = vld [vmem:[#allocation3 + $0x1da0] sm:$0xff] }
0x167a   :  { %8421 = vmatprep.subr.bf16.mxu0 %v8127_v0  ;;  %v8183_v0 = vld [vmem:[#allocation3 + $0x1db8] sm:$0xff] }
0x167d   :  { %8422 = vmatpush1.bf16.msra.mxu0 %v8126_v24  ;;  %v8182_v24 = vld [vmem:[#allocation3 + $0x1db0] sm:$0xff] }
0x167e   :  { %8432 = vmatprep.subr.bf16.mxu0 %v8129_v38  ;;  %v8185_v38 = vld [vmem:[#allocation3 + $0x1dc8] sm:$0xff] }
0x1680   :  { %8424 = vmatmul.mubr.bf16.vlgmr.msra.gmra.mrb[112].mxu0 %v12714_v21  ;;  %v8138_v21 = vld [vmem:[#allocation3 + $0x1c50] sm:$0xff] }
0x1681   :  { %8433 = vmatpush1.bf16.msra.mxu0 %v8128_v35  ;;  %8464 = vmatprep.mubr.bf16.mxu0 %v12717_v60  ;;  %v8140_v60 = vld [vmem:[#allocation3 + $0x1c60] sm:$0xff] }
0x1682   :  { %8434 = vmatprep.subr.bf16.mxu0 %v8131_v18  ;;  %v8184_v35 = vld [vmem:[#allocation3 + $0x1dc0] sm:$0xff]  ;;  %v8187_v18 = vld [vmem:[#allocation3 + $0x1dd8] sm:$0xff] }
0x1685   :  { %8435 = vmatpush1.bf16.msra.mxu0 %v8130_v44  ;;  %v8186_v44 = vld [vmem:[#allocation3 + $0x1dd0] sm:$0xff] }
0x1686   :  { %8436 = vmatprep.subr.bf16.mxu0 %v8133_v53  ;;  %v8189_v53 = vld [vmem:[#allocation3 + $0x1de8] sm:$0xff] }
0x1689   :  { %8437 = vmatpush1.bf16.msra.mxu0 %v8132_v62  ;;  %v8188_v62 = vld [vmem:[#allocation3 + $0x1de0] sm:$0xff] }
0x168a   :  { %8438 = vmatprep.subr.bf16.mxu0 %v8135_v14  ;;  %v8191_v14 = vld [vmem:[#allocation3 + $0x1df8] sm:$0xff] }
0x168d   :  { %8439 = vmatpush1.bf16.msra.mxu0 %v8134_v25  ;;  %v8190_v25 = vld [vmem:[#allocation3 + $0x1df0] sm:$0xff] }
0x168e   :  { %8440 = vmatprep.subr.bf16.mxu0 %v8137_v30  ;;  %v8193_v30 = vld [vmem:[#allocation3 + $0x1e08] sm:$0xff] }
0x1691   :  { %8441 = vmatpush1.bf16.msra.mxu0 %v8136_v39  ;;  %v8192_v39 = vld [vmem:[#allocation3 + $0x1e00] sm:$0xff] }
0x1692   :  { %8442 = vmatprep.subr.bf16.mxu0 %v8139_v52  ;;  %v8195_v52 = vld [vmem:[#allocation3 + $0x1e18] sm:$0xff] }
0x1695   :  { %8443 = vmatpush1.bf16.msra.mxu0 %v8138_v21  ;;  %v10121_v21 = vld [vmem:[#allocation20 + $0x1c0] sm:$0xff]  }
0x1696   :  { %8444 = vmatprep.subr.bf16.mxu0 %v8141_v54  ;;  %v10122_v54 = vld [vmem:[#allocation20 + $0x180] sm:$0xff]   ;;  %9218 = vmatprep.subr.bf16.mxu1 %v10121_v21  ;;  %v8242_v21 = vld [vmem:[#allocation3 + $0x1f90] sm:$0xff] }
0x1697   :  { %9219 = vmatpush3.bf16.msra.mxu1 %v10122_v54  ;;  %v8245_v54 = vld [vmem:[#allocation3 + $0x1fa8] sm:$0xff] }
0x1699   :  { %8445 = vmatpush1.bf16.msra.mxu0 %v8140_v60  ;;  %v10123_v60 = vld [vmem:[#allocation20 + $0x1c8] sm:$0xff]  }
0x169a   :  { %8446 = vmatprep.subr.bf16.mxu0 %v8143_v6  ;;  %v8194_v6 = vld [vmem:[#allocation3 + $0x1e10] sm:$0xff]  ;;  %9220 = vmatprep.subr.bf16.mxu1 %v10123_v60  ;;  %v8244_v60 = vld [vmem:[#allocation3 + $0x1fa0] sm:$0xff] }
0x169d   :  { %8447 = vmatpush1.bf16.msra.mxu0 %v8142_v43  ;;  %v8197_v43 = vld [vmem:[#allocation3 + $0x1e28] sm:$0xff] }
0x169e   :  { %8448 = vmatprep.subr.bf16.mxu0 %v8145_v27  ;;  %v10124_v27 = vld [vmem:[#allocation20 + $0x188] sm:$0xff]  }
0x169f   :  { %9221 = vmatpush3.bf16.msra.mxu1 %v10124_v27  ;;  %v8249_v27 = vld [vmem:[#allocation3 + $0x1fc8] sm:$0xff] }
0x16a1   :  { %8449 = vmatpush1.bf16.msra.mxu0 %v8144_v45  ;;  %v10125_v45 = vld [vmem:[#allocation20 + $0x1d0] sm:$0xff]  }
0x16a2   :  { %8450 = vmatprep.subr.bf16.mxu0 %v8147_v1  ;;  %v8196_v1 = vld [vmem:[#allocation3 + $0x1e20] sm:$0xff]  ;;  %9222 = vmatprep.subr.bf16.mxu1 %v10125_v45 }
0x16a3   :  { %v8248_v45 = vld [vmem:[#allocation3 + $0x1fc0] sm:$0xff] }
0x16a5   :  { %8451 = vmatpush1.bf16.msra.mxu0 %v8146_v28  ;;  %v8199_v28 = vld [vmem:[#allocation3 + $0x1e38] sm:$0xff] }
0x16a6   :  { %8452 = vmatprep.subr.bf16.mxu0 %v8149_v47  ;;  %v10127_v47 = vld [vmem:[#allocation20 + $0x1d8] sm:$0xff]  }
0x16a9   :  { %8453 = vmatpush1.bf16.msra.mxu0 %v8148_v13  ;;  %v8198_v13 = vld [vmem:[#allocation3 + $0x1e30] sm:$0xff] }
0x16aa   :  { %8454 = vmatprep.subr.bf16.mxu0 %v8151_v51  ;;  %v10128_v51 = vld [vmem:[#allocation20 + $0x198] sm:$0xff]  }
0x16ad   :  { %8455 = vmatpush1.bf16.msra.mxu0 %v8150_v34  ;;  %v10129_v34 = vld [vmem:[#allocation20 + $0x1e0] sm:$0xff]  }
0x16ae   :  { %8456 = vmatprep.subr.bf16.mxu0 %v8153_v22  ;;  %v8200_v22 = vld [vmem:[#allocation3 + $0x1e40] sm:$0xff] }
0x16b1   :  { %8457 = vmatpush1.bf16.msra.mxu0 %v8152_v50  ;;  %v8203_v50 = vld [vmem:[#allocation3 + $0x1e58] sm:$0xff] }
0x16b2   :  { %8458 = vmatprep.subr.bf16.mxu0 %v8155_v61  ;;  %v10130_v61 = vld [vmem:[#allocation20 + $0x1a0] sm:$0xff]  }
0x16b5   :  { %8459 = vmatpush1.bf16.msra.mxu0 %v8154_v56  ;;  %v10131_v56 = vld [vmem:[#allocation20 + $0x1e8] sm:$0xff]  }
0x16b6   :  { %8460 = vmatprep.subr.bf16.mxu0 %v8157_v17  ;;  %v8202_v17 = vld [vmem:[#allocation3 + $0x1e50] sm:$0xff] }
0x16b9   :  { %8461 = vmatpush1.bf16.msra.mxu0 %v8156_v49  ;;  %v8205_v49 = vld [vmem:[#allocation3 + $0x1e68] sm:$0xff] }
0x16ba   :  { %8462 = vmatprep.subr.bf16.mxu0 %v8159_v40  ;;  %v10132_v40 = vld [vmem:[#allocation20 + $0x1a8] sm:$0xff]  }
0x16bd   :  { %8463 = vmatpush1.bf16.msra.mxu0 %v8158_v3  ;;  %v8204_v3 = vld [vmem:[#allocation3 + $0x1e60] sm:$0xff] }
0x16be   :  { %8473 = vmatprep.subr.bf16.mxu0 %v8161_v36  ;;  %v8207_v36 = vld [vmem:[#allocation3 + $0x1e78] sm:$0xff] }
0x16c0   :  { %8465 = vmatmul.mubr.bf16.vlgmr.msra.gmra.mrb[112].mxu0 %v12723_v23  ;;  %v8170_v23 = vld [vmem:[#allocation3 + $0x1d50] sm:$0xff] }
0x16c1   :  { %8474 = vmatpush1.bf16.msra.mxu0 %v8160_v7  ;;  %8505 = vmatprep.mubr.bf16.mxu0 %v12727_v32  ;;  %v8172_v32 = vld [vmem:[#allocation3 + $0x1d60] sm:$0xff]  ;;  %v8206_v7 = vld [vmem:[#allocation3 + $0x1e70] sm:$0xff] }
0x16c2   :  { %8475 = vmatprep.subr.bf16.mxu0 %v8163_v29  ;;  %v8209_v29 = vld [vmem:[#allocation3 + $0x1e88] sm:$0xff] }
0x16c5   :  { %8476 = vmatpush1.bf16.msra.mxu0 %v8162_v42  ;;  %v8208_v42 = vld [vmem:[#allocation3 + $0x1e80] sm:$0xff] }
0x16c6   :  { %8477 = vmatprep.subr.bf16.mxu0 %v8165_v19  ;;  %v8211_v19 = vld [vmem:[#allocation3 + $0x1e98] sm:$0xff] }
0x16c9   :  { %8478 = vmatpush1.bf16.msra.mxu0 %v8164_v11  ;;  %v8210_v11 = vld [vmem:[#allocation3 + $0x1e90] sm:$0xff] }
0x16ca   :  { %8479 = vmatprep.subr.bf16.mxu0 %v8167_v9  ;;  %v8213_v9 = vld [vmem:[#allocation3 + $0x1ea8] sm:$0xff] }
0x16cd   :  { %8480 = vmatpush1.bf16.msra.mxu0 %v8166_v63  ;;  %v8212_v63 = vld [vmem:[#allocation3 + $0x1ea0] sm:$0xff] }
0x16ce   :  { %8481 = vmatprep.subr.bf16.mxu0 %v8169_v2  ;;  %v8215_v2 = vld [vmem:[#allocation3 + $0x1eb8] sm:$0xff] }
0x16d1   :  { %8482 = vmatpush1.bf16.msra.mxu0 %v8168_v55  ;;  %v8214_v55 = vld [vmem:[#allocation3 + $0x1eb0] sm:$0xff] }
0x16d2   :  { %8483 = vmatprep.subr.bf16.mxu0 %v8171_v41  ;;  %v8217_v41 = vld [vmem:[#allocation3 + $0x1ec8] sm:$0xff] }
0x16d5   :  { %8484 = vmatpush1.bf16.msra.mxu0 %v8170_v23  ;;  %v8216_v23 = vld [vmem:[#allocation3 + $0x1ec0] sm:$0xff] }
0x16d6   :  { %8485 = vmatprep.subr.bf16.mxu0 %v8173_v12  ;;  %v8219_v12 = vld [vmem:[#allocation3 + $0x1ed8] sm:$0xff] }
0x16d9   :  { %8486 = vmatpush1.bf16.msra.mxu0 %v8172_v32  ;;  %v8218_v32 = vld [vmem:[#allocation3 + $0x1ed0] sm:$0xff] }
0x16da   :  { %8487 = vmatprep.subr.bf16.mxu0 %v8175_v10  ;;  %v8221_v10 = vld [vmem:[#allocation3 + $0x1ee8] sm:$0xff] }
0x16dd   :  { %8488 = vmatpush1.bf16.msra.mxu0 %v8174_v48  ;;  %v8220_v48 = vld [vmem:[#allocation3 + $0x1ee0] sm:$0xff] }
0x16de   :  { %8489 = vmatprep.subr.bf16.mxu0 %v8177_v8  ;;  %v8223_v8 = vld [vmem:[#allocation3 + $0x1ef8] sm:$0xff] }
0x16e1   :  { %8490 = vmatpush1.bf16.msra.mxu0 %v8176_v26  ;;  %v8222_v26 = vld [vmem:[#allocation3 + $0x1ef0] sm:$0xff] }
0x16e2   :  { %8491 = vmatprep.subr.bf16.mxu0 %v8179_v16  ;;  %v8225_v16 = vld [vmem:[#allocation3 + $0x1f08] sm:$0xff] }
0x16e5   :  { %8492 = vmatpush1.bf16.msra.mxu0 %v8178_v58  ;;  %v8224_v58 = vld [vmem:[#allocation3 + $0x1f00] sm:$0xff] }
0x16e6   :  { %8493 = vmatprep.subr.bf16.mxu0 %v8181_v15  ;;  %v8227_v15 = vld [vmem:[#allocation3 + $0x1f18] sm:$0xff] }
0x16e9   :  { %8494 = vmatpush1.bf16.msra.mxu0 %v8180_v59  ;;  %v8226_v59 = vld [vmem:[#allocation3 + $0x1f10] sm:$0xff] }
0x16ea   :  { %8495 = vmatprep.subr.bf16.mxu0 %v8183_v0  ;;  %v8229_v0 = vld [vmem:[#allocation3 + $0x1f28] sm:$0xff] }
0x16ed   :  { %8496 = vmatpush1.bf16.msra.mxu0 %v8182_v24  ;;  %v8228_v24 = vld [vmem:[#allocation3 + $0x1f20] sm:$0xff] }
0x16ee   :  { %8497 = vmatprep.subr.bf16.mxu0 %v8185_v38  ;;  %v8231_v38 = vld [vmem:[#allocation3 + $0x1f38] sm:$0xff] }
0x16f1   :  { %8498 = vmatpush1.bf16.msra.mxu0 %v8184_v35  ;;  %v8230_v35 = vld [vmem:[#allocation3 + $0x1f30] sm:$0xff] }
0x16f2   :  { %8499 = vmatprep.subr.bf16.mxu0 %v8187_v18  ;;  %v8233_v18 = vld [vmem:[#allocation3 + $0x1f48] sm:$0xff] }
0x16f5   :  { %8500 = vmatpush1.bf16.msra.mxu0 %v8186_v44  ;;  %v8232_v44 = vld [vmem:[#allocation3 + $0x1f40] sm:$0xff] }
0x16f6   :  { %8501 = vmatprep.subr.bf16.mxu0 %v8189_v53  ;;  %v8235_v53 = vld [vmem:[#allocation3 + $0x1f58] sm:$0xff] }
0x16f9   :  { %8502 = vmatpush1.bf16.msra.mxu0 %v8188_v62  ;;  %v8237_v62 = vld [vmem:[#allocation3 + $0x1f68] sm:$0xff] }
0x16fa   :  { %8503 = vmatprep.subr.bf16.mxu0 %v8191_v14  ;;  %v8239_v14 = vld [vmem:[#allocation3 + $0x1f78] sm:$0xff] }
0x16fd   :  { %8504 = vmatpush1.bf16.msra.mxu0 %v8190_v25  ;;  %v8238_v25 = vld [vmem:[#allocation3 + $0x1f70] sm:$0xff] }
0x16fe   :  { %8514 = vmatprep.subr.bf16.mxu0 %v8193_v30  ;;  %v8241_v30 = vld [vmem:[#allocation3 + $0x1f88] sm:$0xff] }
0x1700   :  { %8506 = vmatmul.mubr.bf16.vlgmr.msra.gmra.mrb[112].mxu0 %v12740_v5  ;;  %v10126_v5 = vld [vmem:[#allocation20 + $0x190] sm:$0xff]  }
0x1701   :  { %8515 = vmatpush1.bf16.msra.mxu0 %v8192_v39  ;;  %8546 = vmatprep.mubr.bf16.mxu0 %v12743_v31  ;;  %v8201_v31 = vld [vmem:[#allocation3 + $0x1e48] sm:$0xff]  ;;  %v8240_v39 = vld [vmem:[#allocation3 + $0x1f80] sm:$0xff] }
0x1702   :  { %8516 = vmatprep.subr.bf16.mxu0 %v8195_v52  ;;  %9223 = vmatpush3.bf16.msra.mxu1 %v10126_v5  ;;  %v8243_v52 = vld [vmem:[#allocation3 + $0x1f98] sm:$0xff]  ;;  %v8253_v5 = vld [vmem:[#allocation3 + $0x1fe8] sm:$0xff] }
0x1703   :  { %9224 = vmatprep.subr.bf16.mxu1 %v10127_v47  ;;  %v8252_v47 = vld [vmem:[#allocation3 + $0x1fe0] sm:$0xff] }
0x1705   :  { %8517 = vmatpush1.bf16.msra.mxu0 %v8194_v6  ;;  %v8247_v6 = vld [vmem:[#allocation3 + $0x1fb8] sm:$0xff] }
0x1706   :  { %8518 = vmatprep.subr.bf16.mxu0 %v8197_v43  ;;  %9225 = vmatpush3.bf16.msra.mxu1 %v10128_v51  ;;  %v8246_v43 = vld [vmem:[#allocation3 + $0x1fb0] sm:$0xff] }
0x1707   :  { %9226 = vmatprep.subr.bf16.mxu1 %v10129_v34  ;;  %v10133_v51 = vld [vmem:[#allocation20 + $0x1f0] sm:$0xff]  }
0x1708   :  { %v10134_v34 = vld [vmem:[#allocation20 + $0x1b0] sm:$0xff]  }
0x1709   :  { %8519 = vmatpush1.bf16.msra.mxu0 %v8196_v1  ;;  %v8251_v1 = vld [vmem:[#allocation3 + $0x1fd8] sm:$0xff] }
0x170a   :  { %8520 = vmatprep.subr.bf16.mxu0 %v8199_v28  ;;  %9227 = vmatpush3.bf16.msra.mxu1 %v10130_v61  ;;  %v8250_v28 = vld [vmem:[#allocation3 + $0x1fd0] sm:$0xff]  ;;  %v8256_v61 = vld [vmem:[#allocation19 + $0x6] sm:$0x3] }
0x170b   :  { %9228 = vmatprep.subr.bf16.mxu1 %v10131_v56  ;;  %v8261_v56 = vrot.slane %v8256_v61, %v11475_v4 }
0x170d   :  { %8521 = vmatpush1.bf16.msra.mxu0 %v8198_v13  ;;  %v8255_v13 = vld [vmem:[#allocation3 + $0x1ff8] sm:$0xff] }
0x170e   :  { %8522 = vmatprep.subr.bf16.mxu0 %v8201_v31  ;;  %9229 = vmatpush3.bf16.msra.mxu1 %v10132_v40  ;;  %v8254_v31 = vld [vmem:[#allocation3 + $0x1ff0] sm:$0xff] }
0x170f   :  { %9230 = vmatprep.subr.bf16.mxu1 %v10133_v51 }
0x1711   :  { %8523 = vmatpush1.bf16.msra.mxu0 %v8200_v22  ;;  %v10135_v22 = vld [vmem:[#allocation20 + $0x1f8] sm:$0xff]  }
0x1712   :  { %8524 = vmatprep.subr.bf16.mxu0 %v8203_v50  ;;  %9231 = vmatpush3.bf16.msra.mxu1 %v10134_v34  ;;  %v10136_v50 = vld [vmem:[#allocation20 + $0x1b8] sm:$0xff]  }
0x1713   :  { %9232 = vmatprep.subr.bf16.mxu1 %v10135_v22 }
0x1715   :  { %8525 = vmatpush1.bf16.msra.mxu0 %v8202_v17  ;;  %v8265_v17 = vrot.slane %v8256_v61, %v11478_v46 }
0x1716   :  { %8526 = vmatprep.subr.bf16.mxu0 %v8205_v49  ;;  %9233 = vmatpush3.bf16.msra.mxu1 %v10136_v50 }
0x1719   :  { %8527 = vmatpush1.bf16.msra.mxu0 %v8204_v3 }
0x171a   :  { %8528 = vmatprep.subr.bf16.mxu0 %v8207_v36 }
0x171d   :  { %8529 = vmatpush1.bf16.msra.mxu0 %v8206_v7 }
0x171e   :  { %8530 = vmatprep.subr.bf16.mxu0 %v8209_v29 }
0x1721   :  { %8531 = vmatpush1.bf16.msra.mxu0 %v8208_v42 }
0x1722   :  { %8532 = vmatprep.subr.bf16.mxu0 %v8211_v19 }
0x1725   :  { %8533 = vmatpush1.bf16.msra.mxu0 %v8210_v11 }
0x1726   :  { %8534 = vmatprep.subr.bf16.mxu0 %v8213_v9 }
0x1729   :  { %8535 = vmatpush1.bf16.msra.mxu0 %v8212_v63 }
0x172a   :  { %8536 = vmatprep.subr.bf16.mxu0 %v8215_v2 }
0x172d   :  { %8537 = vmatpush1.bf16.msra.mxu0 %v8214_v55 }
0x172e   :  { %8538 = vmatprep.subr.bf16.mxu0 %v8217_v41  ;;  %v9139_v41 = vld [vmem:[#allocation22] ss:$0 sm:$0xff] }
0x1731   :  { %8539 = vmatpush1.bf16.msra.mxu0 %v8216_v23 }
0x1732   :  { %8540 = vmatprep.subr.bf16.mxu0 %v8219_v12 }
0x1735   :  { %8541 = vmatpush1.bf16.msra.mxu0 %v8218_v32 }
0x1736   :  { %8542 = vmatprep.subr.bf16.mxu0 %v8221_v10 }
0x1739   :  { %8543 = vmatpush1.bf16.msra.mxu0 %v8220_v48 }
0x173a   :  { %8544 = vmatprep.subr.bf16.mxu0 %v8223_v8 }
0x173d   :  { %8545 = vmatpush1.bf16.msra.mxu0 %v8222_v26 }
0x173e   :  { %8555 = vmatprep.subr.bf16.mxu0 %v8225_v16 }
0x1740   :  { %8547 = vmatmul.mubr.bf16.vlgmr.msra.gmra.mrb[112].mxu0 %v12749_v57  ;;  %v8234_v57 = vld [vmem:[#allocation3 + $0x1f50] sm:$0xff] }
0x1741   :  { %8556 = vmatpush1.bf16.msra.mxu0 %v8224_v58  ;;  %8587 = vmatprep.mubr.bf16.mxu0 %v12753_v37  ;;  %v8236_v37 = vld [vmem:[#allocation3 + $0x1f60] sm:$0xff] }
0x1742   :  { %8557 = vmatprep.subr.bf16.mxu0 %v8227_v15 }
0x1745   :  { %8558 = vmatpush1.bf16.msra.mxu0 %v8226_v59 }
0x1746   :  { %8559 = vmatprep.subr.bf16.mxu0 %v8229_v0 }
0x1749   :  { %8560 = vmatpush1.bf16.msra.mxu0 %v8228_v24 }
0x174a   :  { %8561 = vmatprep.subr.bf16.mxu0 %v8231_v38 }
0x174d   :  { %8562 = vmatpush1.bf16.msra.mxu0 %v8230_v35 }
0x174e   :  { %8563 = vmatprep.subr.bf16.mxu0 %v8233_v18 }
0x1751   :  { %8564 = vmatpush1.bf16.msra.mxu0 %v8232_v44 }
0x1752   :  { %8565 = vmatprep.subr.bf16.mxu0 %v8235_v53 }
0x1755   :  { %8566 = vmatpush1.bf16.msra.mxu0 %v8234_v57 }
0x1756   :  { %8567 = vmatprep.subr.bf16.mxu0 %v8237_v62 }
0x1759   :  { %8568 = vmatpush1.bf16.msra.mxu0 %v8236_v37 }
0x175a   :  { %8569 = vmatprep.subr.bf16.mxu0 %v8239_v14 }
0x175d   :  { %8570 = vmatpush1.bf16.msra.mxu0 %v8238_v25 }
0x175e   :  { %8571 = vmatprep.subr.bf16.mxu0 %v8241_v30 }
0x1761   :  { %8572 = vmatpush1.bf16.msra.mxu0 %v8240_v39 }
0x1762   :  { %8573 = vmatprep.subr.bf16.mxu0 %v8243_v52 }
0x1765   :  { %8574 = vmatpush1.bf16.msra.mxu0 %v8242_v21 }
0x1766   :  { %8575 = vmatprep.subr.bf16.mxu0 %v8245_v54 }
0x1769   :  { %8576 = vmatpush1.bf16.msra.mxu0 %v8244_v60 }
0x176a   :  { %8577 = vmatprep.subr.bf16.mxu0 %v8247_v6 }
0x176d   :  { %8578 = vmatpush1.bf16.msra.mxu0 %v8246_v43 }
0x176e   :  { %8579 = vmatprep.subr.bf16.mxu0 %v8249_v27 }
0x1771   :  { %8580 = vmatpush1.bf16.msra.mxu0 %v8248_v45 }
0x1772   :  { %8581 = vmatprep.subr.bf16.mxu0 %v8251_v1 }
0x1775   :  { %8582 = vmatpush1.bf16.msra.mxu0 %v8250_v28 }
0x1776   :  { %8583 = vmatprep.subr.bf16.mxu0 %v8253_v5 }
0x1779   :  { %8584 = vmatpush1.bf16.msra.mxu0 %v8252_v47 }
0x177a   :  { %8585 = vmatprep.subr.bf16.mxu0 %v8255_v13 }
0x177d   :  { %8586 = vmatpush1.bf16.msra.mxu0 %v8254_v31 }
0x1780   :  { %8588 = vmatmul.mubr.bf16.vlgmr.msra.gmra.mrb[112].mxu0 %v12952_v20 }
0x1853   :  { %v8589_v49 = vpop.f32.mrb[112].mxu0 }
0x1854   :  { %v9246_v40 = vadd.f32 %v8589_v49, %v8261_v56  ;;  %v8591_v3 = vpop.f32.mrb[113].mxu0 }
0x1855   :  { %v9247_v36 = vadd.f32 %v8591_v3, %v8265_v17  ;;  %v8593_v7 = vpop.f32.mrb[114].mxu0 }
0x1856   :  { %v8596_v29 = vmax.f32 %v9246_v40, 0.0  ;;  %v8594_v20 = vpop.f32.mrb[115].mxu0 }
0x1857   :  { %v8597_v42 = vmax.f32 %v9247_v36, 0.0 }
0x1858   :  { %v8598_v11 = vpack.c.bf16 %v8596_v29, %v8596_v29 }
0x1859   :  { %v8599_v19 = vpack.c.bf16 %v8597_v42, %v8597_v42 }
0x185b   :  { %8760 = vmatprep.mubr.bf16.mxu1 %v8599_v19 }
0x185c   :  { %8761 = vmatmul.mubr.bf16.vlgmr.msra.gmra.mrb[136].mxu1 %v8598_v11 }
0x192f   :  { %v9234_v9 = vpop.f32.mrb[136].mxu1 }
0x1930   :  { %v9235_v63 = vpop.f32.mrb[137].mxu1 }
0x1931   :  { %v9236_v2 = vadd.f32 %v9235_v63, %v9234_v9  ;;  %v9237_v55 = vpop.f32.mrb[138].mxu1 }
0x1932   :  { %v9238_v4 = vpop.f32.mrb[139].mxu1 }
0x1933   :  { %v8768_v46 = vadd.f32 %v9236_v2, %v12841_v33 }
0x1935   :  { %v8776_v23 = vadd.f32 %v9139_v41, %v8768_v46 }
0x1937   :  { %8778 = vst.msk [vmem:[#allocation23] sm:$0x3] %vm8777_vm3, %v8776_v23 }
0x1938   :  { %10390 = shalt.err (!%p10387_p8)
}
0x1939   :  { %s10391_s1 = scalar_lea.hbm %s12887_s13, 32 }
0x193a   :  { %p10392_p9 = scmp.ne.s32.totalorder %s12887_s13, %s10391_s1  ;;  %p10395_p10 = scmp.lt.u32.totalorder %s10391_s1, %s12887_s13 }
0x193c   :  { %p10397_p11 = pnand %p10395_p10, %p10392_p9 }
0x193e   :  { %10400 = shalt.err (!%p10397_p11)
}
0x193f   :  { %8788 = dma.vmem_to_hbm [thread:$0]  %s8786_s28, 32, %s12887_s13, [#allocation7]  }
0x1940   :  { %10421 = dma.done.wait [#allocation7], 32  }
0x1941   :  { %10422 = vsyncadd [#allocation7], 4294967264 }
0x1942   :  { %8792 = vsyncpa [#allocation6], 1 }
0x1943   :  { %8793 = vsyncpa [#allocation9], 1 }
0x1944   :  { %8794 = vsyncpa [#allocation12], 1 }
0x1945   :  { %8795 = vsyncpa [#allocation15], 1 }
0x1946   :  { %8796 = vsyncpa [#allocation18], 1 }
0x1947   :  { %8797 = vsyncpa [#allocation21], 1 }
0x1948   :  { %8798 = vsyncpa [#allocation7], 1 }
0x1949   :  { %8799 = vsyncmov [#allocation4] }
0x194c   :  { %s8800_s25 = vpop.sfrf %8799 }
0x194d   :  { %p9140_p12 = scmp.ne.s32.totalorder %s8800_s25, 0 }
0x194f   :  { %8804 = shalt.err (%p9140_p12)  }
0x1950   :  { %8806 = vsyncmov [#allocation4 + $0x1] }
0x1953   :  { %s8807_s11 = vpop.sfrf %8806 }
0x1954   :  { %p9141_p13 = scmp.ne.s32.totalorder %s8807_s11, 0 }
0x1956   :  { %8811 = shalt.err (%p9141_p13)  }
0x1957   :  { %8813 = vsyncmov [#allocation4 + $0x2] }
0x195a   :  { %s8814_s29 = vpop.sfrf %8813 }
0x195b   :  { %p9142_p0 = scmp.ne.s32.totalorder %s8814_s29, 0 }
0x195d   :  { %8818 = shalt.err (%p9142_p0)  }
0x195e   :  { %8820 = vsyncmov [#allocation4 + $0x3] }
0x1961   :  { %s8821_s13 = vpop.sfrf %8820 }
0x1962   :  { %p9143_p1 = scmp.ne.s32.totalorder %s8821_s13, 0 }
0x1964   :  { %8825 = shalt.err (%p9143_p1)  }

</bundles_post_ra>
